<compile_context>
chip_gen: v7x
topology: tpu7x:2x2x1
jax: 0.10.0
libtpu: 0.0.40
codegen_flags: <defaults>
</compile_context>

<pallas_src>
import random

import jax
import jax.numpy as jnp
from jax.experimental import pallas as pl
from jax.experimental.pallas import tpu as pltpu


# ----------------------------------------------------------------------------
# Resident (constant index_map) BlockSpec for grid=(1,) + 1 scalar-prefetch ref
# ----------------------------------------------------------------------------
def _const(shape):
    zero = (0,) * len(shape)
    return pl.BlockSpec(shape, lambda i, s, _z=zero: _z)


# ----------------------------------------------------------------------------
# Fused Seq2seq kernel: encoder GRU + relu(linear) + hoisted attention
# pre-projection, then the full decoder time recurrence (attention+coverage,
# GRU cell, output projection, guarded greedy next-input embedding).
# ----------------------------------------------------------------------------
def seq2seq_kernel(sel_ref,                                        # SMEM (Tm1+1,)
                   x_ref, m3_ref, mask_ref, femb_ref, demb_ref,
                   enc_wih_ref, enc_whh_ref, enc_bih_ref, enc_bhh_ref,
                   enc_wl_ref, enc_bl_ref,
                   wa_enc_ref, wa_s_ref, wa_cov_sum_ref, ba_ref, vw_ref, vb_ref,
                   dec_wih_ref, dec_bih_ref, dec_whh_ref, dec_bhh_ref,
                   wo_ref, bo_ref,
                   logits_ref,
                   enc_out_scr, enc_att_scr, cov_scr, gemb_scr):
    f32, bf16 = jnp.float32, jnp.bfloat16
    S, B, H = enc_out_scr.shape
    T, _, V = logits_ref.shape
    Tm1 = T - 1

    # -------------------- encoder GRU over source time --------------------
    def enc_step(t, h):
        x = x_ref[t]                                   # (B, Ep) bf16
        m = m3_ref[t]                                  # (B, 1)  f32
        gi = jnp.dot(x, enc_wih_ref[...],
                     preferred_element_type=f32) + enc_bih_ref[...]
        gh = jnp.dot(h.astype(bf16), enc_whh_ref[...],
                     preferred_element_type=f32) + enc_bhh_ref[...]
        r = jax.nn.sigmoid(gi[:, :H] + gh[:, :H])
        z = jax.nn.sigmoid(gi[:, H:2 * H] + gh[:, H:2 * H])
        n = jnp.tanh(gi[:, 2 * H:] + r * gh[:, 2 * H:])
        h_new = (1.0 - z) * n + z * h
        enc_out_scr[t] = m * h_new                     # packed-seq: zero past length
        return m * h_new + (1.0 - m) * h               # packed-seq: freeze hidden

    h_enc = jax.lax.fori_loop(0, S, enc_step, jnp.zeros((B, H), f32), unroll=True)

    # encoder post-projection relu(linear(.)) and the hoisted, loop-invariant
    # attention pre-projection W_enc @ enc_output + b_att (computed once).
    g = enc_out_scr[...].reshape(S * B, H)
    p = jnp.dot(g.astype(bf16), enc_wl_ref[...],
                preferred_element_type=f32) + enc_bl_ref[...]
    p = jnp.maximum(p, 0.0)
    enc_out_scr[...] = p.reshape(S, B, H)              # enc_output
    ea = jnp.dot(p.astype(bf16), wa_enc_ref[...],
                 preferred_element_type=f32) + ba_ref[...]
    enc_att_scr[...] = ea.reshape(S, B, H)

    # -------------------- decoder time recurrence --------------------------
    cov_scr[...] = jnp.zeros_like(cov_scr)
    gemb_scr[...] = jnp.zeros_like(gemb_scr)
    logits_ref[Tm1] = jnp.zeros((B, V), f32)           # reference leaves last slot 0

    def dec_step(t, h):
        # input embedding: teacher-forced (precomputed) vs greedy (carried)
        f = (sel_ref[t] > 0).astype(f32)
        emb = f * femb_ref[t] + (1.0 - f) * gemb_scr[...]          # (B, Ep) f32
        cov = cov_scr[...]                                          # (S, B)

        # attention scores v(tanh(W[enc, s, coverage_copy])); enc term hoisted,
        # coverage term via algebra (cov * colsum(W_cov)), v via VPU mul+reduce.
        t_s = jnp.dot(emb.astype(bf16), wa_s_ref[...],
                      preferred_element_type=f32)                   # (B, H)
        t_cov = cov[:, :, None] * wa_cov_sum_ref[...][None, :, :]   # (S, B, H)
        xatt = jnp.tanh(enc_att_scr[...] + t_s[None, :, :] + t_cov)
        attn = jnp.sum(xatt * vw_ref[...][None, :, :], axis=-1) + vb_ref[...]
        attn = jnp.where(mask_ref[...] > 0.5, attn, jnp.float32(-1e30))
        e = jnp.exp(attn - jnp.max(attn, axis=0, keepdims=True))
        w = e / jnp.sum(e, axis=0, keepdims=True)                   # (S, B)
        cov_scr[...] = cov + w

        # context vector c[b,h] = sum_s w[s,b] * enc[s,b,h]
        c = jnp.sum(w[:, :, None] * enc_out_scr[...], axis=0)       # (B, H)

        # GRU cell on [emb | c], gates concatenated [r|z|n]; one fused dot
        gin = jnp.concatenate([emb, c], axis=-1).astype(bf16)       # (B, Ep+H)
        gi = jnp.dot(gin, dec_wih_ref[...],
                     preferred_element_type=f32) + dec_bih_ref[...]
        gh = jnp.dot(h.astype(bf16), dec_whh_ref[...],
                     preferred_element_type=f32) + dec_bhh_ref[...]
        r = jax.nn.sigmoid(gi[:, :H] + gh[:, :H])
        z = jax.nn.sigmoid(gi[:, H:2 * H] + gh[:, H:2 * H])
        n = jnp.tanh(gi[:, 2 * H:] + r * gh[:, 2 * H:])
        h_new = (1.0 - z) * n + z * h

        # output projection on [h_new | c | emb]; one fused dot
        oin = jnp.concatenate([h_new, c, emb], axis=-1).astype(bf16)  # (B, 2H+Ep)
        logits = jnp.dot(oin, wo_ref[...],
                         preferred_element_type=f32) + bo_ref[...]
        logits_ref[t] = logits

        # greedy next-input embedding only when the NEXT step is not forced
        @pl.when(sel_ref[t + 1] == 0)
        def _():
            col = jax.lax.broadcasted_iota(jnp.int32, (B, V), 1)
            mx = jnp.max(logits, axis=-1, keepdims=True)
            first = jnp.min(jnp.where(logits == mx, col, V), axis=-1, keepdims=True)
            onehot = (col == first).astype(bf16)
            gemb_scr[...] = jnp.dot(onehot, demb_ref[...],
                                    preferred_element_type=f32)

        return h_new

    jax.lax.fori_loop(0, Tm1, dec_step, h_enc, unroll=True)


# ----------------------------------------------------------------------------
# Host-side parameter preparation: pad E up to a lane multiple (128), fuse the
# decoder GRU-input and output-projection weight blocks, pre-reduce W_cov,
# pre-cast matmul weights to bf16 (biases stay f32).
# ----------------------------------------------------------------------------
def prepare_params(p):
    bf16 = jnp.bfloat16
    E = p['enc_emb'].shape[1]
    H = p['enc_whh'].shape[0]
    V = p['dec_emb'].shape[0]
    Ep = max(128, ((E + 127) // 128) * 128)
    padE = Ep - E

    def pad_rows(wt):
        return jnp.pad(wt, ((0, padE), (0, 0)))

    def pad_cols(wt):
        return jnp.pad(wt, ((0, 0), (0, padE)))

    q = {'H': H, 'Ep': Ep, 'V': V}
    q['enc_emb'] = pad_cols(p['enc_emb'])                       # (V, Ep) f32, gathers in XLA
    q['dec_emb'] = pad_cols(p['dec_emb'])                       # (V, Ep) f32
    q['dec_emb_bf'] = q['dec_emb'].astype(bf16)                 # in-kernel greedy table
    q['enc_wih'] = pad_rows(p['enc_wih']).astype(bf16)          # (Ep, 3H)
    q['enc_whh'] = p['enc_whh'].astype(bf16)                    # (H, 3H)
    q['enc_bih'] = p['enc_bih']
    q['enc_bhh'] = p['enc_bhh']
    q['enc_wl'] = p['enc_wl'].astype(bf16)                      # (H, H)
    q['enc_bl'] = p['enc_bl']
    q['wa_enc'] = p['wa_enc'].astype(bf16)                      # (H, H)
    q['wa_s'] = pad_rows(p['wa_s']).astype(bf16)                # (Ep, H)
    q['wa_cov_sum'] = jnp.sum(p['wa_cov'], axis=0, keepdims=True)   # (1, H)
    q['ba'] = p['ba']
    q['vw_row'] = p['vw_row']
    q['vb'] = p['vb']
    # decoder GRU input weights over [emb | c] fused into one (Ep+H, 3H) block
    q['dec_wih'] = jnp.concatenate([pad_rows(p['dec_wih_e']), p['dec_wih_c']],
                                   axis=0).astype(bf16)
    q['dec_bih'] = p['dec_bih']
    q['dec_whh'] = p['dec_whh'].astype(bf16)
    q['dec_bhh'] = p['dec_bhh']
    # output projection over [h | c | emb] fused into one (2H+Ep, V) block
    q['wo'] = jnp.concatenate([p['wo_h'], p['wo_c'], pad_rows(p['wo_e'])],
                              axis=0).astype(bf16)
    q['bo'] = p['bo']
    return q


# ----------------------------------------------------------------------------
# Wrapper
# ----------------------------------------------------------------------------
def seq2seq_forward(q, src, tgt, src_lengths, teacher_forcing_ratio=0.5, seed=0):
    B, S = src.shape
    _, tgt_len = tgt.shape
    H, Ep, V = q['H'], q['Ep'], q['V']
    T = tgt_len
    Tm1 = T - 1

    # time-major embedded source (S, B, Ep), bf16 (only used on the MXU)
    x = q['enc_emb'][src.T].astype(jnp.bfloat16)
    maskT = (jnp.arange(S)[:, None] < src_lengths[None, :]).astype(jnp.float32)  # (S, B)
    m3 = maskT[:, :, None]                                                       # (S, B, 1)

    # host-side teacher-forcing draws (same count/order as the reference loop);
    # step 0 always consumes tgt[:,0]; step t>=1 consumes tgt[:,t-1] if forced.
    rng = random.Random(seed)
    draws = [rng.random() < teacher_forcing_ratio for _ in range(Tm1)]
    sel = jnp.array([1] + [int(d) for d in draws[:Tm1 - 1]] + [1], dtype=jnp.int32)  # (Tm1+1,)
    forced_tok = jnp.concatenate([tgt[:, 0:1], tgt[:, 0:Tm1 - 1]], axis=1)           # (B, Tm1)
    forced_emb = q['dec_emb'][forced_tok.T]                                          # (Tm1, B, Ep)

    args = (x, m3, maskT, forced_emb, q['dec_emb_bf'],
            q['enc_wih'], q['enc_whh'], q['enc_bih'], q['enc_bhh'],
            q['enc_wl'], q['enc_bl'],
            q['wa_enc'], q['wa_s'], q['wa_cov_sum'], q['ba'], q['vw_row'], q['vb'],
            q['dec_wih'], q['dec_bih'], q['dec_whh'], q['dec_bhh'],
            q['wo'], q['bo'])

    grid_spec = pltpu.PrefetchScalarGridSpec(
        num_scalar_prefetch=1,
        grid=(1,),
        in_specs=[_const(a.shape) for a in args],
        out_specs=pl.BlockSpec((T, B, V), lambda i, s: (0, 0, 0)),
        scratch_shapes=[pltpu.VMEM((S, B, H), jnp.float32),   # enc_output
                        pltpu.VMEM((S, B, H), jnp.float32),   # hoisted W_enc@enc + b
                        pltpu.VMEM((S, B), jnp.float32),      # coverage
                        pltpu.VMEM((B, Ep), jnp.float32)],    # greedy embedding
    )

    logits_tb = pl.pallas_call(
        seq2seq_kernel,
        grid_spec=grid_spec,
        out_shape=jax.ShapeDtypeStruct((T, B, V), jnp.float32),
        compiler_params=pltpu.CompilerParams(dimension_semantics=("arbitrary",)),
    )(sel, *args)

    return jnp.transpose(logits_tb, (1, 0, 2))                 # (B, tgt_len, V)


# ----------------------------------------------------------------------------
# Deterministic parameter init (synthetic weights; shapes follow the module,
# linear weights pre-transposed to (in, out), GRU gates concatenated [r|z|n]).
# ----------------------------------------------------------------------------
def init_params(key, vocab_size, emb_size, hidden_size):
    ks = jax.random.split(key, 23)

    def w(k, shape, scale=0.1):
        return (scale * jax.random.normal(k, shape)).astype(jnp.float32)

    V, E, H = vocab_size, emb_size, hidden_size
    p = {}
    p['enc_emb'] = w(ks[0], (V, E)).at[0].set(0.0)      # padding_idx=0
    p['dec_emb'] = w(ks[1], (V, E)).at[0].set(0.0)
    # encoder GRU (num_layers=1)
    p['enc_wih'] = w(ks[2], (E, 3 * H))
    p['enc_whh'] = w(ks[3], (H, 3 * H))
    p['enc_bih'] = w(ks[4], (1, 3 * H))
    p['enc_bhh'] = w(ks[5], (1, 3 * H))
    p['enc_wl'] = w(ks[6], (H, H))
    p['enc_bl'] = w(ks[7], (1, H))
    # attention linear split over [enc_output | s(=embedded) | coverage_copy], and v
    p['wa_enc'] = w(ks[8], (H, H))
    p['wa_s'] = w(ks[9], (E, H))
    p['wa_cov'] = w(ks[10], (H, H))
    p['ba'] = w(ks[11], (1, H))
    p['vw_row'] = w(ks[12], (1, H))
    p['vb'] = w(ks[13], (1, 1))
    # decoder GRU (input = [embedded | context])
    p['dec_wih_e'] = w(ks[14], (E, 3 * H))
    p['dec_wih_c'] = w(ks[15], (H, 3 * H))
    p['dec_bih'] = w(ks[16], (1, 3 * H))
    p['dec_whh'] = w(ks[17], (H, 3 * H))
    p['dec_bhh'] = w(ks[18], (1, 3 * H))
    # decoder output linear over [dec_output | c | embedded]
    p['wo_h'] = w(ks[19], (H, V))
    p['wo_c'] = w(ks[20], (H, V))
    p['wo_e'] = w(ks[21], (E, V))
    p['bo'] = w(ks[22], (1, V))
    return p


if __name__ == "__main__":
    VOCAB, EMB, HID = 256, 64, 128        # EMB is zero-padded to 128 in prepare_params
    B, S, T = 8, 8, 6

    key = jax.random.PRNGKey(0)
    pk, sk, tk = jax.random.split(key, 3)
    params = init_params(pk, VOCAB, EMB, HID)
    prepped = prepare_params(params)

    src_lengths = jnp.array([8, 8, 7, 6, 5, 8, 3, 8], dtype=jnp.int32)
    src = jax.random.randint(sk, (B, S), 1, VOCAB)
    src = jnp.where(jnp.arange(S)[None, :] < src_lengths[:, None], src, 0)  # PAD tail
    tgt = jax.random.randint(tk, (B, T), 1, VOCAB)

    out = seq2seq_forward(prepped, src, tgt, src_lengths, teacher_forcing_ratio=0.5)
    out = jax.block_until_ready(out)
    assert out.shape == (B, T, VOCAB) and out.dtype == jnp.float32
    print("KERNEL_OK")
</pallas_src>

<mosaic_0001>
module attributes {stable_mosaic.version = 11 : i64} {
  func.func @seq2seq_kernel(%arg0: i32, %arg1: memref<6xi32, #tpu.memory_space<smem>>, %arg2: memref<8x8x128xbf16, #tpu.memory_space<vmem>>, %arg3: memref<8x8x1xf32, #tpu.memory_space<vmem>>, %arg4: memref<8x8xf32, #tpu.memory_space<vmem>>, %arg5: memref<5x8x128xf32, #tpu.memory_space<vmem>>, %arg6: memref<256x128xbf16, #tpu.memory_space<vmem>>, %arg7: memref<128x384xbf16, #tpu.memory_space<vmem>>, %arg8: memref<128x384xbf16, #tpu.memory_space<vmem>>, %arg9: memref<1x384xf32, #tpu.memory_space<vmem>>, %arg10: memref<1x384xf32, #tpu.memory_space<vmem>>, %arg11: memref<128x128xbf16, #tpu.memory_space<vmem>>, %arg12: memref<1x128xf32, #tpu.memory_space<vmem>>, %arg13: memref<128x128xbf16, #tpu.memory_space<vmem>>, %arg14: memref<128x128xbf16, #tpu.memory_space<vmem>>, %arg15: memref<1x128xf32, #tpu.memory_space<vmem>>, %arg16: memref<1x128xf32, #tpu.memory_space<vmem>>, %arg17: memref<1x128xf32, #tpu.memory_space<vmem>>, %arg18: memref<1x1xf32, #tpu.memory_space<vmem>>, %arg19: memref<256x384xbf16, #tpu.memory_space<vmem>>, %arg20: memref<1x384xf32, #tpu.memory_space<vmem>>, %arg21: memref<128x384xbf16, #tpu.memory_space<vmem>>, %arg22: memref<1x384xf32, #tpu.memory_space<vmem>>, %arg23: memref<384x256xbf16, #tpu.memory_space<vmem>>, %arg24: memref<1x256xf32, #tpu.memory_space<vmem>>, %arg25: memref<6x8x256xf32, #tpu.memory_space<vmem>>, %arg26: memref<8x8x128xf32, #tpu.memory_space<vmem>>, %arg27: memref<8x8x128xf32, #tpu.memory_space<vmem>>, %arg28: memref<8x8xf32, #tpu.memory_space<vmem>>, %arg29: memref<8x128xf32, #tpu.memory_space<vmem>>) attributes {dimension_semantics = [#tpu.dimension_semantics<arbitrary>], iteration_bounds = array<i64: 1>, scalar_prefetch = 1 : i64, scratch_operands = 4 : i64, tpu.core_type = #tpu.core_type<tc>, window_params = [{pipeline_mode = #tpu.pipeline_mode<synchronous>, transform_indices = @transform_0, window_bounds = array<i64: 8, 8, 128>}, {pipeline_mode = #tpu.pipeline_mode<synchronous>, transform_indices = @transform_1, window_bounds = array<i64: 8, 8, 1>}, {pipeline_mode = #tpu.pipeline_mode<synchronous>, transform_indices = @transform_2, window_bounds = array<i64: 8, 8>}, {pipeline_mode = #tpu.pipeline_mode<synchronous>, transform_indices = @transform_3, window_bounds = array<i64: 5, 8, 128>}, {pipeline_mode = #tpu.pipeline_mode<synchronous>, transform_indices = @transform_4, window_bounds = array<i64: 256, 128>}, {pipeline_mode = #tpu.pipeline_mode<synchronous>, transform_indices = @transform_5, window_bounds = array<i64: 128, 384>}, {pipeline_mode = #tpu.pipeline_mode<synchronous>, transform_indices = @transform_6, window_bounds = array<i64: 128, 384>}, {pipeline_mode = #tpu.pipeline_mode<synchronous>, transform_indices = @transform_7, window_bounds = array<i64: 1, 384>}, {pipeline_mode = #tpu.pipeline_mode<synchronous>, transform_indices = @transform_8, window_bounds = array<i64: 1, 384>}, {pipeline_mode = #tpu.pipeline_mode<synchronous>, transform_indices = @transform_9, window_bounds = array<i64: 128, 128>}, {pipeline_mode = #tpu.pipeline_mode<synchronous>, transform_indices = @transform_10, window_bounds = array<i64: 1, 128>}, {pipeline_mode = #tpu.pipeline_mode<synchronous>, transform_indices = @transform_11, window_bounds = array<i64: 128, 128>}, {pipeline_mode = #tpu.pipeline_mode<synchronous>, transform_indices = @transform_12, window_bounds = array<i64: 128, 128>}, {pipeline_mode = #tpu.pipeline_mode<synchronous>, transform_indices = @transform_13, window_bounds = array<i64: 1, 128>}, {pipeline_mode = #tpu.pipeline_mode<synchronous>, transform_indices = @transform_14, window_bounds = array<i64: 1, 128>}, {pipeline_mode = #tpu.pipeline_mode<synchronous>, transform_indices = @transform_15, window_bounds = array<i64: 1, 128>}, {pipeline_mode = #tpu.pipeline_mode<synchronous>, transform_indices = @transform_16, window_bounds = array<i64: 1, 1>}, {pipeline_mode = #tpu.pipeline_mode<synchronous>, transform_indices = @transform_17, window_bounds = array<i64: 256, 384>}, {pipeline_mode = #tpu.pipeline_mode<synchronous>, transform_indices = @transform_18, window_bounds = array<i64: 1, 384>}, {pipeline_mode = #tpu.pipeline_mode<synchronous>, transform_indices = @transform_19, window_bounds = array<i64: 128, 384>}, {pipeline_mode = #tpu.pipeline_mode<synchronous>, transform_indices = @transform_20, window_bounds = array<i64: 1, 384>}, {pipeline_mode = #tpu.pipeline_mode<synchronous>, transform_indices = @transform_21, window_bounds = array<i64: 384, 256>}, {pipeline_mode = #tpu.pipeline_mode<synchronous>, transform_indices = @transform_22, window_bounds = array<i64: 1, 256>}, {pipeline_mode = #tpu.pipeline_mode<synchronous>, transform_indices = @transform_23, window_bounds = array<i64: 6, 8, 256>}]} {
    %cst = arith.constant 0.000000e+00 : f32
    %0 = vector.broadcast %cst : f32 to vector<8x128xf32>
    %c0_i32 = arith.constant 0 : i32
    %1 = arith.index_cast %c0_i32 : i32 to index
    %c0 = arith.constant 0 : index
    %c0_0 = arith.constant 0 : index
    %2 = vector.load %arg2[%1, %c0, %c0_0] : memref<8x8x128xbf16, #tpu.memory_space<vmem>>, vector<1x8x128xbf16>
    %3 = vector.shape_cast %2 : vector<1x8x128xbf16> to vector<8x128xbf16>
    %4 = arith.index_cast %c0_i32 : i32 to index
    %c0_1 = arith.constant 0 : index
    %c0_2 = arith.constant 0 : index
    %5 = vector.load %arg3[%4, %c0_1, %c0_2] : memref<8x8x1xf32, #tpu.memory_space<vmem>>, vector<1x8x1xf32>
    %6 = vector.shape_cast %5 : vector<1x8x1xf32> to vector<8x1xf32>
    %c0_3 = arith.constant 0 : index
    %c0_4 = arith.constant 0 : index
    %7 = vector.load %arg7[%c0_3, %c0_4] : memref<128x384xbf16, #tpu.memory_space<vmem>>, vector<128x384xbf16>
    %cst_5 = arith.constant dense<0.000000e+00> : vector<8x384xf32>
    %8 = tpu.matmul %3, %7, %cst_5 {dimension_numbers = #tpu.dot_dimension_numbers<[1], [0], [0], [1], [0, 0, 1, 1], [], []>} : vector<8x128xbf16>, vector<128x384xbf16>, vector<8x384xf32> -> vector<8x384xf32>
    %c0_6 = arith.constant 0 : index
    %c0_7 = arith.constant 0 : index
    %9 = vector.load %arg9[%c0_6, %c0_7] : memref<1x384xf32, #tpu.memory_space<vmem>>, vector<1x384xf32>
    %10 = vector.broadcast %9 : vector<1x384xf32> to vector<8x384xf32>
    %11 = arith.addf %8, %10 : vector<8x384xf32>
    %12 = arith.truncf %0 : vector<8x128xf32> to vector<8x128xbf16>
    %c0_8 = arith.constant 0 : index
    %c0_9 = arith.constant 0 : index
    %13 = vector.load %arg8[%c0_8, %c0_9] : memref<128x384xbf16, #tpu.memory_space<vmem>>, vector<128x384xbf16>
    %cst_10 = arith.constant dense<0.000000e+00> : vector<8x384xf32>
    %14 = tpu.matmul %12, %13, %cst_10 {dimension_numbers = #tpu.dot_dimension_numbers<[1], [0], [0], [1], [0, 0, 1, 1], [], []>} : vector<8x128xbf16>, vector<128x384xbf16>, vector<8x384xf32> -> vector<8x384xf32>
    %c0_11 = arith.constant 0 : index
    %c0_12 = arith.constant 0 : index
    %15 = vector.load %arg10[%c0_11, %c0_12] : memref<1x384xf32, #tpu.memory_space<vmem>>, vector<1x384xf32>
    %16 = vector.broadcast %15 : vector<1x384xf32> to vector<8x384xf32>
    %17 = arith.addf %14, %16 : vector<8x384xf32>
    %18 = vector.extract_strided_slice %11 {offsets = [0, 0], sizes = [8, 128], strides = [1, 1]} : vector<8x384xf32> to vector<8x128xf32>
    %19 = vector.extract_strided_slice %17 {offsets = [0, 0], sizes = [8, 128], strides = [1, 1]} : vector<8x384xf32> to vector<8x128xf32>
    %20 = arith.addf %18, %19 : vector<8x128xf32>
    %21 = arith.negf %20 : vector<8x128xf32>
    %22 = math.exp %21 : vector<8x128xf32>
    %cst_13 = arith.constant 1.000000e+00 : f32
    %23 = vector.broadcast %cst_13 : f32 to vector<8x128xf32>
    %24 = arith.addf %23, %22 : vector<8x128xf32>
    %25 = arith.divf %23, %24 : vector<8x128xf32>
    %26 = vector.extract_strided_slice %11 {offsets = [0, 128], sizes = [8, 128], strides = [1, 1]} : vector<8x384xf32> to vector<8x128xf32>
    %27 = vector.extract_strided_slice %17 {offsets = [0, 128], sizes = [8, 128], strides = [1, 1]} : vector<8x384xf32> to vector<8x128xf32>
    %28 = arith.addf %26, %27 : vector<8x128xf32>
    %29 = arith.negf %28 : vector<8x128xf32>
    %30 = math.exp %29 : vector<8x128xf32>
    %cst_14 = arith.constant 1.000000e+00 : f32
    %31 = vector.broadcast %cst_14 : f32 to vector<8x128xf32>
    %32 = arith.addf %31, %30 : vector<8x128xf32>
    %33 = arith.divf %31, %32 : vector<8x128xf32>
    %34 = vector.extract_strided_slice %11 {offsets = [0, 256], sizes = [8, 128], strides = [1, 1]} : vector<8x384xf32> to vector<8x128xf32>
    %35 = vector.extract_strided_slice %17 {offsets = [0, 256], sizes = [8, 128], strides = [1, 1]} : vector<8x384xf32> to vector<8x128xf32>
    %36 = arith.mulf %25, %35 : vector<8x128xf32>
    %37 = arith.addf %34, %36 : vector<8x128xf32>
    %38 = math.tanh %37 : vector<8x128xf32>
    %cst_15 = arith.constant 1.000000e+00 : f32
    %39 = vector.broadcast %cst_15 : f32 to vector<8x128xf32>
    %40 = arith.subf %39, %33 : vector<8x128xf32>
    %41 = arith.mulf %40, %38 : vector<8x128xf32>
    %42 = arith.mulf %33, %0 : vector<8x128xf32>
    %43 = arith.addf %41, %42 : vector<8x128xf32>
    %44 = vector.broadcast %6 : vector<8x1xf32> to vector<8x128xf32>
    %45 = arith.mulf %44, %43 : vector<8x128xf32>
    %46 = arith.index_cast %c0_i32 : i32 to index
    %c0_16 = arith.constant 0 : index
    %c0_17 = arith.constant 0 : index
    %47 = vector.load %arg26[%46, %c0_16, %c0_17] : memref<8x8x128xf32, #tpu.memory_space<vmem>>, vector<1x8x128xf32>
    %48 = vector.shape_cast %47 : vector<1x8x128xf32> to vector<8x128xf32>
    %49 = vector.shape_cast %45 : vector<8x128xf32> to vector<1x8x128xf32>
    tpu.vector_store %arg26[%46, %c0_16, %c0_17], %49 {strides = array<i32>} : memref<8x8x128xf32, #tpu.memory_space<vmem>>, vector<1x8x128xf32>,
    %50 = vector.broadcast %6 : vector<8x1xf32> to vector<8x128xf32>
    %51 = arith.mulf %50, %43 : vector<8x128xf32>
    %cst_18 = arith.constant 1.000000e+00 : f32
    %52 = vector.broadcast %cst_18 : f32 to vector<8x1xf32>
    %53 = arith.subf %52, %6 : vector<8x1xf32>
    %54 = vector.broadcast %53 : vector<8x1xf32> to vector<8x128xf32>
    %55 = arith.mulf %54, %0 : vector<8x128xf32>
    %56 = arith.addf %51, %55 : vector<8x128xf32>
    %c1_i32 = arith.constant 1 : i32
    %57 = arith.index_cast %c1_i32 : i32 to index
    %c0_19 = arith.constant 0 : index
    %c0_20 = arith.constant 0 : index
    %58 = vector.load %arg2[%57, %c0_19, %c0_20] : memref<8x8x128xbf16, #tpu.memory_space<vmem>>, vector<1x8x128xbf16>
    %59 = vector.shape_cast %58 : vector<1x8x128xbf16> to vector<8x128xbf16>
    %60 = arith.index_cast %c1_i32 : i32 to index
    %c0_21 = arith.constant 0 : index
    %c0_22 = arith.constant 0 : index
    %61 = vector.load %arg3[%60, %c0_21, %c0_22] : memref<8x8x1xf32, #tpu.memory_space<vmem>>, vector<1x8x1xf32>
    %62 = vector.shape_cast %61 : vector<1x8x1xf32> to vector<8x1xf32>
    %c0_23 = arith.constant 0 : index
    %c0_24 = arith.constant 0 : index
    %63 = vector.load %arg7[%c0_23, %c0_24] : memref<128x384xbf16, #tpu.memory_space<vmem>>, vector<128x384xbf16>
    %cst_25 = arith.constant dense<0.000000e+00> : vector<8x384xf32>
    %64 = tpu.matmul %59, %63, %cst_25 {dimension_numbers = #tpu.dot_dimension_numbers<[1], [0], [0], [1], [0, 0, 1, 1], [], []>} : vector<8x128xbf16>, vector<128x384xbf16>, vector<8x384xf32> -> vector<8x384xf32>
    %c0_26 = arith.constant 0 : index
    %c0_27 = arith.constant 0 : index
    %65 = vector.load %arg9[%c0_26, %c0_27] : memref<1x384xf32, #tpu.memory_space<vmem>>, vector<1x384xf32>
    %66 = vector.broadcast %65 : vector<1x384xf32> to vector<8x384xf32>
    %67 = arith.addf %64, %66 : vector<8x384xf32>
    %68 = arith.truncf %56 : vector<8x128xf32> to vector<8x128xbf16>
    %c0_28 = arith.constant 0 : index
    %c0_29 = arith.constant 0 : index
    %69 = vector.load %arg8[%c0_28, %c0_29] : memref<128x384xbf16, #tpu.memory_space<vmem>>, vector<128x384xbf16>
    %cst_30 = arith.constant dense<0.000000e+00> : vector<8x384xf32>
    %70 = tpu.matmul %68, %69, %cst_30 {dimension_numbers = #tpu.dot_dimension_numbers<[1], [0], [0], [1], [0, 0, 1, 1], [], []>} : vector<8x128xbf16>, vector<128x384xbf16>, vector<8x384xf32> -> vector<8x384xf32>
    %c0_31 = arith.constant 0 : index
    %c0_32 = arith.constant 0 : index
    %71 = vector.load %arg10[%c0_31, %c0_32] : memref<1x384xf32, #tpu.memory_space<vmem>>, vector<1x384xf32>
    %72 = vector.broadcast %71 : vector<1x384xf32> to vector<8x384xf32>
    %73 = arith.addf %70, %72 : vector<8x384xf32>
    %74 = vector.extract_strided_slice %67 {offsets = [0, 0], sizes = [8, 128], strides = [1, 1]} : vector<8x384xf32> to vector<8x128xf32>
    %75 = vector.extract_strided_slice %73 {offsets = [0, 0], sizes = [8, 128], strides = [1, 1]} : vector<8x384xf32> to vector<8x128xf32>
    %76 = arith.addf %74, %75 : vector<8x128xf32>
    %77 = arith.negf %76 : vector<8x128xf32>
    %78 = math.exp %77 : vector<8x128xf32>
    %cst_33 = arith.constant 1.000000e+00 : f32
    %79 = vector.broadcast %cst_33 : f32 to vector<8x128xf32>
    %80 = arith.addf %79, %78 : vector<8x128xf32>
    %81 = arith.divf %79, %80 : vector<8x128xf32>
    %82 = vector.extract_strided_slice %67 {offsets = [0, 128], sizes = [8, 128], strides = [1, 1]} : vector<8x384xf32> to vector<8x128xf32>
    %83 = vector.extract_strided_slice %73 {offsets = [0, 128], sizes = [8, 128], strides = [1, 1]} : vector<8x384xf32> to vector<8x128xf32>
    %84 = arith.addf %82, %83 : vector<8x128xf32>
    %85 = arith.negf %84 : vector<8x128xf32>
    %86 = math.exp %85 : vector<8x128xf32>
    %cst_34 = arith.constant 1.000000e+00 : f32
    %87 = vector.broadcast %cst_34 : f32 to vector<8x128xf32>
    %88 = arith.addf %87, %86 : vector<8x128xf32>
    %89 = arith.divf %87, %88 : vector<8x128xf32>
    %90 = vector.extract_strided_slice %67 {offsets = [0, 256], sizes = [8, 128], strides = [1, 1]} : vector<8x384xf32> to vector<8x128xf32>
    %91 = vector.extract_strided_slice %73 {offsets = [0, 256], sizes = [8, 128], strides = [1, 1]} : vector<8x384xf32> to vector<8x128xf32>
    %92 = arith.mulf %81, %91 : vector<8x128xf32>
    %93 = arith.addf %90, %92 : vector<8x128xf32>
    %94 = math.tanh %93 : vector<8x128xf32>
    %cst_35 = arith.constant 1.000000e+00 : f32
    %95 = vector.broadcast %cst_35 : f32 to vector<8x128xf32>
    %96 = arith.subf %95, %89 : vector<8x128xf32>
    %97 = arith.mulf %96, %94 : vector<8x128xf32>
    %98 = arith.mulf %89, %56 : vector<8x128xf32>
    %99 = arith.addf %97, %98 : vector<8x128xf32>
    %100 = vector.broadcast %62 : vector<8x1xf32> to vector<8x128xf32>
    %101 = arith.mulf %100, %99 : vector<8x128xf32>
    %102 = arith.index_cast %c1_i32 : i32 to index
    %c0_36 = arith.constant 0 : index
    %c0_37 = arith.constant 0 : index
    %103 = vector.load %arg26[%102, %c0_36, %c0_37] : memref<8x8x128xf32, #tpu.memory_space<vmem>>, vector<1x8x128xf32>
    %104 = vector.shape_cast %103 : vector<1x8x128xf32> to vector<8x128xf32>
    %105 = vector.shape_cast %101 : vector<8x128xf32> to vector<1x8x128xf32>
    tpu.vector_store %arg26[%102, %c0_36, %c0_37], %105 {strides = array<i32>} : memref<8x8x128xf32, #tpu.memory_space<vmem>>, vector<1x8x128xf32>,
    %106 = vector.broadcast %62 : vector<8x1xf32> to vector<8x128xf32>
    %107 = arith.mulf %106, %99 : vector<8x128xf32>
    %cst_38 = arith.constant 1.000000e+00 : f32
    %108 = vector.broadcast %cst_38 : f32 to vector<8x1xf32>
    %109 = arith.subf %108, %62 : vector<8x1xf32>
    %110 = vector.broadcast %109 : vector<8x1xf32> to vector<8x128xf32>
    %111 = arith.mulf %110, %56 : vector<8x128xf32>
    %112 = arith.addf %107, %111 : vector<8x128xf32>
    %c2_i32 = arith.constant 2 : i32
    %113 = arith.index_cast %c2_i32 : i32 to index
    %c0_39 = arith.constant 0 : index
    %c0_40 = arith.constant 0 : index
    %114 = vector.load %arg2[%113, %c0_39, %c0_40] : memref<8x8x128xbf16, #tpu.memory_space<vmem>>, vector<1x8x128xbf16>
    %115 = vector.shape_cast %114 : vector<1x8x128xbf16> to vector<8x128xbf16>
    %116 = arith.index_cast %c2_i32 : i32 to index
    %c0_41 = arith.constant 0 : index
    %c0_42 = arith.constant 0 : index
    %117 = vector.load %arg3[%116, %c0_41, %c0_42] : memref<8x8x1xf32, #tpu.memory_space<vmem>>, vector<1x8x1xf32>
    %118 = vector.shape_cast %117 : vector<1x8x1xf32> to vector<8x1xf32>
    %c0_43 = arith.constant 0 : index
    %c0_44 = arith.constant 0 : index
    %119 = vector.load %arg7[%c0_43, %c0_44] : memref<128x384xbf16, #tpu.memory_space<vmem>>, vector<128x384xbf16>
    %cst_45 = arith.constant dense<0.000000e+00> : vector<8x384xf32>
    %120 = tpu.matmul %115, %119, %cst_45 {dimension_numbers = #tpu.dot_dimension_numbers<[1], [0], [0], [1], [0, 0, 1, 1], [], []>} : vector<8x128xbf16>, vector<128x384xbf16>, vector<8x384xf32> -> vector<8x384xf32>
    %c0_46 = arith.constant 0 : index
    %c0_47 = arith.constant 0 : index
    %121 = vector.load %arg9[%c0_46, %c0_47] : memref<1x384xf32, #tpu.memory_space<vmem>>, vector<1x384xf32>
    %122 = vector.broadcast %121 : vector<1x384xf32> to vector<8x384xf32>
    %123 = arith.addf %120, %122 : vector<8x384xf32>
    %124 = arith.truncf %112 : vector<8x128xf32> to vector<8x128xbf16>
    %c0_48 = arith.constant 0 : index
    %c0_49 = arith.constant 0 : index
    %125 = vector.load %arg8[%c0_48, %c0_49] : memref<128x384xbf16, #tpu.memory_space<vmem>>, vector<128x384xbf16>
    %cst_50 = arith.constant dense<0.000000e+00> : vector<8x384xf32>
    %126 = tpu.matmul %124, %125, %cst_50 {dimension_numbers = #tpu.dot_dimension_numbers<[1], [0], [0], [1], [0, 0, 1, 1], [], []>} : vector<8x128xbf16>, vector<128x384xbf16>, vector<8x384xf32> -> vector<8x384xf32>
    %c0_51 = arith.constant 0 : index
    %c0_52 = arith.constant 0 : index
    %127 = vector.load %arg10[%c0_51, %c0_52] : memref<1x384xf32, #tpu.memory_space<vmem>>, vector<1x384xf32>
    %128 = vector.broadcast %127 : vector<1x384xf32> to vector<8x384xf32>
    %129 = arith.addf %126, %128 : vector<8x384xf32>
    %130 = vector.extract_strided_slice %123 {offsets = [0, 0], sizes = [8, 128], strides = [1, 1]} : vector<8x384xf32> to vector<8x128xf32>
    %131 = vector.extract_strided_slice %129 {offsets = [0, 0], sizes = [8, 128], strides = [1, 1]} : vector<8x384xf32> to vector<8x128xf32>
    %132 = arith.addf %130, %131 : vector<8x128xf32>
    %133 = arith.negf %132 : vector<8x128xf32>
    %134 = math.exp %133 : vector<8x128xf32>
    %cst_53 = arith.constant 1.000000e+00 : f32
    %135 = vector.broadcast %cst_53 : f32 to vector<8x128xf32>
    %136 = arith.addf %135, %134 : vector<8x128xf32>
    %137 = arith.divf %135, %136 : vector<8x128xf32>
    %138 = vector.extract_strided_slice %123 {offsets = [0, 128], sizes = [8, 128], strides = [1, 1]} : vector<8x384xf32> to vector<8x128xf32>
    %139 = vector.extract_strided_slice %129 {offsets = [0, 128], sizes = [8, 128], strides = [1, 1]} : vector<8x384xf32> to vector<8x128xf32>
    %140 = arith.addf %138, %139 : vector<8x128xf32>
    %141 = arith.negf %140 : vector<8x128xf32>
    %142 = math.exp %141 : vector<8x128xf32>
    %cst_54 = arith.constant 1.000000e+00 : f32
    %143 = vector.broadcast %cst_54 : f32 to vector<8x128xf32>
    %144 = arith.addf %143, %142 : vector<8x128xf32>
    %145 = arith.divf %143, %144 : vector<8x128xf32>
    %146 = vector.extract_strided_slice %123 {offsets = [0, 256], sizes = [8, 128], strides = [1, 1]} : vector<8x384xf32> to vector<8x128xf32>
    %147 = vector.extract_strided_slice %129 {offsets = [0, 256], sizes = [8, 128], strides = [1, 1]} : vector<8x384xf32> to vector<8x128xf32>
    %148 = arith.mulf %137, %147 : vector<8x128xf32>
    %149 = arith.addf %146, %148 : vector<8x128xf32>
    %150 = math.tanh %149 : vector<8x128xf32>
    %cst_55 = arith.constant 1.000000e+00 : f32
    %151 = vector.broadcast %cst_55 : f32 to vector<8x128xf32>
    %152 = arith.subf %151, %145 : vector<8x128xf32>
    %153 = arith.mulf %152, %150 : vector<8x128xf32>
    %154 = arith.mulf %145, %112 : vector<8x128xf32>
    %155 = arith.addf %153, %154 : vector<8x128xf32>
    %156 = vector.broadcast %118 : vector<8x1xf32> to vector<8x128xf32>
    %157 = arith.mulf %156, %155 : vector<8x128xf32>
    %158 = arith.index_cast %c2_i32 : i32 to index
    %c0_56 = arith.constant 0 : index
    %c0_57 = arith.constant 0 : index
    %159 = vector.load %arg26[%158, %c0_56, %c0_57] : memref<8x8x128xf32, #tpu.memory_space<vmem>>, vector<1x8x128xf32>
    %160 = vector.shape_cast %159 : vector<1x8x128xf32> to vector<8x128xf32>
    %161 = vector.shape_cast %157 : vector<8x128xf32> to vector<1x8x128xf32>
    tpu.vector_store %arg26[%158, %c0_56, %c0_57], %161 {strides = array<i32>} : memref<8x8x128xf32, #tpu.memory_space<vmem>>, vector<1x8x128xf32>,
    %162 = vector.broadcast %118 : vector<8x1xf32> to vector<8x128xf32>
    %163 = arith.mulf %162, %155 : vector<8x128xf32>
    %cst_58 = arith.constant 1.000000e+00 : f32
    %164 = vector.broadcast %cst_58 : f32 to vector<8x1xf32>
    %165 = arith.subf %164, %118 : vector<8x1xf32>
    %166 = vector.broadcast %165 : vector<8x1xf32> to vector<8x128xf32>
    %167 = arith.mulf %166, %112 : vector<8x128xf32>
    %168 = arith.addf %163, %167 : vector<8x128xf32>
    %c3_i32 = arith.constant 3 : i32
    %169 = arith.index_cast %c3_i32 : i32 to index
    %c0_59 = arith.constant 0 : index
    %c0_60 = arith.constant 0 : index
    %170 = vector.load %arg2[%169, %c0_59, %c0_60] : memref<8x8x128xbf16, #tpu.memory_space<vmem>>, vector<1x8x128xbf16>
    %171 = vector.shape_cast %170 : vector<1x8x128xbf16> to vector<8x128xbf16>
    %172 = arith.index_cast %c3_i32 : i32 to index
    %c0_61 = arith.constant 0 : index
    %c0_62 = arith.constant 0 : index
    %173 = vector.load %arg3[%172, %c0_61, %c0_62] : memref<8x8x1xf32, #tpu.memory_space<vmem>>, vector<1x8x1xf32>
    %174 = vector.shape_cast %173 : vector<1x8x1xf32> to vector<8x1xf32>
    %c0_63 = arith.constant 0 : index
    %c0_64 = arith.constant 0 : index
    %175 = vector.load %arg7[%c0_63, %c0_64] : memref<128x384xbf16, #tpu.memory_space<vmem>>, vector<128x384xbf16>
    %cst_65 = arith.constant dense<0.000000e+00> : vector<8x384xf32>
    %176 = tpu.matmul %171, %175, %cst_65 {dimension_numbers = #tpu.dot_dimension_numbers<[1], [0], [0], [1], [0, 0, 1, 1], [], []>} : vector<8x128xbf16>, vector<128x384xbf16>, vector<8x384xf32> -> vector<8x384xf32>
    %c0_66 = arith.constant 0 : index
    %c0_67 = arith.constant 0 : index
    %177 = vector.load %arg9[%c0_66, %c0_67] : memref<1x384xf32, #tpu.memory_space<vmem>>, vector<1x384xf32>
    %178 = vector.broadcast %177 : vector<1x384xf32> to vector<8x384xf32>
    %179 = arith.addf %176, %178 : vector<8x384xf32>
    %180 = arith.truncf %168 : vector<8x128xf32> to vector<8x128xbf16>
    %c0_68 = arith.constant 0 : index
    %c0_69 = arith.constant 0 : index
    %181 = vector.load %arg8[%c0_68, %c0_69] : memref<128x384xbf16, #tpu.memory_space<vmem>>, vector<128x384xbf16>
    %cst_70 = arith.constant dense<0.000000e+00> : vector<8x384xf32>
    %182 = tpu.matmul %180, %181, %cst_70 {dimension_numbers = #tpu.dot_dimension_numbers<[1], [0], [0], [1], [0, 0, 1, 1], [], []>} : vector<8x128xbf16>, vector<128x384xbf16>, vector<8x384xf32> -> vector<8x384xf32>
    %c0_71 = arith.constant 0 : index
    %c0_72 = arith.constant 0 : index
    %183 = vector.load %arg10[%c0_71, %c0_72] : memref<1x384xf32, #tpu.memory_space<vmem>>, vector<1x384xf32>
    %184 = vector.broadcast %183 : vector<1x384xf32> to vector<8x384xf32>
    %185 = arith.addf %182, %184 : vector<8x384xf32>
    %186 = vector.extract_strided_slice %179 {offsets = [0, 0], sizes = [8, 128], strides = [1, 1]} : vector<8x384xf32> to vector<8x128xf32>
    %187 = vector.extract_strided_slice %185 {offsets = [0, 0], sizes = [8, 128], strides = [1, 1]} : vector<8x384xf32> to vector<8x128xf32>
    %188 = arith.addf %186, %187 : vector<8x128xf32>
    %189 = arith.negf %188 : vector<8x128xf32>
    %190 = math.exp %189 : vector<8x128xf32>
    %cst_73 = arith.constant 1.000000e+00 : f32
    %191 = vector.broadcast %cst_73 : f32 to vector<8x128xf32>
    %192 = arith.addf %191, %190 : vector<8x128xf32>
    %193 = arith.divf %191, %192 : vector<8x128xf32>
    %194 = vector.extract_strided_slice %179 {offsets = [0, 128], sizes = [8, 128], strides = [1, 1]} : vector<8x384xf32> to vector<8x128xf32>
    %195 = vector.extract_strided_slice %185 {offsets = [0, 128], sizes = [8, 128], strides = [1, 1]} : vector<8x384xf32> to vector<8x128xf32>
    %196 = arith.addf %194, %195 : vector<8x128xf32>
    %197 = arith.negf %196 : vector<8x128xf32>
    %198 = math.exp %197 : vector<8x128xf32>
    %cst_74 = arith.constant 1.000000e+00 : f32
    %199 = vector.broadcast %cst_74 : f32 to vector<8x128xf32>
    %200 = arith.addf %199, %198 : vector<8x128xf32>
    %201 = arith.divf %199, %200 : vector<8x128xf32>
    %202 = vector.extract_strided_slice %179 {offsets = [0, 256], sizes = [8, 128], strides = [1, 1]} : vector<8x384xf32> to vector<8x128xf32>
    %203 = vector.extract_strided_slice %185 {offsets = [0, 256], sizes = [8, 128], strides = [1, 1]} : vector<8x384xf32> to vector<8x128xf32>
    %204 = arith.mulf %193, %203 : vector<8x128xf32>
    %205 = arith.addf %202, %204 : vector<8x128xf32>
    %206 = math.tanh %205 : vector<8x128xf32>
    %cst_75 = arith.constant 1.000000e+00 : f32
    %207 = vector.broadcast %cst_75 : f32 to vector<8x128xf32>
    %208 = arith.subf %207, %201 : vector<8x128xf32>
    %209 = arith.mulf %208, %206 : vector<8x128xf32>
    %210 = arith.mulf %201, %168 : vector<8x128xf32>
    %211 = arith.addf %209, %210 : vector<8x128xf32>
    %212 = vector.broadcast %174 : vector<8x1xf32> to vector<8x128xf32>
    %213 = arith.mulf %212, %211 : vector<8x128xf32>
    %214 = arith.index_cast %c3_i32 : i32 to index
    %c0_76 = arith.constant 0 : index
    %c0_77 = arith.constant 0 : index
    %215 = vector.load %arg26[%214, %c0_76, %c0_77] : memref<8x8x128xf32, #tpu.memory_space<vmem>>, vector<1x8x128xf32>
    %216 = vector.shape_cast %215 : vector<1x8x128xf32> to vector<8x128xf32>
    %217 = vector.shape_cast %213 : vector<8x128xf32> to vector<1x8x128xf32>
    tpu.vector_store %arg26[%214, %c0_76, %c0_77], %217 {strides = array<i32>} : memref<8x8x128xf32, #tpu.memory_space<vmem>>, vector<1x8x128xf32>,
    %218 = vector.broadcast %174 : vector<8x1xf32> to vector<8x128xf32>
    %219 = arith.mulf %218, %211 : vector<8x128xf32>
    %cst_78 = arith.constant 1.000000e+00 : f32
    %220 = vector.broadcast %cst_78 : f32 to vector<8x1xf32>
    %221 = arith.subf %220, %174 : vector<8x1xf32>
    %222 = vector.broadcast %221 : vector<8x1xf32> to vector<8x128xf32>
    %223 = arith.mulf %222, %168 : vector<8x128xf32>
    %224 = arith.addf %219, %223 : vector<8x128xf32>
    %c4_i32 = arith.constant 4 : i32
    %225 = arith.index_cast %c4_i32 : i32 to index
    %c0_79 = arith.constant 0 : index
    %c0_80 = arith.constant 0 : index
    %226 = vector.load %arg2[%225, %c0_79, %c0_80] : memref<8x8x128xbf16, #tpu.memory_space<vmem>>, vector<1x8x128xbf16>
    %227 = vector.shape_cast %226 : vector<1x8x128xbf16> to vector<8x128xbf16>
    %228 = arith.index_cast %c4_i32 : i32 to index
    %c0_81 = arith.constant 0 : index
    %c0_82 = arith.constant 0 : index
    %229 = vector.load %arg3[%228, %c0_81, %c0_82] : memref<8x8x1xf32, #tpu.memory_space<vmem>>, vector<1x8x1xf32>
    %230 = vector.shape_cast %229 : vector<1x8x1xf32> to vector<8x1xf32>
    %c0_83 = arith.constant 0 : index
    %c0_84 = arith.constant 0 : index
    %231 = vector.load %arg7[%c0_83, %c0_84] : memref<128x384xbf16, #tpu.memory_space<vmem>>, vector<128x384xbf16>
    %cst_85 = arith.constant dense<0.000000e+00> : vector<8x384xf32>
    %232 = tpu.matmul %227, %231, %cst_85 {dimension_numbers = #tpu.dot_dimension_numbers<[1], [0], [0], [1], [0, 0, 1, 1], [], []>} : vector<8x128xbf16>, vector<128x384xbf16>, vector<8x384xf32> -> vector<8x384xf32>
    %c0_86 = arith.constant 0 : index
    %c0_87 = arith.constant 0 : index
    %233 = vector.load %arg9[%c0_86, %c0_87] : memref<1x384xf32, #tpu.memory_space<vmem>>, vector<1x384xf32>
    %234 = vector.broadcast %233 : vector<1x384xf32> to vector<8x384xf32>
    %235 = arith.addf %232, %234 : vector<8x384xf32>
    %236 = arith.truncf %224 : vector<8x128xf32> to vector<8x128xbf16>
    %c0_88 = arith.constant 0 : index
    %c0_89 = arith.constant 0 : index
    %237 = vector.load %arg8[%c0_88, %c0_89] : memref<128x384xbf16, #tpu.memory_space<vmem>>, vector<128x384xbf16>
    %cst_90 = arith.constant dense<0.000000e+00> : vector<8x384xf32>
    %238 = tpu.matmul %236, %237, %cst_90 {dimension_numbers = #tpu.dot_dimension_numbers<[1], [0], [0], [1], [0, 0, 1, 1], [], []>} : vector<8x128xbf16>, vector<128x384xbf16>, vector<8x384xf32> -> vector<8x384xf32>
    %c0_91 = arith.constant 0 : index
    %c0_92 = arith.constant 0 : index
    %239 = vector.load %arg10[%c0_91, %c0_92] : memref<1x384xf32, #tpu.memory_space<vmem>>, vector<1x384xf32>
    %240 = vector.broadcast %239 : vector<1x384xf32> to vector<8x384xf32>
    %241 = arith.addf %238, %240 : vector<8x384xf32>
    %242 = vector.extract_strided_slice %235 {offsets = [0, 0], sizes = [8, 128], strides = [1, 1]} : vector<8x384xf32> to vector<8x128xf32>
    %243 = vector.extract_strided_slice %241 {offsets = [0, 0], sizes = [8, 128], strides = [1, 1]} : vector<8x384xf32> to vector<8x128xf32>
    %244 = arith.addf %242, %243 : vector<8x128xf32>
    %245 = arith.negf %244 : vector<8x128xf32>
    %246 = math.exp %245 : vector<8x128xf32>
    %cst_93 = arith.constant 1.000000e+00 : f32
    %247 = vector.broadcast %cst_93 : f32 to vector<8x128xf32>
    %248 = arith.addf %247, %246 : vector<8x128xf32>
    %249 = arith.divf %247, %248 : vector<8x128xf32>
    %250 = vector.extract_strided_slice %235 {offsets = [0, 128], sizes = [8, 128], strides = [1, 1]} : vector<8x384xf32> to vector<8x128xf32>
    %251 = vector.extract_strided_slice %241 {offsets = [0, 128], sizes = [8, 128], strides = [1, 1]} : vector<8x384xf32> to vector<8x128xf32>
    %252 = arith.addf %250, %251 : vector<8x128xf32>
    %253 = arith.negf %252 : vector<8x128xf32>
    %254 = math.exp %253 : vector<8x128xf32>
    %cst_94 = arith.constant 1.000000e+00 : f32
    %255 = vector.broadcast %cst_94 : f32 to vector<8x128xf32>
    %256 = arith.addf %255, %254 : vector<8x128xf32>
    %257 = arith.divf %255, %256 : vector<8x128xf32>
    %258 = vector.extract_strided_slice %235 {offsets = [0, 256], sizes = [8, 128], strides = [1, 1]} : vector<8x384xf32> to vector<8x128xf32>
    %259 = vector.extract_strided_slice %241 {offsets = [0, 256], sizes = [8, 128], strides = [1, 1]} : vector<8x384xf32> to vector<8x128xf32>
    %260 = arith.mulf %249, %259 : vector<8x128xf32>
    %261 = arith.addf %258, %260 : vector<8x128xf32>
    %262 = math.tanh %261 : vector<8x128xf32>
    %cst_95 = arith.constant 1.000000e+00 : f32
    %263 = vector.broadcast %cst_95 : f32 to vector<8x128xf32>
    %264 = arith.subf %263, %257 : vector<8x128xf32>
    %265 = arith.mulf %264, %262 : vector<8x128xf32>
    %266 = arith.mulf %257, %224 : vector<8x128xf32>
    %267 = arith.addf %265, %266 : vector<8x128xf32>
    %268 = vector.broadcast %230 : vector<8x1xf32> to vector<8x128xf32>
    %269 = arith.mulf %268, %267 : vector<8x128xf32>
    %270 = arith.index_cast %c4_i32 : i32 to index
    %c0_96 = arith.constant 0 : index
    %c0_97 = arith.constant 0 : index
    %271 = vector.load %arg26[%270, %c0_96, %c0_97] : memref<8x8x128xf32, #tpu.memory_space<vmem>>, vector<1x8x128xf32>
    %272 = vector.shape_cast %271 : vector<1x8x128xf32> to vector<8x128xf32>
    %273 = vector.shape_cast %269 : vector<8x128xf32> to vector<1x8x128xf32>
    tpu.vector_store %arg26[%270, %c0_96, %c0_97], %273 {strides = array<i32>} : memref<8x8x128xf32, #tpu.memory_space<vmem>>, vector<1x8x128xf32>,
    %274 = vector.broadcast %230 : vector<8x1xf32> to vector<8x128xf32>
    %275 = arith.mulf %274, %267 : vector<8x128xf32>
    %cst_98 = arith.constant 1.000000e+00 : f32
    %276 = vector.broadcast %cst_98 : f32 to vector<8x1xf32>
    %277 = arith.subf %276, %230 : vector<8x1xf32>
    %278 = vector.broadcast %277 : vector<8x1xf32> to vector<8x128xf32>
    %279 = arith.mulf %278, %224 : vector<8x128xf32>
    %280 = arith.addf %275, %279 : vector<8x128xf32>
    %c5_i32 = arith.constant 5 : i32
    %281 = arith.index_cast %c5_i32 : i32 to index
    %c0_99 = arith.constant 0 : index
    %c0_100 = arith.constant 0 : index
    %282 = vector.load %arg2[%281, %c0_99, %c0_100] : memref<8x8x128xbf16, #tpu.memory_space<vmem>>, vector<1x8x128xbf16>
    %283 = vector.shape_cast %282 : vector<1x8x128xbf16> to vector<8x128xbf16>
    %284 = arith.index_cast %c5_i32 : i32 to index
    %c0_101 = arith.constant 0 : index
    %c0_102 = arith.constant 0 : index
    %285 = vector.load %arg3[%284, %c0_101, %c0_102] : memref<8x8x1xf32, #tpu.memory_space<vmem>>, vector<1x8x1xf32>
    %286 = vector.shape_cast %285 : vector<1x8x1xf32> to vector<8x1xf32>
    %c0_103 = arith.constant 0 : index
    %c0_104 = arith.constant 0 : index
    %287 = vector.load %arg7[%c0_103, %c0_104] : memref<128x384xbf16, #tpu.memory_space<vmem>>, vector<128x384xbf16>
    %cst_105 = arith.constant dense<0.000000e+00> : vector<8x384xf32>
    %288 = tpu.matmul %283, %287, %cst_105 {dimension_numbers = #tpu.dot_dimension_numbers<[1], [0], [0], [1], [0, 0, 1, 1], [], []>} : vector<8x128xbf16>, vector<128x384xbf16>, vector<8x384xf32> -> vector<8x384xf32>
    %c0_106 = arith.constant 0 : index
    %c0_107 = arith.constant 0 : index
    %289 = vector.load %arg9[%c0_106, %c0_107] : memref<1x384xf32, #tpu.memory_space<vmem>>, vector<1x384xf32>
    %290 = vector.broadcast %289 : vector<1x384xf32> to vector<8x384xf32>
    %291 = arith.addf %288, %290 : vector<8x384xf32>
    %292 = arith.truncf %280 : vector<8x128xf32> to vector<8x128xbf16>
    %c0_108 = arith.constant 0 : index
    %c0_109 = arith.constant 0 : index
    %293 = vector.load %arg8[%c0_108, %c0_109] : memref<128x384xbf16, #tpu.memory_space<vmem>>, vector<128x384xbf16>
    %cst_110 = arith.constant dense<0.000000e+00> : vector<8x384xf32>
    %294 = tpu.matmul %292, %293, %cst_110 {dimension_numbers = #tpu.dot_dimension_numbers<[1], [0], [0], [1], [0, 0, 1, 1], [], []>} : vector<8x128xbf16>, vector<128x384xbf16>, vector<8x384xf32> -> vector<8x384xf32>
    %c0_111 = arith.constant 0 : index
    %c0_112 = arith.constant 0 : index
    %295 = vector.load %arg10[%c0_111, %c0_112] : memref<1x384xf32, #tpu.memory_space<vmem>>, vector<1x384xf32>
    %296 = vector.broadcast %295 : vector<1x384xf32> to vector<8x384xf32>
    %297 = arith.addf %294, %296 : vector<8x384xf32>
    %298 = vector.extract_strided_slice %291 {offsets = [0, 0], sizes = [8, 128], strides = [1, 1]} : vector<8x384xf32> to vector<8x128xf32>
    %299 = vector.extract_strided_slice %297 {offsets = [0, 0], sizes = [8, 128], strides = [1, 1]} : vector<8x384xf32> to vector<8x128xf32>
    %300 = arith.addf %298, %299 : vector<8x128xf32>
    %301 = arith.negf %300 : vector<8x128xf32>
    %302 = math.exp %301 : vector<8x128xf32>
    %cst_113 = arith.constant 1.000000e+00 : f32
    %303 = vector.broadcast %cst_113 : f32 to vector<8x128xf32>
    %304 = arith.addf %303, %302 : vector<8x128xf32>
    %305 = arith.divf %303, %304 : vector<8x128xf32>
    %306 = vector.extract_strided_slice %291 {offsets = [0, 128], sizes = [8, 128], strides = [1, 1]} : vector<8x384xf32> to vector<8x128xf32>
    %307 = vector.extract_strided_slice %297 {offsets = [0, 128], sizes = [8, 128], strides = [1, 1]} : vector<8x384xf32> to vector<8x128xf32>
    %308 = arith.addf %306, %307 : vector<8x128xf32>
    %309 = arith.negf %308 : vector<8x128xf32>
    %310 = math.exp %309 : vector<8x128xf32>
    %cst_114 = arith.constant 1.000000e+00 : f32
    %311 = vector.broadcast %cst_114 : f32 to vector<8x128xf32>
    %312 = arith.addf %311, %310 : vector<8x128xf32>
    %313 = arith.divf %311, %312 : vector<8x128xf32>
    %314 = vector.extract_strided_slice %291 {offsets = [0, 256], sizes = [8, 128], strides = [1, 1]} : vector<8x384xf32> to vector<8x128xf32>
    %315 = vector.extract_strided_slice %297 {offsets = [0, 256], sizes = [8, 128], strides = [1, 1]} : vector<8x384xf32> to vector<8x128xf32>
    %316 = arith.mulf %305, %315 : vector<8x128xf32>
    %317 = arith.addf %314, %316 : vector<8x128xf32>
    %318 = math.tanh %317 : vector<8x128xf32>
    %cst_115 = arith.constant 1.000000e+00 : f32
    %319 = vector.broadcast %cst_115 : f32 to vector<8x128xf32>
    %320 = arith.subf %319, %313 : vector<8x128xf32>
    %321 = arith.mulf %320, %318 : vector<8x128xf32>
    %322 = arith.mulf %313, %280 : vector<8x128xf32>
    %323 = arith.addf %321, %322 : vector<8x128xf32>
    %324 = vector.broadcast %286 : vector<8x1xf32> to vector<8x128xf32>
    %325 = arith.mulf %324, %323 : vector<8x128xf32>
    %326 = arith.index_cast %c5_i32 : i32 to index
    %c0_116 = arith.constant 0 : index
    %c0_117 = arith.constant 0 : index
    %327 = vector.load %arg26[%326, %c0_116, %c0_117] : memref<8x8x128xf32, #tpu.memory_space<vmem>>, vector<1x8x128xf32>
    %328 = vector.shape_cast %327 : vector<1x8x128xf32> to vector<8x128xf32>
    %329 = vector.shape_cast %325 : vector<8x128xf32> to vector<1x8x128xf32>
    tpu.vector_store %arg26[%326, %c0_116, %c0_117], %329 {strides = array<i32>} : memref<8x8x128xf32, #tpu.memory_space<vmem>>, vector<1x8x128xf32>,
    %330 = vector.broadcast %286 : vector<8x1xf32> to vector<8x128xf32>
    %331 = arith.mulf %330, %323 : vector<8x128xf32>
    %cst_118 = arith.constant 1.000000e+00 : f32
    %332 = vector.broadcast %cst_118 : f32 to vector<8x1xf32>
    %333 = arith.subf %332, %286 : vector<8x1xf32>
    %334 = vector.broadcast %333 : vector<8x1xf32> to vector<8x128xf32>
    %335 = arith.mulf %334, %280 : vector<8x128xf32>
    %336 = arith.addf %331, %335 : vector<8x128xf32>
    %c6_i32 = arith.constant 6 : i32
    %337 = arith.index_cast %c6_i32 : i32 to index
    %c0_119 = arith.constant 0 : index
    %c0_120 = arith.constant 0 : index
    %338 = vector.load %arg2[%337, %c0_119, %c0_120] : memref<8x8x128xbf16, #tpu.memory_space<vmem>>, vector<1x8x128xbf16>
    %339 = vector.shape_cast %338 : vector<1x8x128xbf16> to vector<8x128xbf16>
    %340 = arith.index_cast %c6_i32 : i32 to index
    %c0_121 = arith.constant 0 : index
    %c0_122 = arith.constant 0 : index
    %341 = vector.load %arg3[%340, %c0_121, %c0_122] : memref<8x8x1xf32, #tpu.memory_space<vmem>>, vector<1x8x1xf32>
    %342 = vector.shape_cast %341 : vector<1x8x1xf32> to vector<8x1xf32>
    %c0_123 = arith.constant 0 : index
    %c0_124 = arith.constant 0 : index
    %343 = vector.load %arg7[%c0_123, %c0_124] : memref<128x384xbf16, #tpu.memory_space<vmem>>, vector<128x384xbf16>
    %cst_125 = arith.constant dense<0.000000e+00> : vector<8x384xf32>
    %344 = tpu.matmul %339, %343, %cst_125 {dimension_numbers = #tpu.dot_dimension_numbers<[1], [0], [0], [1], [0, 0, 1, 1], [], []>} : vector<8x128xbf16>, vector<128x384xbf16>, vector<8x384xf32> -> vector<8x384xf32>
    %c0_126 = arith.constant 0 : index
    %c0_127 = arith.constant 0 : index
    %345 = vector.load %arg9[%c0_126, %c0_127] : memref<1x384xf32, #tpu.memory_space<vmem>>, vector<1x384xf32>
    %346 = vector.broadcast %345 : vector<1x384xf32> to vector<8x384xf32>
    %347 = arith.addf %344, %346 : vector<8x384xf32>
    %348 = arith.truncf %336 : vector<8x128xf32> to vector<8x128xbf16>
    %c0_128 = arith.constant 0 : index
    %c0_129 = arith.constant 0 : index
    %349 = vector.load %arg8[%c0_128, %c0_129] : memref<128x384xbf16, #tpu.memory_space<vmem>>, vector<128x384xbf16>
    %cst_130 = arith.constant dense<0.000000e+00> : vector<8x384xf32>
    %350 = tpu.matmul %348, %349, %cst_130 {dimension_numbers = #tpu.dot_dimension_numbers<[1], [0], [0], [1], [0, 0, 1, 1], [], []>} : vector<8x128xbf16>, vector<128x384xbf16>, vector<8x384xf32> -> vector<8x384xf32>
    %c0_131 = arith.constant 0 : index
    %c0_132 = arith.constant 0 : index
    %351 = vector.load %arg10[%c0_131, %c0_132] : memref<1x384xf32, #tpu.memory_space<vmem>>, vector<1x384xf32>
    %352 = vector.broadcast %351 : vector<1x384xf32> to vector<8x384xf32>
    %353 = arith.addf %350, %352 : vector<8x384xf32>
    %354 = vector.extract_strided_slice %347 {offsets = [0, 0], sizes = [8, 128], strides = [1, 1]} : vector<8x384xf32> to vector<8x128xf32>
    %355 = vector.extract_strided_slice %353 {offsets = [0, 0], sizes = [8, 128], strides = [1, 1]} : vector<8x384xf32> to vector<8x128xf32>
    %356 = arith.addf %354, %355 : vector<8x128xf32>
    %357 = arith.negf %356 : vector<8x128xf32>
    %358 = math.exp %357 : vector<8x128xf32>
    %cst_133 = arith.constant 1.000000e+00 : f32
    %359 = vector.broadcast %cst_133 : f32 to vector<8x128xf32>
    %360 = arith.addf %359, %358 : vector<8x128xf32>
    %361 = arith.divf %359, %360 : vector<8x128xf32>
    %362 = vector.extract_strided_slice %347 {offsets = [0, 128], sizes = [8, 128], strides = [1, 1]} : vector<8x384xf32> to vector<8x128xf32>
    %363 = vector.extract_strided_slice %353 {offsets = [0, 128], sizes = [8, 128], strides = [1, 1]} : vector<8x384xf32> to vector<8x128xf32>
    %364 = arith.addf %362, %363 : vector<8x128xf32>
    %365 = arith.negf %364 : vector<8x128xf32>
    %366 = math.exp %365 : vector<8x128xf32>
    %cst_134 = arith.constant 1.000000e+00 : f32
    %367 = vector.broadcast %cst_134 : f32 to vector<8x128xf32>
    %368 = arith.addf %367, %366 : vector<8x128xf32>
    %369 = arith.divf %367, %368 : vector<8x128xf32>
    %370 = vector.extract_strided_slice %347 {offsets = [0, 256], sizes = [8, 128], strides = [1, 1]} : vector<8x384xf32> to vector<8x128xf32>
    %371 = vector.extract_strided_slice %353 {offsets = [0, 256], sizes = [8, 128], strides = [1, 1]} : vector<8x384xf32> to vector<8x128xf32>
    %372 = arith.mulf %361, %371 : vector<8x128xf32>
    %373 = arith.addf %370, %372 : vector<8x128xf32>
    %374 = math.tanh %373 : vector<8x128xf32>
    %cst_135 = arith.constant 1.000000e+00 : f32
    %375 = vector.broadcast %cst_135 : f32 to vector<8x128xf32>
    %376 = arith.subf %375, %369 : vector<8x128xf32>
    %377 = arith.mulf %376, %374 : vector<8x128xf32>
    %378 = arith.mulf %369, %336 : vector<8x128xf32>
    %379 = arith.addf %377, %378 : vector<8x128xf32>
    %380 = vector.broadcast %342 : vector<8x1xf32> to vector<8x128xf32>
    %381 = arith.mulf %380, %379 : vector<8x128xf32>
    %382 = arith.index_cast %c6_i32 : i32 to index
    %c0_136 = arith.constant 0 : index
    %c0_137 = arith.constant 0 : index
    %383 = vector.load %arg26[%382, %c0_136, %c0_137] : memref<8x8x128xf32, #tpu.memory_space<vmem>>, vector<1x8x128xf32>
    %384 = vector.shape_cast %383 : vector<1x8x128xf32> to vector<8x128xf32>
    %385 = vector.shape_cast %381 : vector<8x128xf32> to vector<1x8x128xf32>
    tpu.vector_store %arg26[%382, %c0_136, %c0_137], %385 {strides = array<i32>} : memref<8x8x128xf32, #tpu.memory_space<vmem>>, vector<1x8x128xf32>,
    %386 = vector.broadcast %342 : vector<8x1xf32> to vector<8x128xf32>
    %387 = arith.mulf %386, %379 : vector<8x128xf32>
    %cst_138 = arith.constant 1.000000e+00 : f32
    %388 = vector.broadcast %cst_138 : f32 to vector<8x1xf32>
    %389 = arith.subf %388, %342 : vector<8x1xf32>
    %390 = vector.broadcast %389 : vector<8x1xf32> to vector<8x128xf32>
    %391 = arith.mulf %390, %336 : vector<8x128xf32>
    %392 = arith.addf %387, %391 : vector<8x128xf32>
    %c7_i32 = arith.constant 7 : i32
    %393 = arith.index_cast %c7_i32 : i32 to index
    %c0_139 = arith.constant 0 : index
    %c0_140 = arith.constant 0 : index
    %394 = vector.load %arg2[%393, %c0_139, %c0_140] : memref<8x8x128xbf16, #tpu.memory_space<vmem>>, vector<1x8x128xbf16>
    %395 = vector.shape_cast %394 : vector<1x8x128xbf16> to vector<8x128xbf16>
    %396 = arith.index_cast %c7_i32 : i32 to index
    %c0_141 = arith.constant 0 : index
    %c0_142 = arith.constant 0 : index
    %397 = vector.load %arg3[%396, %c0_141, %c0_142] : memref<8x8x1xf32, #tpu.memory_space<vmem>>, vector<1x8x1xf32>
    %398 = vector.shape_cast %397 : vector<1x8x1xf32> to vector<8x1xf32>
    %c0_143 = arith.constant 0 : index
    %c0_144 = arith.constant 0 : index
    %399 = vector.load %arg7[%c0_143, %c0_144] : memref<128x384xbf16, #tpu.memory_space<vmem>>, vector<128x384xbf16>
    %cst_145 = arith.constant dense<0.000000e+00> : vector<8x384xf32>
    %400 = tpu.matmul %395, %399, %cst_145 {dimension_numbers = #tpu.dot_dimension_numbers<[1], [0], [0], [1], [0, 0, 1, 1], [], []>} : vector<8x128xbf16>, vector<128x384xbf16>, vector<8x384xf32> -> vector<8x384xf32>
    %c0_146 = arith.constant 0 : index
    %c0_147 = arith.constant 0 : index
    %401 = vector.load %arg9[%c0_146, %c0_147] : memref<1x384xf32, #tpu.memory_space<vmem>>, vector<1x384xf32>
    %402 = vector.broadcast %401 : vector<1x384xf32> to vector<8x384xf32>
    %403 = arith.addf %400, %402 : vector<8x384xf32>
    %404 = arith.truncf %392 : vector<8x128xf32> to vector<8x128xbf16>
    %c0_148 = arith.constant 0 : index
    %c0_149 = arith.constant 0 : index
    %405 = vector.load %arg8[%c0_148, %c0_149] : memref<128x384xbf16, #tpu.memory_space<vmem>>, vector<128x384xbf16>
    %cst_150 = arith.constant dense<0.000000e+00> : vector<8x384xf32>
    %406 = tpu.matmul %404, %405, %cst_150 {dimension_numbers = #tpu.dot_dimension_numbers<[1], [0], [0], [1], [0, 0, 1, 1], [], []>} : vector<8x128xbf16>, vector<128x384xbf16>, vector<8x384xf32> -> vector<8x384xf32>
    %c0_151 = arith.constant 0 : index
    %c0_152 = arith.constant 0 : index
    %407 = vector.load %arg10[%c0_151, %c0_152] : memref<1x384xf32, #tpu.memory_space<vmem>>, vector<1x384xf32>
    %408 = vector.broadcast %407 : vector<1x384xf32> to vector<8x384xf32>
    %409 = arith.addf %406, %408 : vector<8x384xf32>
    %410 = vector.extract_strided_slice %403 {offsets = [0, 0], sizes = [8, 128], strides = [1, 1]} : vector<8x384xf32> to vector<8x128xf32>
    %411 = vector.extract_strided_slice %409 {offsets = [0, 0], sizes = [8, 128], strides = [1, 1]} : vector<8x384xf32> to vector<8x128xf32>
    %412 = arith.addf %410, %411 : vector<8x128xf32>
    %413 = arith.negf %412 : vector<8x128xf32>
    %414 = math.exp %413 : vector<8x128xf32>
    %cst_153 = arith.constant 1.000000e+00 : f32
    %415 = vector.broadcast %cst_153 : f32 to vector<8x128xf32>
    %416 = arith.addf %415, %414 : vector<8x128xf32>
    %417 = arith.divf %415, %416 : vector<8x128xf32>
    %418 = vector.extract_strided_slice %403 {offsets = [0, 128], sizes = [8, 128], strides = [1, 1]} : vector<8x384xf32> to vector<8x128xf32>
    %419 = vector.extract_strided_slice %409 {offsets = [0, 128], sizes = [8, 128], strides = [1, 1]} : vector<8x384xf32> to vector<8x128xf32>
    %420 = arith.addf %418, %419 : vector<8x128xf32>
    %421 = arith.negf %420 : vector<8x128xf32>
    %422 = math.exp %421 : vector<8x128xf32>
    %cst_154 = arith.constant 1.000000e+00 : f32
    %423 = vector.broadcast %cst_154 : f32 to vector<8x128xf32>
    %424 = arith.addf %423, %422 : vector<8x128xf32>
    %425 = arith.divf %423, %424 : vector<8x128xf32>
    %426 = vector.extract_strided_slice %403 {offsets = [0, 256], sizes = [8, 128], strides = [1, 1]} : vector<8x384xf32> to vector<8x128xf32>
    %427 = vector.extract_strided_slice %409 {offsets = [0, 256], sizes = [8, 128], strides = [1, 1]} : vector<8x384xf32> to vector<8x128xf32>
    %428 = arith.mulf %417, %427 : vector<8x128xf32>
    %429 = arith.addf %426, %428 : vector<8x128xf32>
    %430 = math.tanh %429 : vector<8x128xf32>
    %cst_155 = arith.constant 1.000000e+00 : f32
    %431 = vector.broadcast %cst_155 : f32 to vector<8x128xf32>
    %432 = arith.subf %431, %425 : vector<8x128xf32>
    %433 = arith.mulf %432, %430 : vector<8x128xf32>
    %434 = arith.mulf %425, %392 : vector<8x128xf32>
    %435 = arith.addf %433, %434 : vector<8x128xf32>
    %436 = vector.broadcast %398 : vector<8x1xf32> to vector<8x128xf32>
    %437 = arith.mulf %436, %435 : vector<8x128xf32>
    %438 = arith.index_cast %c7_i32 : i32 to index
    %c0_156 = arith.constant 0 : index
    %c0_157 = arith.constant 0 : index
    %439 = vector.load %arg26[%438, %c0_156, %c0_157] : memref<8x8x128xf32, #tpu.memory_space<vmem>>, vector<1x8x128xf32>
    %440 = vector.shape_cast %439 : vector<1x8x128xf32> to vector<8x128xf32>
    %441 = vector.shape_cast %437 : vector<8x128xf32> to vector<1x8x128xf32>
    tpu.vector_store %arg26[%438, %c0_156, %c0_157], %441 {strides = array<i32>} : memref<8x8x128xf32, #tpu.memory_space<vmem>>, vector<1x8x128xf32>,
    %442 = vector.broadcast %398 : vector<8x1xf32> to vector<8x128xf32>
    %443 = arith.mulf %442, %435 : vector<8x128xf32>
    %cst_158 = arith.constant 1.000000e+00 : f32
    %444 = vector.broadcast %cst_158 : f32 to vector<8x1xf32>
    %445 = arith.subf %444, %398 : vector<8x1xf32>
    %446 = vector.broadcast %445 : vector<8x1xf32> to vector<8x128xf32>
    %447 = arith.mulf %446, %392 : vector<8x128xf32>
    %448 = arith.addf %443, %447 : vector<8x128xf32>
    %c8_i32 = arith.constant 8 : i32
    %c0_159 = arith.constant 0 : index
    %c0_160 = arith.constant 0 : index
    %c0_161 = arith.constant 0 : index
    %449 = vector.load %arg26[%c0_159, %c0_160, %c0_161] : memref<8x8x128xf32, #tpu.memory_space<vmem>>, vector<8x8x128xf32>
    %450 = vector.shape_cast %449 : vector<8x8x128xf32> to vector<64x128xf32>
    %451 = arith.truncf %450 : vector<64x128xf32> to vector<64x128xbf16>
    %c0_162 = arith.constant 0 : index
    %c0_163 = arith.constant 0 : index
    %452 = vector.load %arg11[%c0_162, %c0_163] : memref<128x128xbf16, #tpu.memory_space<vmem>>, vector<128x128xbf16>
    %cst_164 = arith.constant dense<0.000000e+00> : vector<64x128xf32>
    %453 = tpu.matmul %451, %452, %cst_164 {dimension_numbers = #tpu.dot_dimension_numbers<[1], [0], [0], [1], [0, 0, 1, 1], [], []>} : vector<64x128xbf16>, vector<128x128xbf16>, vector<64x128xf32> -> vector<64x128xf32>
    %c0_165 = arith.constant 0 : index
    %c0_166 = arith.constant 0 : index
    %454 = vector.load %arg12[%c0_165, %c0_166] : memref<1x128xf32, #tpu.memory_space<vmem>>, vector<1x128xf32>
    %455 = vector.broadcast %454 : vector<1x128xf32> to vector<64x128xf32>
    %456 = arith.addf %453, %455 : vector<64x128xf32>
    %cst_167 = arith.constant 0.000000e+00 : f32
    %457 = vector.broadcast %cst_167 : f32 to vector<64x128xf32>
    %458 = arith.maximumf %456, %457 : vector<64x128xf32>
    %459 = vector.shape_cast %458 : vector<64x128xf32> to vector<8x8x128xf32>
    %c0_168 = arith.constant 0 : index
    %c0_169 = arith.constant 0 : index
    %c0_170 = arith.constant 0 : index
    %460 = vector.load %arg26[%c0_168, %c0_169, %c0_170] : memref<8x8x128xf32, #tpu.memory_space<vmem>>, vector<8x8x128xf32>
    tpu.vector_store %arg26[%c0_168, %c0_169, %c0_170], %459 {strides = array<i32>} : memref<8x8x128xf32, #tpu.memory_space<vmem>>, vector<8x8x128xf32>,
    %461 = arith.truncf %458 : vector<64x128xf32> to vector<64x128xbf16>
    %c0_171 = arith.constant 0 : index
    %c0_172 = arith.constant 0 : index
    %462 = vector.load %arg13[%c0_171, %c0_172] : memref<128x128xbf16, #tpu.memory_space<vmem>>, vector<128x128xbf16>
    %cst_173 = arith.constant dense<0.000000e+00> : vector<64x128xf32>
    %463 = tpu.matmul %461, %462, %cst_173 {dimension_numbers = #tpu.dot_dimension_numbers<[1], [0], [0], [1], [0, 0, 1, 1], [], []>} : vector<64x128xbf16>, vector<128x128xbf16>, vector<64x128xf32> -> vector<64x128xf32>
    %c0_174 = arith.constant 0 : index
    %c0_175 = arith.constant 0 : index
    %464 = vector.load %arg16[%c0_174, %c0_175] : memref<1x128xf32, #tpu.memory_space<vmem>>, vector<1x128xf32>
    %465 = vector.broadcast %464 : vector<1x128xf32> to vector<64x128xf32>
    %466 = arith.addf %463, %465 : vector<64x128xf32>
    %467 = vector.shape_cast %466 : vector<64x128xf32> to vector<8x8x128xf32>
    %c0_176 = arith.constant 0 : index
    %c0_177 = arith.constant 0 : index
    %c0_178 = arith.constant 0 : index
    %468 = vector.load %arg27[%c0_176, %c0_177, %c0_178] : memref<8x8x128xf32, #tpu.memory_space<vmem>>, vector<8x8x128xf32>
    tpu.vector_store %arg27[%c0_176, %c0_177, %c0_178], %467 {strides = array<i32>} : memref<8x8x128xf32, #tpu.memory_space<vmem>>, vector<8x8x128xf32>,
    %cst_179 = arith.constant 0.000000e+00 : f32
    %469 = vector.broadcast %cst_179 : f32 to vector<8x8xf32>
    %c0_180 = arith.constant 0 : index
    %c0_181 = arith.constant 0 : index
    %470 = vector.load %arg28[%c0_180, %c0_181] : memref<8x8xf32, #tpu.memory_space<vmem>>, vector<8x8xf32>
    tpu.vector_store %arg28[%c0_180, %c0_181], %469 {strides = array<i32>} : memref<8x8xf32, #tpu.memory_space<vmem>>, vector<8x8xf32>,
    %cst_182 = arith.constant 0.000000e+00 : f32
    %471 = vector.broadcast %cst_182 : f32 to vector<8x128xf32>
    %c0_183 = arith.constant 0 : index
    %c0_184 = arith.constant 0 : index
    %472 = vector.load %arg29[%c0_183, %c0_184] : memref<8x128xf32, #tpu.memory_space<vmem>>, vector<8x128xf32>
    tpu.vector_store %arg29[%c0_183, %c0_184], %471 {strides = array<i32>} : memref<8x128xf32, #tpu.memory_space<vmem>>, vector<8x128xf32>,
    %cst_185 = arith.constant 0.000000e+00 : f32
    %473 = vector.broadcast %cst_185 : f32 to vector<8x256xf32>
    %c5 = arith.constant 5 : index
    %c0_186 = arith.constant 0 : index
    %c0_187 = arith.constant 0 : index
    %474 = vector.load %arg25[%c5, %c0_186, %c0_187] : memref<6x8x256xf32, #tpu.memory_space<vmem>>, vector<1x8x256xf32>
    %475 = vector.shape_cast %474 : vector<1x8x256xf32> to vector<8x256xf32>
    %476 = vector.shape_cast %473 : vector<8x256xf32> to vector<1x8x256xf32>
    tpu.vector_store %arg25[%c5, %c0_186, %c0_187], %476 {strides = array<i32>} : memref<6x8x256xf32, #tpu.memory_space<vmem>>, vector<1x8x256xf32>,
    %c0_i32_188 = arith.constant 0 : i32
    %477 = arith.index_cast %c0_i32_188 : i32 to index
    %478 = memref.load %arg1[%477] : memref<6xi32, #tpu.memory_space<smem>>
    %c0_i32_189 = arith.constant 0 : i32
    %479 = arith.cmpi sgt, %478, %c0_i32_189 : i32
    %480 = arith.extui %479 : i1 to i32
    %481 = arith.sitofp %480 : i32 to f32
    %482 = arith.index_cast %c0_i32_188 : i32 to index
    %c0_190 = arith.constant 0 : index
    %c0_191 = arith.constant 0 : index
    %483 = vector.load %arg5[%482, %c0_190, %c0_191] : memref<5x8x128xf32, #tpu.memory_space<vmem>>, vector<1x8x128xf32>
    %484 = vector.shape_cast %483 : vector<1x8x128xf32> to vector<8x128xf32>
    %485 = vector.broadcast %481 : f32 to vector<8x128xf32>
    %486 = arith.mulf %485, %484 : vector<8x128xf32>
    %cst_192 = arith.constant 1.000000e+00 : f32
    %487 = arith.subf %cst_192, %481 : f32
    %c0_193 = arith.constant 0 : index
    %c0_194 = arith.constant 0 : index
    %488 = vector.load %arg29[%c0_193, %c0_194] : memref<8x128xf32, #tpu.memory_space<vmem>>, vector<8x128xf32>
    %489 = vector.broadcast %487 : f32 to vector<8x128xf32>
    %490 = arith.mulf %489, %488 : vector<8x128xf32>
    %491 = arith.addf %486, %490 : vector<8x128xf32>
    %c0_195 = arith.constant 0 : index
    %c0_196 = arith.constant 0 : index
    %492 = vector.load %arg28[%c0_195, %c0_196] : memref<8x8xf32, #tpu.memory_space<vmem>>, vector<8x8xf32>
    %493 = arith.truncf %491 : vector<8x128xf32> to vector<8x128xbf16>
    %c0_197 = arith.constant 0 : index
    %c0_198 = arith.constant 0 : index
    %494 = vector.load %arg14[%c0_197, %c0_198] : memref<128x128xbf16, #tpu.memory_space<vmem>>, vector<128x128xbf16>
    %cst_199 = arith.constant dense<0.000000e+00> : vector<8x128xf32>
    %495 = tpu.matmul %493, %494, %cst_199 {dimension_numbers = #tpu.dot_dimension_numbers<[1], [0], [0], [1], [0, 0, 1, 1], [], []>} : vector<8x128xbf16>, vector<128x128xbf16>, vector<8x128xf32> -> vector<8x128xf32>
    %496 = vector.shape_cast %492 : vector<8x8xf32> to vector<8x8x1xf32>
    %c0_200 = arith.constant 0 : index
    %c0_201 = arith.constant 0 : index
    %497 = vector.load %arg15[%c0_200, %c0_201] : memref<1x128xf32, #tpu.memory_space<vmem>>, vector<1x128xf32>
    %498 = vector.shape_cast %497 : vector<1x128xf32> to vector<1x1x128xf32>
    %499 = vector.broadcast %496 : vector<8x8x1xf32> to vector<8x8x128xf32>
    %500 = vector.broadcast %498 : vector<1x1x128xf32> to vector<8x8x128xf32>
    %501 = arith.mulf %499, %500 : vector<8x8x128xf32>
    %c0_202 = arith.constant 0 : index
    %c0_203 = arith.constant 0 : index
    %c0_204 = arith.constant 0 : index
    %502 = vector.load %arg27[%c0_202, %c0_203, %c0_204] : memref<8x8x128xf32, #tpu.memory_space<vmem>>, vector<8x8x128xf32>
    %503 = vector.shape_cast %495 : vector<8x128xf32> to vector<1x8x128xf32>
    %504 = vector.broadcast %503 : vector<1x8x128xf32> to vector<8x8x128xf32>
    %505 = arith.addf %502, %504 : vector<8x8x128xf32>
    %506 = arith.addf %505, %501 : vector<8x8x128xf32>
    %507 = math.tanh %506 : vector<8x8x128xf32>
    %c0_205 = arith.constant 0 : index
    %c0_206 = arith.constant 0 : index
    %508 = vector.load %arg17[%c0_205, %c0_206] : memref<1x128xf32, #tpu.memory_space<vmem>>, vector<1x128xf32>
    %509 = vector.shape_cast %508 : vector<1x128xf32> to vector<1x1x128xf32>
    %510 = vector.broadcast %509 : vector<1x1x128xf32> to vector<8x8x128xf32>
    %511 = arith.mulf %507, %510 : vector<8x8x128xf32>
    %cst_207 = arith.constant dense<0.000000e+00> : vector<8x8xf32>
    %512 = vector.multi_reduction <add>, %511, %cst_207 [2] : vector<8x8x128xf32> to vector<8x8xf32>
    %c0_208 = arith.constant 0 : index
    %c0_209 = arith.constant 0 : index
    %513 = vector.load %arg18[%c0_208, %c0_209] : memref<1x1xf32, #tpu.memory_space<vmem>>, vector<1x1xf32>
    %514 = vector.broadcast %513 : vector<1x1xf32> to vector<8x8xf32>
    %515 = arith.addf %512, %514 : vector<8x8xf32>
    %c0_210 = arith.constant 0 : index
    %c0_211 = arith.constant 0 : index
    %516 = vector.load %arg4[%c0_210, %c0_211] : memref<8x8xf32, #tpu.memory_space<vmem>>, vector<8x8xf32>
    %cst_212 = arith.constant 5.000000e-01 : f32
    %517 = vector.broadcast %cst_212 : f32 to vector<8x8xf32>
    %518 = arith.cmpf ogt, %516, %517 : vector<8x8xf32>
    %cst_213 = arith.constant -1.000000e+30 : f32
    %519 = vector.broadcast %cst_213 : f32 to vector<8x8xf32>
    %520 = arith.select %518, %515, %519 : vector<8x8xi1>, vector<8x8xf32>
    %cst_214 = arith.constant dense<0xFF800000> : vector<8xf32>
    %521 = vector.multi_reduction <maximumf>, %520, %cst_214 [0] : vector<8x8xf32> to vector<8xf32>
    %522 = vector.shape_cast %521 : vector<8xf32> to vector<1x8xf32>
    %523 = vector.broadcast %522 : vector<1x8xf32> to vector<8x8xf32>
    %524 = arith.subf %520, %523 : vector<8x8xf32>
    %525 = math.exp %524 : vector<8x8xf32>
    %cst_215 = arith.constant dense<0.000000e+00> : vector<8xf32>
    %526 = vector.multi_reduction <add>, %525, %cst_215 [0] : vector<8x8xf32> to vector<8xf32>
    %527 = vector.shape_cast %526 : vector<8xf32> to vector<1x8xf32>
    %528 = vector.broadcast %527 : vector<1x8xf32> to vector<8x8xf32>
    %529 = arith.divf %525, %528 : vector<8x8xf32>
    %530 = arith.addf %492, %529 : vector<8x8xf32>
    %c0_216 = arith.constant 0 : index
    %c0_217 = arith.constant 0 : index
    %531 = vector.load %arg28[%c0_216, %c0_217] : memref<8x8xf32, #tpu.memory_space<vmem>>, vector<8x8xf32>
    tpu.vector_store %arg28[%c0_216, %c0_217], %530 {strides = array<i32>} : memref<8x8xf32, #tpu.memory_space<vmem>>, vector<8x8xf32>,
    %532 = vector.shape_cast %529 : vector<8x8xf32> to vector<8x8x1xf32>
    %c0_218 = arith.constant 0 : index
    %c0_219 = arith.constant 0 : index
    %c0_220 = arith.constant 0 : index
    %533 = vector.load %arg26[%c0_218, %c0_219, %c0_220] : memref<8x8x128xf32, #tpu.memory_space<vmem>>, vector<8x8x128xf32>
    %534 = vector.broadcast %532 : vector<8x8x1xf32> to vector<8x8x128xf32>
    %535 = arith.mulf %534, %533 : vector<8x8x128xf32>
    %cst_221 = arith.constant dense<0.000000e+00> : vector<8x128xf32>
    %536 = vector.multi_reduction <add>, %535, %cst_221 [0] : vector<8x8x128xf32> to vector<8x128xf32>
    %537 = tpu.concatenate %491, %536 in 1 : vector<8x128xf32>, vector<8x128xf32> -> vector<8x256xf32>
    %538 = arith.truncf %537 : vector<8x256xf32> to vector<8x256xbf16>
    %c0_222 = arith.constant 0 : index
    %c0_223 = arith.constant 0 : index
    %539 = vector.load %arg19[%c0_222, %c0_223] : memref<256x384xbf16, #tpu.memory_space<vmem>>, vector<256x384xbf16>
    %cst_224 = arith.constant dense<0.000000e+00> : vector<8x384xf32>
    %540 = tpu.matmul %538, %539, %cst_224 {dimension_numbers = #tpu.dot_dimension_numbers<[1], [0], [0], [1], [0, 0, 1, 1], [], []>} : vector<8x256xbf16>, vector<256x384xbf16>, vector<8x384xf32> -> vector<8x384xf32>
    %c0_225 = arith.constant 0 : index
    %c0_226 = arith.constant 0 : index
    %541 = vector.load %arg20[%c0_225, %c0_226] : memref<1x384xf32, #tpu.memory_space<vmem>>, vector<1x384xf32>
    %542 = vector.broadcast %541 : vector<1x384xf32> to vector<8x384xf32>
    %543 = arith.addf %540, %542 : vector<8x384xf32>
    %544 = arith.truncf %448 : vector<8x128xf32> to vector<8x128xbf16>
    %c0_227 = arith.constant 0 : index
    %c0_228 = arith.constant 0 : index
    %545 = vector.load %arg21[%c0_227, %c0_228] : memref<128x384xbf16, #tpu.memory_space<vmem>>, vector<128x384xbf16>
    %cst_229 = arith.constant dense<0.000000e+00> : vector<8x384xf32>
    %546 = tpu.matmul %544, %545, %cst_229 {dimension_numbers = #tpu.dot_dimension_numbers<[1], [0], [0], [1], [0, 0, 1, 1], [], []>} : vector<8x128xbf16>, vector<128x384xbf16>, vector<8x384xf32> -> vector<8x384xf32>
    %c0_230 = arith.constant 0 : index
    %c0_231 = arith.constant 0 : index
    %547 = vector.load %arg22[%c0_230, %c0_231] : memref<1x384xf32, #tpu.memory_space<vmem>>, vector<1x384xf32>
    %548 = vector.broadcast %547 : vector<1x384xf32> to vector<8x384xf32>
    %549 = arith.addf %546, %548 : vector<8x384xf32>
    %550 = vector.extract_strided_slice %543 {offsets = [0, 0], sizes = [8, 128], strides = [1, 1]} : vector<8x384xf32> to vector<8x128xf32>
    %551 = vector.extract_strided_slice %549 {offsets = [0, 0], sizes = [8, 128], strides = [1, 1]} : vector<8x384xf32> to vector<8x128xf32>
    %552 = arith.addf %550, %551 : vector<8x128xf32>
    %553 = arith.negf %552 : vector<8x128xf32>
    %554 = math.exp %553 : vector<8x128xf32>
    %cst_232 = arith.constant 1.000000e+00 : f32
    %555 = vector.broadcast %cst_232 : f32 to vector<8x128xf32>
    %556 = arith.addf %555, %554 : vector<8x128xf32>
    %557 = arith.divf %555, %556 : vector<8x128xf32>
    %558 = vector.extract_strided_slice %543 {offsets = [0, 128], sizes = [8, 128], strides = [1, 1]} : vector<8x384xf32> to vector<8x128xf32>
    %559 = vector.extract_strided_slice %549 {offsets = [0, 128], sizes = [8, 128], strides = [1, 1]} : vector<8x384xf32> to vector<8x128xf32>
    %560 = arith.addf %558, %559 : vector<8x128xf32>
    %561 = arith.negf %560 : vector<8x128xf32>
    %562 = math.exp %561 : vector<8x128xf32>
    %cst_233 = arith.constant 1.000000e+00 : f32
    %563 = vector.broadcast %cst_233 : f32 to vector<8x128xf32>
    %564 = arith.addf %563, %562 : vector<8x128xf32>
    %565 = arith.divf %563, %564 : vector<8x128xf32>
    %566 = vector.extract_strided_slice %543 {offsets = [0, 256], sizes = [8, 128], strides = [1, 1]} : vector<8x384xf32> to vector<8x128xf32>
    %567 = vector.extract_strided_slice %549 {offsets = [0, 256], sizes = [8, 128], strides = [1, 1]} : vector<8x384xf32> to vector<8x128xf32>
    %568 = arith.mulf %557, %567 : vector<8x128xf32>
    %569 = arith.addf %566, %568 : vector<8x128xf32>
    %570 = math.tanh %569 : vector<8x128xf32>
    %cst_234 = arith.constant 1.000000e+00 : f32
    %571 = vector.broadcast %cst_234 : f32 to vector<8x128xf32>
    %572 = arith.subf %571, %565 : vector<8x128xf32>
    %573 = arith.mulf %572, %570 : vector<8x128xf32>
    %574 = arith.mulf %565, %448 : vector<8x128xf32>
    %575 = arith.addf %573, %574 : vector<8x128xf32>
    %576 = tpu.concatenate %575, %536, %491 in 1 : vector<8x128xf32>, vector<8x128xf32>, vector<8x128xf32> -> vector<8x384xf32>
    %577 = arith.truncf %576 : vector<8x384xf32> to vector<8x384xbf16>
    %c0_235 = arith.constant 0 : index
    %c0_236 = arith.constant 0 : index
    %578 = vector.load %arg23[%c0_235, %c0_236] : memref<384x256xbf16, #tpu.memory_space<vmem>>, vector<384x256xbf16>
    %cst_237 = arith.constant dense<0.000000e+00> : vector<8x256xf32>
    %579 = tpu.matmul %577, %578, %cst_237 {dimension_numbers = #tpu.dot_dimension_numbers<[1], [0], [0], [1], [0, 0, 1, 1], [], []>} : vector<8x384xbf16>, vector<384x256xbf16>, vector<8x256xf32> -> vector<8x256xf32>
    %c0_238 = arith.constant 0 : index
    %c0_239 = arith.constant 0 : index
    %580 = vector.load %arg24[%c0_238, %c0_239] : memref<1x256xf32, #tpu.memory_space<vmem>>, vector<1x256xf32>
    %581 = vector.broadcast %580 : vector<1x256xf32> to vector<8x256xf32>
    %582 = arith.addf %579, %581 : vector<8x256xf32>
    %583 = arith.index_cast %c0_i32_188 : i32 to index
    %c0_240 = arith.constant 0 : index
    %c0_241 = arith.constant 0 : index
    %584 = vector.load %arg25[%583, %c0_240, %c0_241] : memref<6x8x256xf32, #tpu.memory_space<vmem>>, vector<1x8x256xf32>
    %585 = vector.shape_cast %584 : vector<1x8x256xf32> to vector<8x256xf32>
    %586 = vector.shape_cast %582 : vector<8x256xf32> to vector<1x8x256xf32>
    tpu.vector_store %arg25[%583, %c0_240, %c0_241], %586 {strides = array<i32>} : memref<6x8x256xf32, #tpu.memory_space<vmem>>, vector<1x8x256xf32>,
    %c1_i32_242 = arith.constant 1 : i32
    %587 = arith.addi %c0_i32_188, %c1_i32_242 : i32
    %588 = arith.index_cast %587 : i32 to index
    %589 = memref.load %arg1[%588] : memref<6xi32, #tpu.memory_space<smem>>
    %c0_i32_243 = arith.constant 0 : i32
    %590 = arith.cmpi eq, %589, %c0_i32_243 : i32
    %591 = arith.extui %590 : i1 to i32
    %c0_i32_244 = arith.constant 0 : i32
    %592 = arith.cmpi ne, %591, %c0_i32_244 : i32
    scf.if %592 {
      %1057 = tpu.iota {dimensions = array<i32: 1>} : vector<8x256xi32>
      %cst_474 = arith.constant dense<0xFF800000> : vector<8xf32>
      %1058 = vector.multi_reduction <maximumf>, %582, %cst_474 [1] : vector<8x256xf32> to vector<8xf32>
      %1059 = vector.shape_cast %1058 : vector<8xf32> to vector<8x1xf32>
      %1060 = vector.broadcast %1059 : vector<8x1xf32> to vector<8x256xf32>
      %1061 = arith.cmpf oeq, %582, %1060 : vector<8x256xf32>
      %c256_i32 = arith.constant 256 : i32
      %1062 = vector.broadcast %c256_i32 : i32 to vector<8x256xi32>
      %1063 = arith.select %1061, %1057, %1062 : vector<8x256xi1>, vector<8x256xi32>
      %cst_475 = arith.constant dense<2147483647> : vector<8xi32>
      %1064 = vector.multi_reduction <minsi>, %1063, %cst_475 [1] : vector<8x256xi32> to vector<8xi32>
      %1065 = vector.shape_cast %1064 : vector<8xi32> to vector<8x1xi32>
      %1066 = vector.broadcast %1065 : vector<8x1xi32> to vector<8x256xi32>
      %1067 = arith.cmpi eq, %1057, %1066 : vector<8x256xi32>
      %1068 = arith.extui %1067 : vector<8x256xi1> to vector<8x256xi32>
      %1069 = arith.sitofp %1068 : vector<8x256xi32> to vector<8x256xf32>
      %1070 = arith.truncf %1069 : vector<8x256xf32> to vector<8x256xbf16>
      %c0_476 = arith.constant 0 : index
      %c0_477 = arith.constant 0 : index
      %1071 = vector.load %arg6[%c0_476, %c0_477] : memref<256x128xbf16, #tpu.memory_space<vmem>>, vector<256x128xbf16>
      %cst_478 = arith.constant dense<0.000000e+00> : vector<8x128xf32>
      %1072 = tpu.matmul %1070, %1071, %cst_478 {dimension_numbers = #tpu.dot_dimension_numbers<[1], [0], [0], [1], [0, 0, 1, 1], [], []>} : vector<8x256xbf16>, vector<256x128xbf16>, vector<8x128xf32> -> vector<8x128xf32>
      %c0_479 = arith.constant 0 : index
      %c0_480 = arith.constant 0 : index
      %1073 = vector.load %arg29[%c0_479, %c0_480] : memref<8x128xf32, #tpu.memory_space<vmem>>, vector<8x128xf32>
      tpu.vector_store %arg29[%c0_479, %c0_480], %1072 {strides = array<i32>} : memref<8x128xf32, #tpu.memory_space<vmem>>, vector<8x128xf32>,
    } else {
    }
    %c1_i32_245 = arith.constant 1 : i32
    %593 = arith.index_cast %c1_i32_245 : i32 to index
    %594 = memref.load %arg1[%593] : memref<6xi32, #tpu.memory_space<smem>>
    %c0_i32_246 = arith.constant 0 : i32
    %595 = arith.cmpi sgt, %594, %c0_i32_246 : i32
    %596 = arith.extui %595 : i1 to i32
    %597 = arith.sitofp %596 : i32 to f32
    %598 = arith.index_cast %c1_i32_245 : i32 to index
    %c0_247 = arith.constant 0 : index
    %c0_248 = arith.constant 0 : index
    %599 = vector.load %arg5[%598, %c0_247, %c0_248] : memref<5x8x128xf32, #tpu.memory_space<vmem>>, vector<1x8x128xf32>
    %600 = vector.shape_cast %599 : vector<1x8x128xf32> to vector<8x128xf32>
    %601 = vector.broadcast %597 : f32 to vector<8x128xf32>
    %602 = arith.mulf %601, %600 : vector<8x128xf32>
    %cst_249 = arith.constant 1.000000e+00 : f32
    %603 = arith.subf %cst_249, %597 : f32
    %c0_250 = arith.constant 0 : index
    %c0_251 = arith.constant 0 : index
    %604 = vector.load %arg29[%c0_250, %c0_251] : memref<8x128xf32, #tpu.memory_space<vmem>>, vector<8x128xf32>
    %605 = vector.broadcast %603 : f32 to vector<8x128xf32>
    %606 = arith.mulf %605, %604 : vector<8x128xf32>
    %607 = arith.addf %602, %606 : vector<8x128xf32>
    %c0_252 = arith.constant 0 : index
    %c0_253 = arith.constant 0 : index
    %608 = vector.load %arg28[%c0_252, %c0_253] : memref<8x8xf32, #tpu.memory_space<vmem>>, vector<8x8xf32>
    %609 = arith.truncf %607 : vector<8x128xf32> to vector<8x128xbf16>
    %c0_254 = arith.constant 0 : index
    %c0_255 = arith.constant 0 : index
    %610 = vector.load %arg14[%c0_254, %c0_255] : memref<128x128xbf16, #tpu.memory_space<vmem>>, vector<128x128xbf16>
    %cst_256 = arith.constant dense<0.000000e+00> : vector<8x128xf32>
    %611 = tpu.matmul %609, %610, %cst_256 {dimension_numbers = #tpu.dot_dimension_numbers<[1], [0], [0], [1], [0, 0, 1, 1], [], []>} : vector<8x128xbf16>, vector<128x128xbf16>, vector<8x128xf32> -> vector<8x128xf32>
    %612 = vector.shape_cast %608 : vector<8x8xf32> to vector<8x8x1xf32>
    %c0_257 = arith.constant 0 : index
    %c0_258 = arith.constant 0 : index
    %613 = vector.load %arg15[%c0_257, %c0_258] : memref<1x128xf32, #tpu.memory_space<vmem>>, vector<1x128xf32>
    %614 = vector.shape_cast %613 : vector<1x128xf32> to vector<1x1x128xf32>
    %615 = vector.broadcast %612 : vector<8x8x1xf32> to vector<8x8x128xf32>
    %616 = vector.broadcast %614 : vector<1x1x128xf32> to vector<8x8x128xf32>
    %617 = arith.mulf %615, %616 : vector<8x8x128xf32>
    %c0_259 = arith.constant 0 : index
    %c0_260 = arith.constant 0 : index
    %c0_261 = arith.constant 0 : index
    %618 = vector.load %arg27[%c0_259, %c0_260, %c0_261] : memref<8x8x128xf32, #tpu.memory_space<vmem>>, vector<8x8x128xf32>
    %619 = vector.shape_cast %611 : vector<8x128xf32> to vector<1x8x128xf32>
    %620 = vector.broadcast %619 : vector<1x8x128xf32> to vector<8x8x128xf32>
    %621 = arith.addf %618, %620 : vector<8x8x128xf32>
    %622 = arith.addf %621, %617 : vector<8x8x128xf32>
    %623 = math.tanh %622 : vector<8x8x128xf32>
    %c0_262 = arith.constant 0 : index
    %c0_263 = arith.constant 0 : index
    %624 = vector.load %arg17[%c0_262, %c0_263] : memref<1x128xf32, #tpu.memory_space<vmem>>, vector<1x128xf32>
    %625 = vector.shape_cast %624 : vector<1x128xf32> to vector<1x1x128xf32>
    %626 = vector.broadcast %625 : vector<1x1x128xf32> to vector<8x8x128xf32>
    %627 = arith.mulf %623, %626 : vector<8x8x128xf32>
    %cst_264 = arith.constant dense<0.000000e+00> : vector<8x8xf32>
    %628 = vector.multi_reduction <add>, %627, %cst_264 [2] : vector<8x8x128xf32> to vector<8x8xf32>
    %c0_265 = arith.constant 0 : index
    %c0_266 = arith.constant 0 : index
    %629 = vector.load %arg18[%c0_265, %c0_266] : memref<1x1xf32, #tpu.memory_space<vmem>>, vector<1x1xf32>
    %630 = vector.broadcast %629 : vector<1x1xf32> to vector<8x8xf32>
    %631 = arith.addf %628, %630 : vector<8x8xf32>
    %c0_267 = arith.constant 0 : index
    %c0_268 = arith.constant 0 : index
    %632 = vector.load %arg4[%c0_267, %c0_268] : memref<8x8xf32, #tpu.memory_space<vmem>>, vector<8x8xf32>
    %cst_269 = arith.constant 5.000000e-01 : f32
    %633 = vector.broadcast %cst_269 : f32 to vector<8x8xf32>
    %634 = arith.cmpf ogt, %632, %633 : vector<8x8xf32>
    %cst_270 = arith.constant -1.000000e+30 : f32
    %635 = vector.broadcast %cst_270 : f32 to vector<8x8xf32>
    %636 = arith.select %634, %631, %635 : vector<8x8xi1>, vector<8x8xf32>
    %cst_271 = arith.constant dense<0xFF800000> : vector<8xf32>
    %637 = vector.multi_reduction <maximumf>, %636, %cst_271 [0] : vector<8x8xf32> to vector<8xf32>
    %638 = vector.shape_cast %637 : vector<8xf32> to vector<1x8xf32>
    %639 = vector.broadcast %638 : vector<1x8xf32> to vector<8x8xf32>
    %640 = arith.subf %636, %639 : vector<8x8xf32>
    %641 = math.exp %640 : vector<8x8xf32>
    %cst_272 = arith.constant dense<0.000000e+00> : vector<8xf32>
    %642 = vector.multi_reduction <add>, %641, %cst_272 [0] : vector<8x8xf32> to vector<8xf32>
    %643 = vector.shape_cast %642 : vector<8xf32> to vector<1x8xf32>
    %644 = vector.broadcast %643 : vector<1x8xf32> to vector<8x8xf32>
    %645 = arith.divf %641, %644 : vector<8x8xf32>
    %646 = arith.addf %608, %645 : vector<8x8xf32>
    %c0_273 = arith.constant 0 : index
    %c0_274 = arith.constant 0 : index
    %647 = vector.load %arg28[%c0_273, %c0_274] : memref<8x8xf32, #tpu.memory_space<vmem>>, vector<8x8xf32>
    tpu.vector_store %arg28[%c0_273, %c0_274], %646 {strides = array<i32>} : memref<8x8xf32, #tpu.memory_space<vmem>>, vector<8x8xf32>,
    %648 = vector.shape_cast %645 : vector<8x8xf32> to vector<8x8x1xf32>
    %c0_275 = arith.constant 0 : index
    %c0_276 = arith.constant 0 : index
    %c0_277 = arith.constant 0 : index
    %649 = vector.load %arg26[%c0_275, %c0_276, %c0_277] : memref<8x8x128xf32, #tpu.memory_space<vmem>>, vector<8x8x128xf32>
    %650 = vector.broadcast %648 : vector<8x8x1xf32> to vector<8x8x128xf32>
    %651 = arith.mulf %650, %649 : vector<8x8x128xf32>
    %cst_278 = arith.constant dense<0.000000e+00> : vector<8x128xf32>
    %652 = vector.multi_reduction <add>, %651, %cst_278 [0] : vector<8x8x128xf32> to vector<8x128xf32>
    %653 = tpu.concatenate %607, %652 in 1 : vector<8x128xf32>, vector<8x128xf32> -> vector<8x256xf32>
    %654 = arith.truncf %653 : vector<8x256xf32> to vector<8x256xbf16>
    %c0_279 = arith.constant 0 : index
    %c0_280 = arith.constant 0 : index
    %655 = vector.load %arg19[%c0_279, %c0_280] : memref<256x384xbf16, #tpu.memory_space<vmem>>, vector<256x384xbf16>
    %cst_281 = arith.constant dense<0.000000e+00> : vector<8x384xf32>
    %656 = tpu.matmul %654, %655, %cst_281 {dimension_numbers = #tpu.dot_dimension_numbers<[1], [0], [0], [1], [0, 0, 1, 1], [], []>} : vector<8x256xbf16>, vector<256x384xbf16>, vector<8x384xf32> -> vector<8x384xf32>
    %c0_282 = arith.constant 0 : index
    %c0_283 = arith.constant 0 : index
    %657 = vector.load %arg20[%c0_282, %c0_283] : memref<1x384xf32, #tpu.memory_space<vmem>>, vector<1x384xf32>
    %658 = vector.broadcast %657 : vector<1x384xf32> to vector<8x384xf32>
    %659 = arith.addf %656, %658 : vector<8x384xf32>
    %660 = arith.truncf %575 : vector<8x128xf32> to vector<8x128xbf16>
    %c0_284 = arith.constant 0 : index
    %c0_285 = arith.constant 0 : index
    %661 = vector.load %arg21[%c0_284, %c0_285] : memref<128x384xbf16, #tpu.memory_space<vmem>>, vector<128x384xbf16>
    %cst_286 = arith.constant dense<0.000000e+00> : vector<8x384xf32>
    %662 = tpu.matmul %660, %661, %cst_286 {dimension_numbers = #tpu.dot_dimension_numbers<[1], [0], [0], [1], [0, 0, 1, 1], [], []>} : vector<8x128xbf16>, vector<128x384xbf16>, vector<8x384xf32> -> vector<8x384xf32>
    %c0_287 = arith.constant 0 : index
    %c0_288 = arith.constant 0 : index
    %663 = vector.load %arg22[%c0_287, %c0_288] : memref<1x384xf32, #tpu.memory_space<vmem>>, vector<1x384xf32>
    %664 = vector.broadcast %663 : vector<1x384xf32> to vector<8x384xf32>
    %665 = arith.addf %662, %664 : vector<8x384xf32>
    %666 = vector.extract_strided_slice %659 {offsets = [0, 0], sizes = [8, 128], strides = [1, 1]} : vector<8x384xf32> to vector<8x128xf32>
    %667 = vector.extract_strided_slice %665 {offsets = [0, 0], sizes = [8, 128], strides = [1, 1]} : vector<8x384xf32> to vector<8x128xf32>
    %668 = arith.addf %666, %667 : vector<8x128xf32>
    %669 = arith.negf %668 : vector<8x128xf32>
    %670 = math.exp %669 : vector<8x128xf32>
    %cst_289 = arith.constant 1.000000e+00 : f32
    %671 = vector.broadcast %cst_289 : f32 to vector<8x128xf32>
    %672 = arith.addf %671, %670 : vector<8x128xf32>
    %673 = arith.divf %671, %672 : vector<8x128xf32>
    %674 = vector.extract_strided_slice %659 {offsets = [0, 128], sizes = [8, 128], strides = [1, 1]} : vector<8x384xf32> to vector<8x128xf32>
    %675 = vector.extract_strided_slice %665 {offsets = [0, 128], sizes = [8, 128], strides = [1, 1]} : vector<8x384xf32> to vector<8x128xf32>
    %676 = arith.addf %674, %675 : vector<8x128xf32>
    %677 = arith.negf %676 : vector<8x128xf32>
    %678 = math.exp %677 : vector<8x128xf32>
    %cst_290 = arith.constant 1.000000e+00 : f32
    %679 = vector.broadcast %cst_290 : f32 to vector<8x128xf32>
    %680 = arith.addf %679, %678 : vector<8x128xf32>
    %681 = arith.divf %679, %680 : vector<8x128xf32>
    %682 = vector.extract_strided_slice %659 {offsets = [0, 256], sizes = [8, 128], strides = [1, 1]} : vector<8x384xf32> to vector<8x128xf32>
    %683 = vector.extract_strided_slice %665 {offsets = [0, 256], sizes = [8, 128], strides = [1, 1]} : vector<8x384xf32> to vector<8x128xf32>
    %684 = arith.mulf %673, %683 : vector<8x128xf32>
    %685 = arith.addf %682, %684 : vector<8x128xf32>
    %686 = math.tanh %685 : vector<8x128xf32>
    %cst_291 = arith.constant 1.000000e+00 : f32
    %687 = vector.broadcast %cst_291 : f32 to vector<8x128xf32>
    %688 = arith.subf %687, %681 : vector<8x128xf32>
    %689 = arith.mulf %688, %686 : vector<8x128xf32>
    %690 = arith.mulf %681, %575 : vector<8x128xf32>
    %691 = arith.addf %689, %690 : vector<8x128xf32>
    %692 = tpu.concatenate %691, %652, %607 in 1 : vector<8x128xf32>, vector<8x128xf32>, vector<8x128xf32> -> vector<8x384xf32>
    %693 = arith.truncf %692 : vector<8x384xf32> to vector<8x384xbf16>
    %c0_292 = arith.constant 0 : index
    %c0_293 = arith.constant 0 : index
    %694 = vector.load %arg23[%c0_292, %c0_293] : memref<384x256xbf16, #tpu.memory_space<vmem>>, vector<384x256xbf16>
    %cst_294 = arith.constant dense<0.000000e+00> : vector<8x256xf32>
    %695 = tpu.matmul %693, %694, %cst_294 {dimension_numbers = #tpu.dot_dimension_numbers<[1], [0], [0], [1], [0, 0, 1, 1], [], []>} : vector<8x384xbf16>, vector<384x256xbf16>, vector<8x256xf32> -> vector<8x256xf32>
    %c0_295 = arith.constant 0 : index
    %c0_296 = arith.constant 0 : index
    %696 = vector.load %arg24[%c0_295, %c0_296] : memref<1x256xf32, #tpu.memory_space<vmem>>, vector<1x256xf32>
    %697 = vector.broadcast %696 : vector<1x256xf32> to vector<8x256xf32>
    %698 = arith.addf %695, %697 : vector<8x256xf32>
    %699 = arith.index_cast %c1_i32_245 : i32 to index
    %c0_297 = arith.constant 0 : index
    %c0_298 = arith.constant 0 : index
    %700 = vector.load %arg25[%699, %c0_297, %c0_298] : memref<6x8x256xf32, #tpu.memory_space<vmem>>, vector<1x8x256xf32>
    %701 = vector.shape_cast %700 : vector<1x8x256xf32> to vector<8x256xf32>
    %702 = vector.shape_cast %698 : vector<8x256xf32> to vector<1x8x256xf32>
    tpu.vector_store %arg25[%699, %c0_297, %c0_298], %702 {strides = array<i32>} : memref<6x8x256xf32, #tpu.memory_space<vmem>>, vector<1x8x256xf32>,
    %c1_i32_299 = arith.constant 1 : i32
    %703 = arith.addi %c1_i32_245, %c1_i32_299 : i32
    %704 = arith.index_cast %703 : i32 to index
    %705 = memref.load %arg1[%704] : memref<6xi32, #tpu.memory_space<smem>>
    %c0_i32_300 = arith.constant 0 : i32
    %706 = arith.cmpi eq, %705, %c0_i32_300 : i32
    %707 = arith.extui %706 : i1 to i32
    %c0_i32_301 = arith.constant 0 : i32
    %708 = arith.cmpi ne, %707, %c0_i32_301 : i32
    scf.if %708 {
      %1057 = tpu.iota {dimensions = array<i32: 1>} : vector<8x256xi32>
      %cst_474 = arith.constant dense<0xFF800000> : vector<8xf32>
      %1058 = vector.multi_reduction <maximumf>, %698, %cst_474 [1] : vector<8x256xf32> to vector<8xf32>
      %1059 = vector.shape_cast %1058 : vector<8xf32> to vector<8x1xf32>
      %1060 = vector.broadcast %1059 : vector<8x1xf32> to vector<8x256xf32>
      %1061 = arith.cmpf oeq, %698, %1060 : vector<8x256xf32>
      %c256_i32 = arith.constant 256 : i32
      %1062 = vector.broadcast %c256_i32 : i32 to vector<8x256xi32>
      %1063 = arith.select %1061, %1057, %1062 : vector<8x256xi1>, vector<8x256xi32>
      %cst_475 = arith.constant dense<2147483647> : vector<8xi32>
      %1064 = vector.multi_reduction <minsi>, %1063, %cst_475 [1] : vector<8x256xi32> to vector<8xi32>
      %1065 = vector.shape_cast %1064 : vector<8xi32> to vector<8x1xi32>
      %1066 = vector.broadcast %1065 : vector<8x1xi32> to vector<8x256xi32>
      %1067 = arith.cmpi eq, %1057, %1066 : vector<8x256xi32>
      %1068 = arith.extui %1067 : vector<8x256xi1> to vector<8x256xi32>
      %1069 = arith.sitofp %1068 : vector<8x256xi32> to vector<8x256xf32>
      %1070 = arith.truncf %1069 : vector<8x256xf32> to vector<8x256xbf16>
      %c0_476 = arith.constant 0 : index
      %c0_477 = arith.constant 0 : index
      %1071 = vector.load %arg6[%c0_476, %c0_477] : memref<256x128xbf16, #tpu.memory_space<vmem>>, vector<256x128xbf16>
      %cst_478 = arith.constant dense<0.000000e+00> : vector<8x128xf32>
      %1072 = tpu.matmul %1070, %1071, %cst_478 {dimension_numbers = #tpu.dot_dimension_numbers<[1], [0], [0], [1], [0, 0, 1, 1], [], []>} : vector<8x256xbf16>, vector<256x128xbf16>, vector<8x128xf32> -> vector<8x128xf32>
      %c0_479 = arith.constant 0 : index
      %c0_480 = arith.constant 0 : index
      %1073 = vector.load %arg29[%c0_479, %c0_480] : memref<8x128xf32, #tpu.memory_space<vmem>>, vector<8x128xf32>
      tpu.vector_store %arg29[%c0_479, %c0_480], %1072 {strides = array<i32>} : memref<8x128xf32, #tpu.memory_space<vmem>>, vector<8x128xf32>,
    } else {
    }
    %c2_i32_302 = arith.constant 2 : i32
    %709 = arith.index_cast %c2_i32_302 : i32 to index
    %710 = memref.load %arg1[%709] : memref<6xi32, #tpu.memory_space<smem>>
    %c0_i32_303 = arith.constant 0 : i32
    %711 = arith.cmpi sgt, %710, %c0_i32_303 : i32
    %712 = arith.extui %711 : i1 to i32
    %713 = arith.sitofp %712 : i32 to f32
    %714 = arith.index_cast %c2_i32_302 : i32 to index
    %c0_304 = arith.constant 0 : index
    %c0_305 = arith.constant 0 : index
    %715 = vector.load %arg5[%714, %c0_304, %c0_305] : memref<5x8x128xf32, #tpu.memory_space<vmem>>, vector<1x8x128xf32>
    %716 = vector.shape_cast %715 : vector<1x8x128xf32> to vector<8x128xf32>
    %717 = vector.broadcast %713 : f32 to vector<8x128xf32>
    %718 = arith.mulf %717, %716 : vector<8x128xf32>
    %cst_306 = arith.constant 1.000000e+00 : f32
    %719 = arith.subf %cst_306, %713 : f32
    %c0_307 = arith.constant 0 : index
    %c0_308 = arith.constant 0 : index
    %720 = vector.load %arg29[%c0_307, %c0_308] : memref<8x128xf32, #tpu.memory_space<vmem>>, vector<8x128xf32>
    %721 = vector.broadcast %719 : f32 to vector<8x128xf32>
    %722 = arith.mulf %721, %720 : vector<8x128xf32>
    %723 = arith.addf %718, %722 : vector<8x128xf32>
    %c0_309 = arith.constant 0 : index
    %c0_310 = arith.constant 0 : index
    %724 = vector.load %arg28[%c0_309, %c0_310] : memref<8x8xf32, #tpu.memory_space<vmem>>, vector<8x8xf32>
    %725 = arith.truncf %723 : vector<8x128xf32> to vector<8x128xbf16>
    %c0_311 = arith.constant 0 : index
    %c0_312 = arith.constant 0 : index
    %726 = vector.load %arg14[%c0_311, %c0_312] : memref<128x128xbf16, #tpu.memory_space<vmem>>, vector<128x128xbf16>
    %cst_313 = arith.constant dense<0.000000e+00> : vector<8x128xf32>
    %727 = tpu.matmul %725, %726, %cst_313 {dimension_numbers = #tpu.dot_dimension_numbers<[1], [0], [0], [1], [0, 0, 1, 1], [], []>} : vector<8x128xbf16>, vector<128x128xbf16>, vector<8x128xf32> -> vector<8x128xf32>
    %728 = vector.shape_cast %724 : vector<8x8xf32> to vector<8x8x1xf32>
    %c0_314 = arith.constant 0 : index
    %c0_315 = arith.constant 0 : index
    %729 = vector.load %arg15[%c0_314, %c0_315] : memref<1x128xf32, #tpu.memory_space<vmem>>, vector<1x128xf32>
    %730 = vector.shape_cast %729 : vector<1x128xf32> to vector<1x1x128xf32>
    %731 = vector.broadcast %728 : vector<8x8x1xf32> to vector<8x8x128xf32>
    %732 = vector.broadcast %730 : vector<1x1x128xf32> to vector<8x8x128xf32>
    %733 = arith.mulf %731, %732 : vector<8x8x128xf32>
    %c0_316 = arith.constant 0 : index
    %c0_317 = arith.constant 0 : index
    %c0_318 = arith.constant 0 : index
    %734 = vector.load %arg27[%c0_316, %c0_317, %c0_318] : memref<8x8x128xf32, #tpu.memory_space<vmem>>, vector<8x8x128xf32>
    %735 = vector.shape_cast %727 : vector<8x128xf32> to vector<1x8x128xf32>
    %736 = vector.broadcast %735 : vector<1x8x128xf32> to vector<8x8x128xf32>
    %737 = arith.addf %734, %736 : vector<8x8x128xf32>
    %738 = arith.addf %737, %733 : vector<8x8x128xf32>
    %739 = math.tanh %738 : vector<8x8x128xf32>
    %c0_319 = arith.constant 0 : index
    %c0_320 = arith.constant 0 : index
    %740 = vector.load %arg17[%c0_319, %c0_320] : memref<1x128xf32, #tpu.memory_space<vmem>>, vector<1x128xf32>
    %741 = vector.shape_cast %740 : vector<1x128xf32> to vector<1x1x128xf32>
    %742 = vector.broadcast %741 : vector<1x1x128xf32> to vector<8x8x128xf32>
    %743 = arith.mulf %739, %742 : vector<8x8x128xf32>
    %cst_321 = arith.constant dense<0.000000e+00> : vector<8x8xf32>
    %744 = vector.multi_reduction <add>, %743, %cst_321 [2] : vector<8x8x128xf32> to vector<8x8xf32>
    %c0_322 = arith.constant 0 : index
    %c0_323 = arith.constant 0 : index
    %745 = vector.load %arg18[%c0_322, %c0_323] : memref<1x1xf32, #tpu.memory_space<vmem>>, vector<1x1xf32>
    %746 = vector.broadcast %745 : vector<1x1xf32> to vector<8x8xf32>
    %747 = arith.addf %744, %746 : vector<8x8xf32>
    %c0_324 = arith.constant 0 : index
    %c0_325 = arith.constant 0 : index
    %748 = vector.load %arg4[%c0_324, %c0_325] : memref<8x8xf32, #tpu.memory_space<vmem>>, vector<8x8xf32>
    %cst_326 = arith.constant 5.000000e-01 : f32
    %749 = vector.broadcast %cst_326 : f32 to vector<8x8xf32>
    %750 = arith.cmpf ogt, %748, %749 : vector<8x8xf32>
    %cst_327 = arith.constant -1.000000e+30 : f32
    %751 = vector.broadcast %cst_327 : f32 to vector<8x8xf32>
    %752 = arith.select %750, %747, %751 : vector<8x8xi1>, vector<8x8xf32>
    %cst_328 = arith.constant dense<0xFF800000> : vector<8xf32>
    %753 = vector.multi_reduction <maximumf>, %752, %cst_328 [0] : vector<8x8xf32> to vector<8xf32>
    %754 = vector.shape_cast %753 : vector<8xf32> to vector<1x8xf32>
    %755 = vector.broadcast %754 : vector<1x8xf32> to vector<8x8xf32>
    %756 = arith.subf %752, %755 : vector<8x8xf32>
    %757 = math.exp %756 : vector<8x8xf32>
    %cst_329 = arith.constant dense<0.000000e+00> : vector<8xf32>
    %758 = vector.multi_reduction <add>, %757, %cst_329 [0] : vector<8x8xf32> to vector<8xf32>
    %759 = vector.shape_cast %758 : vector<8xf32> to vector<1x8xf32>
    %760 = vector.broadcast %759 : vector<1x8xf32> to vector<8x8xf32>
    %761 = arith.divf %757, %760 : vector<8x8xf32>
    %762 = arith.addf %724, %761 : vector<8x8xf32>
    %c0_330 = arith.constant 0 : index
    %c0_331 = arith.constant 0 : index
    %763 = vector.load %arg28[%c0_330, %c0_331] : memref<8x8xf32, #tpu.memory_space<vmem>>, vector<8x8xf32>
    tpu.vector_store %arg28[%c0_330, %c0_331], %762 {strides = array<i32>} : memref<8x8xf32, #tpu.memory_space<vmem>>, vector<8x8xf32>,
    %764 = vector.shape_cast %761 : vector<8x8xf32> to vector<8x8x1xf32>
    %c0_332 = arith.constant 0 : index
    %c0_333 = arith.constant 0 : index
    %c0_334 = arith.constant 0 : index
    %765 = vector.load %arg26[%c0_332, %c0_333, %c0_334] : memref<8x8x128xf32, #tpu.memory_space<vmem>>, vector<8x8x128xf32>
    %766 = vector.broadcast %764 : vector<8x8x1xf32> to vector<8x8x128xf32>
    %767 = arith.mulf %766, %765 : vector<8x8x128xf32>
    %cst_335 = arith.constant dense<0.000000e+00> : vector<8x128xf32>
    %768 = vector.multi_reduction <add>, %767, %cst_335 [0] : vector<8x8x128xf32> to vector<8x128xf32>
    %769 = tpu.concatenate %723, %768 in 1 : vector<8x128xf32>, vector<8x128xf32> -> vector<8x256xf32>
    %770 = arith.truncf %769 : vector<8x256xf32> to vector<8x256xbf16>
    %c0_336 = arith.constant 0 : index
    %c0_337 = arith.constant 0 : index
    %771 = vector.load %arg19[%c0_336, %c0_337] : memref<256x384xbf16, #tpu.memory_space<vmem>>, vector<256x384xbf16>
    %cst_338 = arith.constant dense<0.000000e+00> : vector<8x384xf32>
    %772 = tpu.matmul %770, %771, %cst_338 {dimension_numbers = #tpu.dot_dimension_numbers<[1], [0], [0], [1], [0, 0, 1, 1], [], []>} : vector<8x256xbf16>, vector<256x384xbf16>, vector<8x384xf32> -> vector<8x384xf32>
    %c0_339 = arith.constant 0 : index
    %c0_340 = arith.constant 0 : index
    %773 = vector.load %arg20[%c0_339, %c0_340] : memref<1x384xf32, #tpu.memory_space<vmem>>, vector<1x384xf32>
    %774 = vector.broadcast %773 : vector<1x384xf32> to vector<8x384xf32>
    %775 = arith.addf %772, %774 : vector<8x384xf32>
    %776 = arith.truncf %691 : vector<8x128xf32> to vector<8x128xbf16>
    %c0_341 = arith.constant 0 : index
    %c0_342 = arith.constant 0 : index
    %777 = vector.load %arg21[%c0_341, %c0_342] : memref<128x384xbf16, #tpu.memory_space<vmem>>, vector<128x384xbf16>
    %cst_343 = arith.constant dense<0.000000e+00> : vector<8x384xf32>
    %778 = tpu.matmul %776, %777, %cst_343 {dimension_numbers = #tpu.dot_dimension_numbers<[1], [0], [0], [1], [0, 0, 1, 1], [], []>} : vector<8x128xbf16>, vector<128x384xbf16>, vector<8x384xf32> -> vector<8x384xf32>
    %c0_344 = arith.constant 0 : index
    %c0_345 = arith.constant 0 : index
    %779 = vector.load %arg22[%c0_344, %c0_345] : memref<1x384xf32, #tpu.memory_space<vmem>>, vector<1x384xf32>
    %780 = vector.broadcast %779 : vector<1x384xf32> to vector<8x384xf32>
    %781 = arith.addf %778, %780 : vector<8x384xf32>
    %782 = vector.extract_strided_slice %775 {offsets = [0, 0], sizes = [8, 128], strides = [1, 1]} : vector<8x384xf32> to vector<8x128xf32>
    %783 = vector.extract_strided_slice %781 {offsets = [0, 0], sizes = [8, 128], strides = [1, 1]} : vector<8x384xf32> to vector<8x128xf32>
    %784 = arith.addf %782, %783 : vector<8x128xf32>
    %785 = arith.negf %784 : vector<8x128xf32>
    %786 = math.exp %785 : vector<8x128xf32>
    %cst_346 = arith.constant 1.000000e+00 : f32
    %787 = vector.broadcast %cst_346 : f32 to vector<8x128xf32>
    %788 = arith.addf %787, %786 : vector<8x128xf32>
    %789 = arith.divf %787, %788 : vector<8x128xf32>
    %790 = vector.extract_strided_slice %775 {offsets = [0, 128], sizes = [8, 128], strides = [1, 1]} : vector<8x384xf32> to vector<8x128xf32>
    %791 = vector.extract_strided_slice %781 {offsets = [0, 128], sizes = [8, 128], strides = [1, 1]} : vector<8x384xf32> to vector<8x128xf32>
    %792 = arith.addf %790, %791 : vector<8x128xf32>
    %793 = arith.negf %792 : vector<8x128xf32>
    %794 = math.exp %793 : vector<8x128xf32>
    %cst_347 = arith.constant 1.000000e+00 : f32
    %795 = vector.broadcast %cst_347 : f32 to vector<8x128xf32>
    %796 = arith.addf %795, %794 : vector<8x128xf32>
    %797 = arith.divf %795, %796 : vector<8x128xf32>
    %798 = vector.extract_strided_slice %775 {offsets = [0, 256], sizes = [8, 128], strides = [1, 1]} : vector<8x384xf32> to vector<8x128xf32>
    %799 = vector.extract_strided_slice %781 {offsets = [0, 256], sizes = [8, 128], strides = [1, 1]} : vector<8x384xf32> to vector<8x128xf32>
    %800 = arith.mulf %789, %799 : vector<8x128xf32>
    %801 = arith.addf %798, %800 : vector<8x128xf32>
    %802 = math.tanh %801 : vector<8x128xf32>
    %cst_348 = arith.constant 1.000000e+00 : f32
    %803 = vector.broadcast %cst_348 : f32 to vector<8x128xf32>
    %804 = arith.subf %803, %797 : vector<8x128xf32>
    %805 = arith.mulf %804, %802 : vector<8x128xf32>
    %806 = arith.mulf %797, %691 : vector<8x128xf32>
    %807 = arith.addf %805, %806 : vector<8x128xf32>
    %808 = tpu.concatenate %807, %768, %723 in 1 : vector<8x128xf32>, vector<8x128xf32>, vector<8x128xf32> -> vector<8x384xf32>
    %809 = arith.truncf %808 : vector<8x384xf32> to vector<8x384xbf16>
    %c0_349 = arith.constant 0 : index
    %c0_350 = arith.constant 0 : index
    %810 = vector.load %arg23[%c0_349, %c0_350] : memref<384x256xbf16, #tpu.memory_space<vmem>>, vector<384x256xbf16>
    %cst_351 = arith.constant dense<0.000000e+00> : vector<8x256xf32>
    %811 = tpu.matmul %809, %810, %cst_351 {dimension_numbers = #tpu.dot_dimension_numbers<[1], [0], [0], [1], [0, 0, 1, 1], [], []>} : vector<8x384xbf16>, vector<384x256xbf16>, vector<8x256xf32> -> vector<8x256xf32>
    %c0_352 = arith.constant 0 : index
    %c0_353 = arith.constant 0 : index
    %812 = vector.load %arg24[%c0_352, %c0_353] : memref<1x256xf32, #tpu.memory_space<vmem>>, vector<1x256xf32>
    %813 = vector.broadcast %812 : vector<1x256xf32> to vector<8x256xf32>
    %814 = arith.addf %811, %813 : vector<8x256xf32>
    %815 = arith.index_cast %c2_i32_302 : i32 to index
    %c0_354 = arith.constant 0 : index
    %c0_355 = arith.constant 0 : index
    %816 = vector.load %arg25[%815, %c0_354, %c0_355] : memref<6x8x256xf32, #tpu.memory_space<vmem>>, vector<1x8x256xf32>
    %817 = vector.shape_cast %816 : vector<1x8x256xf32> to vector<8x256xf32>
    %818 = vector.shape_cast %814 : vector<8x256xf32> to vector<1x8x256xf32>
    tpu.vector_store %arg25[%815, %c0_354, %c0_355], %818 {strides = array<i32>} : memref<6x8x256xf32, #tpu.memory_space<vmem>>, vector<1x8x256xf32>,
    %c1_i32_356 = arith.constant 1 : i32
    %819 = arith.addi %c2_i32_302, %c1_i32_356 : i32
    %820 = arith.index_cast %819 : i32 to index
    %821 = memref.load %arg1[%820] : memref<6xi32, #tpu.memory_space<smem>>
    %c0_i32_357 = arith.constant 0 : i32
    %822 = arith.cmpi eq, %821, %c0_i32_357 : i32
    %823 = arith.extui %822 : i1 to i32
    %c0_i32_358 = arith.constant 0 : i32
    %824 = arith.cmpi ne, %823, %c0_i32_358 : i32
    scf.if %824 {
      %1057 = tpu.iota {dimensions = array<i32: 1>} : vector<8x256xi32>
      %cst_474 = arith.constant dense<0xFF800000> : vector<8xf32>
      %1058 = vector.multi_reduction <maximumf>, %814, %cst_474 [1] : vector<8x256xf32> to vector<8xf32>
      %1059 = vector.shape_cast %1058 : vector<8xf32> to vector<8x1xf32>
      %1060 = vector.broadcast %1059 : vector<8x1xf32> to vector<8x256xf32>
      %1061 = arith.cmpf oeq, %814, %1060 : vector<8x256xf32>
      %c256_i32 = arith.constant 256 : i32
      %1062 = vector.broadcast %c256_i32 : i32 to vector<8x256xi32>
      %1063 = arith.select %1061, %1057, %1062 : vector<8x256xi1>, vector<8x256xi32>
      %cst_475 = arith.constant dense<2147483647> : vector<8xi32>
      %1064 = vector.multi_reduction <minsi>, %1063, %cst_475 [1] : vector<8x256xi32> to vector<8xi32>
      %1065 = vector.shape_cast %1064 : vector<8xi32> to vector<8x1xi32>
      %1066 = vector.broadcast %1065 : vector<8x1xi32> to vector<8x256xi32>
      %1067 = arith.cmpi eq, %1057, %1066 : vector<8x256xi32>
      %1068 = arith.extui %1067 : vector<8x256xi1> to vector<8x256xi32>
      %1069 = arith.sitofp %1068 : vector<8x256xi32> to vector<8x256xf32>
      %1070 = arith.truncf %1069 : vector<8x256xf32> to vector<8x256xbf16>
      %c0_476 = arith.constant 0 : index
      %c0_477 = arith.constant 0 : index
      %1071 = vector.load %arg6[%c0_476, %c0_477] : memref<256x128xbf16, #tpu.memory_space<vmem>>, vector<256x128xbf16>
      %cst_478 = arith.constant dense<0.000000e+00> : vector<8x128xf32>
      %1072 = tpu.matmul %1070, %1071, %cst_478 {dimension_numbers = #tpu.dot_dimension_numbers<[1], [0], [0], [1], [0, 0, 1, 1], [], []>} : vector<8x256xbf16>, vector<256x128xbf16>, vector<8x128xf32> -> vector<8x128xf32>
      %c0_479 = arith.constant 0 : index
      %c0_480 = arith.constant 0 : index
      %1073 = vector.load %arg29[%c0_479, %c0_480] : memref<8x128xf32, #tpu.memory_space<vmem>>, vector<8x128xf32>
      tpu.vector_store %arg29[%c0_479, %c0_480], %1072 {strides = array<i32>} : memref<8x128xf32, #tpu.memory_space<vmem>>, vector<8x128xf32>,
    } else {
    }
    %c3_i32_359 = arith.constant 3 : i32
    %825 = arith.index_cast %c3_i32_359 : i32 to index
    %826 = memref.load %arg1[%825] : memref<6xi32, #tpu.memory_space<smem>>
    %c0_i32_360 = arith.constant 0 : i32
    %827 = arith.cmpi sgt, %826, %c0_i32_360 : i32
    %828 = arith.extui %827 : i1 to i32
    %829 = arith.sitofp %828 : i32 to f32
    %830 = arith.index_cast %c3_i32_359 : i32 to index
    %c0_361 = arith.constant 0 : index
    %c0_362 = arith.constant 0 : index
    %831 = vector.load %arg5[%830, %c0_361, %c0_362] : memref<5x8x128xf32, #tpu.memory_space<vmem>>, vector<1x8x128xf32>
    %832 = vector.shape_cast %831 : vector<1x8x128xf32> to vector<8x128xf32>
    %833 = vector.broadcast %829 : f32 to vector<8x128xf32>
    %834 = arith.mulf %833, %832 : vector<8x128xf32>
    %cst_363 = arith.constant 1.000000e+00 : f32
    %835 = arith.subf %cst_363, %829 : f32
    %c0_364 = arith.constant 0 : index
    %c0_365 = arith.constant 0 : index
    %836 = vector.load %arg29[%c0_364, %c0_365] : memref<8x128xf32, #tpu.memory_space<vmem>>, vector<8x128xf32>
    %837 = vector.broadcast %835 : f32 to vector<8x128xf32>
    %838 = arith.mulf %837, %836 : vector<8x128xf32>
    %839 = arith.addf %834, %838 : vector<8x128xf32>
    %c0_366 = arith.constant 0 : index
    %c0_367 = arith.constant 0 : index
    %840 = vector.load %arg28[%c0_366, %c0_367] : memref<8x8xf32, #tpu.memory_space<vmem>>, vector<8x8xf32>
    %841 = arith.truncf %839 : vector<8x128xf32> to vector<8x128xbf16>
    %c0_368 = arith.constant 0 : index
    %c0_369 = arith.constant 0 : index
    %842 = vector.load %arg14[%c0_368, %c0_369] : memref<128x128xbf16, #tpu.memory_space<vmem>>, vector<128x128xbf16>
    %cst_370 = arith.constant dense<0.000000e+00> : vector<8x128xf32>
    %843 = tpu.matmul %841, %842, %cst_370 {dimension_numbers = #tpu.dot_dimension_numbers<[1], [0], [0], [1], [0, 0, 1, 1], [], []>} : vector<8x128xbf16>, vector<128x128xbf16>, vector<8x128xf32> -> vector<8x128xf32>
    %844 = vector.shape_cast %840 : vector<8x8xf32> to vector<8x8x1xf32>
    %c0_371 = arith.constant 0 : index
    %c0_372 = arith.constant 0 : index
    %845 = vector.load %arg15[%c0_371, %c0_372] : memref<1x128xf32, #tpu.memory_space<vmem>>, vector<1x128xf32>
    %846 = vector.shape_cast %845 : vector<1x128xf32> to vector<1x1x128xf32>
    %847 = vector.broadcast %844 : vector<8x8x1xf32> to vector<8x8x128xf32>
    %848 = vector.broadcast %846 : vector<1x1x128xf32> to vector<8x8x128xf32>
    %849 = arith.mulf %847, %848 : vector<8x8x128xf32>
    %c0_373 = arith.constant 0 : index
    %c0_374 = arith.constant 0 : index
    %c0_375 = arith.constant 0 : index
    %850 = vector.load %arg27[%c0_373, %c0_374, %c0_375] : memref<8x8x128xf32, #tpu.memory_space<vmem>>, vector<8x8x128xf32>
    %851 = vector.shape_cast %843 : vector<8x128xf32> to vector<1x8x128xf32>
    %852 = vector.broadcast %851 : vector<1x8x128xf32> to vector<8x8x128xf32>
    %853 = arith.addf %850, %852 : vector<8x8x128xf32>
    %854 = arith.addf %853, %849 : vector<8x8x128xf32>
    %855 = math.tanh %854 : vector<8x8x128xf32>
    %c0_376 = arith.constant 0 : index
    %c0_377 = arith.constant 0 : index
    %856 = vector.load %arg17[%c0_376, %c0_377] : memref<1x128xf32, #tpu.memory_space<vmem>>, vector<1x128xf32>
    %857 = vector.shape_cast %856 : vector<1x128xf32> to vector<1x1x128xf32>
    %858 = vector.broadcast %857 : vector<1x1x128xf32> to vector<8x8x128xf32>
    %859 = arith.mulf %855, %858 : vector<8x8x128xf32>
    %cst_378 = arith.constant dense<0.000000e+00> : vector<8x8xf32>
    %860 = vector.multi_reduction <add>, %859, %cst_378 [2] : vector<8x8x128xf32> to vector<8x8xf32>
    %c0_379 = arith.constant 0 : index
    %c0_380 = arith.constant 0 : index
    %861 = vector.load %arg18[%c0_379, %c0_380] : memref<1x1xf32, #tpu.memory_space<vmem>>, vector<1x1xf32>
    %862 = vector.broadcast %861 : vector<1x1xf32> to vector<8x8xf32>
    %863 = arith.addf %860, %862 : vector<8x8xf32>
    %c0_381 = arith.constant 0 : index
    %c0_382 = arith.constant 0 : index
    %864 = vector.load %arg4[%c0_381, %c0_382] : memref<8x8xf32, #tpu.memory_space<vmem>>, vector<8x8xf32>
    %cst_383 = arith.constant 5.000000e-01 : f32
    %865 = vector.broadcast %cst_383 : f32 to vector<8x8xf32>
    %866 = arith.cmpf ogt, %864, %865 : vector<8x8xf32>
    %cst_384 = arith.constant -1.000000e+30 : f32
    %867 = vector.broadcast %cst_384 : f32 to vector<8x8xf32>
    %868 = arith.select %866, %863, %867 : vector<8x8xi1>, vector<8x8xf32>
    %cst_385 = arith.constant dense<0xFF800000> : vector<8xf32>
    %869 = vector.multi_reduction <maximumf>, %868, %cst_385 [0] : vector<8x8xf32> to vector<8xf32>
    %870 = vector.shape_cast %869 : vector<8xf32> to vector<1x8xf32>
    %871 = vector.broadcast %870 : vector<1x8xf32> to vector<8x8xf32>
    %872 = arith.subf %868, %871 : vector<8x8xf32>
    %873 = math.exp %872 : vector<8x8xf32>
    %cst_386 = arith.constant dense<0.000000e+00> : vector<8xf32>
    %874 = vector.multi_reduction <add>, %873, %cst_386 [0] : vector<8x8xf32> to vector<8xf32>
    %875 = vector.shape_cast %874 : vector<8xf32> to vector<1x8xf32>
    %876 = vector.broadcast %875 : vector<1x8xf32> to vector<8x8xf32>
    %877 = arith.divf %873, %876 : vector<8x8xf32>
    %878 = arith.addf %840, %877 : vector<8x8xf32>
    %c0_387 = arith.constant 0 : index
    %c0_388 = arith.constant 0 : index
    %879 = vector.load %arg28[%c0_387, %c0_388] : memref<8x8xf32, #tpu.memory_space<vmem>>, vector<8x8xf32>
    tpu.vector_store %arg28[%c0_387, %c0_388], %878 {strides = array<i32>} : memref<8x8xf32, #tpu.memory_space<vmem>>, vector<8x8xf32>,
    %880 = vector.shape_cast %877 : vector<8x8xf32> to vector<8x8x1xf32>
    %c0_389 = arith.constant 0 : index
    %c0_390 = arith.constant 0 : index
    %c0_391 = arith.constant 0 : index
    %881 = vector.load %arg26[%c0_389, %c0_390, %c0_391] : memref<8x8x128xf32, #tpu.memory_space<vmem>>, vector<8x8x128xf32>
    %882 = vector.broadcast %880 : vector<8x8x1xf32> to vector<8x8x128xf32>
    %883 = arith.mulf %882, %881 : vector<8x8x128xf32>
    %cst_392 = arith.constant dense<0.000000e+00> : vector<8x128xf32>
    %884 = vector.multi_reduction <add>, %883, %cst_392 [0] : vector<8x8x128xf32> to vector<8x128xf32>
    %885 = tpu.concatenate %839, %884 in 1 : vector<8x128xf32>, vector<8x128xf32> -> vector<8x256xf32>
    %886 = arith.truncf %885 : vector<8x256xf32> to vector<8x256xbf16>
    %c0_393 = arith.constant 0 : index
    %c0_394 = arith.constant 0 : index
    %887 = vector.load %arg19[%c0_393, %c0_394] : memref<256x384xbf16, #tpu.memory_space<vmem>>, vector<256x384xbf16>
    %cst_395 = arith.constant dense<0.000000e+00> : vector<8x384xf32>
    %888 = tpu.matmul %886, %887, %cst_395 {dimension_numbers = #tpu.dot_dimension_numbers<[1], [0], [0], [1], [0, 0, 1, 1], [], []>} : vector<8x256xbf16>, vector<256x384xbf16>, vector<8x384xf32> -> vector<8x384xf32>
    %c0_396 = arith.constant 0 : index
    %c0_397 = arith.constant 0 : index
    %889 = vector.load %arg20[%c0_396, %c0_397] : memref<1x384xf32, #tpu.memory_space<vmem>>, vector<1x384xf32>
    %890 = vector.broadcast %889 : vector<1x384xf32> to vector<8x384xf32>
    %891 = arith.addf %888, %890 : vector<8x384xf32>
    %892 = arith.truncf %807 : vector<8x128xf32> to vector<8x128xbf16>
    %c0_398 = arith.constant 0 : index
    %c0_399 = arith.constant 0 : index
    %893 = vector.load %arg21[%c0_398, %c0_399] : memref<128x384xbf16, #tpu.memory_space<vmem>>, vector<128x384xbf16>
    %cst_400 = arith.constant dense<0.000000e+00> : vector<8x384xf32>
    %894 = tpu.matmul %892, %893, %cst_400 {dimension_numbers = #tpu.dot_dimension_numbers<[1], [0], [0], [1], [0, 0, 1, 1], [], []>} : vector<8x128xbf16>, vector<128x384xbf16>, vector<8x384xf32> -> vector<8x384xf32>
    %c0_401 = arith.constant 0 : index
    %c0_402 = arith.constant 0 : index
    %895 = vector.load %arg22[%c0_401, %c0_402] : memref<1x384xf32, #tpu.memory_space<vmem>>, vector<1x384xf32>
    %896 = vector.broadcast %895 : vector<1x384xf32> to vector<8x384xf32>
    %897 = arith.addf %894, %896 : vector<8x384xf32>
    %898 = vector.extract_strided_slice %891 {offsets = [0, 0], sizes = [8, 128], strides = [1, 1]} : vector<8x384xf32> to vector<8x128xf32>
    %899 = vector.extract_strided_slice %897 {offsets = [0, 0], sizes = [8, 128], strides = [1, 1]} : vector<8x384xf32> to vector<8x128xf32>
    %900 = arith.addf %898, %899 : vector<8x128xf32>
    %901 = arith.negf %900 : vector<8x128xf32>
    %902 = math.exp %901 : vector<8x128xf32>
    %cst_403 = arith.constant 1.000000e+00 : f32
    %903 = vector.broadcast %cst_403 : f32 to vector<8x128xf32>
    %904 = arith.addf %903, %902 : vector<8x128xf32>
    %905 = arith.divf %903, %904 : vector<8x128xf32>
    %906 = vector.extract_strided_slice %891 {offsets = [0, 128], sizes = [8, 128], strides = [1, 1]} : vector<8x384xf32> to vector<8x128xf32>
    %907 = vector.extract_strided_slice %897 {offsets = [0, 128], sizes = [8, 128], strides = [1, 1]} : vector<8x384xf32> to vector<8x128xf32>
    %908 = arith.addf %906, %907 : vector<8x128xf32>
    %909 = arith.negf %908 : vector<8x128xf32>
    %910 = math.exp %909 : vector<8x128xf32>
    %cst_404 = arith.constant 1.000000e+00 : f32
    %911 = vector.broadcast %cst_404 : f32 to vector<8x128xf32>
    %912 = arith.addf %911, %910 : vector<8x128xf32>
    %913 = arith.divf %911, %912 : vector<8x128xf32>
    %914 = vector.extract_strided_slice %891 {offsets = [0, 256], sizes = [8, 128], strides = [1, 1]} : vector<8x384xf32> to vector<8x128xf32>
    %915 = vector.extract_strided_slice %897 {offsets = [0, 256], sizes = [8, 128], strides = [1, 1]} : vector<8x384xf32> to vector<8x128xf32>
    %916 = arith.mulf %905, %915 : vector<8x128xf32>
    %917 = arith.addf %914, %916 : vector<8x128xf32>
    %918 = math.tanh %917 : vector<8x128xf32>
    %cst_405 = arith.constant 1.000000e+00 : f32
    %919 = vector.broadcast %cst_405 : f32 to vector<8x128xf32>
    %920 = arith.subf %919, %913 : vector<8x128xf32>
    %921 = arith.mulf %920, %918 : vector<8x128xf32>
    %922 = arith.mulf %913, %807 : vector<8x128xf32>
    %923 = arith.addf %921, %922 : vector<8x128xf32>
    %924 = tpu.concatenate %923, %884, %839 in 1 : vector<8x128xf32>, vector<8x128xf32>, vector<8x128xf32> -> vector<8x384xf32>
    %925 = arith.truncf %924 : vector<8x384xf32> to vector<8x384xbf16>
    %c0_406 = arith.constant 0 : index
    %c0_407 = arith.constant 0 : index
    %926 = vector.load %arg23[%c0_406, %c0_407] : memref<384x256xbf16, #tpu.memory_space<vmem>>, vector<384x256xbf16>
    %cst_408 = arith.constant dense<0.000000e+00> : vector<8x256xf32>
    %927 = tpu.matmul %925, %926, %cst_408 {dimension_numbers = #tpu.dot_dimension_numbers<[1], [0], [0], [1], [0, 0, 1, 1], [], []>} : vector<8x384xbf16>, vector<384x256xbf16>, vector<8x256xf32> -> vector<8x256xf32>
    %c0_409 = arith.constant 0 : index
    %c0_410 = arith.constant 0 : index
    %928 = vector.load %arg24[%c0_409, %c0_410] : memref<1x256xf32, #tpu.memory_space<vmem>>, vector<1x256xf32>
    %929 = vector.broadcast %928 : vector<1x256xf32> to vector<8x256xf32>
    %930 = arith.addf %927, %929 : vector<8x256xf32>
    %931 = arith.index_cast %c3_i32_359 : i32 to index
    %c0_411 = arith.constant 0 : index
    %c0_412 = arith.constant 0 : index
    %932 = vector.load %arg25[%931, %c0_411, %c0_412] : memref<6x8x256xf32, #tpu.memory_space<vmem>>, vector<1x8x256xf32>
    %933 = vector.shape_cast %932 : vector<1x8x256xf32> to vector<8x256xf32>
    %934 = vector.shape_cast %930 : vector<8x256xf32> to vector<1x8x256xf32>
    tpu.vector_store %arg25[%931, %c0_411, %c0_412], %934 {strides = array<i32>} : memref<6x8x256xf32, #tpu.memory_space<vmem>>, vector<1x8x256xf32>,
    %c1_i32_413 = arith.constant 1 : i32
    %935 = arith.addi %c3_i32_359, %c1_i32_413 : i32
    %936 = arith.index_cast %935 : i32 to index
    %937 = memref.load %arg1[%936] : memref<6xi32, #tpu.memory_space<smem>>
    %c0_i32_414 = arith.constant 0 : i32
    %938 = arith.cmpi eq, %937, %c0_i32_414 : i32
    %939 = arith.extui %938 : i1 to i32
    %c0_i32_415 = arith.constant 0 : i32
    %940 = arith.cmpi ne, %939, %c0_i32_415 : i32
    scf.if %940 {
      %1057 = tpu.iota {dimensions = array<i32: 1>} : vector<8x256xi32>
      %cst_474 = arith.constant dense<0xFF800000> : vector<8xf32>
      %1058 = vector.multi_reduction <maximumf>, %930, %cst_474 [1] : vector<8x256xf32> to vector<8xf32>
      %1059 = vector.shape_cast %1058 : vector<8xf32> to vector<8x1xf32>
      %1060 = vector.broadcast %1059 : vector<8x1xf32> to vector<8x256xf32>
      %1061 = arith.cmpf oeq, %930, %1060 : vector<8x256xf32>
      %c256_i32 = arith.constant 256 : i32
      %1062 = vector.broadcast %c256_i32 : i32 to vector<8x256xi32>
      %1063 = arith.select %1061, %1057, %1062 : vector<8x256xi1>, vector<8x256xi32>
      %cst_475 = arith.constant dense<2147483647> : vector<8xi32>
      %1064 = vector.multi_reduction <minsi>, %1063, %cst_475 [1] : vector<8x256xi32> to vector<8xi32>
      %1065 = vector.shape_cast %1064 : vector<8xi32> to vector<8x1xi32>
      %1066 = vector.broadcast %1065 : vector<8x1xi32> to vector<8x256xi32>
      %1067 = arith.cmpi eq, %1057, %1066 : vector<8x256xi32>
      %1068 = arith.extui %1067 : vector<8x256xi1> to vector<8x256xi32>
      %1069 = arith.sitofp %1068 : vector<8x256xi32> to vector<8x256xf32>
      %1070 = arith.truncf %1069 : vector<8x256xf32> to vector<8x256xbf16>
      %c0_476 = arith.constant 0 : index
      %c0_477 = arith.constant 0 : index
      %1071 = vector.load %arg6[%c0_476, %c0_477] : memref<256x128xbf16, #tpu.memory_space<vmem>>, vector<256x128xbf16>
      %cst_478 = arith.constant dense<0.000000e+00> : vector<8x128xf32>
      %1072 = tpu.matmul %1070, %1071, %cst_478 {dimension_numbers = #tpu.dot_dimension_numbers<[1], [0], [0], [1], [0, 0, 1, 1], [], []>} : vector<8x256xbf16>, vector<256x128xbf16>, vector<8x128xf32> -> vector<8x128xf32>
      %c0_479 = arith.constant 0 : index
      %c0_480 = arith.constant 0 : index
      %1073 = vector.load %arg29[%c0_479, %c0_480] : memref<8x128xf32, #tpu.memory_space<vmem>>, vector<8x128xf32>
      tpu.vector_store %arg29[%c0_479, %c0_480], %1072 {strides = array<i32>} : memref<8x128xf32, #tpu.memory_space<vmem>>, vector<8x128xf32>,
    } else {
    }
    %c4_i32_416 = arith.constant 4 : i32
    %941 = arith.index_cast %c4_i32_416 : i32 to index
    %942 = memref.load %arg1[%941] : memref<6xi32, #tpu.memory_space<smem>>
    %c0_i32_417 = arith.constant 0 : i32
    %943 = arith.cmpi sgt, %942, %c0_i32_417 : i32
    %944 = arith.extui %943 : i1 to i32
    %945 = arith.sitofp %944 : i32 to f32
    %946 = arith.index_cast %c4_i32_416 : i32 to index
    %c0_418 = arith.constant 0 : index
    %c0_419 = arith.constant 0 : index
    %947 = vector.load %arg5[%946, %c0_418, %c0_419] : memref<5x8x128xf32, #tpu.memory_space<vmem>>, vector<1x8x128xf32>
    %948 = vector.shape_cast %947 : vector<1x8x128xf32> to vector<8x128xf32>
    %949 = vector.broadcast %945 : f32 to vector<8x128xf32>
    %950 = arith.mulf %949, %948 : vector<8x128xf32>
    %cst_420 = arith.constant 1.000000e+00 : f32
    %951 = arith.subf %cst_420, %945 : f32
    %c0_421 = arith.constant 0 : index
    %c0_422 = arith.constant 0 : index
    %952 = vector.load %arg29[%c0_421, %c0_422] : memref<8x128xf32, #tpu.memory_space<vmem>>, vector<8x128xf32>
    %953 = vector.broadcast %951 : f32 to vector<8x128xf32>
    %954 = arith.mulf %953, %952 : vector<8x128xf32>
    %955 = arith.addf %950, %954 : vector<8x128xf32>
    %c0_423 = arith.constant 0 : index
    %c0_424 = arith.constant 0 : index
    %956 = vector.load %arg28[%c0_423, %c0_424] : memref<8x8xf32, #tpu.memory_space<vmem>>, vector<8x8xf32>
    %957 = arith.truncf %955 : vector<8x128xf32> to vector<8x128xbf16>
    %c0_425 = arith.constant 0 : index
    %c0_426 = arith.constant 0 : index
    %958 = vector.load %arg14[%c0_425, %c0_426] : memref<128x128xbf16, #tpu.memory_space<vmem>>, vector<128x128xbf16>
    %cst_427 = arith.constant dense<0.000000e+00> : vector<8x128xf32>
    %959 = tpu.matmul %957, %958, %cst_427 {dimension_numbers = #tpu.dot_dimension_numbers<[1], [0], [0], [1], [0, 0, 1, 1], [], []>} : vector<8x128xbf16>, vector<128x128xbf16>, vector<8x128xf32> -> vector<8x128xf32>
    %960 = vector.shape_cast %956 : vector<8x8xf32> to vector<8x8x1xf32>
    %c0_428 = arith.constant 0 : index
    %c0_429 = arith.constant 0 : index
    %961 = vector.load %arg15[%c0_428, %c0_429] : memref<1x128xf32, #tpu.memory_space<vmem>>, vector<1x128xf32>
    %962 = vector.shape_cast %961 : vector<1x128xf32> to vector<1x1x128xf32>
    %963 = vector.broadcast %960 : vector<8x8x1xf32> to vector<8x8x128xf32>
    %964 = vector.broadcast %962 : vector<1x1x128xf32> to vector<8x8x128xf32>
    %965 = arith.mulf %963, %964 : vector<8x8x128xf32>
    %c0_430 = arith.constant 0 : index
    %c0_431 = arith.constant 0 : index
    %c0_432 = arith.constant 0 : index
    %966 = vector.load %arg27[%c0_430, %c0_431, %c0_432] : memref<8x8x128xf32, #tpu.memory_space<vmem>>, vector<8x8x128xf32>
    %967 = vector.shape_cast %959 : vector<8x128xf32> to vector<1x8x128xf32>
    %968 = vector.broadcast %967 : vector<1x8x128xf32> to vector<8x8x128xf32>
    %969 = arith.addf %966, %968 : vector<8x8x128xf32>
    %970 = arith.addf %969, %965 : vector<8x8x128xf32>
    %971 = math.tanh %970 : vector<8x8x128xf32>
    %c0_433 = arith.constant 0 : index
    %c0_434 = arith.constant 0 : index
    %972 = vector.load %arg17[%c0_433, %c0_434] : memref<1x128xf32, #tpu.memory_space<vmem>>, vector<1x128xf32>
    %973 = vector.shape_cast %972 : vector<1x128xf32> to vector<1x1x128xf32>
    %974 = vector.broadcast %973 : vector<1x1x128xf32> to vector<8x8x128xf32>
    %975 = arith.mulf %971, %974 : vector<8x8x128xf32>
    %cst_435 = arith.constant dense<0.000000e+00> : vector<8x8xf32>
    %976 = vector.multi_reduction <add>, %975, %cst_435 [2] : vector<8x8x128xf32> to vector<8x8xf32>
    %c0_436 = arith.constant 0 : index
    %c0_437 = arith.constant 0 : index
    %977 = vector.load %arg18[%c0_436, %c0_437] : memref<1x1xf32, #tpu.memory_space<vmem>>, vector<1x1xf32>
    %978 = vector.broadcast %977 : vector<1x1xf32> to vector<8x8xf32>
    %979 = arith.addf %976, %978 : vector<8x8xf32>
    %c0_438 = arith.constant 0 : index
    %c0_439 = arith.constant 0 : index
    %980 = vector.load %arg4[%c0_438, %c0_439] : memref<8x8xf32, #tpu.memory_space<vmem>>, vector<8x8xf32>
    %cst_440 = arith.constant 5.000000e-01 : f32
    %981 = vector.broadcast %cst_440 : f32 to vector<8x8xf32>
    %982 = arith.cmpf ogt, %980, %981 : vector<8x8xf32>
    %cst_441 = arith.constant -1.000000e+30 : f32
    %983 = vector.broadcast %cst_441 : f32 to vector<8x8xf32>
    %984 = arith.select %982, %979, %983 : vector<8x8xi1>, vector<8x8xf32>
    %cst_442 = arith.constant dense<0xFF800000> : vector<8xf32>
    %985 = vector.multi_reduction <maximumf>, %984, %cst_442 [0] : vector<8x8xf32> to vector<8xf32>
    %986 = vector.shape_cast %985 : vector<8xf32> to vector<1x8xf32>
    %987 = vector.broadcast %986 : vector<1x8xf32> to vector<8x8xf32>
    %988 = arith.subf %984, %987 : vector<8x8xf32>
    %989 = math.exp %988 : vector<8x8xf32>
    %cst_443 = arith.constant dense<0.000000e+00> : vector<8xf32>
    %990 = vector.multi_reduction <add>, %989, %cst_443 [0] : vector<8x8xf32> to vector<8xf32>
    %991 = vector.shape_cast %990 : vector<8xf32> to vector<1x8xf32>
    %992 = vector.broadcast %991 : vector<1x8xf32> to vector<8x8xf32>
    %993 = arith.divf %989, %992 : vector<8x8xf32>
    %994 = arith.addf %956, %993 : vector<8x8xf32>
    %c0_444 = arith.constant 0 : index
    %c0_445 = arith.constant 0 : index
    %995 = vector.load %arg28[%c0_444, %c0_445] : memref<8x8xf32, #tpu.memory_space<vmem>>, vector<8x8xf32>
    tpu.vector_store %arg28[%c0_444, %c0_445], %994 {strides = array<i32>} : memref<8x8xf32, #tpu.memory_space<vmem>>, vector<8x8xf32>,
    %996 = vector.shape_cast %993 : vector<8x8xf32> to vector<8x8x1xf32>
    %c0_446 = arith.constant 0 : index
    %c0_447 = arith.constant 0 : index
    %c0_448 = arith.constant 0 : index
    %997 = vector.load %arg26[%c0_446, %c0_447, %c0_448] : memref<8x8x128xf32, #tpu.memory_space<vmem>>, vector<8x8x128xf32>
    %998 = vector.broadcast %996 : vector<8x8x1xf32> to vector<8x8x128xf32>
    %999 = arith.mulf %998, %997 : vector<8x8x128xf32>
    %cst_449 = arith.constant dense<0.000000e+00> : vector<8x128xf32>
    %1000 = vector.multi_reduction <add>, %999, %cst_449 [0] : vector<8x8x128xf32> to vector<8x128xf32>
    %1001 = tpu.concatenate %955, %1000 in 1 : vector<8x128xf32>, vector<8x128xf32> -> vector<8x256xf32>
    %1002 = arith.truncf %1001 : vector<8x256xf32> to vector<8x256xbf16>
    %c0_450 = arith.constant 0 : index
    %c0_451 = arith.constant 0 : index
    %1003 = vector.load %arg19[%c0_450, %c0_451] : memref<256x384xbf16, #tpu.memory_space<vmem>>, vector<256x384xbf16>
    %cst_452 = arith.constant dense<0.000000e+00> : vector<8x384xf32>
    %1004 = tpu.matmul %1002, %1003, %cst_452 {dimension_numbers = #tpu.dot_dimension_numbers<[1], [0], [0], [1], [0, 0, 1, 1], [], []>} : vector<8x256xbf16>, vector<256x384xbf16>, vector<8x384xf32> -> vector<8x384xf32>
    %c0_453 = arith.constant 0 : index
    %c0_454 = arith.constant 0 : index
    %1005 = vector.load %arg20[%c0_453, %c0_454] : memref<1x384xf32, #tpu.memory_space<vmem>>, vector<1x384xf32>
    %1006 = vector.broadcast %1005 : vector<1x384xf32> to vector<8x384xf32>
    %1007 = arith.addf %1004, %1006 : vector<8x384xf32>
    %1008 = arith.truncf %923 : vector<8x128xf32> to vector<8x128xbf16>
    %c0_455 = arith.constant 0 : index
    %c0_456 = arith.constant 0 : index
    %1009 = vector.load %arg21[%c0_455, %c0_456] : memref<128x384xbf16, #tpu.memory_space<vmem>>, vector<128x384xbf16>
    %cst_457 = arith.constant dense<0.000000e+00> : vector<8x384xf32>
    %1010 = tpu.matmul %1008, %1009, %cst_457 {dimension_numbers = #tpu.dot_dimension_numbers<[1], [0], [0], [1], [0, 0, 1, 1], [], []>} : vector<8x128xbf16>, vector<128x384xbf16>, vector<8x384xf32> -> vector<8x384xf32>
    %c0_458 = arith.constant 0 : index
    %c0_459 = arith.constant 0 : index
    %1011 = vector.load %arg22[%c0_458, %c0_459] : memref<1x384xf32, #tpu.memory_space<vmem>>, vector<1x384xf32>
    %1012 = vector.broadcast %1011 : vector<1x384xf32> to vector<8x384xf32>
    %1013 = arith.addf %1010, %1012 : vector<8x384xf32>
    %1014 = vector.extract_strided_slice %1007 {offsets = [0, 0], sizes = [8, 128], strides = [1, 1]} : vector<8x384xf32> to vector<8x128xf32>
    %1015 = vector.extract_strided_slice %1013 {offsets = [0, 0], sizes = [8, 128], strides = [1, 1]} : vector<8x384xf32> to vector<8x128xf32>
    %1016 = arith.addf %1014, %1015 : vector<8x128xf32>
    %1017 = arith.negf %1016 : vector<8x128xf32>
    %1018 = math.exp %1017 : vector<8x128xf32>
    %cst_460 = arith.constant 1.000000e+00 : f32
    %1019 = vector.broadcast %cst_460 : f32 to vector<8x128xf32>
    %1020 = arith.addf %1019, %1018 : vector<8x128xf32>
    %1021 = arith.divf %1019, %1020 : vector<8x128xf32>
    %1022 = vector.extract_strided_slice %1007 {offsets = [0, 128], sizes = [8, 128], strides = [1, 1]} : vector<8x384xf32> to vector<8x128xf32>
    %1023 = vector.extract_strided_slice %1013 {offsets = [0, 128], sizes = [8, 128], strides = [1, 1]} : vector<8x384xf32> to vector<8x128xf32>
    %1024 = arith.addf %1022, %1023 : vector<8x128xf32>
    %1025 = arith.negf %1024 : vector<8x128xf32>
    %1026 = math.exp %1025 : vector<8x128xf32>
    %cst_461 = arith.constant 1.000000e+00 : f32
    %1027 = vector.broadcast %cst_461 : f32 to vector<8x128xf32>
    %1028 = arith.addf %1027, %1026 : vector<8x128xf32>
    %1029 = arith.divf %1027, %1028 : vector<8x128xf32>
    %1030 = vector.extract_strided_slice %1007 {offsets = [0, 256], sizes = [8, 128], strides = [1, 1]} : vector<8x384xf32> to vector<8x128xf32>
    %1031 = vector.extract_strided_slice %1013 {offsets = [0, 256], sizes = [8, 128], strides = [1, 1]} : vector<8x384xf32> to vector<8x128xf32>
    %1032 = arith.mulf %1021, %1031 : vector<8x128xf32>
    %1033 = arith.addf %1030, %1032 : vector<8x128xf32>
    %1034 = math.tanh %1033 : vector<8x128xf32>
    %cst_462 = arith.constant 1.000000e+00 : f32
    %1035 = vector.broadcast %cst_462 : f32 to vector<8x128xf32>
    %1036 = arith.subf %1035, %1029 : vector<8x128xf32>
    %1037 = arith.mulf %1036, %1034 : vector<8x128xf32>
    %1038 = arith.mulf %1029, %923 : vector<8x128xf32>
    %1039 = arith.addf %1037, %1038 : vector<8x128xf32>
    %1040 = tpu.concatenate %1039, %1000, %955 in 1 : vector<8x128xf32>, vector<8x128xf32>, vector<8x128xf32> -> vector<8x384xf32>
    %1041 = arith.truncf %1040 : vector<8x384xf32> to vector<8x384xbf16>
    %c0_463 = arith.constant 0 : index
    %c0_464 = arith.constant 0 : index
    %1042 = vector.load %arg23[%c0_463, %c0_464] : memref<384x256xbf16, #tpu.memory_space<vmem>>, vector<384x256xbf16>
    %cst_465 = arith.constant dense<0.000000e+00> : vector<8x256xf32>
    %1043 = tpu.matmul %1041, %1042, %cst_465 {dimension_numbers = #tpu.dot_dimension_numbers<[1], [0], [0], [1], [0, 0, 1, 1], [], []>} : vector<8x384xbf16>, vector<384x256xbf16>, vector<8x256xf32> -> vector<8x256xf32>
    %c0_466 = arith.constant 0 : index
    %c0_467 = arith.constant 0 : index
    %1044 = vector.load %arg24[%c0_466, %c0_467] : memref<1x256xf32, #tpu.memory_space<vmem>>, vector<1x256xf32>
    %1045 = vector.broadcast %1044 : vector<1x256xf32> to vector<8x256xf32>
    %1046 = arith.addf %1043, %1045 : vector<8x256xf32>
    %1047 = arith.index_cast %c4_i32_416 : i32 to index
    %c0_468 = arith.constant 0 : index
    %c0_469 = arith.constant 0 : index
    %1048 = vector.load %arg25[%1047, %c0_468, %c0_469] : memref<6x8x256xf32, #tpu.memory_space<vmem>>, vector<1x8x256xf32>
    %1049 = vector.shape_cast %1048 : vector<1x8x256xf32> to vector<8x256xf32>
    %1050 = vector.shape_cast %1046 : vector<8x256xf32> to vector<1x8x256xf32>
    tpu.vector_store %arg25[%1047, %c0_468, %c0_469], %1050 {strides = array<i32>} : memref<6x8x256xf32, #tpu.memory_space<vmem>>, vector<1x8x256xf32>,
    %c1_i32_470 = arith.constant 1 : i32
    %1051 = arith.addi %c4_i32_416, %c1_i32_470 : i32
    %1052 = arith.index_cast %1051 : i32 to index
    %1053 = memref.load %arg1[%1052] : memref<6xi32, #tpu.memory_space<smem>>
    %c0_i32_471 = arith.constant 0 : i32
    %1054 = arith.cmpi eq, %1053, %c0_i32_471 : i32
    %1055 = arith.extui %1054 : i1 to i32
    %c0_i32_472 = arith.constant 0 : i32
    %1056 = arith.cmpi ne, %1055, %c0_i32_472 : i32
    scf.if %1056 {
      %1057 = tpu.iota {dimensions = array<i32: 1>} : vector<8x256xi32>
      %cst_474 = arith.constant dense<0xFF800000> : vector<8xf32>
      %1058 = vector.multi_reduction <maximumf>, %1046, %cst_474 [1] : vector<8x256xf32> to vector<8xf32>
      %1059 = vector.shape_cast %1058 : vector<8xf32> to vector<8x1xf32>
      %1060 = vector.broadcast %1059 : vector<8x1xf32> to vector<8x256xf32>
      %1061 = arith.cmpf oeq, %1046, %1060 : vector<8x256xf32>
      %c256_i32 = arith.constant 256 : i32
      %1062 = vector.broadcast %c256_i32 : i32 to vector<8x256xi32>
      %1063 = arith.select %1061, %1057, %1062 : vector<8x256xi1>, vector<8x256xi32>
      %cst_475 = arith.constant dense<2147483647> : vector<8xi32>
      %1064 = vector.multi_reduction <minsi>, %1063, %cst_475 [1] : vector<8x256xi32> to vector<8xi32>
      %1065 = vector.shape_cast %1064 : vector<8xi32> to vector<8x1xi32>
      %1066 = vector.broadcast %1065 : vector<8x1xi32> to vector<8x256xi32>
      %1067 = arith.cmpi eq, %1057, %1066 : vector<8x256xi32>
      %1068 = arith.extui %1067 : vector<8x256xi1> to vector<8x256xi32>
      %1069 = arith.sitofp %1068 : vector<8x256xi32> to vector<8x256xf32>
      %1070 = arith.truncf %1069 : vector<8x256xf32> to vector<8x256xbf16>
      %c0_476 = arith.constant 0 : index
      %c0_477 = arith.constant 0 : index
      %1071 = vector.load %arg6[%c0_476, %c0_477] : memref<256x128xbf16, #tpu.memory_space<vmem>>, vector<256x128xbf16>
      %cst_478 = arith.constant dense<0.000000e+00> : vector<8x128xf32>
      %1072 = tpu.matmul %1070, %1071, %cst_478 {dimension_numbers = #tpu.dot_dimension_numbers<[1], [0], [0], [1], [0, 0, 1, 1], [], []>} : vector<8x256xbf16>, vector<256x128xbf16>, vector<8x128xf32> -> vector<8x128xf32>
      %c0_479 = arith.constant 0 : index
      %c0_480 = arith.constant 0 : index
      %1073 = vector.load %arg29[%c0_479, %c0_480] : memref<8x128xf32, #tpu.memory_space<vmem>>, vector<8x128xf32>
      tpu.vector_store %arg29[%c0_479, %c0_480], %1072 {strides = array<i32>} : memref<8x128xf32, #tpu.memory_space<vmem>>, vector<8x128xf32>,
    } else {
    }
    %c5_i32_473 = arith.constant 5 : i32
    return
  }
  func.func @transform_0(%arg0: i32, %arg1: memref<6xi32, #tpu.memory_space<smem>>) -> (i32, i32, i32) {
    %c0_i32 = arith.constant 0 : i32
    %c0_i32_0 = arith.constant 0 : i32
    %c0_i32_1 = arith.constant 0 : i32
    %c0_i32_2 = arith.constant 0 : i32
    return %c0_i32, %c0_i32_0, %c0_i32_1 : i32, i32, i32
  }
  func.func @transform_1(%arg0: i32, %arg1: memref<6xi32, #tpu.memory_space<smem>>) -> (i32, i32, i32) {
    %c0_i32 = arith.constant 0 : i32
    %c0_i32_0 = arith.constant 0 : i32
    %c0_i32_1 = arith.constant 0 : i32
    %c0_i32_2 = arith.constant 0 : i32
    return %c0_i32, %c0_i32_0, %c0_i32_1 : i32, i32, i32
  }
  func.func @transform_2(%arg0: i32, %arg1: memref<6xi32, #tpu.memory_space<smem>>) -> (i32, i32) {
    %c0_i32 = arith.constant 0 : i32
    %c0_i32_0 = arith.constant 0 : i32
    %c0_i32_1 = arith.constant 0 : i32
    return %c0_i32, %c0_i32_0 : i32, i32
  }
  func.func @transform_3(%arg0: i32, %arg1: memref<6xi32, #tpu.memory_space<smem>>) -> (i32, i32, i32) {
    %c0_i32 = arith.constant 0 : i32
    %c0_i32_0 = arith.constant 0 : i32
    %c0_i32_1 = arith.constant 0 : i32
    %c0_i32_2 = arith.constant 0 : i32
    return %c0_i32, %c0_i32_0, %c0_i32_1 : i32, i32, i32
  }
  func.func @transform_4(%arg0: i32, %arg1: memref<6xi32, #tpu.memory_space<smem>>) -> (i32, i32) {
    %c0_i32 = arith.constant 0 : i32
    %c0_i32_0 = arith.constant 0 : i32
    %c0_i32_1 = arith.constant 0 : i32
    return %c0_i32, %c0_i32_0 : i32, i32
  }
  func.func @transform_5(%arg0: i32, %arg1: memref<6xi32, #tpu.memory_space<smem>>) -> (i32, i32) {
    %c0_i32 = arith.constant 0 : i32
    %c0_i32_0 = arith.constant 0 : i32
    %c0_i32_1 = arith.constant 0 : i32
    return %c0_i32, %c0_i32_0 : i32, i32
  }
  func.func @transform_6(%arg0: i32, %arg1: memref<6xi32, #tpu.memory_space<smem>>) -> (i32, i32) {
    %c0_i32 = arith.constant 0 : i32
    %c0_i32_0 = arith.constant 0 : i32
    %c0_i32_1 = arith.constant 0 : i32
    return %c0_i32, %c0_i32_0 : i32, i32
  }
  func.func @transform_7(%arg0: i32, %arg1: memref<6xi32, #tpu.memory_space<smem>>) -> (i32, i32) {
    %c0_i32 = arith.constant 0 : i32
    %c0_i32_0 = arith.constant 0 : i32
    %c0_i32_1 = arith.constant 0 : i32
    return %c0_i32, %c0_i32_0 : i32, i32
  }
  func.func @transform_8(%arg0: i32, %arg1: memref<6xi32, #tpu.memory_space<smem>>) -> (i32, i32) {
    %c0_i32 = arith.constant 0 : i32
    %c0_i32_0 = arith.constant 0 : i32
    %c0_i32_1 = arith.constant 0 : i32
    return %c0_i32, %c0_i32_0 : i32, i32
  }
  func.func @transform_9(%arg0: i32, %arg1: memref<6xi32, #tpu.memory_space<smem>>) -> (i32, i32) {
    %c0_i32 = arith.constant 0 : i32
    %c0_i32_0 = arith.constant 0 : i32
    %c0_i32_1 = arith.constant 0 : i32
    return %c0_i32, %c0_i32_0 : i32, i32
  }
  func.func @transform_10(%arg0: i32, %arg1: memref<6xi32, #tpu.memory_space<smem>>) -> (i32, i32) {
    %c0_i32 = arith.constant 0 : i32
    %c0_i32_0 = arith.constant 0 : i32
    %c0_i32_1 = arith.constant 0 : i32
    return %c0_i32, %c0_i32_0 : i32, i32
  }
  func.func @transform_11(%arg0: i32, %arg1: memref<6xi32, #tpu.memory_space<smem>>) -> (i32, i32) {
    %c0_i32 = arith.constant 0 : i32
    %c0_i32_0 = arith.constant 0 : i32
    %c0_i32_1 = arith.constant 0 : i32
    return %c0_i32, %c0_i32_0 : i32, i32
  }
  func.func @transform_12(%arg0: i32, %arg1: memref<6xi32, #tpu.memory_space<smem>>) -> (i32, i32) {
    %c0_i32 = arith.constant 0 : i32
    %c0_i32_0 = arith.constant 0 : i32
    %c0_i32_1 = arith.constant 0 : i32
    return %c0_i32, %c0_i32_0 : i32, i32
  }
  func.func @transform_13(%arg0: i32, %arg1: memref<6xi32, #tpu.memory_space<smem>>) -> (i32, i32) {
    %c0_i32 = arith.constant 0 : i32
    %c0_i32_0 = arith.constant 0 : i32
    %c0_i32_1 = arith.constant 0 : i32
    return %c0_i32, %c0_i32_0 : i32, i32
  }
  func.func @transform_14(%arg0: i32, %arg1: memref<6xi32, #tpu.memory_space<smem>>) -> (i32, i32) {
    %c0_i32 = arith.constant 0 : i32
    %c0_i32_0 = arith.constant 0 : i32
    %c0_i32_1 = arith.constant 0 : i32
    return %c0_i32, %c0_i32_0 : i32, i32
  }
  func.func @transform_15(%arg0: i32, %arg1: memref<6xi32, #tpu.memory_space<smem>>) -> (i32, i32) {
    %c0_i32 = arith.constant 0 : i32
    %c0_i32_0 = arith.constant 0 : i32
    %c0_i32_1 = arith.constant 0 : i32
    return %c0_i32, %c0_i32_0 : i32, i32
  }
  func.func @transform_16(%arg0: i32, %arg1: memref<6xi32, #tpu.memory_space<smem>>) -> (i32, i32) {
    %c0_i32 = arith.constant 0 : i32
    %c0_i32_0 = arith.constant 0 : i32
    %c0_i32_1 = arith.constant 0 : i32
    return %c0_i32, %c0_i32_0 : i32, i32
  }
  func.func @transform_17(%arg0: i32, %arg1: memref<6xi32, #tpu.memory_space<smem>>) -> (i32, i32) {
    %c0_i32 = arith.constant 0 : i32
    %c0_i32_0 = arith.constant 0 : i32
    %c0_i32_1 = arith.constant 0 : i32
    return %c0_i32, %c0_i32_0 : i32, i32
  }
  func.func @transform_18(%arg0: i32, %arg1: memref<6xi32, #tpu.memory_space<smem>>) -> (i32, i32) {
    %c0_i32 = arith.constant 0 : i32
    %c0_i32_0 = arith.constant 0 : i32
    %c0_i32_1 = arith.constant 0 : i32
    return %c0_i32, %c0_i32_0 : i32, i32
  }
  func.func @transform_19(%arg0: i32, %arg1: memref<6xi32, #tpu.memory_space<smem>>) -> (i32, i32) {
    %c0_i32 = arith.constant 0 : i32
    %c0_i32_0 = arith.constant 0 : i32
    %c0_i32_1 = arith.constant 0 : i32
    return %c0_i32, %c0_i32_0 : i32, i32
  }
  func.func @transform_20(%arg0: i32, %arg1: memref<6xi32, #tpu.memory_space<smem>>) -> (i32, i32) {
    %c0_i32 = arith.constant 0 : i32
    %c0_i32_0 = arith.constant 0 : i32
    %c0_i32_1 = arith.constant 0 : i32
    return %c0_i32, %c0_i32_0 : i32, i32
  }
  func.func @transform_21(%arg0: i32, %arg1: memref<6xi32, #tpu.memory_space<smem>>) -> (i32, i32) {
    %c0_i32 = arith.constant 0 : i32
    %c0_i32_0 = arith.constant 0 : i32
    %c0_i32_1 = arith.constant 0 : i32
    return %c0_i32, %c0_i32_0 : i32, i32
  }
  func.func @transform_22(%arg0: i32, %arg1: memref<6xi32, #tpu.memory_space<smem>>) -> (i32, i32) {
    %c0_i32 = arith.constant 0 : i32
    %c0_i32_0 = arith.constant 0 : i32
    %c0_i32_1 = arith.constant 0 : i32
    return %c0_i32, %c0_i32_0 : i32, i32
  }
  func.func @transform_23(%arg0: i32, %arg1: memref<6xi32, #tpu.memory_space<smem>>) -> (i32, i32, i32) {
    %c0_i32 = arith.constant 0 : i32
    %c0_i32_0 = arith.constant 0 : i32
    %c0_i32_1 = arith.constant 0 : i32
    %c0_i32_2 = arith.constant 0 : i32
    return %c0_i32, %c0_i32_0, %c0_i32_1 : i32, i32, i32
  }
}

</mosaic_0001>

<bundles_post_ra>
// kernel: tpu_custom_call.1
= control target key start
LH: loop header
LB: loop body
LE: loop exit
PB: predicated region body
PF: predicated region fallthrough
CT: control target
= control target key end

     0   :  { %s19671_s0 = inlined_call_operand.hbm [shape: s32[6], index: 0, kind: input, shape index: {}]   ;;  %s19672_s1 = inlined_call_operand.hbm [shape: bf16[8,8,128], index: 1, kind: input, shape index: {}]   ;;  %s19673_s2 = inlined_call_operand.vmem [shape: f32[8,8,1], index: 2, kind: input, shape index: {}]   ;;  %s19674_s3 = inlined_call_operand.vmem [shape: f32[8,8], index: 3, kind: input, shape index: {}]   ;;  %s19675_s4 = inlined_call_operand.vmem [shape: f32[5,8,128], index: 4, kind: input, shape index: {}]   ;;  %s19676_s5 = inlined_call_operand.hbm [shape: bf16[256,128], index: 5, kind: input, shape index: {}]   ;;  %s19677_s6 = inlined_call_operand.hbm [shape: bf16[128,384], index: 6, kind: input, shape index: {}]   ;;  %s19678_s7 = inlined_call_operand.hbm [shape: bf16[128,384], index: 7, kind: input, shape index: {}]   ;;  %s19679_s8 = inlined_call_operand.hbm [shape: f32[1,384], index: 8, kind: input, shape index: {}]   ;;  %s19680_s9 = inlined_call_operand.hbm [shape: f32[1,384], index: 9, kind: input, shape index: {}]   ;;  %s19681_s10 = inlined_call_operand.vmem [shape: bf16[128,128], index: 10, kind: input, shape index: {}]   ;;  %s19682_s11 = inlined_call_operand.hbm [shape: f32[1,128], index: 11, kind: input, shape index: {}]   ;;  %s19683_s12 = inlined_call_operand.hbm [shape: bf16[128,128], index: 12, kind: input, shape index: {}]   ;;  %s19684_s13 = inlined_call_operand.hbm [shape: bf16[128,128], index: 13, kind: input, shape index: {}]   ;;  %s19685_s14 = inlined_call_operand.vmem [shape: f32[1,128], index: 14, kind: input, shape index: {}]   ;;  %s19686_s15 = inlined_call_operand.vmem [shape: f32[1,128], index: 15, kind: input, shape index: {}]   ;;  %s19687_s16 = inlined_call_operand.vmem [shape: f32[1,128], index: 16, kind: input, shape index: {}]   ;;  %s19688_s18 = inlined_call_operand.hbm [shape: bf16[256,384], index: 18, kind: input, shape index: {}]   ;;  %s19689_s19 = inlined_call_operand.vmem [shape: f32[1,384], index: 19, kind: input, shape index: {}]   ;;  %s19690_s20 = inlined_call_operand.hbm [shape: bf16[128,384], index: 20, kind: input, shape index: {}]   ;;  %s19691_s21 = inlined_call_operand.vmem [shape: f32[1,384], index: 21, kind: input, shape index: {}]   ;;  %s19692_s22 = inlined_call_operand.hbm [shape: bf16[384,256], index: 22, kind: input, shape index: {}]   ;;  %s19693_s23 = inlined_call_operand.vmem [shape: f32[1,256], index: 23, kind: input, shape index: {}]   ;;  %s19694_s24 = inlined_call_operand.hbm [shape: f32[6,8,256], index: 24, kind: output, shape index: {}]   ;;  %s19695_s17 = inlined_call_operand.<no memory space> [shape: f32[1,1], index: 17, kind: input, shape index: {}]  }
   0x1   :  { %19709 = sst [smem:[#allocation39_spill]] %s19671_s0 }
   0x2   :  { %19710 = sst [smem:[#allocation40_spill]] %s19672_s1  ;;  %s19720_s27 = sld [smem:[#allocation39_spill]] }
   0x3   :  { %19711 = sst [smem:[#allocation41_spill]] %s19673_s2 }
   0x4   :  { %19712 = sst [smem:[#allocation42_spill]] %s19674_s3 }
   0x5   :  { %19713 = sst [smem:[#allocation43_spill]] %s19675_s4 }
   0x6   :  { %19714 = sst [smem:[#allocation44_spill]] %s19676_s5 }
   0x7   :  { %19715 = sst [smem:[#allocation45_spill]] %s19677_s6 }
   0x8   :  { %19716 = sst [smem:[#allocation46_spill]] %s19678_s7 }
   0x9   :  { %19717 = sst [smem:[#allocation47_spill]] %s19679_s8 }
   0xa   :  { %19718 = sst [smem:[#allocation48_spill]] %s19689_s19  ;;  %s17559_s19 = scalar_lea.hbm %s19720_s27, 16 }
   0xb   :  { %19719 = sst [smem:[#allocation49_spill]] %s19694_s24  ;;  %p17560_p0 = scmp.ne.s32.totalorder %s19720_s27, %s17559_s19 }
   0xc   :  { %p17563_p1 = scmp.lt.u32.totalorder %s17559_s19, %s19720_s27 }
   0xe   :  { %p17565_p2 = pnand %p17563_p1, %p17560_p0 }
  0x10   :  { %17568 = shalt.err (!%p17565_p2)  }
  0x11   :  { %s17873_s0 = smov [#allocation7]   ;;  %v31_v0 = vstv %s19695_s17 }
  0x12   :  { %30 = dma.hbm_to_smem %s19720_s27, 16, %s17873_s0, [#allocation6]  ;;  %32 = vst [vmem:[#allocation8] sm:$0x1] %v31_v0 }
  0x13   :  { %17855 = dma.done.wait [#allocation6], 16 }
  0x14   :  { %17856 = vsyncadd [#allocation6], 4294967280 }
  0x15   :  { %34 = sfence }
  0x16   :  { %35 = vsyncpa [#allocation10], 0 }
  0x17   :  { %36 = vsyncpa [#allocation13], 0 }
  0x18   :  { %37 = vsyncpa [#allocation16], 0 }
  0x19   :  { %38 = vsyncpa [#allocation19], 0 }
  0x1a   :  { %39 = vsyncpa [#allocation22], 0 }
  0x1b   :  { %40 = vsyncpa [#allocation25], 0 }
  0x1c   :  { %41 = vsyncpa [#allocation28], 0 }
  0x1d   :  { %42 = vsyncpa [#allocation11], 0  ;;  %s17874_s19 = smov [#allocation12]   ;;  %s19721_s5 = sld [smem:[#allocation44_spill]] }
  0x1e   :  { %s66_s8 = sshll.u32 %s17874_s19, 4  ;;  %s67_s8 = int_to_ptr.vmem [resolvable:$true] %s66_s8 }
  0x23   :  { %s17569_s26 = scalar_lea.hbm %s19721_s5, 2048 }
  0x24   :  { %p17570_p3 = scmp.ne.s32.totalorder %s19721_s5, %s17569_s26  ;;  %p17573_p4 = scmp.lt.u32.totalorder %s17569_s26, %s19721_s5 }
  0x26   :  { %p17575_p5 = pnand %p17573_p4, %p17570_p3 }
  0x28   :  { %17578 = shalt.err (!%p17575_p5)
}
  0x29   :  { %s17579_s2 = scalar_lea.vmem %s67_s8, 2048  ;;  %p17584_p7 = scmp.lt.s32.totalorder %s67_s8, %s67_s8 }
  0x2a   :  { %p17580_p6 = scmp.ne.s32.totalorder %s67_s8, %s17579_s2  ;;  %p17585_p8 = scmp.lt.s32.totalorder %s17579_s2, %s17579_s2 }
  0x2c   :  { %p17586_p9 = por %p17585_p8, %p17584_p7 }
  0x2e   :  { %p17587_p10 = pnand %p17586_p9, %p17580_p6 }
  0x30   :  { %17590 = shalt.err (!%p17587_p10)
}
  0x31   :  { %s17875_s29 = smov 64   ;;  %s17876_s0 = smov 4  }
  0x32   :  { %72 = dma.hbm_to_vmem [thread:$0]  %s19721_s5, 2048, %s67_s8, [#allocation13], %s17875_s29, %s17875_s29, %s17876_s0  }
  0x33   :  { %s17877_s3 = smov [#allocation15]   ;;  %s17878_s19 = smov [#allocation18]  }
  0x34   :  { %s90_s25 = sshll.u32 %s17877_s3, 4  ;;  %s113_s4 = sshll.u32 %s17878_s19, 4  ;;  %s91_s25 = int_to_ptr.vmem [resolvable:$true] %s90_s25  ;;  %s114_s4 = int_to_ptr.vmem [resolvable:$true] %s113_s4 }
  0x35   :  { %s19722_s17 = sld [smem:[#allocation46_spill]] }
  0x3b   :  { %s17591_s27 = scalar_lea.hbm %s19722_s17, 3072 }
  0x3c   :  { %p17592_p11 = scmp.ne.s32.totalorder %s19722_s17, %s17591_s27  ;;  %p17595_p12 = scmp.lt.u32.totalorder %s17591_s27, %s19722_s17 }
  0x3e   :  { %p17597_p13 = pnand %p17595_p12, %p17592_p11 }
  0x40   :  { %17600 = shalt.err (!%p17597_p13)
}
  0x41   :  { %s17601_s8 = scalar_lea.vmem %s91_s25, 3072  ;;  %p17606_p1 = scmp.lt.s32.totalorder %s91_s25, %s91_s25 }
  0x42   :  { %p17602_p0 = scmp.ne.s32.totalorder %s91_s25, %s17601_s8  ;;  %p17607_p2 = scmp.lt.s32.totalorder %s17601_s8, %s17601_s8 }
  0x44   :  { %p17608_p3 = por %p17607_p2, %p17606_p1 }
  0x46   :  { %p17609_p4 = pnand %p17608_p3, %p17602_p0 }
  0x48   :  { %17612 = shalt.err (!%p17609_p4)
}
  0x49   :  { %s17879_s5 = smov 192   ;;  %s17880_s7 = smov 12  }
  0x4a   :  { %96 = dma.hbm_to_vmem [thread:$0]  %s19722_s17, 3072, %s91_s25, [#allocation16], %s17879_s5, %s17879_s5, %s17880_s7  }
  0x4b   :  { %s17613_s1 = scalar_lea.hbm %s19680_s9, 48 }
  0x4c   :  { %p17614_p5 = scmp.ne.s32.totalorder %s19680_s9, %s17613_s1  ;;  %p17617_p6 = scmp.lt.u32.totalorder %s17613_s1, %s19680_s9 }
  0x4e   :  { %p17619_p7 = pnand %p17617_p6, %p17614_p5 }
  0x50   :  { %17622 = shalt.err (!%p17619_p7)
}
  0x51   :  { %s17623_s2 = scalar_lea.vmem %s114_s4, 48  ;;  %s17627_s8 = scalar_lea.vmem %s114_s4, 64 }
  0x52   :  { %p17624_p8 = scmp.ne.s32.totalorder %s114_s4, %s17623_s2  ;;  %p17628_p9 = scmp.lt.s32.totalorder %s114_s4, %s114_s4 }
  0x53   :  { %p17629_p10 = scmp.lt.s32.totalorder %s17627_s8, %s17623_s2 }
  0x55   :  { %p17630_p11 = por %p17629_p10, %p17628_p9 }
  0x57   :  { %p17631_p12 = pnand %p17630_p11, %p17624_p8 }
  0x59   :  { %17634 = shalt.err (!%p17631_p12)
}
  0x5a   :  { %116 = dma.hbm_to_vmem [thread:$0]  %s19680_s9, 48, %s114_s4, [#allocation19]  }
  0x5b   :  { %s17881_s30 = smov [#allocation21]   ;;  %s17882_s24 = smov [#allocation24]  }
  0x5c   :  { %s134_s3 = sshll.u32 %s17881_s30, 4  ;;  %s166_s19 = sshll.u32 %s17882_s24, 4  ;;  %s135_s3 = int_to_ptr.vmem [resolvable:$true] %s134_s3  ;;  %s167_s19 = int_to_ptr.vmem [resolvable:$true] %s166_s19 }
  0x5d   :  { %s17635_s27 = scalar_lea.hbm %s19683_s12, 1024 }
  0x5e   :  { %p17636_p13 = scmp.ne.s32.totalorder %s19683_s12, %s17635_s27  ;;  %p17639_p0 = scmp.lt.u32.totalorder %s17635_s27, %s19683_s12 }
  0x60   :  { %p17641_p1 = pnand %p17639_p0, %p17636_p13 }
  0x62   :  { %17644 = shalt.err (!%p17641_p1)
}
  0x63   :  { %s17645_s9 = scalar_lea.vmem %s135_s3, 1024  ;;  %p17650_p3 = scmp.lt.s32.totalorder %s135_s3, %s135_s3 }
  0x64   :  { %p17646_p2 = scmp.ne.s32.totalorder %s135_s3, %s17645_s9  ;;  %p17651_p4 = scmp.lt.s32.totalorder %s17645_s9, %s17645_s9 }
  0x66   :  { %p17652_p5 = por %p17651_p4, %p17650_p3 }
  0x68   :  { %p17653_p6 = pnand %p17652_p5, %p17646_p2 }
  0x6a   :  { %17656 = shalt.err (!%p17653_p6)
}
  0x6b   :  { %140 = dma.hbm_to_vmem [thread:$0]  %s19683_s12, 1024, %s135_s3, [#allocation22], %s17875_s29, %s17875_s29, %s17876_s0  }
  0x6c   :  { %s17657_s24 = scalar_lea.hbm %s19688_s18, 6144 }
  0x6d   :  { %p17658_p7 = scmp.ne.s32.totalorder %s19688_s18, %s17657_s24  ;;  %p17661_p8 = scmp.lt.u32.totalorder %s17657_s24, %s19688_s18 }
  0x6f   :  { %p17663_p9 = pnand %p17661_p8, %p17658_p7 }
  0x71   :  { %17666 = shalt.err (!%p17663_p9)
}
  0x72   :  { %s17667_s6 = scalar_lea.vmem %s167_s19, 6144  ;;  %p17672_p11 = scmp.lt.s32.totalorder %s167_s19, %s167_s19 }
  0x73   :  { %p17668_p10 = scmp.ne.s32.totalorder %s167_s19, %s17667_s6  ;;  %p17673_p12 = scmp.lt.s32.totalorder %s17667_s6, %s17667_s6 }
  0x75   :  { %p17674_p13 = por %p17673_p12, %p17672_p11 }
  0x77   :  { %p17675_p0 = pnand %p17674_p13, %p17668_p10 }
  0x79   :  { %17678 = shalt.err (!%p17675_p0)
}
  0x7a   :  { %172 = dma.hbm_to_vmem [thread:$0]  %s19688_s18, 6144, %s167_s19, [#allocation25], %s17879_s5, %s17879_s5, %s17880_s7  }
  0x7b   :  { %s17883_s2 = smov [#allocation9]   ;;  %s17884_s9 = smov [#allocation14]  }
  0x7c   :  { %s48_s8 = sshll.u32 %s17883_s2, 4  ;;  %s78_s4 = sshll.u32 %s17884_s9, 4  ;;  %s49_s8 = int_to_ptr.vmem [resolvable:$true] %s48_s8  ;;  %s79_s4 = int_to_ptr.vmem [resolvable:$true] %s78_s4 }
  0x7d   :  { %s19723_s30 = sld [smem:[#allocation40_spill]] }
  0x83   :  { %s17679_s24 = scalar_lea.hbm %s19723_s30, 512 }
  0x84   :  { %p17680_p1 = scmp.ne.s32.totalorder %s19723_s30, %s17679_s24  ;;  %p17683_p2 = scmp.lt.u32.totalorder %s17679_s24, %s19723_s30 }
  0x86   :  { %p17685_p3 = pnand %p17683_p2, %p17680_p1 }
  0x88   :  { %17688 = shalt.err (!%p17685_p3)
}
  0x89   :  { %s17689_s18 = scalar_lea.vmem %s49_s8, 512  ;;  %p17694_p5 = scmp.lt.s32.totalorder %s49_s8, %s49_s8 }
  0x8a   :  { %p17690_p4 = scmp.ne.s32.totalorder %s49_s8, %s17689_s18  ;;  %p17695_p6 = scmp.lt.s32.totalorder %s17689_s18, %s17689_s18 }
  0x8c   :  { %p17696_p7 = por %p17695_p6, %p17694_p5 }
  0x8e   :  { %p17697_p8 = pnand %p17696_p7, %p17690_p4 }
  0x90   :  { %17700 = shalt.err (!%p17697_p8)
}
  0x91   :  { %54 = dma.hbm_to_vmem [thread:$0]  %s19723_s30, 512, %s49_s8, [#allocation10], %s17875_s29, %s17875_s29, %s17876_s0  }
  0x92   :  { %s19724_s2 = sld [smem:[#allocation45_spill]] }
  0x98   :  { %s17701_s9 = scalar_lea.hbm %s19724_s2, 3072 }
  0x99   :  { %p17702_p9 = scmp.ne.s32.totalorder %s19724_s2, %s17701_s9  ;;  %p17705_p10 = scmp.lt.u32.totalorder %s17701_s9, %s19724_s2 }
  0x9b   :  { %p17707_p11 = pnand %p17705_p10, %p17702_p9 }
  0x9d   :  { %17710 = shalt.err (!%p17707_p11)
}
  0x9e   :  { %s17711_s26 = scalar_lea.vmem %s79_s4, 3072  ;;  %p17716_p13 = scmp.lt.s32.totalorder %s79_s4, %s79_s4 }
  0x9f   :  { %p17712_p12 = scmp.ne.s32.totalorder %s79_s4, %s17711_s26  ;;  %p17717_p0 = scmp.lt.s32.totalorder %s17711_s26, %s17711_s26 }
  0xa1   :  { %p17718_p1 = por %p17717_p0, %p17716_p13 }
  0xa3   :  { %p17719_p2 = pnand %p17718_p1, %p17712_p12 }
  0xa5   :  { %17722 = shalt.err (!%p17719_p2)
}
  0xa6   :  { %84 = dma.hbm_to_vmem [thread:$0]  %s19724_s2, 3072, %s79_s4, [#allocation13], %s17879_s5, %s17879_s5, %s17880_s7  }
  0xa7   :  { %s17885_s27 = smov [#allocation17]   ;;  %s17886_s18 = smov [#allocation20]  }
  0xa8   :  { %s103_s28 = sshll.u32 %s17885_s27, 4  ;;  %s125_s19 = sshll.u32 %s17886_s18, 4  ;;  %s104_s28 = int_to_ptr.vmem [resolvable:$true] %s103_s28  ;;  %s126_s19 = int_to_ptr.vmem [resolvable:$true] %s125_s19 }
  0xa9   :  { %s19725_s3 = sld [smem:[#allocation47_spill]] }
  0xaf   :  { %s17723_s9 = scalar_lea.hbm %s19725_s3, 48 }
  0xb0   :  { %p17724_p3 = scmp.ne.s32.totalorder %s19725_s3, %s17723_s9  ;;  %p17727_p4 = scmp.lt.u32.totalorder %s17723_s9, %s19725_s3 }
  0xb2   :  { %p17729_p5 = pnand %p17727_p4, %p17724_p3 }
  0xb4   :  { %17732 = shalt.err (!%p17729_p5)
}
  0xb5   :  { %s17733_s4 = scalar_lea.vmem %s104_s28, 48  ;;  %s17737_s2 = scalar_lea.vmem %s104_s28, 64 }
  0xb6   :  { %p17734_p6 = scmp.ne.s32.totalorder %s104_s28, %s17733_s4  ;;  %p17738_p7 = scmp.lt.s32.totalorder %s104_s28, %s104_s28 }
  0xb7   :  { %p17739_p8 = scmp.lt.s32.totalorder %s17737_s2, %s17733_s4 }
  0xb9   :  { %p17740_p9 = por %p17739_p8, %p17738_p7 }
  0xbb   :  { %p17741_p10 = pnand %p17740_p9, %p17734_p6 }
  0xbd   :  { %17744 = shalt.err (!%p17741_p10)
}
  0xbe   :  { %106 = dma.hbm_to_vmem [thread:$0]  %s19725_s3, 48, %s104_s28, [#allocation16]  }
  0xbf   :  { %s17745_s18 = scalar_lea.hbm %s19682_s11, 16 }
  0xc0   :  { %p17746_p11 = scmp.ne.s32.totalorder %s19682_s11, %s17745_s18  ;;  %p17749_p12 = scmp.lt.u32.totalorder %s17745_s18, %s19682_s11 }
  0xc2   :  { %p17751_p13 = pnand %p17749_p12, %p17746_p11 }
  0xc4   :  { %17754 = shalt.err (!%p17751_p13)
}
  0xc5   :  { %s17755_s17 = scalar_lea.vmem %s126_s19, 16  ;;  %s17759_s24 = scalar_lea.vmem %s126_s19, 32 }
  0xc6   :  { %p17756_p0 = scmp.ne.s32.totalorder %s126_s19, %s17755_s17  ;;  %p17760_p1 = scmp.lt.s32.totalorder %s126_s19, %s126_s19 }
  0xc7   :  { %p17761_p2 = scmp.lt.s32.totalorder %s17759_s24, %s17755_s17 }
  0xc9   :  { %p17762_p3 = por %p17761_p2, %p17760_p1 }
  0xcb   :  { %p17763_p4 = pnand %p17762_p3, %p17756_p0 }
  0xcd   :  { %17766 = shalt.err (!%p17763_p4)
}
  0xce   :  { %128 = dma.hbm_to_vmem [thread:$0]  %s19682_s11, 16, %s126_s19, [#allocation19]  }
  0xcf   :  { %s17887_s1 = smov [#allocation23]   ;;  %s17888_s2 = smov [#allocation26]  }
  0xd0   :  { %s146_s4 = sshll.u32 %s17887_s1, 4  ;;  %s180_s26 = sshll.u32 %s17888_s2, 4  ;;  %s147_s4 = int_to_ptr.vmem [resolvable:$true] %s146_s4  ;;  %s181_s26 = int_to_ptr.vmem [resolvable:$true] %s180_s26 }
  0xd1   :  { %s17767_s27 = scalar_lea.hbm %s19684_s13, 1024 }
  0xd2   :  { %p17768_p5 = scmp.ne.s32.totalorder %s19684_s13, %s17767_s27  ;;  %p17771_p6 = scmp.lt.u32.totalorder %s17767_s27, %s19684_s13 }
  0xd4   :  { %p17773_p7 = pnand %p17771_p6, %p17768_p5 }
  0xd6   :  { %17776 = shalt.err (!%p17773_p7)
}
  0xd7   :  { %s17777_s11 = scalar_lea.vmem %s147_s4, 1024  ;;  %p17782_p9 = scmp.lt.s32.totalorder %s147_s4, %s147_s4 }
  0xd8   :  { %p17778_p8 = scmp.ne.s32.totalorder %s147_s4, %s17777_s11  ;;  %p17783_p10 = scmp.lt.s32.totalorder %s17777_s11, %s17777_s11 }
  0xda   :  { %p17784_p11 = por %p17783_p10, %p17782_p9 }
  0xdc   :  { %p17785_p12 = pnand %p17784_p11, %p17778_p8 }
  0xde   :  { %17788 = shalt.err (!%p17785_p12)
}
  0xdf   :  { %152 = dma.hbm_to_vmem [thread:$0]  %s19684_s13, 1024, %s147_s4, [#allocation22], %s17875_s29, %s17875_s29, %s17876_s0  }
  0xe0   :  { %s17789_s28 = scalar_lea.hbm %s19690_s20, 3072 }
  0xe1   :  { %p17790_p13 = scmp.ne.s32.totalorder %s19690_s20, %s17789_s28  ;;  %p17793_p0 = scmp.lt.u32.totalorder %s17789_s28, %s19690_s20 }
  0xe3   :  { %p17795_p1 = pnand %p17793_p0, %p17790_p13 }
  0xe5   :  { %17798 = shalt.err (!%p17795_p1)
}
  0xe6   :  { %s17799_s30 = scalar_lea.vmem %s181_s26, 3072  ;;  %p17804_p3 = scmp.lt.s32.totalorder %s181_s26, %s181_s26 }
  0xe7   :  { %p17800_p2 = scmp.ne.s32.totalorder %s181_s26, %s17799_s30  ;;  %p17805_p4 = scmp.lt.s32.totalorder %s17799_s30, %s17799_s30 }
  0xe9   :  { %p17806_p5 = por %p17805_p4, %p17804_p3 }
  0xeb   :  { %p17807_p6 = pnand %p17806_p5, %p17800_p2 }
  0xed   :  { %17810 = shalt.err (!%p17807_p6)
}
  0xee   :  { %186 = dma.hbm_to_vmem [thread:$0]  %s19690_s20, 3072, %s181_s26, [#allocation25], %s17879_s5, %s17879_s5, %s17880_s7  }
  0xef   :  { %s17889_s0 = smov [#allocation27]   ;;  %s17811_s6 = scalar_lea.hbm %s19692_s22, 6144 }
  0xf0   :  { %s194_s4 = sshll.u32 %s17889_s0, 4  ;;  %p17812_p7 = scmp.ne.s32.totalorder %s19692_s22, %s17811_s6  ;;  %s195_s4 = int_to_ptr.vmem [resolvable:$true] %s194_s4 }
  0xf1   :  { %p17815_p8 = scmp.lt.u32.totalorder %s17811_s6, %s19692_s22 }
  0xf3   :  { %p17817_p9 = pnand %p17815_p8, %p17812_p7 }
  0xf5   :  { %17820 = shalt.err (!%p17817_p9)
}
  0xf6   :  { %s17821_s25 = scalar_lea.vmem %s195_s4, 6144  ;;  %p17826_p11 = scmp.lt.s32.totalorder %s195_s4, %s195_s4 }
  0xf7   :  { %p17822_p10 = scmp.ne.s32.totalorder %s195_s4, %s17821_s25  ;;  %p17827_p12 = scmp.lt.s32.totalorder %s17821_s25, %s17821_s25 }
  0xf9   :  { %p17828_p13 = por %p17827_p12, %p17826_p11 }
  0xfb   :  { %p17829_p0 = pnand %p17828_p13, %p17822_p10 }
  0xfd   :  { %17832 = shalt.err (!%p17829_p0)
}
  0xfe   :  { %s17890_s20 = smov 128   ;;  %s17891_s5 = smov 8  }
  0xff   :  { %200 = dma.hbm_to_vmem [thread:$0]  %s19692_s22, 6144, %s195_s4, [#allocation28], %s17890_s20, %s17890_s20, %s17891_s5  }
 0x100   :  { %17857 = dma.done.wait [#allocation10], 512  }
 0x101   :  { %17858 = vsyncadd [#allocation10], 4294966784 }
 0x102   :  { %17859 = dma.done.wait [#allocation13], 5120  }
 0x103   :  { %17860 = vsyncadd [#allocation13], 4294962176 }
 0x104   :  { %17861 = dma.done.wait [#allocation16], 3120  }
 0x105   :  { %17862 = vsyncadd [#allocation16], 4294964176 }
 0x106   :  { %17863 = dma.done.wait [#allocation19], 64  }
 0x107   :  { %17864 = vsyncadd [#allocation19], 4294967232 }
 0x108   :  { %17865 = dma.done.wait [#allocation22], 2048  }
 0x109   :  { %17866 = vsyncadd [#allocation22], 4294965248 }
 0x10a   :  { %17867 = dma.done.wait [#allocation25], 9216  }
 0x10b   :  { %17868 = vsyncadd [#allocation25], 4294958080 }
 0x10c   :  { %17869 = dma.done.wait [#allocation28], 6144  }
 0x10d   :  { %17870 = vsyncadd [#allocation28], 4294961152  ;;  %v19704_v1 = vmov 0.0   ;;  %s18213_s22 = sld [smem:[#allocation7 + $0x1]]  ;;  %v17893_v2 = vmov 0   ;;  %v258_v16 = vld [vmem:[#allocation14 + $0x60] sm:$0xff] }
 0x10e   :  { %5016 = vst [vmem:[#allocation29 + $0x50] sm:$0xff] %v19704_v1  ;;  %5017 = vst [vmem:[#allocation29 + $0x58] sm:$0xff] %v19704_v1  ;;  %451 = vmatprep.mubr.bf16.mxu1 %v17893_v2  ;;  %709 = vmatprep.mubr.bf16.mxu0 %v17893_v2  ;;  %v18220_v3 = vld [vmem:[#allocation14 + $0x4] ss:$12 sps:$4 sm:$0xff]   ;;  %v18222_v4 = vld [vmem:[#allocation14] ss:$12 sps:$4 sm:$0xff]  }
 0x10f   :  { %5014 = vst [vmem:[#allocation5] sm:$0xff] %v19704_v1  ;;  %16035 = vset.pattern.permute.xlu0 %v17893_v2  ;;  %16036 = vset.pattern.permute.xlu1 %v17893_v2  ;;  %v18225_v5 = vld [vmem:[#allocation14 + $0x1c] ss:$12 sps:$4 sm:$0xff]   ;;  %v18228_v6 = vld [vmem:[#allocation15 + $0x4] ss:$12 sps:$4 sm:$0xff]   ;;  %vm17894_vm0 = vmmov 0  }
 0x110   :  { %419 = vmatprep.subr.bf16.mxu1 %v18220_v3  ;;  %v18230_v7 = vld [vmem:[#allocation14 + $0x18] ss:$12 sps:$4 sm:$0xff]   ;;  %v16045_v8 = vld [vmem:[#allocation15] ss:$12 sps:$4 sm:$0xff]   ;;  %677 = vmatprep.subr.bf16.mxu0 %v18228_v6  ;;  %v16048_v10 = vld [vmem:[#allocation15 + $0x1c] ss:$12 sps:$4 sm:$0xff]  }
 0x111   :  { %420 = vmatpush1.bf16.msra.mxu1 %v18222_v4  ;;  %v18233_v9 = vld [vmem:[#allocation14 + $0x34] ss:$12 sps:$4 sm:$0xff]   ;;  %678 = vmatpush1.bf16.msra.mxu0 %v16045_v8  ;;  %v16051_v11 = vld [vmem:[#allocation15 + $0x18] ss:$12 sps:$4 sm:$0xff]   ;;  %v18237_v12 = vld [vmem:[#allocation14 + $0x30] ss:$12 sps:$4 sm:$0xff]  }
 0x112   :  { %421 = vmatprep.subr.bf16.mxu1 %v18225_v5  ;;  %679 = vmatprep.subr.bf16.mxu0 %v16048_v10  ;;  %v18240_v13 = vld [vmem:[#allocation14 + $0x4c] ss:$12 sps:$4 sm:$0xff]   ;;  %v16054_v14 = vld [vmem:[#allocation15 + $0x34] ss:$12 sps:$4 sm:$0xff]   ;;  %v16057_v18 = vld [vmem:[#allocation15 + $0x30] ss:$12 sps:$4 sm:$0xff]  }
 0x113   :  { %v18242_v15 = vld [vmem:[#allocation14 + $0x48] ss:$12 sps:$4 sm:$0xff]   ;;  %v260_v17 = vld [vmem:[#allocation14 + $0x6c] sm:$0xff]  ;;  %v18255_v26 = vld [vmem:[#allocation14 + $0x78] ss:$12 sps:$4 sm:$0xff]   ;;  %s19726_s28 = sld [smem:[#allocation41_spill]] }
 0x114   :  { %v16059_v19 = vld [vmem:[#allocation15 + $0x4c] ss:$12 sps:$4 sm:$0xff]   ;;  %v18246_v20 = vcombine.high %v258_v16, %v260_v17  ;;  %v16062_v21 = vld [vmem:[#allocation15 + $0x48] ss:$12 sps:$4 sm:$0xff]   ;;  %v18249_v22 = vcombine.low %v258_v16, %v260_v17  ;;  %v16065_v23 = vld [vmem:[#allocation15 + $0x64] ss:$12 sps:$4 sm:$0xff]  }
 0x115   :  { %422 = vmatpush1.bf16.msra.mxu1 %v18230_v7  ;;  %680 = vmatpush1.bf16.msra.mxu0 %v16051_v11  ;;  %v18252_v24 = vld [vmem:[#allocation14 + $0x7c] ss:$12 sps:$4 sm:$0xff]   ;;  %v16068_v25 = vld [vmem:[#allocation15 + $0x60] ss:$12 sps:$4 sm:$0xff]   ;;  %v16074_v30 = vld [vmem:[#allocation15 + $0x78] ss:$12 sps:$4 sm:$0xff]  }
 0x116   :  { %423 = vmatprep.subr.bf16.mxu1 %v18233_v9  ;;  %681 = vmatprep.subr.bf16.mxu0 %v16054_v14  ;;  %v16071_v27 = vld [vmem:[#allocation15 + $0x7c] ss:$12 sps:$4 sm:$0xff]   ;;  %v18258_v28 = vld [vmem:[#allocation14 + $0x94] ss:$12 sps:$4 sm:$0xff]   ;;  %v18264_v32 = vld [vmem:[#allocation14 + $0xac] ss:$12 sps:$4 sm:$0xff]  }
 0x117   :  { %v18260_v29 = vld [vmem:[#allocation14 + $0x90] ss:$12 sps:$4 sm:$0xff]   ;;  %v16077_v31 = vld [vmem:[#allocation15 + $0x94] ss:$12 sps:$4 sm:$0xff]   ;;  %v16081_v35 = vld [vmem:[#allocation15 + $0xac] ss:$12 sps:$4 sm:$0xff]  }
 0x118   :  { %v18266_v33 = vld [vmem:[#allocation14 + $0xa8] ss:$12 sps:$4 sm:$0xff]   ;;  %v16080_v34 = vld [vmem:[#allocation15 + $0x90] ss:$12 sps:$4 sm:$0xff]   ;;  %v18270_v36 = vld [vmem:[#allocation9] sm:$0xf] }
 0x119   :  { %424 = vmatpush1.bf16.msra.mxu1 %v18237_v12  ;;  %682 = vmatpush1.bf16.msra.mxu0 %v16057_v18  ;;  %v16084_v37 = vld [vmem:[#allocation15 + $0xa8] ss:$12 sps:$4 sm:$0xff]   ;;  %v16085_v39 = vld [vmem:[#allocation14 + $0x20] ss:$12 sps:$4 sm:$0xff]   ;;  %v16086_v41 = vld [vmem:[#allocation14 + $0x38] ss:$12 sps:$4 sm:$0xff]  }
 0x11a   :  { %425 = vmatprep.subr.bf16.mxu1 %v18240_v13  ;;  %683 = vmatprep.subr.bf16.mxu0 %v16059_v19  ;;  %v16083_v38 = vld [vmem:[#allocation14 + $0x8] ss:$12 sps:$4 sm:$0xff]   ;;  %v13710_v43 = vld [vmem:[%s19726_s28 + $0x10] sm:$0xff]  ;;  %vm5012_vm1 = vcmask 64512   ;;  %s19727_s12 = sld [smem:[#allocation43_spill]]  ;;  %vm5332_vm2 = vcmask 1041409  }
 0x11b   :  { %v241_v40 = vld [vmem:[%s19726_s28] sm:$0xff]  ;;  %v13761_v44 = vld [vmem:[%s19726_s28 + $0x18] sm:$0xff]  ;;  %v13659_v46 = vld [vmem:[%s19726_s28 + $0x8] sm:$0xff]  ;;  %v1902_v47 = vsub.f32 1.0, %v13710_v43  ;;  %vm5334_vm3 = vcmask 1042434   ;;  %vm5336_vm4 = vcmask 1043459  }
 0x11c   :  { %781 = vperm.xlu0 %16035, %v241_v40   ;;  %v786_v42 = vsub.f32 1.0, %v241_v40  ;;  %v13812_v45 = vld [vmem:[%s19726_s28 + $0x20] sm:$0xff]  ;;  %v2460_v48 = vsub.f32 1.0, %v13761_v44  ;;  %1338 = vperm.xlu1 %16036, %v13659_v46   ;;  %v1344_v50 = vsub.f32 1.0, %v13659_v46  ;;  %v16090_v54 = vld [vmem:[#allocation14 + $0x98] ss:$12 sps:$4 sm:$0xff]  }
 0x11d   :  { %426 = vmatpush1.bf16.msra.mxu1 %v18242_v15  ;;  %684 = vmatpush1.bf16.msra.mxu0 %v16062_v21  ;;  %v3018_v49 = vsub.f32 1.0, %v13812_v45  ;;  %v16087_v51 = vld [vmem:[#allocation14 + $0x50] ss:$12 sps:$4 sm:$0xff]   ;;  %v16088_v52 = vld [vmem:[#allocation14 + $0x68] ss:$12 sps:$4 sm:$0xff]   ;;  %vm5338_vm5 = vcmask 1044484  }
 0x11e   :  { %427 = vmatprep.subr.bf16.mxu1 %v18246_v20  ;;  %685 = vmatprep.subr.bf16.mxu0 %v16065_v23  ;;  %v16089_v53 = vld [vmem:[#allocation14 + $0x80] ss:$12 sps:$4 sm:$0xff]   ;;  %v13863_v55 = vld [vmem:[%s19726_s28 + $0x28] sm:$0xff]  ;;  %s19728_s26 = sld [smem:[#allocation42_spill]]  ;;  %vm5340_vm6 = vcmask 1045509   ;;  %vm5342_vm7 = vcmask 1046534  }
 0x11f   :  { %v3576_v56 = vsub.f32 1.0, %v13863_v55  ;;  %v16091_v57 = vld [vmem:[#allocation14 + $0xb0] ss:$12 sps:$4 sm:$0xff]   ;;  %v16092_v60 = vld [vmem:[#allocation15 + $0x8] ss:$12 sps:$4 sm:$0xff]   ;;  %vm5344_vm8 = vcmask 1047559  }
 0x120   :  { %789 = vperm.xlu0 %16035, %v786_v42   ;;  %1347 = vperm.xlu1 %16036, %v1344_v50   ;;  %v13914_v58 = vld [vmem:[%s19726_s28 + $0x30] sm:$0xff]  ;;  %v13965_v61 = vld [vmem:[%s19726_s28 + $0x38] sm:$0xff]  ;;  %v276_v42 = vlaneseq  ;;  %s19729_s1 = sld [smem:[#allocation48_spill]]  ;;  %p14168_p2 = scmp.ne.s32.totalorder %s18213_s22, 0 }
 0x121   :  { %428 = vmatpush1.bf16.msra.mxu1 %v18249_v22  ;;  %686 = vmatpush1.bf16.msra.mxu0 %v16068_v25  ;;  %v4134_v59 = vsub.f32 1.0, %v13914_v58  ;;  %v16093_v62 = vld [vmem:[#allocation15 + $0x20] ss:$12 sps:$4 sm:$0xff]   ;;  %v16094_v63 = vld [vmem:[#allocation15 + $0x38] ss:$12 sps:$4 sm:$0xff]  }
 0x122   :  { %429 = vmatprep.subr.bf16.mxu1 %v18252_v24  ;;  %687 = vmatprep.subr.bf16.mxu0 %v16071_v27  ;;  %v16095_v0 = vld [vmem:[#allocation15 + $0x50] ss:$12 sps:$4 sm:$0xff]   ;;  %v16102_v10 = vld [vmem:[#allocation14 + $0x38] ss:$12 sps:$4 sm:$0xff]   ;;  %v16612_v14 = vld [vmem:[#allocation15] ss:$12 sps:$4 sm:$0xff]  }
 0x123   :  { %v18342_v8 = vld [vmem:[#allocation29 + $0x50] sm:$0xff]  ;;  %v16619_v25 = vld [vmem:[#allocation15 + $0x64] ss:$12 sps:$4 sm:$0xff]  }
 0x124   :  { %1896 = vperm.xlu0 %16035, %v13710_v43   ;;  %1905 = vperm.xlu1 %16036, %v1902_v47   ;;  %v16103_v11 = vld [vmem:[#allocation14 + $0x50] ss:$12 sps:$4 sm:$0xff]   ;;  %v16105_v16 = vld [vmem:[#allocation14 + $0x80] ss:$12 sps:$4 sm:$0xff]   ;;  %v16614_v17 = vld [vmem:[#allocation15 + $0x18] ss:$12 sps:$4 sm:$0xff]  }
 0x125   :  { %430 = vmatpush1.bf16.msra.mxu1 %v18255_v26  ;;  %688 = vmatpush1.bf16.msra.mxu0 %v16074_v30  ;;  %v16615_v18 = vld [vmem:[#allocation15 + $0x34] ss:$12 sps:$4 sm:$0xff]   ;;  %v16106_v19 = vld [vmem:[#allocation14 + $0x98] ss:$12 sps:$4 sm:$0xff]   ;;  %v16107_v23 = vld [vmem:[#allocation14 + $0xb0] ss:$12 sps:$4 sm:$0xff]  }
 0x126   :  { %431 = vmatprep.subr.bf16.mxu1 %v18258_v28  ;;  %689 = vmatprep.subr.bf16.mxu0 %v16077_v31  ;;  %v16617_v21 = vld [vmem:[#allocation15 + $0x4c] ss:$12 sps:$4 sm:$0xff]   ;;  %v16623_v30 = vld [vmem:[#allocation15 + $0x94] ss:$12 sps:$4 sm:$0xff]   ;;  %v18364_v43 = vshrl.u32 %v276_v42, 7 }
 0x127   :  { %v16620_v27 = vld [vmem:[#allocation15 + $0x60] ss:$12 sps:$4 sm:$0xff]   ;;  %v16114_v40 = vld [vmem:[#allocation15 + $0x98] ss:$12 sps:$4 sm:$0xff]  }
 0x128   :  { %2454 = vperm.xlu0 %16035, %v13761_v44   ;;  %2463 = vperm.xlu1 %16036, %v2460_v48   ;;  %v16109_v31 = vld [vmem:[#allocation15 + $0x20] ss:$12 sps:$4 sm:$0xff]   ;;  %v18367_v44 = vsub.s32 0, %v18364_v43  ;;  %v18370_v46 = vsub.s32 1, %v18364_v43  ;;  %v532_v47 = vld [vmem:[#allocation18] sm:$0x7] }
 0x129   :  { %432 = vmatpush1.bf16.msra.mxu1 %v18260_v29  ;;  %690 = vmatpush1.bf16.msra.mxu0 %v16080_v34  ;;  %v16110_v34 = vld [vmem:[#allocation15 + $0x38] ss:$12 sps:$4 sm:$0xff]  }
 0x12a   :  { %433 = vmatprep.subr.bf16.mxu1 %v18264_v32  ;;  %691 = vmatprep.subr.bf16.mxu0 %v16081_v35  ;;  %v16626_v35 = vld [vmem:[#allocation15 + $0xa8] ss:$12 sps:$4 sm:$0xff]   ;;  %v537_v50 = vrot.slane %v532_v47, %v18367_v44 }
 0x12c   :  { %3012 = vperm.xlu0 %16035, %v13812_v45   ;;  %3021 = vperm.xlu1 %16036, %v3018_v49   ;;  %v274_v45 = vld [vmem:[#allocation17] sm:$0x7] }
 0x12d   :  { %434 = vmatpush1.bf16.msra.mxu1 %v18266_v33  ;;  %692 = vmatpush1.bf16.msra.mxu0 %v16084_v37  ;;  %v16111_v37 = vld [vmem:[#allocation15 + $0x50] ss:$12 sps:$4 sm:$0xff]   ;;  %v279_v48 = vrot.slane %v274_v45, %v18367_v44  ;;  %v283_v49 = vrot.slane %v274_v45, %v18370_v46 }
 0x12e   :  { %15305 = vmatprep.subr.bf16.mxu1 %v19704_v1  ;;  %975 = vmatprep.subr.bf16.mxu0 %v18220_v3  ;;  %v16096_v3 = vld [vmem:[#allocation15 + $0x68] ss:$12 sps:$4 sm:$0xff]  }
 0x130   :  { %452 = vmatmul.mubr.bf16.vlgmr.msra.gmra.mrb[0].mxu1 %v18270_v36  ;;  %710 = vmatmul.mubr.bf16.vlgmr.msra.gmra.mrb[0].mxu0 %v17893_v2 }
 0x131   :  { %15306 = vmatpush3.bf16.msra.mxu1 %v16083_v38  ;;  %15321 = vmatprep.mubr.msk.bf16.mxu1 %vm17894_vm0, %v19704_v1  ;;  %v16112_v38 = vld [vmem:[#allocation15 + $0x68] ss:$12 sps:$4 sm:$0xff]  }
 0x132   :  { %15307 = vmatprep.subr.bf16.mxu1 %v19704_v1  ;;  %976 = vmatpush1.bf16.msra.mxu0 %v18222_v4  ;;  %v16097_v4 = vld [vmem:[#allocation15 + $0x80] ss:$12 sps:$4 sm:$0xff]  }
 0x133   :  { %977 = vmatprep.subr.bf16.mxu0 %v18225_v5  ;;  %1007 = vmatprep.mubr.bf16.mxu0 %v17893_v2  ;;  %v16098_v5 = vld [vmem:[#allocation15 + $0x98] ss:$12 sps:$4 sm:$0xff]  }
 0x134   :  { %3570 = vperm.xlu0 %16035, %v13863_v55   ;;  %3579 = vperm.xlu1 %16036, %v3576_v56  }
 0x135   :  { %15308 = vmatpush3.bf16.msra.mxu1 %v16085_v39  ;;  %v16113_v39 = vld [vmem:[#allocation15 + $0x80] ss:$12 sps:$4 sm:$0xff]  }
 0x136   :  { %15309 = vmatprep.subr.bf16.mxu1 %v19704_v1  ;;  %978 = vmatpush1.bf16.msra.mxu0 %v18230_v7  ;;  %v16100_v7 = vld [vmem:[#allocation14 + $0x8] ss:$12 sps:$4 sm:$0xff]  }
 0x137   :  { %979 = vmatprep.subr.bf16.mxu0 %v18233_v9  ;;  %v16101_v9 = vld [vmem:[#allocation14 + $0x20] ss:$12 sps:$4 sm:$0xff]  }
 0x138   :  { %4128 = vperm.xlu0 %16035, %v13914_v58   ;;  %4137 = vperm.xlu1 %16036, %v4134_v59  }
 0x139   :  { %15310 = vmatpush3.bf16.msra.mxu1 %v16086_v41  ;;  %v16115_v41 = vld [vmem:[#allocation15 + $0xb0] ss:$12 sps:$4 sm:$0xff]  }
 0x13a   :  { %15311 = vmatprep.subr.bf16.mxu1 %v19704_v1  ;;  %980 = vmatpush1.bf16.msra.mxu0 %v18237_v12  ;;  %v795_v12 = vld [vmem:[#allocation9 + $0x4] sm:$0xf] }
 0x13b   :  { %981 = vmatprep.subr.bf16.mxu0 %v18240_v13  ;;  %v16104_v13 = vld [vmem:[#allocation14 + $0x68] ss:$12 sps:$4 sm:$0xff]  }
 0x13c   :  { %4686 = vperm.xlu0 %16035, %v13965_v61  }
 0x13d   :  { %15312 = vmatpush3.bf16.msra.mxu1 %v16087_v51 }
 0x13e   :  { %15313 = vmatprep.subr.bf16.mxu1 %v19704_v1  ;;  %982 = vmatpush1.bf16.msra.mxu0 %v18242_v15  ;;  %v16613_v15 = vld [vmem:[#allocation15 + $0x1c] ss:$12 sps:$4 sm:$0xff]  }
 0x13f   :  { %983 = vmatprep.subr.bf16.mxu0 %v18246_v20  ;;  %v16616_v20 = vld [vmem:[#allocation15 + $0x30] ss:$12 sps:$4 sm:$0xff]  }
 0x141   :  { %15314 = vmatpush3.bf16.msra.mxu1 %v16088_v52  ;;  %v541_v52 = vrot.slane %v532_v47, %v18370_v46 }
 0x142   :  { %15315 = vmatprep.subr.bf16.mxu1 %v19704_v1  ;;  %984 = vmatpush1.bf16.msra.mxu0 %v18249_v22 }
 0x143   :  { %985 = vmatprep.subr.bf16.mxu0 %v18252_v24  ;;  %v16618_v24 = vld [vmem:[#allocation15 + $0x48] ss:$12 sps:$4 sm:$0xff]  }
 0x145   :  { %15316 = vmatpush3.bf16.msra.mxu1 %v16089_v53 }
 0x146   :  { %15317 = vmatprep.subr.bf16.mxu1 %v19704_v1  ;;  %986 = vmatpush1.bf16.msra.mxu0 %v18255_v26  ;;  %v16108_v26 = vld [vmem:[#allocation15 + $0x8] ss:$12 sps:$4 sm:$0xff]  }
 0x147   :  { %987 = vmatprep.subr.bf16.mxu0 %v18258_v28  ;;  %v16621_v28 = vld [vmem:[#allocation15 + $0x7c] ss:$12 sps:$4 sm:$0xff]  }
 0x149   :  { %15318 = vmatpush3.bf16.msra.mxu1 %v16090_v54 }
 0x14a   :  { %15319 = vmatprep.subr.bf16.mxu1 %v19704_v1  ;;  %988 = vmatpush1.bf16.msra.mxu0 %v18260_v29  ;;  %v16622_v29 = vld [vmem:[#allocation15 + $0x78] ss:$12 sps:$4 sm:$0xff]  }
 0x14b   :  { %989 = vmatprep.subr.bf16.mxu0 %v18264_v32  ;;  %v16624_v32 = vld [vmem:[#allocation15 + $0x90] ss:$12 sps:$4 sm:$0xff]  }
 0x14d   :  { %15320 = vmatpush3.bf16.msra.mxu1 %v16091_v57 }
 0x14e   :  { %15325 = vmatprep.subr.bf16.mxu1 %v19704_v1  ;;  %990 = vmatpush1.bf16.msra.mxu0 %v18266_v33  ;;  %v16625_v33 = vld [vmem:[#allocation15 + $0xac] ss:$12 sps:$4 sm:$0xff]  }
 0x14f   :  { %1234 = vmatprep.subr.bf16.mxu0 %v18228_v6  ;;  %v16099_v6 = vld [vmem:[#allocation15 + $0xb0] ss:$12 sps:$4 sm:$0xff]  }
 0x150   :  { %15322 = vmatmul.mubr.bf16.vlgmr.msra.gmra.mrb[4].mxu1 %v18270_v36  ;;  %v16627_v36 = vld [vmem:[#allocation14 + $0x4] ss:$12 sps:$4 sm:$0xff]  }
 0x151   :  { %15326 = vmatpush3.bf16.msra.mxu1 %v16092_v60  ;;  %15341 = vmatprep.mubr.msk.bf16.mxu1 %vm17894_vm0, %v19704_v1 }
 0x152   :  { %15327 = vmatprep.subr.bf16.mxu1 %v19704_v1  ;;  %1008 = vmatmul.mubr.bf16.vlgmr.msra.gmra.mrb[4].mxu0 %v795_v12 }
 0x153   :  { %1235 = vmatpush1.bf16.msra.mxu0 %v16612_v14  ;;  %1266 = vmatprep.mubr.bf16.mxu0 %v17893_v2 }
 0x154   :  { %1236 = vmatprep.subr.bf16.mxu0 %v16613_v15 }
 0x155   :  { %15328 = vmatpush3.bf16.msra.mxu1 %v16093_v62 }
 0x156   :  { %15329 = vmatprep.subr.bf16.mxu1 %v19704_v1 }
 0x157   :  { %1237 = vmatpush1.bf16.msra.mxu0 %v16614_v17 }
 0x158   :  { %1238 = vmatprep.subr.bf16.mxu0 %v16615_v18 }
 0x159   :  { %15330 = vmatpush3.bf16.msra.mxu1 %v16094_v63 }
 0x15a   :  { %15331 = vmatprep.subr.bf16.mxu1 %v19704_v1 }
 0x15b   :  { %1239 = vmatpush1.bf16.msra.mxu0 %v16616_v20 }
 0x15c   :  { %1240 = vmatprep.subr.bf16.mxu0 %v16617_v21 }
 0x15d   :  { %15332 = vmatpush3.bf16.msra.mxu1 %v16095_v0 }
 0x15e   :  { %15333 = vmatprep.subr.bf16.mxu1 %v19704_v1 }
 0x15f   :  { %1241 = vmatpush1.bf16.msra.mxu0 %v16618_v24 }
 0x160   :  { %1242 = vmatprep.subr.bf16.mxu0 %v16619_v25 }
 0x161   :  { %15334 = vmatpush3.bf16.msra.mxu1 %v16096_v3 }
 0x162   :  { %15335 = vmatprep.subr.bf16.mxu1 %v19704_v1 }
 0x163   :  { %1243 = vmatpush1.bf16.msra.mxu0 %v16620_v27 }
 0x164   :  { %1244 = vmatprep.subr.bf16.mxu0 %v16621_v28 }
 0x165   :  { %15336 = vmatpush3.bf16.msra.mxu1 %v16097_v4 }
 0x166   :  { %15337 = vmatprep.subr.bf16.mxu1 %v19704_v1 }
 0x167   :  { %1245 = vmatpush1.bf16.msra.mxu0 %v16622_v29 }
 0x168   :  { %1246 = vmatprep.subr.bf16.mxu0 %v16623_v30 }
 0x169   :  { %15338 = vmatpush3.bf16.msra.mxu1 %v16098_v5 }
 0x16a   :  { %15339 = vmatprep.subr.bf16.mxu1 %v19704_v1 }
 0x16b   :  { %1247 = vmatpush1.bf16.msra.mxu0 %v16624_v32 }
 0x16c   :  { %1248 = vmatprep.subr.bf16.mxu0 %v16625_v33 }
 0x16d   :  { %15340 = vmatpush3.bf16.msra.mxu1 %v16099_v6 }
 0x16e   :  { %15345 = vmatprep.subr.bf16.mxu1 %v19704_v1 }
 0x16f   :  { %1249 = vmatpush1.bf16.msra.mxu0 %v16626_v35 }
 0x170   :  { %15342 = vmatmul.mubr.bf16.vlgmr.msra.gmra.mrb[8].mxu1 %v17893_v2  ;;  %1533 = vmatprep.subr.bf16.mxu0 %v16627_v36 }
 0x171   :  { %15361 = vmatprep.mubr.msk.bf16.mxu1 %vm17894_vm0, %v19704_v1  ;;  %15346 = vmatpush3.bf16.msra.mxu1 %v16100_v7 }
 0x172   :  { %15347 = vmatprep.subr.bf16.mxu1 %v18342_v8 }
 0x175   :  { %15348 = vmatpush3.bf16.msra.mxu1 %v16101_v9 }
 0x176   :  { %15349 = vmatprep.subr.bf16.mxu1 %v18342_v8 }
 0x179   :  { %15350 = vmatpush3.bf16.msra.mxu1 %v16102_v10 }
 0x17a   :  { %15351 = vmatprep.subr.bf16.mxu1 %v18342_v8 }
 0x17d   :  { %15352 = vmatpush3.bf16.msra.mxu1 %v16103_v11 }
 0x17e   :  { %15353 = vmatprep.subr.bf16.mxu1 %v18342_v8 }
 0x181   :  { %15354 = vmatpush3.bf16.msra.mxu1 %v16104_v13  ;;  %v18377_v13 = vsub.s32 2, %v18364_v43 }
 0x182   :  { %15355 = vmatprep.subr.bf16.mxu1 %v18342_v8 }
 0x183   :  { %v545_v15 = vrot.slane %v532_v47, %v18377_v13  ;;  %v287_v17 = vrot.slane %v274_v45, %v18377_v13  ;;  %v16117_v45 = vld [vmem:[#allocation14 + $0x20] ss:$12 sps:$4 sm:$0xff]   ;;  %v16629_v47 = vld [vmem:[#allocation14 + $0x1c] ss:$12 sps:$4 sm:$0xff]  }
 0x185   :  { %15356 = vmatpush3.bf16.msra.mxu1 %v16105_v16 }
 0x186   :  { %15357 = vmatprep.subr.bf16.mxu1 %v18342_v8 }
 0x189   :  { %15358 = vmatpush3.bf16.msra.mxu1 %v16106_v19 }
 0x18a   :  { %15359 = vmatprep.subr.bf16.mxu1 %v18342_v8 }
 0x18d   :  { %15360 = vmatpush3.bf16.msra.mxu1 %v16107_v23 }
 0x18e   :  { %15365 = vmatprep.subr.bf16.mxu1 %v18342_v8 }
 0x190   :  { %15362 = vmatmul.mubr.bf16.vlgmr.msra.gmra.mrb[12].mxu1 %v795_v12 }
 0x191   :  { %15366 = vmatpush3.bf16.msra.mxu1 %v16108_v26  ;;  %15381 = vmatprep.mubr.msk.bf16.mxu1 %vm17894_vm0, %v18342_v8 }
 0x192   :  { %15367 = vmatprep.subr.bf16.mxu1 %v18342_v8 }
 0x195   :  { %15368 = vmatpush3.bf16.msra.mxu1 %v16109_v31 }
 0x196   :  { %15369 = vmatprep.subr.bf16.mxu1 %v18342_v8 }
 0x199   :  { %15370 = vmatpush3.bf16.msra.mxu1 %v16110_v34 }
 0x19a   :  { %15371 = vmatprep.subr.bf16.mxu1 %v18342_v8 }
 0x19b   :  { %v782_v29 = vpop.permute.xlu0 %781 }
 0x19d   :  { %15372 = vmatpush3.bf16.msra.mxu1 %v16111_v37 }
 0x19e   :  { %15373 = vmatprep.subr.bf16.mxu1 %v18342_v8 }
 0x19f   :  { %v790_v35 = vpop.permute.xlu0 %789 }
 0x1a0   :  { %v792_v36 = vmul.f32 0.0, %v790_v35  ;;  %v18452_v35 = vld [vmem:[#allocation15 + $0xa8] ss:$12 sps:$4 sm:$0xff]  }
 0x1a1   :  { %15374 = vmatpush3.bf16.msra.mxu1 %v16112_v38 }
 0x1a2   :  { %15375 = vmatprep.subr.bf16.mxu1 %v18342_v8 }
 0x1a5   :  { %15376 = vmatpush3.bf16.msra.mxu1 %v16113_v39  ;;  %v16116_v39 = vld [vmem:[#allocation14 + $0x8] ss:$12 sps:$4 sm:$0xff]  }
 0x1a6   :  { %15377 = vmatprep.subr.bf16.mxu1 %v18342_v8 }
 0x1a9   :  { %15378 = vmatpush3.bf16.msra.mxu1 %v16114_v40 }
 0x1aa   :  { %15379 = vmatprep.subr.bf16.mxu1 %v18342_v8 }
 0x1ad   :  { %15380 = vmatpush3.bf16.msra.mxu1 %v16115_v41  ;;  %v16628_v41 = vld [vmem:[#allocation14] ss:$12 sps:$4 sm:$0xff]  }
 0x1ae   :  { %15385 = vmatprep.subr.bf16.mxu1 %v18342_v8 }
 0x203   :  { %v453_v51 = vpop.f32.mrb[0].mxu1  ;;  %v711_v58 = vpop.f32.mrb[0].mxu0 }
 0x204   :  { %v454_v53 = vadd.f32 %v453_v51, %v279_v48  ;;  %v455_v54 = vpop.f32.mrb[1].mxu1  ;;  %v713_v60 = vpop.f32.mrb[1].mxu0  ;;  %v16630_v48 = vld [vmem:[#allocation14 + $0x18] ss:$12 sps:$4 sm:$0xff]   ;;  %v16632_v51 = vld [vmem:[#allocation14 + $0x30] ss:$12 sps:$4 sm:$0xff]  }
 0x205   :  { %v456_v55 = vadd.f32 %v455_v54, %v283_v49  ;;  %v457_v56 = vpop.f32.mrb[2].mxu1  ;;  %v715_v63 = vpop.f32.mrb[2].mxu0  ;;  %v16118_v49 = vld [vmem:[#allocation14 + $0x38] ss:$12 sps:$4 sm:$0xff]  }
 0x206   :  { %v458_v57 = vpop.f32.mrb[3].mxu1  ;;  %v15874_v59 = vadd.f32 %v537_v50, %v454_v53  ;;  %v716_v3 = vpop.f32.mrb[3].mxu0  ;;  %v16631_v50 = vld [vmem:[#allocation14 + $0x34] ss:$12 sps:$4 sm:$0xff]   ;;  %v16637_v63 = vld [vmem:[#allocation14 + $0x7c] ss:$12 sps:$4 sm:$0xff]  }
 0x207   :  { %v15877_v61 = vadd.f32 %v541_v52, %v456_v55  ;;  %v16633_v52 = vld [vmem:[#allocation14 + $0x4c] ss:$12 sps:$4 sm:$0xff]   ;;  %v16634_v53 = vld [vmem:[#allocation14 + $0x48] ss:$12 sps:$4 sm:$0xff]  }
 0x208   :  { %v15875_v62 = vadd.f32 %v15874_v59, %v711_v58  ;;  %v16119_v58 = vld [vmem:[#allocation14 + $0x50] ss:$12 sps:$4 sm:$0xff]   ;;  %v16635_v59 = vld [vmem:[#allocation14 + $0x60] sm:$0xff] }
 0x209   :  { %v15878_v0 = vadd.f32 %v15877_v61, %v713_v60  ;;  %v16636_v60 = vld [vmem:[#allocation14 + $0x6c] sm:$0xff]  ;;  %v16638_v3 = vld [vmem:[#allocation14 + $0x78] ss:$12 sps:$4 sm:$0xff]  }
 0x20a   :  { %v13657_v7 = vmul.f32 -1.442695, %v15875_v62  ;;  %v13724_v61 = vcombine.high %v16635_v59, %v16636_v60  ;;  %v16121_v62 = vld [vmem:[#allocation14 + $0x68] ss:$12 sps:$4 sm:$0xff]  }
 0x20b   :  { %v13658_v10 = vmul.f32 -1.442695, %v15878_v0  ;;  %v16122_v0 = vld [vmem:[#allocation14 + $0x80] ss:$12 sps:$4 sm:$0xff]  }
 0x20c   :  { %16501 = vpow2.f32 %v13657_v7  ;;  %v16641_v7 = vld [vmem:[#allocation14 + $0xac] ss:$12 sps:$4 sm:$0xff]  }
 0x20d   :  { %16503 = vpow2.f32 %v13658_v10  ;;  %v18398_v10 = vld [vmem:[#allocation15 + $0x4] ss:$12 sps:$4 sm:$0xff]  }
 0x216   :  { %v16502_v11 = vpop.eup %16501 }
 0x217   :  { %v762_v12 = vadd.f32 1.0, %v16502_v11  ;;  %v16504_v14 = vpop.eup %16503  ;;  %v18401_v11 = vld [vmem:[#allocation15] ss:$12 sps:$4 sm:$0xff]  }
 0x218   :  { %v769_v16 = vadd.f32 1.0, %v16504_v14  ;;  %v1353_v14 = vld [vmem:[#allocation9 + $0x8] sm:$0xf] }
 0x219   :  { %16505 = vrcp.f32 %v762_v12  ;;  %v16128_v12 = vld [vmem:[#allocation15 + $0x8] ss:$12 sps:$4 sm:$0xff]  }
 0x21a   :  { %16507 = vrcp.f32 %v769_v16  ;;  %v18407_v16 = vld [vmem:[#allocation15 + $0x18] ss:$12 sps:$4 sm:$0xff]  }
 0x223   :  { %v494_v4 = vpop.f32.mrb[4].mxu1  ;;  %v16506_v21 = vpop.eup %16505 }
 0x224   :  { %v15323_v5 = vpop.f32.mrb[5].mxu1  ;;  %v495_v24 = vadd.f32 %v494_v4, %v287_v17  ;;  %v16508_v28 = vpop.eup %16507  ;;  %v16639_v4 = vld [vmem:[#allocation14 + $0x94] ss:$12 sps:$4 sm:$0xff]  }
 0x225   :  { %v497_v6 = vpop.f32.mrb[6].mxu1  ;;  %v775_v30 = vsub.f32 1.0, %v16508_v28  ;;  %v777_v33 = vmul.f32 0.0, %v16508_v28  ;;  %v16123_v5 = vld [vmem:[#allocation14 + $0x98] ss:$12 sps:$4 sm:$0xff]  }
 0x226   :  { %v15324_v9 = vpop.f32.mrb[7].mxu1  ;;  %v16640_v6 = vld [vmem:[#allocation14 + $0x90] ss:$12 sps:$4 sm:$0xff]   ;;  %v16132_v17 = vld [vmem:[#allocation15 + $0x20] ss:$12 sps:$4 sm:$0xff]  }
 0x227   :  { %v16642_v9 = vld [vmem:[#allocation14 + $0xa8] ss:$12 sps:$4 sm:$0xff]  }
 0x228   :  { %v18436_v28 = vld [vmem:[#allocation15 + $0x7c] ss:$12 sps:$4 sm:$0xff]  }
 0x243   :  { %v752_v18 = vpop.f32.mrb[8].mxu1 }
 0x244   :  { %v753_v19 = vadd.f32 %v752_v18, %v545_v15  ;;  %v15343_v20 = vpop.f32.mrb[9].mxu1  ;;  %v18405_v15 = vld [vmem:[#allocation15 + $0x1c] ss:$12 sps:$4 sm:$0xff]   ;;  %v18415_v18 = vld [vmem:[#allocation15 + $0x34] ss:$12 sps:$4 sm:$0xff]  }
 0x245   :  { %v755_v23 = vpop.f32.mrb[10].mxu1  ;;  %v16136_v20 = vld [vmem:[#allocation15 + $0x38] ss:$12 sps:$4 sm:$0xff]  }
 0x246   :  { %v772_v25 = vmul.f32 %v16506_v21, %v753_v19  ;;  %v15344_v26 = vpop.f32.mrb[11].mxu1  ;;  %v18417_v19 = vld [vmem:[#allocation15 + $0x30] ss:$12 sps:$4 sm:$0xff]   ;;  %v18422_v21 = vld [vmem:[#allocation15 + $0x4c] ss:$12 sps:$4 sm:$0xff]  }
 0x247   :  { %v18424_v23 = vld [vmem:[#allocation15 + $0x48] ss:$12 sps:$4 sm:$0xff]   ;;  %v18431_v26 = vld [vmem:[#allocation15 + $0x60] ss:$12 sps:$4 sm:$0xff]  }
 0x248   :  { %v773_v27 = vadd.f32 %v772_v25, %v495_v24  ;;  %v16140_v24 = vld [vmem:[#allocation15 + $0x50] ss:$12 sps:$4 sm:$0xff]  }
 0x249   :  { %v18429_v25 = vld [vmem:[#allocation15 + $0x64] ss:$12 sps:$4 sm:$0xff]  }
 0x24a   :  { %16509 = vtanh.f32 %v773_v27  ;;  %v16144_v27 = vld [vmem:[#allocation15 + $0x68] ss:$12 sps:$4 sm:$0xff]  }
 0x254   :  { %v16510_v31 = vpop.eup %16509 }
 0x255   :  { %v776_v32 = vmul.f32 %v16510_v31, %v775_v30  ;;  %v16148_v30 = vld [vmem:[#allocation15 + $0x80] ss:$12 sps:$4 sm:$0xff]  }
 0x256   :  { %v18443_v31 = vld [vmem:[#allocation15 + $0x94] ss:$12 sps:$4 sm:$0xff]  }
 0x257   :  { %v778_v34 = vadd.f32 %v777_v33, %v776_v32  ;;  %v18445_v32 = vld [vmem:[#allocation15 + $0x90] ss:$12 sps:$4 sm:$0xff]   ;;  %v16152_v33 = vld [vmem:[#allocation15 + $0x98] ss:$12 sps:$4 sm:$0xff]  }
 0x259   :  { %v784_v37 = vmul.f32 %v782_v29, %v778_v34  ;;  %v18438_v29 = vld [vmem:[#allocation15 + $0x78] ss:$12 sps:$4 sm:$0xff]  }
 0x25a   :  { %v18450_v34 = vld [vmem:[#allocation15 + $0xac] ss:$12 sps:$4 sm:$0xff]  }
 0x25b   :  { %785 = vst [vmem:[#allocation2] sm:$0xff] %v784_v37  ;;  %v18381_v38 = vadd.f32 %v792_v36, %v784_v37  ;;  %v16156_v36 = vld [vmem:[#allocation15 + $0xb0] ss:$12 sps:$4 sm:$0xff]  }
 0x25c   :  { %v18458_v37 = vld [vmem:[#allocation14 + $0x4] ss:$12 sps:$4 sm:$0xff]  }
 0x25d   :  { %v1056_v40 = vpack.c.bf16 %v18381_v38, %v18381_v38 }
 0x25f   :  { %1267 = vmatmul.mubr.bf16.vlgmr.msra.gmra.mrb[4].mxu0 %v1056_v40  ;;  %15382 = vmatmul.mubr.bf16.vlgmr.msra.gmra.mrb[16].mxu1 %v1056_v40  ;;  %v830_v40 = vld [vmem:[#allocation17] sm:$0x7] }
 0x260   :  { %1534 = vmatpush1.bf16.msra.mxu0 %v16628_v41  ;;  %15386 = vmatpush3.bf16.msra.mxu1 %v16116_v39  ;;  %v1089_v39 = vld [vmem:[#allocation18] sm:$0x7]  ;;  %v835_v41 = vrot.slane %v830_v40, %v18367_v44 }
 0x261   :  { %1535 = vmatprep.subr.bf16.mxu0 %v16629_v47  ;;  %15387 = vmatprep.subr.bf16.mxu1 %v18342_v8  ;;  %v839_v47 = vrot.slane %v830_v40, %v18370_v46 }
 0x262   :  { %1565 = vmatprep.mubr.bf16.mxu0 %v17893_v2  ;;  %15401 = vmatprep.mubr.msk.bf16.mxu1 %vm17894_vm0, %v18342_v8 }
 0x263   :  { %v18391_v54 = vpop.f32.mrb[12].mxu1 }
 0x264   :  { %1536 = vmatpush1.bf16.msra.mxu0 %v16630_v48  ;;  %15388 = vmatpush3.bf16.msra.mxu1 %v16117_v45  ;;  %v15363_v55 = vpop.f32.mrb[13].mxu1  ;;  %v1094_v45 = vrot.slane %v1089_v39, %v18367_v44  ;;  %v1098_v48 = vrot.slane %v1089_v39, %v18370_v46 }
 0x265   :  { %1537 = vmatprep.subr.bf16.mxu0 %v16631_v50  ;;  %15389 = vmatprep.subr.bf16.mxu1 %v18342_v8  ;;  %v1053_v56 = vpop.f32.mrb[14].mxu1 }
 0x266   :  { %v15364_v57 = vpop.f32.mrb[15].mxu1 }
 0x268   :  { %1538 = vmatpush1.bf16.msra.mxu0 %v16632_v51  ;;  %15390 = vmatpush3.bf16.msra.mxu1 %v16118_v49  ;;  %v15879_v49 = vadd.f32 %v1094_v45, %v835_v41 }
 0x269   :  { %1539 = vmatprep.subr.bf16.mxu0 %v16633_v52  ;;  %15391 = vmatprep.subr.bf16.mxu1 %v18342_v8  ;;  %v15881_v52 = vadd.f32 %v1098_v48, %v839_v47  ;;  %v16160_v48 = vld [vmem:[#allocation14 + $0x8] ss:$12 sps:$4 sm:$0xff]  }
 0x26c   :  { %1540 = vmatpush1.bf16.msra.mxu0 %v16634_v53  ;;  %15392 = vmatpush3.bf16.msra.mxu1 %v16119_v58 }
 0x26d   :  { %15393 = vmatprep.subr.bf16.mxu1 %v18342_v8  ;;  %1541 = vmatprep.subr.bf16.mxu0 %v13724_v61 }
 0x270   :  { %1542 = vmatpush1.bf16.msra.mxu0 %v18249_v22  ;;  %15394 = vmatpush3.bf16.msra.mxu1 %v16121_v62  ;;  %v16124_v22 = vld [vmem:[#allocation14 + $0xb0] ss:$12 sps:$4 sm:$0xff]  }
 0x271   :  { %1543 = vmatprep.subr.bf16.mxu0 %v16637_v63  ;;  %15395 = vmatprep.subr.bf16.mxu1 %v18342_v8 }
 0x274   :  { %1544 = vmatpush1.bf16.msra.mxu0 %v16638_v3  ;;  %15396 = vmatpush3.bf16.msra.mxu1 %v16122_v0 }
 0x275   :  { %1545 = vmatprep.subr.bf16.mxu0 %v16639_v4  ;;  %15397 = vmatprep.subr.bf16.mxu1 %v18342_v8 }
 0x278   :  { %1546 = vmatpush1.bf16.msra.mxu0 %v16640_v6  ;;  %15398 = vmatpush3.bf16.msra.mxu1 %v16123_v5  ;;  %v1102_v5 = vrot.slane %v1089_v39, %v18377_v13  ;;  %v843_v6 = vrot.slane %v830_v40, %v18377_v13 }
 0x279   :  { %1547 = vmatprep.subr.bf16.mxu0 %v16641_v7  ;;  %15399 = vmatprep.subr.bf16.mxu1 %v18342_v8 }
 0x27c   :  { %1548 = vmatpush1.bf16.msra.mxu0 %v16642_v9  ;;  %15400 = vmatpush3.bf16.msra.mxu1 %v16124_v22 }
 0x27d   :  { %15405 = vmatprep.subr.bf16.mxu1 %v18342_v8  ;;  %1792 = vmatprep.subr.bf16.mxu0 %v18398_v10 }
 0x27f   :  { %1566 = vmatmul.mubr.bf16.vlgmr.msra.gmra.mrb[8].mxu0 %v1353_v14  ;;  %15402 = vmatmul.mubr.bf16.vlgmr.msra.gmra.mrb[20].mxu1 %v1353_v14 }
 0x280   :  { %1793 = vmatpush1.bf16.msra.mxu0 %v18401_v11  ;;  %15406 = vmatpush3.bf16.msra.mxu1 %v16128_v12  ;;  %v1051_v12 = vadd.f32 %v18391_v54, %v843_v6  ;;  %v18472_v54 = vld [vmem:[#allocation14] ss:$12 sps:$4 sm:$0xff]  }
 0x281   :  { %15407 = vmatprep.subr.bf16.mxu1 %v18342_v8  ;;  %1824 = vmatprep.mubr.bf16.mxu0 %v17893_v2  ;;  %v16180_v6 = vld [vmem:[#allocation14 + $0x80] ss:$12 sps:$4 sm:$0xff]  }
 0x282   :  { %1794 = vmatprep.subr.bf16.mxu0 %v18405_v15  ;;  %15421 = vmatprep.mubr.msk.bf16.mxu1 %vm17894_vm0, %v18342_v8 }
 0x284   :  { %1795 = vmatpush1.bf16.msra.mxu0 %v18407_v16  ;;  %15408 = vmatpush3.bf16.msra.mxu1 %v16132_v17 }
 0x285   :  { %15409 = vmatprep.subr.bf16.mxu1 %v18342_v8  ;;  %1796 = vmatprep.subr.bf16.mxu0 %v18415_v18 }
 0x288   :  { %1797 = vmatpush1.bf16.msra.mxu0 %v18417_v19  ;;  %15410 = vmatpush3.bf16.msra.mxu1 %v16136_v20 }
 0x289   :  { %15411 = vmatprep.subr.bf16.mxu1 %v18342_v8  ;;  %1798 = vmatprep.subr.bf16.mxu0 %v18422_v21 }
 0x28c   :  { %1799 = vmatpush1.bf16.msra.mxu0 %v18424_v23  ;;  %15412 = vmatpush3.bf16.msra.mxu1 %v16140_v24  ;;  %v1339_v24 = vpop.permute.xlu1 %1338 }
 0x28d   :  { %15413 = vmatprep.subr.bf16.mxu1 %v18342_v8  ;;  %1800 = vmatprep.subr.bf16.mxu0 %v18429_v25 }
 0x290   :  { %1801 = vmatpush1.bf16.msra.mxu0 %v18431_v26  ;;  %15414 = vmatpush3.bf16.msra.mxu1 %v16144_v27  ;;  %v1348_v41 = vpop.permute.xlu1 %1347 }
 0x291   :  { %15415 = vmatprep.subr.bf16.mxu1 %v18342_v8  ;;  %1802 = vmatprep.subr.bf16.mxu0 %v18436_v28  ;;  %v1350_v40 = vmul.f32 %v1348_v41, %v18381_v38  ;;  %v16194_v41 = vld [vmem:[#allocation15 + $0x80] ss:$12 sps:$4 sm:$0xff]  }
 0x294   :  { %1803 = vmatpush1.bf16.msra.mxu0 %v18438_v29  ;;  %15416 = vmatpush3.bf16.msra.mxu1 %v16148_v30 }
 0x295   :  { %15417 = vmatprep.subr.bf16.mxu1 %v18342_v8  ;;  %1804 = vmatprep.subr.bf16.mxu0 %v18443_v31 }
 0x298   :  { %1805 = vmatpush1.bf16.msra.mxu0 %v18445_v32  ;;  %15418 = vmatpush3.bf16.msra.mxu1 %v16152_v33 }
 0x299   :  { %15419 = vmatprep.subr.bf16.mxu1 %v18342_v8  ;;  %1806 = vmatprep.subr.bf16.mxu0 %v18450_v34 }
 0x29c   :  { %1807 = vmatpush1.bf16.msra.mxu0 %v18452_v35  ;;  %15420 = vmatpush3.bf16.msra.mxu1 %v16156_v36 }
 0x29d   :  { %15425 = vmatprep.subr.bf16.mxu1 %v18342_v8  ;;  %2091 = vmatprep.subr.bf16.mxu0 %v18458_v37 }
 0x332   :  { %v1268_v50 = vpop.f32.mrb[4].mxu0  ;;  %v1309_v51 = vpop.f32.mrb[16].mxu1 }
 0x333   :  { %v15880_v53 = vadd.f32 %v15879_v49, %v1268_v50  ;;  %v1270_v55 = vpop.f32.mrb[5].mxu0  ;;  %v15383_v56 = vpop.f32.mrb[17].mxu1  ;;  %v1310_v22 = vadd.f32 %v1309_v51, %v1102_v5  ;;  %v18476_v50 = vld [vmem:[#allocation14 + $0x1c] ss:$12 sps:$4 sm:$0xff]   ;;  %v18479_v51 = vld [vmem:[#allocation14 + $0x18] ss:$12 sps:$4 sm:$0xff]  }
 0x334   :  { %v1272_v57 = vpop.f32.mrb[6].mxu0  ;;  %v1312_v58 = vpop.f32.mrb[18].mxu1  ;;  %v15882_v62 = vadd.f32 %v15881_v52, %v1270_v55  ;;  %v18483_v52 = vld [vmem:[#allocation14 + $0x34] ss:$12 sps:$4 sm:$0xff]   ;;  %v16168_v55 = vld [vmem:[#allocation14 + $0x38] ss:$12 sps:$4 sm:$0xff]  }
 0x335   :  { %v13708_v59 = vmul.f32 -1.442695, %v15880_v53  ;;  %v1273_v60 = vpop.f32.mrb[7].mxu0  ;;  %v15384_v61 = vpop.f32.mrb[19].mxu1  ;;  %v18489_v53 = vld [vmem:[#allocation14 + $0x30] ss:$12 sps:$4 sm:$0xff]  }
 0x336   :  { %v13709_v63 = vmul.f32 -1.442695, %v15882_v62  ;;  %v18497_v60 = vld [vmem:[#allocation14 + $0x4c] ss:$12 sps:$4 sm:$0xff]   ;;  %v18499_v61 = vld [vmem:[#allocation14 + $0x48] ss:$12 sps:$4 sm:$0xff]  }
 0x337   :  { %16511 = vpow2.f32 %v13708_v59  ;;  %v16172_v62 = vld [vmem:[#allocation14 + $0x50] ss:$12 sps:$4 sm:$0xff]   ;;  %v18513_v5 = vld [vmem:[#allocation14 + $0x78] ss:$12 sps:$4 sm:$0xff]  }
 0x338   :  { %16513 = vpow2.f32 %v13709_v63  ;;  %v18503_v63 = vld [vmem:[#allocation14 + $0x64] ss:$12 sps:$4 sm:$0xff]  }
 0x341   :  { %v16512_v0 = vpop.eup %16511 }
 0x342   :  { %v1319_v3 = vadd.f32 1.0, %v16512_v0  ;;  %v16514_v4 = vpop.eup %16513  ;;  %v18506_v0 = vld [vmem:[#allocation14 + $0x60] ss:$12 sps:$4 sm:$0xff]  }
 0x343   :  { %v1326_v7 = vadd.f32 1.0, %v16514_v4  ;;  %v18510_v4 = vld [vmem:[#allocation14 + $0x7c] ss:$12 sps:$4 sm:$0xff]  }
 0x344   :  { %16515 = vrcp.f32 %v1319_v3  ;;  %v16176_v3 = vld [vmem:[#allocation14 + $0x68] ss:$12 sps:$4 sm:$0xff]  }
 0x345   :  { %16517 = vrcp.f32 %v1326_v7  ;;  %v18517_v7 = vld [vmem:[#allocation14 + $0x94] ss:$12 sps:$4 sm:$0xff]  }
 0x34e   :  { %v16516_v9 = vpop.eup %16515 }
 0x34f   :  { %v1329_v14 = vmul.f32 %v16516_v9, %v1310_v22  ;;  %v16518_v20 = vpop.eup %16517  ;;  %v18519_v22 = vld [vmem:[#allocation29 + $0x50] sm:$0xff] }
 0x350   :  { %v1332_v27 = vsub.f32 1.0, %v16518_v20  ;;  %v1334_v36 = vmul.f32 %v16518_v20, %v18381_v38  ;;  %v16164_v38 = vld [vmem:[#allocation14 + $0x20] ss:$12 sps:$4 sm:$0xff]   ;;  %v18522_v9 = vld [vmem:[#allocation14 + $0x90] ss:$12 sps:$4 sm:$0xff]  }
 0x351   :  { %v1330_v17 = vadd.f32 %v1329_v14, %v1051_v12  ;;  %v16184_v12 = vld [vmem:[#allocation14 + $0x98] ss:$12 sps:$4 sm:$0xff]   ;;  %v18529_v14 = vld [vmem:[#allocation14 + $0xa8] ss:$12 sps:$4 sm:$0xff]  }
 0x352   :  { %v18495_v56 = vpop.f32.mrb[20].mxu1  ;;  %v16189_v20 = vld [vmem:[#allocation15 + $0x8] ss:$12 sps:$4 sm:$0xff]  }
 0x353   :  { %16519 = vtanh.f32 %v1330_v17  ;;  %v15403_v57 = vpop.f32.mrb[21].mxu1  ;;  %v16188_v17 = vld [vmem:[#allocation14 + $0xb0] ss:$12 sps:$4 sm:$0xff]  }
 0x354   :  { %v1611_v58 = vpop.f32.mrb[22].mxu1 }
 0x355   :  { %v15404_v59 = vpop.f32.mrb[23].mxu1 }
 0x35d   :  { %v16520_v30 = vpop.eup %16519 }
 0x35e   :  { %v1333_v33 = vmul.f32 %v16520_v30, %v1332_v27  ;;  %v16190_v27 = vld [vmem:[#allocation15 + $0x20] ss:$12 sps:$4 sm:$0xff]   ;;  %v16191_v30 = vld [vmem:[#allocation15 + $0x38] ss:$12 sps:$4 sm:$0xff]  }
 0x360   :  { %v1335_v39 = vadd.f32 %v1334_v36, %v1333_v33  ;;  %v16192_v33 = vld [vmem:[#allocation15 + $0x50] ss:$12 sps:$4 sm:$0xff]   ;;  %v16193_v36 = vld [vmem:[#allocation15 + $0x68] ss:$12 sps:$4 sm:$0xff]  }
 0x362   :  { %v1341_v45 = vmul.f32 %v1339_v24, %v1335_v39  ;;  %v1911_v24 = vld [vmem:[#allocation9 + $0xc] sm:$0xf]  ;;  %v16195_v39 = vld [vmem:[#allocation15 + $0x98] ss:$12 sps:$4 sm:$0xff]  }
 0x364   :  { %1343 = vst [vmem:[#allocation2 + $0x8] sm:$0xff] %v1341_v45  ;;  %v18470_v47 = vadd.f32 %v1350_v40, %v1341_v45  ;;  %v16196_v40 = vld [vmem:[#allocation15 + $0xb0] ss:$12 sps:$4 sm:$0xff]   ;;  %v1647_v45 = vld [vmem:[#allocation18] sm:$0x7] }
 0x365   :  { %v1656_v57 = vrot.slane %v1647_v45, %v18370_v46 }
 0x366   :  { %v1614_v49 = vpack.c.bf16 %v18470_v47, %v18470_v47 }
 0x368   :  { %1825 = vmatmul.mubr.bf16.vlgmr.msra.gmra.mrb[8].mxu0 %v1614_v49  ;;  %15422 = vmatmul.mubr.bf16.vlgmr.msra.gmra.mrb[24].mxu1 %v1614_v49 }
 0x369   :  { %2092 = vmatpush1.bf16.msra.mxu0 %v18472_v54  ;;  %15426 = vmatpush3.bf16.msra.mxu1 %v16160_v48  ;;  %v1388_v48 = vld [vmem:[#allocation17] sm:$0x7] }
 0x36a   :  { %2093 = vmatprep.subr.bf16.mxu0 %v18476_v50  ;;  %15427 = vmatprep.subr.bf16.mxu1 %v18342_v8  ;;  %v1393_v49 = vrot.slane %v1388_v48, %v18367_v44 }
 0x36b   :  { %2123 = vmatprep.mubr.bf16.mxu0 %v17893_v2  ;;  %15441 = vmatprep.mubr.msk.bf16.mxu1 %vm17894_vm0, %v18342_v8 }
 0x36d   :  { %2094 = vmatpush1.bf16.msra.mxu0 %v18479_v51  ;;  %15428 = vmatpush3.bf16.msra.mxu1 %v16164_v38  ;;  %v1652_v38 = vrot.slane %v1647_v45, %v18367_v44 }
 0x36e   :  { %2095 = vmatprep.subr.bf16.mxu0 %v18483_v52  ;;  %15429 = vmatprep.subr.bf16.mxu1 %v18342_v8 }
 0x36f   :  { %v15883_v58 = vadd.f32 %v1652_v38, %v1393_v49  ;;  %v1660_v49 = vrot.slane %v1647_v45, %v18377_v13  ;;  %v1401_v38 = vrot.slane %v1388_v48, %v18377_v13  ;;  %v1906_v45 = vpop.permute.xlu1 %1905 }
 0x371   :  { %2096 = vmatpush1.bf16.msra.mxu0 %v18489_v53  ;;  %15430 = vmatpush3.bf16.msra.mxu1 %v16168_v55  ;;  %v1397_v55 = vrot.slane %v1388_v48, %v18370_v46  ;;  %v1908_v48 = vmul.f32 %v1906_v45, %v18470_v47 }
 0x372   :  { %15431 = vmatprep.subr.bf16.mxu1 %v18342_v8  ;;  %2097 = vmatprep.subr.bf16.mxu0 %v18497_v60 }
 0x375   :  { %2098 = vmatpush1.bf16.msra.mxu0 %v18499_v61  ;;  %15432 = vmatpush3.bf16.msra.mxu1 %v16172_v62 }
 0x376   :  { %15433 = vmatprep.subr.bf16.mxu1 %v18342_v8  ;;  %2099 = vmatprep.subr.bf16.mxu0 %v18503_v63 }
 0x379   :  { %2100 = vmatpush1.bf16.msra.mxu0 %v18506_v0  ;;  %15434 = vmatpush3.bf16.msra.mxu1 %v16176_v3  ;;  %v15885_v3 = vadd.f32 %v1656_v57, %v1397_v55 }
 0x37a   :  { %15435 = vmatprep.subr.bf16.mxu1 %v18342_v8  ;;  %2101 = vmatprep.subr.bf16.mxu0 %v18510_v4  ;;  %v18526_v8 = vld [vmem:[#allocation14 + $0xac] ss:$12 sps:$4 sm:$0xff]  }
 0x37d   :  { %2102 = vmatpush1.bf16.msra.mxu0 %v18513_v5  ;;  %15436 = vmatpush3.bf16.msra.mxu1 %v16180_v6 }
 0x37e   :  { %15437 = vmatprep.subr.bf16.mxu1 %v18519_v22  ;;  %2103 = vmatprep.subr.bf16.mxu0 %v18517_v7 }
 0x381   :  { %2104 = vmatpush1.bf16.msra.mxu0 %v18522_v9  ;;  %15438 = vmatpush3.bf16.msra.mxu1 %v16184_v12 }
 0x382   :  { %15439 = vmatprep.subr.bf16.mxu1 %v18519_v22  ;;  %2105 = vmatprep.subr.bf16.mxu0 %v18526_v8 }
 0x385   :  { %2106 = vmatpush1.bf16.msra.mxu0 %v18529_v14  ;;  %15440 = vmatpush3.bf16.msra.mxu1 %v16188_v17 }
 0x386   :  { %2350 = vmatprep.subr.bf16.mxu0 %v18398_v10  ;;  %15445 = vmatprep.subr.bf16.mxu1 %v18519_v22 }
 0x388   :  { %2124 = vmatmul.mubr.bf16.vlgmr.msra.gmra.mrb[12].mxu0 %v1911_v24  ;;  %15442 = vmatmul.mubr.bf16.vlgmr.msra.gmra.mrb[28].mxu1 %v1911_v24 }
 0x389   :  { %2351 = vmatpush1.bf16.msra.mxu0 %v18401_v11  ;;  %15446 = vmatpush3.bf16.msra.mxu1 %v16189_v20 }
 0x38a   :  { %2352 = vmatprep.subr.bf16.mxu0 %v18405_v15  ;;  %15447 = vmatprep.subr.bf16.mxu1 %v18519_v22 }
 0x38b   :  { %2382 = vmatprep.mubr.bf16.mxu0 %v17893_v2  ;;  %15461 = vmatprep.mubr.msk.bf16.mxu1 %vm17894_vm0, %v18519_v22 }
 0x38d   :  { %2353 = vmatpush1.bf16.msra.mxu0 %v18407_v16  ;;  %15448 = vmatpush3.bf16.msra.mxu1 %v16190_v27 }
 0x38e   :  { %2354 = vmatprep.subr.bf16.mxu0 %v18415_v18  ;;  %15449 = vmatprep.subr.bf16.mxu1 %v18519_v22 }
 0x391   :  { %2355 = vmatpush1.bf16.msra.mxu0 %v18417_v19  ;;  %15450 = vmatpush3.bf16.msra.mxu1 %v16191_v30 }
 0x392   :  { %2356 = vmatprep.subr.bf16.mxu0 %v18422_v21  ;;  %15451 = vmatprep.subr.bf16.mxu1 %v18519_v22 }
 0x395   :  { %2357 = vmatpush1.bf16.msra.mxu0 %v18424_v23  ;;  %15452 = vmatpush3.bf16.msra.mxu1 %v16192_v33 }
 0x396   :  { %2358 = vmatprep.subr.bf16.mxu0 %v18429_v25  ;;  %15453 = vmatprep.subr.bf16.mxu1 %v18519_v22 }
 0x399   :  { %2359 = vmatpush1.bf16.msra.mxu0 %v18431_v26  ;;  %15454 = vmatpush3.bf16.msra.mxu1 %v16193_v36 }
 0x39a   :  { %2360 = vmatprep.subr.bf16.mxu0 %v18436_v28  ;;  %15455 = vmatprep.subr.bf16.mxu1 %v18519_v22 }
 0x39d   :  { %2361 = vmatpush1.bf16.msra.mxu0 %v18438_v29  ;;  %15456 = vmatpush3.bf16.msra.mxu1 %v16194_v41 }
 0x39e   :  { %2362 = vmatprep.subr.bf16.mxu0 %v18443_v31  ;;  %15457 = vmatprep.subr.bf16.mxu1 %v18519_v22 }
 0x3a1   :  { %2363 = vmatpush1.bf16.msra.mxu0 %v18445_v32  ;;  %15458 = vmatpush3.bf16.msra.mxu1 %v16195_v39 }
 0x3a2   :  { %2364 = vmatprep.subr.bf16.mxu0 %v18450_v34  ;;  %15459 = vmatprep.subr.bf16.mxu1 %v18519_v22 }
 0x3a5   :  { %2365 = vmatpush1.bf16.msra.mxu0 %v18452_v35  ;;  %15460 = vmatpush3.bf16.msra.mxu1 %v16196_v40 }
 0x3a6   :  { %2649 = vmatprep.subr.bf16.mxu0 %v18458_v37  ;;  %15465 = vmatprep.subr.bf16.mxu1 %v18519_v22 }
 0x43b   :  { %v1826_v59 = vpop.f32.mrb[8].mxu0  ;;  %v1867_v62 = vpop.f32.mrb[24].mxu1 }
 0x43c   :  { %v15884_v6 = vadd.f32 %v15883_v58, %v1826_v59  ;;  %v1828_v12 = vpop.f32.mrb[9].mxu0  ;;  %v15423_v17 = vpop.f32.mrb[25].mxu1  ;;  %v1868_v57 = vadd.f32 %v1867_v62, %v1660_v49  ;;  %v1609_v59 = vadd.f32 %v18495_v56, %v1401_v38  ;;  %v16197_v56 = vld [vmem:[#allocation14 + $0x8] ss:$12 sps:$4 sm:$0xff]  }
 0x43d   :  { %v1830_v20 = vpop.f32.mrb[10].mxu0  ;;  %v1870_v24 = vpop.f32.mrb[26].mxu1  ;;  %v15886_v36 = vadd.f32 %v15885_v3, %v1828_v12 }
 0x43e   :  { %v13759_v27 = vmul.f32 -1.442695, %v15884_v6  ;;  %v1831_v30 = vpop.f32.mrb[11].mxu0  ;;  %v15424_v33 = vpop.f32.mrb[27].mxu1 }
 0x43f   :  { %v13760_v41 = vmul.f32 -1.442695, %v15886_v36  ;;  %v1897_v33 = vpop.permute.xlu0 %1896 }
 0x440   :  { %16521 = vpow2.f32 %v13759_v27 }
 0x441   :  { %16523 = vpow2.f32 %v13760_v41  ;;  %v16198_v41 = vld [vmem:[#allocation14 + $0x20] ss:$12 sps:$4 sm:$0xff]  }
 0x44a   :  { %v16522_v39 = vpop.eup %16521 }
 0x44b   :  { %v1877_v40 = vadd.f32 1.0, %v16522_v39  ;;  %v16524_v1 = vpop.eup %16523 }
 0x44c   :  { %v1884_v55 = vadd.f32 1.0, %v16524_v1 }
 0x44d   :  { %16525 = vrcp.f32 %v1877_v40 }
 0x44e   :  { %16527 = vrcp.f32 %v1884_v55  ;;  %v16200_v55 = vld [vmem:[#allocation14 + $0x50] ss:$12 sps:$4 sm:$0xff]  }
 0x457   :  { %v16526_v58 = vpop.eup %16525 }
 0x458   :  { %v1887_v6 = vmul.f32 %v16526_v58, %v1868_v57  ;;  %v16528_v3 = vpop.eup %16527  ;;  %v16201_v57 = vld [vmem:[#allocation14 + $0x68] ss:$12 sps:$4 sm:$0xff]   ;;  %v16202_v58 = vld [vmem:[#allocation14 + $0x80] ss:$12 sps:$4 sm:$0xff]  }
 0x459   :  { %v1890_v12 = vsub.f32 1.0, %v16528_v3  ;;  %v1892_v27 = vmul.f32 %v16528_v3, %v18470_v47  ;;  %v16199_v47 = vld [vmem:[#allocation14 + $0x38] ss:$12 sps:$4 sm:$0xff]   ;;  %v16206_v3 = vld [vmem:[#allocation15 + $0x20] ss:$12 sps:$4 sm:$0xff]  }
 0x45a   :  { %v1888_v17 = vadd.f32 %v1887_v6, %v1609_v59  ;;  %v16203_v59 = vld [vmem:[#allocation14 + $0x98] ss:$12 sps:$4 sm:$0xff]   ;;  %v16205_v6 = vld [vmem:[#allocation15 + $0x8] ss:$12 sps:$4 sm:$0xff]  }
 0x45b   :  { %v18597_v39 = vpop.f32.mrb[28].mxu1 }
 0x45c   :  { %16529 = vtanh.f32 %v1888_v17  ;;  %v15443_v40 = vpop.f32.mrb[29].mxu1  ;;  %v2469_v17 = vld [vmem:[#allocation9 + $0x10] sm:$0xf] }
 0x45d   :  { %v2169_v49 = vpop.f32.mrb[30].mxu1 }
 0x45e   :  { %v15444_v38 = vpop.f32.mrb[31].mxu1 }
 0x466   :  { %v16530_v20 = vpop.eup %16529 }
 0x467   :  { %v1891_v24 = vmul.f32 %v16530_v20, %v1890_v12  ;;  %v16207_v12 = vld [vmem:[#allocation15 + $0x38] ss:$12 sps:$4 sm:$0xff]  }
 0x469   :  { %v1893_v30 = vadd.f32 %v1892_v27, %v1891_v24 }
 0x46b   :  { %v1899_v1 = vmul.f32 %v1897_v33, %v1893_v30 }
 0x46d   :  { %1901 = vst [vmem:[#allocation2 + $0x10] sm:$0xff] %v1899_v1  ;;  %v18571_v62 = vadd.f32 %v1908_v48, %v1899_v1 }
 0x46f   :  { %v2172_v36 = vpack.c.bf16 %v18571_v62, %v18571_v62 }
 0x471   :  { %2383 = vmatmul.mubr.bf16.vlgmr.msra.gmra.mrb[12].mxu0 %v2172_v36  ;;  %15462 = vmatmul.mubr.bf16.vlgmr.msra.gmra.mrb[32].mxu1 %v2172_v36 }
 0x472   :  { %2650 = vmatpush1.bf16.msra.mxu0 %v18472_v54  ;;  %15466 = vmatpush3.bf16.msra.mxu1 %v16197_v56 }
 0x473   :  { %2651 = vmatprep.subr.bf16.mxu0 %v18476_v50  ;;  %15467 = vmatprep.subr.bf16.mxu1 %v18519_v22 }
 0x474   :  { %2681 = vmatprep.mubr.bf16.mxu0 %v17893_v2  ;;  %15481 = vmatprep.mubr.msk.bf16.mxu1 %vm17894_vm0, %v18519_v22 }
 0x476   :  { %2652 = vmatpush1.bf16.msra.mxu0 %v18479_v51  ;;  %15468 = vmatpush3.bf16.msra.mxu1 %v16198_v41 }
 0x477   :  { %2653 = vmatprep.subr.bf16.mxu0 %v18483_v52  ;;  %15469 = vmatprep.subr.bf16.mxu1 %v18519_v22 }
 0x47a   :  { %2654 = vmatpush1.bf16.msra.mxu0 %v18489_v53  ;;  %15470 = vmatpush3.bf16.msra.mxu1 %v16199_v47 }
 0x47b   :  { %2655 = vmatprep.subr.bf16.mxu0 %v18497_v60  ;;  %15471 = vmatprep.subr.bf16.mxu1 %v18519_v22 }
 0x47e   :  { %2656 = vmatpush1.bf16.msra.mxu0 %v18499_v61  ;;  %15472 = vmatpush3.bf16.msra.mxu1 %v16200_v55 }
 0x47f   :  { %2657 = vmatprep.subr.bf16.mxu0 %v18503_v63  ;;  %15473 = vmatprep.subr.bf16.mxu1 %v18519_v22 }
 0x482   :  { %2658 = vmatpush1.bf16.msra.mxu0 %v18506_v0  ;;  %15474 = vmatpush3.bf16.msra.mxu1 %v16201_v57 }
 0x483   :  { %2659 = vmatprep.subr.bf16.mxu0 %v18510_v4  ;;  %15475 = vmatprep.subr.bf16.mxu1 %v18519_v22 }
 0x486   :  { %2660 = vmatpush1.bf16.msra.mxu0 %v18513_v5  ;;  %15476 = vmatpush3.bf16.msra.mxu1 %v16202_v58 }
 0x487   :  { %2661 = vmatprep.subr.bf16.mxu0 %v18517_v7  ;;  %15477 = vmatprep.subr.bf16.mxu1 %v18519_v22 }
 0x48a   :  { %2662 = vmatpush1.bf16.msra.mxu0 %v18522_v9  ;;  %15478 = vmatpush3.bf16.msra.mxu1 %v16203_v59 }
 0x48b   :  { %2663 = vmatprep.subr.bf16.mxu0 %v18526_v8  ;;  %15479 = vmatprep.subr.bf16.mxu1 %v18519_v22 }
 0x48e   :  { %2664 = vmatpush1.bf16.msra.mxu0 %v18529_v14 }
 0x48f   :  { %2908 = vmatprep.subr.bf16.mxu0 %v18398_v10  ;;  %v16204_v10 = vld [vmem:[#allocation14 + $0xb0] ss:$12 sps:$4 sm:$0xff]  }
 0x490   :  { %15480 = vmatpush3.bf16.msra.mxu1 %v16204_v10 }
 0x491   :  { %15485 = vmatprep.subr.bf16.mxu1 %v18519_v22  ;;  %2682 = vmatmul.mubr.bf16.vlgmr.msra.gmra.mrb[16].mxu0 %v2469_v17 }
 0x492   :  { %2909 = vmatpush1.bf16.msra.mxu0 %v18401_v11  ;;  %2940 = vmatprep.mubr.bf16.mxu0 %v17893_v2  ;;  %v16208_v11 = vld [vmem:[#allocation15 + $0x50] ss:$12 sps:$4 sm:$0xff]  }
 0x493   :  { %15482 = vmatmul.mubr.bf16.vlgmr.msra.gmra.mrb[36].mxu1 %v2469_v17  ;;  %2910 = vmatprep.subr.bf16.mxu0 %v18405_v15  ;;  %v16209_v15 = vld [vmem:[#allocation15 + $0x68] ss:$12 sps:$4 sm:$0xff]  }
 0x494   :  { %15486 = vmatpush3.bf16.msra.mxu1 %v16205_v6  ;;  %15501 = vmatprep.mubr.msk.bf16.mxu1 %vm17894_vm0, %v18519_v22 }
 0x495   :  { %15487 = vmatprep.subr.bf16.mxu1 %v18519_v22 }
 0x496   :  { %2911 = vmatpush1.bf16.msra.mxu0 %v18407_v16  ;;  %v16210_v16 = vld [vmem:[#allocation15 + $0x80] ss:$12 sps:$4 sm:$0xff]  }
 0x497   :  { %2912 = vmatprep.subr.bf16.mxu0 %v18415_v18  ;;  %v16211_v18 = vld [vmem:[#allocation15 + $0x98] ss:$12 sps:$4 sm:$0xff]  }
 0x498   :  { %15488 = vmatpush3.bf16.msra.mxu1 %v16206_v3 }
 0x499   :  { %15489 = vmatprep.subr.bf16.mxu1 %v18519_v22 }
 0x49a   :  { %2913 = vmatpush1.bf16.msra.mxu0 %v18417_v19  ;;  %v16212_v19 = vld [vmem:[#allocation15 + $0xb0] ss:$12 sps:$4 sm:$0xff]  }
 0x49b   :  { %2914 = vmatprep.subr.bf16.mxu0 %v18422_v21  ;;  %v2205_v21 = vld [vmem:[#allocation18] sm:$0x7] }
 0x49c   :  { %15490 = vmatpush3.bf16.msra.mxu1 %v16207_v12  ;;  %v2218_v40 = vrot.slane %v2205_v21, %v18377_v13 }
 0x49d   :  { %15491 = vmatprep.subr.bf16.mxu1 %v18519_v22 }
 0x49e   :  { %2915 = vmatpush1.bf16.msra.mxu0 %v18424_v23  ;;  %v1946_v23 = vld [vmem:[#allocation17] sm:$0x7] }
 0x49f   :  { %2916 = vmatprep.subr.bf16.mxu0 %v18429_v25  ;;  %v1951_v25 = vrot.slane %v1946_v23, %v18367_v44  ;;  %v1959_v49 = vrot.slane %v1946_v23, %v18377_v13 }
 0x4a0   :  { %15492 = vmatpush3.bf16.msra.mxu1 %v16208_v11 }
 0x4a1   :  { %15493 = vmatprep.subr.bf16.mxu1 %v18519_v22  ;;  %v2167_v58 = vadd.f32 %v18597_v39, %v1959_v49  ;;  %v16213_v39 = vld [vmem:[#allocation14 + $0x8] ss:$12 sps:$4 sm:$0xff]   ;;  %v2763_v49 = vld [vmem:[#allocation18] sm:$0x7] }
 0x4a2   :  { %2917 = vmatpush1.bf16.msra.mxu0 %v18431_v26  ;;  %v2210_v26 = vrot.slane %v2205_v21, %v18367_v44 }
 0x4a3   :  { %2918 = vmatprep.subr.bf16.mxu0 %v18436_v28  ;;  %v1955_v28 = vrot.slane %v1946_v23, %v18370_v46 }
 0x4a4   :  { %15494 = vmatpush3.bf16.msra.mxu1 %v16209_v15 }
 0x4a5   :  { %15495 = vmatprep.subr.bf16.mxu1 %v18519_v22 }
 0x4a6   :  { %2919 = vmatpush1.bf16.msra.mxu0 %v18438_v29  ;;  %v2214_v29 = vrot.slane %v2205_v21, %v18370_v46 }
 0x4a7   :  { %2920 = vmatprep.subr.bf16.mxu0 %v18443_v31  ;;  %v15887_v31 = vadd.f32 %v2210_v26, %v1951_v25  ;;  %v16214_v26 = vld [vmem:[#allocation14 + $0x20] ss:$12 sps:$4 sm:$0xff]  }
 0x4a8   :  { %15496 = vmatpush3.bf16.msra.mxu1 %v16210_v16  ;;  %v15889_v20 = vadd.f32 %v2214_v29, %v1955_v28  ;;  %v2455_v16 = vpop.permute.xlu0 %2454  ;;  %v16228_v28 = vld [vmem:[#allocation15 + $0x20] ss:$12 sps:$4 sm:$0xff]  }
 0x4a9   :  { %15497 = vmatprep.subr.bf16.mxu1 %v18519_v22  ;;  %v18688_v29 = vld [vmem:[#allocation15 + $0x34] ss:$12 sps:$4 sm:$0xff]  }
 0x4aa   :  { %2921 = vmatpush1.bf16.msra.mxu0 %v18445_v32 }
 0x4ab   :  { %2922 = vmatprep.subr.bf16.mxu0 %v18450_v34 }
 0x4ac   :  { %15498 = vmatpush3.bf16.msra.mxu1 %v16211_v18  ;;  %v2464_v18 = vpop.permute.xlu1 %2463 }
 0x4ad   :  { %15499 = vmatprep.subr.bf16.mxu1 %v18519_v22  ;;  %v2466_v21 = vmul.f32 %v2464_v18, %v18571_v62 }
 0x4ae   :  { %2923 = vmatpush1.bf16.msra.mxu0 %v18452_v35 }
 0x4af   :  { %3207 = vmatprep.subr.bf16.mxu0 %v18458_v37 }
 0x4b0   :  { %15500 = vmatpush3.bf16.msra.mxu1 %v16212_v19 }
 0x4b1   :  { %15505 = vmatprep.subr.bf16.mxu1 %v18519_v22 }
 0x544   :  { %v2384_v32 = vpop.f32.mrb[12].mxu0  ;;  %v2425_v34 = vpop.f32.mrb[32].mxu1 }
 0x545   :  { %v15888_v35 = vadd.f32 %v15887_v31, %v2384_v32  ;;  %v2386_v24 = vpop.f32.mrb[13].mxu0  ;;  %v15463_v27 = vpop.f32.mrb[33].mxu1  ;;  %v2426_v55 = vadd.f32 %v2425_v34, %v2218_v40  ;;  %v18690_v31 = vld [vmem:[#allocation15 + $0x30] ss:$12 sps:$4 sm:$0xff]   ;;  %v16232_v32 = vld [vmem:[#allocation15 + $0x38] ss:$12 sps:$4 sm:$0xff]  }
 0x546   :  { %v2388_v37 = vpop.f32.mrb[14].mxu0  ;;  %v2428_v30 = vpop.f32.mrb[34].mxu1  ;;  %v15890_v1 = vadd.f32 %v15889_v20, %v2386_v24  ;;  %v18695_v34 = vld [vmem:[#allocation15 + $0x4c] ss:$12 sps:$4 sm:$0xff]   ;;  %v18697_v20 = vld [vmem:[#allocation15 + $0x48] ss:$12 sps:$4 sm:$0xff]  }
 0x547   :  { %v13810_v33 = vmul.f32 -1.442695, %v15888_v35  ;;  %v2389_v45 = vpop.f32.mrb[15].mxu0  ;;  %v15464_v48 = vpop.f32.mrb[35].mxu1  ;;  %v16236_v35 = vld [vmem:[#allocation15 + $0x50] ss:$12 sps:$4 sm:$0xff]  }
 0x548   :  { %v13811_v56 = vmul.f32 -1.442695, %v15890_v1  ;;  %v18702_v24 = vld [vmem:[#allocation15 + $0x64] ss:$12 sps:$4 sm:$0xff]   ;;  %v18704_v27 = vld [vmem:[#allocation15 + $0x60] ss:$12 sps:$4 sm:$0xff]  }
 0x549   :  { %16531 = vpow2.f32 %v13810_v33  ;;  %v16240_v37 = vld [vmem:[#allocation15 + $0x68] ss:$12 sps:$4 sm:$0xff]   ;;  %v18711_v33 = vld [vmem:[#allocation15 + $0x78] ss:$12 sps:$4 sm:$0xff]   ;;  %v16244_v45 = vld [vmem:[#allocation15 + $0x80] ss:$12 sps:$4 sm:$0xff]  }
 0x54a   :  { %16533 = vpow2.f32 %v13811_v56  ;;  %v18709_v30 = vld [vmem:[#allocation15 + $0x7c] ss:$12 sps:$4 sm:$0xff]   ;;  %v18718_v1 = vld [vmem:[#allocation15 + $0x94] ss:$12 sps:$4 sm:$0xff]   ;;  %v16248_v56 = vld [vmem:[#allocation15 + $0x98] ss:$12 sps:$4 sm:$0xff]  }
 0x54b   :  { %v18716_v48 = vld [vmem:[#allocation15 + $0x90] ss:$12 sps:$4 sm:$0xff]  }
 0x54c   :  { %v18731_v40 = vld [vmem:[#allocation14 + $0x4] ss:$12 sps:$4 sm:$0xff]  }
 0x553   :  { %v16532_v36 = vpop.eup %16531 }
 0x554   :  { %v2435_v41 = vadd.f32 1.0, %v16532_v36  ;;  %v16534_v47 = vpop.eup %16533  ;;  %v18721_v36 = vld [vmem:[#allocation15 + $0xac] ss:$12 sps:$4 sm:$0xff]  }
 0x555   :  { %v2442_v38 = vadd.f32 1.0, %v16534_v47  ;;  %v16252_v47 = vld [vmem:[#allocation15 + $0xb0] ss:$12 sps:$4 sm:$0xff]  }
 0x556   :  { %16535 = vrcp.f32 %v2435_v41  ;;  %v18725_v41 = vld [vmem:[#allocation15 + $0xa8] ss:$12 sps:$4 sm:$0xff]  }
 0x557   :  { %16537 = vrcp.f32 %v2442_v38  ;;  %v2504_v38 = vld [vmem:[#allocation17] sm:$0x7] }
 0x560   :  { %v16536_v57 = vpop.eup %16535 }
 0x561   :  { %v2445_v59 = vmul.f32 %v16536_v57, %v2426_v55  ;;  %v16538_v6 = vpop.eup %16537  ;;  %v2509_v55 = vrot.slane %v2504_v38, %v18367_v44  ;;  %v2768_v57 = vrot.slane %v2763_v49, %v18367_v44 }
 0x562   :  { %v2448_v17 = vsub.f32 1.0, %v16538_v6  ;;  %v2450_v11 = vmul.f32 %v16538_v6, %v18571_v62  ;;  %v16215_v62 = vld [vmem:[#allocation14 + $0x38] ss:$12 sps:$4 sm:$0xff]  }
 0x563   :  { %v2446_v10 = vadd.f32 %v2445_v59, %v2167_v58  ;;  %v2513_v58 = vrot.slane %v2504_v38, %v18370_v46  ;;  %v2772_v59 = vrot.slane %v2763_v49, %v18370_v46 }
 0x565   :  { %16539 = vtanh.f32 %v2446_v10  ;;  %v15891_v10 = vadd.f32 %v2768_v57, %v2509_v55 }
 0x56f   :  { %v16540_v3 = vpop.eup %16539 }
 0x570   :  { %v2449_v12 = vmul.f32 %v16540_v3, %v2448_v17  ;;  %v15893_v3 = vadd.f32 %v2772_v59, %v2513_v58  ;;  %v16256_v58 = vld [vmem:[#allocation14 + $0x8] ss:$12 sps:$4 sm:$0xff]  }
 0x572   :  { %v2451_v15 = vadd.f32 %v2450_v11, %v2449_v12 }
 0x574   :  { %v2457_v19 = vmul.f32 %v2455_v16, %v2451_v15 }
 0x576   :  { %2459 = vst [vmem:[#allocation2 + $0x18] sm:$0xff] %v2457_v19  ;;  %v18640_v23 = vadd.f32 %v2466_v21, %v2457_v19 }
 0x578   :  { %v2730_v25 = vpack.c.bf16 %v18640_v23, %v18640_v23 }
 0x57a   :  { %2941 = vmatmul.mubr.bf16.vlgmr.msra.gmra.mrb[16].mxu0 %v2730_v25  ;;  %15502 = vmatmul.mubr.bf16.vlgmr.msra.gmra.mrb[40].mxu1 %v2730_v25 }
 0x57b   :  { %3208 = vmatpush1.bf16.msra.mxu0 %v18472_v54  ;;  %15506 = vmatpush3.bf16.msra.mxu1 %v16213_v39  ;;  %v18665_v54 = vpop.f32.mrb[36].mxu1 }
 0x57c   :  { %3209 = vmatprep.subr.bf16.mxu0 %v18476_v50  ;;  %15507 = vmatprep.subr.bf16.mxu1 %v18519_v22  ;;  %v15483_v50 = vpop.f32.mrb[37].mxu1 }
 0x57d   :  { %3239 = vmatprep.mubr.bf16.mxu0 %v17893_v2  ;;  %15521 = vmatprep.mubr.msk.bf16.mxu1 %vm17894_vm0, %v18519_v22 }
 0x57f   :  { %3210 = vmatpush1.bf16.msra.mxu0 %v18479_v51  ;;  %15508 = vmatpush3.bf16.msra.mxu1 %v16214_v26  ;;  %v2727_v51 = vpop.f32.mrb[38].mxu1 }
 0x580   :  { %3211 = vmatprep.subr.bf16.mxu0 %v18483_v52  ;;  %15509 = vmatprep.subr.bf16.mxu1 %v18519_v22  ;;  %v15484_v52 = vpop.f32.mrb[39].mxu1 }
 0x581   :  { %v2776_v52 = vrot.slane %v2763_v49, %v18377_v13  ;;  %v3022_v49 = vpop.permute.xlu1 %3021 }
 0x583   :  { %3212 = vmatpush1.bf16.msra.mxu0 %v18489_v53  ;;  %15510 = vmatpush3.bf16.msra.mxu1 %v16215_v62  ;;  %v16216_v53 = vld [vmem:[#allocation14 + $0x50] ss:$12 sps:$4 sm:$0xff]  }
 0x584   :  { %3213 = vmatprep.subr.bf16.mxu0 %v18497_v60  ;;  %15511 = vmatprep.subr.bf16.mxu1 %v18519_v22  ;;  %v16217_v60 = vld [vmem:[#allocation14 + $0x68] ss:$12 sps:$4 sm:$0xff]  }
 0x587   :  { %3214 = vmatpush1.bf16.msra.mxu0 %v18499_v61  ;;  %15512 = vmatpush3.bf16.msra.mxu1 %v16216_v53  ;;  %v16218_v61 = vld [vmem:[#allocation14 + $0x80] ss:$12 sps:$4 sm:$0xff]   ;;  %v2517_v53 = vrot.slane %v2504_v38, %v18377_v13  ;;  %v3024_v38 = vmul.f32 %v3022_v49, %v18640_v23  ;;  %v16292_v49 = vld [vmem:[#allocation15 + $0xb0] ss:$12 sps:$4 sm:$0xff]  }
 0x588   :  { %3215 = vmatprep.subr.bf16.mxu0 %v18503_v63  ;;  %15513 = vmatprep.subr.bf16.mxu1 %v18519_v22  ;;  %v16219_v63 = vld [vmem:[#allocation14 + $0x98] ss:$12 sps:$4 sm:$0xff]  }
 0x58b   :  { %3216 = vmatpush1.bf16.msra.mxu0 %v18506_v0  ;;  %15514 = vmatpush3.bf16.msra.mxu1 %v16217_v60  ;;  %v16220_v0 = vld [vmem:[#allocation14 + $0xb0] ss:$12 sps:$4 sm:$0xff]  }
 0x58c   :  { %3217 = vmatprep.subr.bf16.mxu0 %v18510_v4  ;;  %15515 = vmatprep.subr.bf16.mxu1 %v18519_v22  ;;  %v18671_v4 = vld [vmem:[#allocation15 + $0x4] ss:$12 sps:$4 sm:$0xff]  }
 0x58f   :  { %3218 = vmatpush1.bf16.msra.mxu0 %v18513_v5  ;;  %15516 = vmatpush3.bf16.msra.mxu1 %v16218_v61  ;;  %v18674_v5 = vld [vmem:[#allocation15] ss:$12 sps:$4 sm:$0xff]  }
 0x590   :  { %3219 = vmatprep.subr.bf16.mxu0 %v18517_v7  ;;  %15517 = vmatprep.subr.bf16.mxu1 %v18519_v22  ;;  %v16224_v7 = vld [vmem:[#allocation15 + $0x8] ss:$12 sps:$4 sm:$0xff]  }
 0x593   :  { %3220 = vmatpush1.bf16.msra.mxu0 %v18522_v9  ;;  %15518 = vmatpush3.bf16.msra.mxu1 %v16219_v63  ;;  %v3027_v9 = vld [vmem:[#allocation9 + $0x14] sm:$0xf] }
 0x594   :  { %3221 = vmatprep.subr.bf16.mxu0 %v18526_v8  ;;  %15519 = vmatprep.subr.bf16.mxu1 %v18519_v22  ;;  %v18678_v8 = vld [vmem:[#allocation15 + $0x1c] ss:$12 sps:$4 sm:$0xff]  }
 0x597   :  { %3222 = vmatpush1.bf16.msra.mxu0 %v18529_v14  ;;  %15520 = vmatpush3.bf16.msra.mxu1 %v16220_v0  ;;  %v18680_v14 = vld [vmem:[#allocation15 + $0x18] ss:$12 sps:$4 sm:$0xff]   ;;  %v2725_v0 = vadd.f32 %v18665_v54, %v2517_v53  ;;  %v18745_v54 = vld [vmem:[#allocation14] ss:$12 sps:$4 sm:$0xff]  }
 0x598   :  { %15525 = vmatprep.subr.bf16.mxu1 %v18519_v22  ;;  %3466 = vmatprep.subr.bf16.mxu0 %v18671_v4  ;;  %v18790_v53 = vld [vmem:[#allocation14 + $0x94] ss:$12 sps:$4 sm:$0xff]  }
 0x59a   :  { %3240 = vmatmul.mubr.bf16.vlgmr.msra.gmra.mrb[20].mxu0 %v3027_v9  ;;  %15522 = vmatmul.mubr.bf16.vlgmr.msra.gmra.mrb[44].mxu1 %v3027_v9 }
 0x59b   :  { %3467 = vmatpush1.bf16.msra.mxu0 %v18674_v5  ;;  %15526 = vmatpush3.bf16.msra.mxu1 %v16224_v7 }
 0x59c   :  { %15527 = vmatprep.subr.bf16.mxu1 %v18519_v22  ;;  %3498 = vmatprep.mubr.bf16.mxu0 %v17893_v2 }
 0x59d   :  { %3468 = vmatprep.subr.bf16.mxu0 %v18678_v8  ;;  %15541 = vmatprep.mubr.msk.bf16.mxu1 %vm17894_vm0, %v18519_v22 }
 0x59f   :  { %3469 = vmatpush1.bf16.msra.mxu0 %v18680_v14  ;;  %15528 = vmatpush3.bf16.msra.mxu1 %v16228_v28 }
 0x5a0   :  { %15529 = vmatprep.subr.bf16.mxu1 %v18519_v22  ;;  %3470 = vmatprep.subr.bf16.mxu0 %v18688_v29 }
 0x5a3   :  { %3471 = vmatpush1.bf16.msra.mxu0 %v18690_v31  ;;  %15530 = vmatpush3.bf16.msra.mxu1 %v16232_v32 }
 0x5a4   :  { %15531 = vmatprep.subr.bf16.mxu1 %v18519_v22  ;;  %3472 = vmatprep.subr.bf16.mxu0 %v18695_v34 }
 0x5a7   :  { %3473 = vmatpush1.bf16.msra.mxu0 %v18697_v20  ;;  %15532 = vmatpush3.bf16.msra.mxu1 %v16236_v35 }
 0x5a8   :  { %15533 = vmatprep.subr.bf16.mxu1 %v18519_v22  ;;  %3474 = vmatprep.subr.bf16.mxu0 %v18702_v24 }
 0x5ab   :  { %3475 = vmatpush1.bf16.msra.mxu0 %v18704_v27  ;;  %15534 = vmatpush3.bf16.msra.mxu1 %v16240_v37 }
 0x5ac   :  { %15535 = vmatprep.subr.bf16.mxu1 %v18519_v22  ;;  %3476 = vmatprep.subr.bf16.mxu0 %v18709_v30 }
 0x5af   :  { %3477 = vmatpush1.bf16.msra.mxu0 %v18711_v33  ;;  %15536 = vmatpush3.bf16.msra.mxu1 %v16244_v45 }
 0x5b0   :  { %15537 = vmatprep.subr.bf16.mxu1 %v18519_v22  ;;  %3478 = vmatprep.subr.bf16.mxu0 %v18718_v1 }
 0x5b3   :  { %3479 = vmatpush1.bf16.msra.mxu0 %v18716_v48  ;;  %15538 = vmatpush3.bf16.msra.mxu1 %v16248_v56 }
 0x5b4   :  { %3480 = vmatprep.subr.bf16.mxu0 %v18721_v36  ;;  %15539 = vmatprep.subr.bf16.mxu1 %v18519_v22 }
 0x5b7   :  { %3481 = vmatpush1.bf16.msra.mxu0 %v18725_v41  ;;  %15540 = vmatpush3.bf16.msra.mxu1 %v16252_v47  ;;  %v3013_v47 = vpop.permute.xlu0 %3012 }
 0x5b8   :  { %15545 = vmatprep.subr.bf16.mxu1 %v18519_v22  ;;  %3765 = vmatprep.subr.bf16.mxu0 %v18731_v40 }
 0x64d   :  { %v2942_v6 = vpop.f32.mrb[16].mxu0  ;;  %v2983_v17 = vpop.f32.mrb[40].mxu1 }
 0x64e   :  { %v15892_v12 = vadd.f32 %v15891_v10, %v2942_v6  ;;  %v2944_v11 = vpop.f32.mrb[17].mxu0  ;;  %v15503_v15 = vpop.f32.mrb[41].mxu1  ;;  %v2984_v61 = vadd.f32 %v2983_v17, %v2776_v52  ;;  %v18749_v10 = vld [vmem:[#allocation14 + $0x1c] ss:$12 sps:$4 sm:$0xff]   ;;  %v18752_v6 = vld [vmem:[#allocation14 + $0x18] ss:$12 sps:$4 sm:$0xff]  }
 0x64f   :  { %v2946_v16 = vpop.f32.mrb[18].mxu0  ;;  %v2986_v18 = vpop.f32.mrb[42].mxu1  ;;  %v15894_v25 = vadd.f32 %v15893_v3, %v2944_v11  ;;  %v16260_v17 = vld [vmem:[#allocation14 + $0x20] ss:$12 sps:$4 sm:$0xff]   ;;  %v18762_v3 = vld [vmem:[#allocation14 + $0x30] ss:$12 sps:$4 sm:$0xff]  }
 0x650   :  { %v13861_v19 = vmul.f32 -1.442695, %v15892_v12  ;;  %v2947_v21 = vpop.f32.mrb[19].mxu0  ;;  %v15504_v39 = vpop.f32.mrb[43].mxu1  ;;  %v16264_v12 = vld [vmem:[#allocation14 + $0x38] ss:$12 sps:$4 sm:$0xff]  }
 0x651   :  { %v13862_v26 = vmul.f32 -1.442695, %v15894_v25  ;;  %v18772_v21 = vld [vmem:[#allocation14 + $0x48] ss:$12 sps:$4 sm:$0xff]   ;;  %v16268_v39 = vld [vmem:[#allocation14 + $0x50] ss:$12 sps:$4 sm:$0xff]  }
 0x652   :  { %16541 = vpow2.f32 %v13861_v19  ;;  %v18770_v19 = vld [vmem:[#allocation14 + $0x4c] ss:$12 sps:$4 sm:$0xff]   ;;  %v18776_v25 = vld [vmem:[#allocation14 + $0x64] ss:$12 sps:$4 sm:$0xff]  }
 0x653   :  { %16543 = vpow2.f32 %v13862_v26  ;;  %v18779_v26 = vld [vmem:[#allocation14 + $0x60] ss:$12 sps:$4 sm:$0xff]  }
 0x654   :  { %v16276_v52 = vld [vmem:[#allocation14 + $0x80] ss:$12 sps:$4 sm:$0xff]  }
 0x65c   :  { %v16542_v62 = vpop.eup %16541 }
 0x65d   :  { %v2993_v50 = vadd.f32 1.0, %v16542_v62  ;;  %v16544_v51 = vpop.eup %16543  ;;  %v16272_v62 = vld [vmem:[#allocation14 + $0x68] ss:$12 sps:$4 sm:$0xff]  }
 0x65e   :  { %v3000_v60 = vadd.f32 1.0, %v16544_v51  ;;  %v18786_v51 = vld [vmem:[#allocation14 + $0x78] ss:$12 sps:$4 sm:$0xff]  }
 0x65f   :  { %16545 = vrcp.f32 %v2993_v50  ;;  %v18783_v50 = vld [vmem:[#allocation14 + $0x7c] ss:$12 sps:$4 sm:$0xff]  }
 0x660   :  { %16547 = vrcp.f32 %v3000_v60  ;;  %v18793_v60 = vld [vmem:[#allocation14 + $0x90] ss:$12 sps:$4 sm:$0xff]  }
 0x669   :  { %v16546_v63 = vpop.eup %16545 }
 0x66a   :  { %v3003_v7 = vmul.f32 %v16546_v63, %v2984_v61  ;;  %v16548_v28 = vpop.eup %16547  ;;  %v16280_v61 = vld [vmem:[#allocation14 + $0x98] ss:$12 sps:$4 sm:$0xff]  }
 0x66b   :  { %v3006_v32 = vsub.f32 1.0, %v16548_v28  ;;  %v3008_v45 = vmul.f32 %v16548_v28, %v18640_v23  ;;  %v18756_v23 = vld [vmem:[#allocation14 + $0x34] ss:$12 sps:$4 sm:$0xff]   ;;  %v18797_v63 = vld [vmem:[#allocation14 + $0xac] ss:$12 sps:$4 sm:$0xff]  }
 0x66c   :  { %v3004_v9 = vadd.f32 %v3003_v7, %v2725_v0  ;;  %v18800_v0 = vld [vmem:[#allocation14 + $0xa8] ss:$12 sps:$4 sm:$0xff]   ;;  %v16284_v7 = vld [vmem:[#allocation14 + $0xb0] ss:$12 sps:$4 sm:$0xff]   ;;  %v3585_v28 = vld [vmem:[#allocation9 + $0x18] sm:$0xf] }
 0x66d   :  { %v18768_v11 = vpop.f32.mrb[44].mxu1 }
 0x66e   :  { %16549 = vtanh.f32 %v3004_v9  ;;  %v15523_v15 = vpop.f32.mrb[45].mxu1  ;;  %v16285_v9 = vld [vmem:[#allocation15 + $0x8] ss:$12 sps:$4 sm:$0xff]  }
 0x66f   :  { %v3285_v16 = vpop.f32.mrb[46].mxu1 }
 0x670   :  { %v15524_v18 = vpop.f32.mrb[47].mxu1 }
 0x678   :  { %v16550_v35 = vpop.eup %16549 }
 0x679   :  { %v3007_v37 = vmul.f32 %v16550_v35, %v3006_v32  ;;  %v16286_v32 = vld [vmem:[#allocation15 + $0x20] ss:$12 sps:$4 sm:$0xff]   ;;  %v16287_v35 = vld [vmem:[#allocation15 + $0x38] ss:$12 sps:$4 sm:$0xff]  }
 0x67b   :  { %v3009_v56 = vadd.f32 %v3008_v45, %v3007_v37  ;;  %v16288_v37 = vld [vmem:[#allocation15 + $0x50] ss:$12 sps:$4 sm:$0xff]   ;;  %v16289_v45 = vld [vmem:[#allocation15 + $0x68] ss:$12 sps:$4 sm:$0xff]  }
 0x67d   :  { %v3015_v55 = vmul.f32 %v3013_v47, %v3009_v56  ;;  %v16290_v56 = vld [vmem:[#allocation15 + $0x80] ss:$12 sps:$4 sm:$0xff]   ;;  %v16291_v47 = vld [vmem:[#allocation15 + $0x98] ss:$12 sps:$4 sm:$0xff]  }
 0x67f   :  { %3017 = vst [vmem:[#allocation2 + $0x20] sm:$0xff] %v3015_v55  ;;  %v18743_v57 = vadd.f32 %v3024_v38, %v3015_v55  ;;  %v18829_v55 = vld [vmem:[#allocation29 + $0x50] sm:$0xff]  ;;  %v3321_v38 = vld [vmem:[#allocation18] sm:$0x7] }
 0x680   :  { %5013 = vst.msk [vmem:[#allocation4] sm:$0xff] %vm5012_vm1, %v18829_v55 }
 0x681   :  { %v3288_v59 = vpack.c.bf16 %v18743_v57, %v18743_v57 }
 0x683   :  { %3499 = vmatmul.mubr.bf16.vlgmr.msra.gmra.mrb[20].mxu0 %v3288_v59  ;;  %15542 = vmatmul.mubr.bf16.vlgmr.msra.gmra.mrb[48].mxu1 %v3288_v59  ;;  %v3326_v59 = vrot.slane %v3321_v38, %v18367_v44 }
 0x684   :  { %3766 = vmatpush1.bf16.msra.mxu0 %v18745_v54  ;;  %15546 = vmatpush3.bf16.msra.mxu1 %v16256_v58  ;;  %v3062_v58 = vld [vmem:[#allocation17] sm:$0x7] }
 0x685   :  { %3767 = vmatprep.subr.bf16.mxu0 %v18749_v10  ;;  %15547 = vmatprep.subr.bf16.mxu1 %v18519_v22 }
 0x686   :  { %3797 = vmatprep.mubr.bf16.mxu0 %v17893_v2  ;;  %15561 = vmatprep.mubr.msk.bf16.mxu1 %vm17894_vm0, %v18519_v22 }
 0x688   :  { %3768 = vmatpush1.bf16.msra.mxu0 %v18752_v6  ;;  %15548 = vmatpush3.bf16.msra.mxu1 %v16260_v17  ;;  %v3071_v17 = vrot.slane %v3062_v58, %v18370_v46 }
 0x689   :  { %3769 = vmatprep.subr.bf16.mxu0 %v18756_v23  ;;  %15549 = vmatprep.subr.bf16.mxu1 %v18519_v22 }
 0x68c   :  { %3770 = vmatpush1.bf16.msra.mxu0 %v18762_v3  ;;  %15550 = vmatpush3.bf16.msra.mxu1 %v16264_v12  ;;  %v3330_v12 = vrot.slane %v3321_v38, %v18370_v46 }
 0x68d   :  { %15551 = vmatprep.subr.bf16.mxu1 %v18519_v22  ;;  %3771 = vmatprep.subr.bf16.mxu0 %v18770_v19 }
 0x690   :  { %3772 = vmatpush1.bf16.msra.mxu0 %v18772_v21  ;;  %15552 = vmatpush3.bf16.msra.mxu1 %v16268_v39  ;;  %v15897_v39 = vadd.f32 %v3330_v12, %v3071_v17 }
 0x691   :  { %15553 = vmatprep.subr.bf16.mxu1 %v18519_v22  ;;  %3773 = vmatprep.subr.bf16.mxu0 %v18776_v25 }
 0x694   :  { %3774 = vmatpush1.bf16.msra.mxu0 %v18779_v26  ;;  %15554 = vmatpush3.bf16.msra.mxu1 %v16272_v62 }
 0x695   :  { %15555 = vmatprep.subr.bf16.mxu1 %v18519_v22  ;;  %3775 = vmatprep.subr.bf16.mxu0 %v18783_v50 }
 0x698   :  { %3776 = vmatpush1.bf16.msra.mxu0 %v18786_v51  ;;  %15556 = vmatpush3.bf16.msra.mxu1 %v16276_v52 }
 0x699   :  { %15557 = vmatprep.subr.bf16.mxu1 %v18519_v22  ;;  %3777 = vmatprep.subr.bf16.mxu0 %v18790_v53 }
 0x69c   :  { %3778 = vmatpush1.bf16.msra.mxu0 %v18793_v60  ;;  %15558 = vmatpush3.bf16.msra.mxu1 %v16280_v61 }
 0x69d   :  { %15559 = vmatprep.subr.bf16.mxu1 %v18519_v22  ;;  %3779 = vmatprep.subr.bf16.mxu0 %v18797_v63 }
 0x6a0   :  { %3780 = vmatpush1.bf16.msra.mxu0 %v18800_v0  ;;  %15560 = vmatpush3.bf16.msra.mxu1 %v16284_v7 }
 0x6a1   :  { %4024 = vmatprep.subr.bf16.mxu0 %v18671_v4  ;;  %15565 = vmatprep.subr.bf16.mxu1 %v18519_v22 }
 0x6a3   :  { %3798 = vmatmul.mubr.bf16.vlgmr.msra.gmra.mrb[24].mxu0 %v3585_v28  ;;  %15562 = vmatmul.mubr.bf16.vlgmr.msra.gmra.mrb[52].mxu1 %v3585_v28 }
 0x6a4   :  { %4025 = vmatpush1.bf16.msra.mxu0 %v18674_v5  ;;  %15566 = vmatpush3.bf16.msra.mxu1 %v16285_v9 }
 0x6a5   :  { %4026 = vmatprep.subr.bf16.mxu0 %v18678_v8  ;;  %15567 = vmatprep.subr.bf16.mxu1 %v18519_v22 }
 0x6a6   :  { %4056 = vmatprep.mubr.bf16.mxu0 %v17893_v2  ;;  %15581 = vmatprep.mubr.msk.bf16.mxu1 %vm17894_vm0, %v18519_v22 }
 0x6a8   :  { %4027 = vmatpush1.bf16.msra.mxu0 %v18680_v14  ;;  %15568 = vmatpush3.bf16.msra.mxu1 %v16286_v32 }
 0x6a9   :  { %4028 = vmatprep.subr.bf16.mxu0 %v18688_v29  ;;  %15569 = vmatprep.subr.bf16.mxu1 %v18519_v22 }
 0x6ac   :  { %4029 = vmatpush1.bf16.msra.mxu0 %v18690_v31  ;;  %15570 = vmatpush3.bf16.msra.mxu1 %v16287_v35 }
 0x6ad   :  { %4030 = vmatprep.subr.bf16.mxu0 %v18695_v34  ;;  %15571 = vmatprep.subr.bf16.mxu1 %v18519_v22 }
 0x6b0   :  { %4031 = vmatpush1.bf16.msra.mxu0 %v18697_v20  ;;  %15572 = vmatpush3.bf16.msra.mxu1 %v16288_v37 }
 0x6b1   :  { %4032 = vmatprep.subr.bf16.mxu0 %v18702_v24  ;;  %15573 = vmatprep.subr.bf16.mxu1 %v18519_v22 }
 0x6b4   :  { %4033 = vmatpush1.bf16.msra.mxu0 %v18704_v27  ;;  %15574 = vmatpush3.bf16.msra.mxu1 %v16289_v45 }
 0x6b5   :  { %4034 = vmatprep.subr.bf16.mxu0 %v18709_v30  ;;  %15575 = vmatprep.subr.bf16.mxu1 %v18519_v22 }
 0x6b8   :  { %4035 = vmatpush1.bf16.msra.mxu0 %v18711_v33  ;;  %15576 = vmatpush3.bf16.msra.mxu1 %v16290_v56 }
 0x6b9   :  { %4036 = vmatprep.subr.bf16.mxu0 %v18718_v1  ;;  %15577 = vmatprep.subr.bf16.mxu1 %v18519_v22  ;;  %v3067_v22 = vrot.slane %v3062_v58, %v18367_v44 }
 0x6bb   :  { %v15895_v15 = vadd.f32 %v3326_v59, %v3067_v22  ;;  %v3075_v22 = vrot.slane %v3062_v58, %v18377_v13 }
 0x6bc   :  { %4037 = vmatpush1.bf16.msra.mxu0 %v18716_v48  ;;  %15578 = vmatpush3.bf16.msra.mxu1 %v16291_v47 }
 0x6bd   :  { %4038 = vmatprep.subr.bf16.mxu0 %v18721_v36  ;;  %15579 = vmatprep.subr.bf16.mxu1 %v18829_v55 }
 0x6c0   :  { %4039 = vmatpush1.bf16.msra.mxu0 %v18725_v41  ;;  %15580 = vmatpush3.bf16.msra.mxu1 %v16292_v49  ;;  %v3334_v49 = vrot.slane %v3321_v38, %v18377_v13  ;;  %v3580_v38 = vpop.permute.xlu1 %3579 }
 0x6c1   :  { %4323 = vmatprep.subr.bf16.mxu0 %v18731_v40  ;;  %15585 = vmatprep.subr.bf16.mxu1 %v18829_v55  ;;  %v3582_v58 = vmul.f32 %v3580_v38, %v18743_v57 }
 0x756   :  { %v3500_v16 = vpop.f32.mrb[20].mxu0  ;;  %v3541_v18 = vpop.f32.mrb[48].mxu1 }
 0x757   :  { %v15896_v62 = vadd.f32 %v15895_v15, %v3500_v16  ;;  %v3502_v52 = vpop.f32.mrb[21].mxu0  ;;  %v15543_v61 = vpop.f32.mrb[49].mxu1  ;;  %v3542_v17 = vadd.f32 %v3541_v18, %v3334_v49  ;;  %v3283_v15 = vadd.f32 %v18768_v11, %v3075_v22  ;;  %v16293_v11 = vld [vmem:[#allocation14 + $0x8] ss:$12 sps:$4 sm:$0xff]  }
 0x758   :  { %v3504_v40 = vpop.f32.mrb[22].mxu0  ;;  %v3544_v7 = vpop.f32.mrb[50].mxu1  ;;  %v15898_v35 = vadd.f32 %v15897_v39, %v3502_v52 }
 0x759   :  { %v13912_v9 = vmul.f32 -1.442695, %v15896_v62  ;;  %v3505_v28 = vpop.f32.mrb[23].mxu0  ;;  %v15544_v32 = vpop.f32.mrb[51].mxu1 }
 0x75a   :  { %v13913_v37 = vmul.f32 -1.442695, %v15898_v35  ;;  %v3571_v28 = vpop.permute.xlu0 %3570 }
 0x75b   :  { %16551 = vpow2.f32 %v13912_v9 }
 0x75c   :  { %16553 = vpow2.f32 %v13913_v37  ;;  %v16294_v37 = vld [vmem:[#allocation14 + $0x20] ss:$12 sps:$4 sm:$0xff]  }
 0x765   :  { %v16552_v45 = vpop.eup %16551 }
 0x766   :  { %v3551_v56 = vadd.f32 1.0, %v16552_v45  ;;  %v16554_v47 = vpop.eup %16553 }
 0x767   :  { %v3558_v59 = vadd.f32 1.0, %v16554_v47 }
 0x768   :  { %16555 = vrcp.f32 %v3551_v56 }
 0x769   :  { %16557 = vrcp.f32 %v3558_v59 }
 0x772   :  { %v16556_v12 = vpop.eup %16555 }
 0x773   :  { %v3561_v16 = vmul.f32 %v16556_v12, %v3542_v17  ;;  %v16558_v39 = vpop.eup %16557 }
 0x774   :  { %v3564_v52 = vsub.f32 1.0, %v16558_v39  ;;  %v3566_v7 = vmul.f32 %v16558_v39, %v18743_v57  ;;  %v16295_v57 = vld [vmem:[#allocation14 + $0x38] ss:$12 sps:$4 sm:$0xff]  }
 0x775   :  { %v3562_v62 = vadd.f32 %v3561_v16, %v3283_v15 }
 0x777   :  { %16559 = vtanh.f32 %v3562_v62 }
 0x781   :  { %v16560_v61 = vpop.eup %16559 }
 0x782   :  { %v3565_v40 = vmul.f32 %v16560_v61, %v3564_v52 }
 0x784   :  { %v3567_v9 = vadd.f32 %v3566_v7, %v3565_v40 }
 0x786   :  { %v18843_v32 = vmul.f32 %v3571_v28, %v3567_v9 }
 0x788   :  { %v18847_v18 = vadd.f32 %v3582_v58, %v18843_v32 }
 0x78a   :  { %v3846_v35 = vpack.c.bf16 %v18847_v18, %v18847_v18 }
 0x78c   :  { %4057 = vmatmul.mubr.bf16.vlgmr.msra.gmra.mrb[24].mxu0 %v3846_v35  ;;  %15582 = vmatmul.mubr.bf16.vlgmr.msra.gmra.mrb[56].mxu1 %v3846_v35 }
 0x78d   :  { %4324 = vmatpush1.bf16.msra.mxu0 %v18745_v54  ;;  %15586 = vmatpush3.bf16.msra.mxu1 %v16293_v11  ;;  %v18873_v54 = vpop.f32.mrb[52].mxu1 }
 0x78e   :  { %4325 = vmatprep.subr.bf16.mxu0 %v18749_v10  ;;  %15587 = vmatprep.subr.bf16.mxu1 %v18829_v55  ;;  %v15563_v10 = vpop.f32.mrb[53].mxu1 }
 0x78f   :  { %4355 = vmatprep.mubr.bf16.mxu0 %v17893_v2  ;;  %15601 = vmatprep.mubr.msk.bf16.mxu1 %vm17894_vm0, %v18829_v55 }
 0x791   :  { %4326 = vmatpush1.bf16.msra.mxu0 %v18752_v6  ;;  %15588 = vmatpush3.bf16.msra.mxu1 %v16294_v37  ;;  %v3843_v6 = vpop.f32.mrb[54].mxu1 }
 0x792   :  { %4327 = vmatprep.subr.bf16.mxu0 %v18756_v23  ;;  %15589 = vmatprep.subr.bf16.mxu1 %v18829_v55  ;;  %v15564_v23 = vpop.f32.mrb[55].mxu1  ;;  %v4129_v6 = vpop.permute.xlu0 %4128 }
 0x793   :  { %v4138_v23 = vpop.permute.xlu1 %4137 }
 0x795   :  { %4328 = vmatpush1.bf16.msra.mxu0 %v18762_v3  ;;  %15590 = vmatpush3.bf16.msra.mxu1 %v16295_v57  ;;  %v16296_v3 = vld [vmem:[#allocation14 + $0x50] ss:$12 sps:$4 sm:$0xff]  }
 0x796   :  { %4329 = vmatprep.subr.bf16.mxu0 %v18770_v19  ;;  %15591 = vmatprep.subr.bf16.mxu1 %v18829_v55  ;;  %v16297_v19 = vld [vmem:[#allocation14 + $0x68] ss:$12 sps:$4 sm:$0xff]  }
 0x799   :  { %4330 = vmatpush1.bf16.msra.mxu0 %v18772_v21  ;;  %15592 = vmatpush3.bf16.msra.mxu1 %v16296_v3  ;;  %v16298_v21 = vld [vmem:[#allocation14 + $0x80] ss:$12 sps:$4 sm:$0xff]  }
 0x79a   :  { %4331 = vmatprep.subr.bf16.mxu0 %v18776_v25  ;;  %15593 = vmatprep.subr.bf16.mxu1 %v18829_v55  ;;  %v16299_v25 = vld [vmem:[#allocation14 + $0x98] ss:$12 sps:$4 sm:$0xff]  }
 0x79d   :  { %4332 = vmatpush1.bf16.msra.mxu0 %v18779_v26  ;;  %15594 = vmatpush3.bf16.msra.mxu1 %v16297_v19  ;;  %v4143_v26 = vld [vmem:[#allocation9 + $0x1c] sm:$0xf]  ;;  %v4140_v19 = vmul.f32 %v4138_v23, %v18847_v18 }
 0x79e   :  { %4333 = vmatprep.subr.bf16.mxu0 %v18783_v50  ;;  %15595 = vmatprep.subr.bf16.mxu1 %v18829_v55  ;;  %v16301_v50 = vld [vmem:[#allocation15 + $0x8] ss:$12 sps:$4 sm:$0xff]  }
 0x7a1   :  { %4334 = vmatpush1.bf16.msra.mxu0 %v18786_v51  ;;  %15596 = vmatpush3.bf16.msra.mxu1 %v16298_v21  ;;  %v16302_v51 = vld [vmem:[#allocation15 + $0x20] ss:$12 sps:$4 sm:$0xff]  }
 0x7a2   :  { %4335 = vmatprep.subr.bf16.mxu0 %v18790_v53  ;;  %15597 = vmatprep.subr.bf16.mxu1 %v18829_v55  ;;  %v16303_v53 = vld [vmem:[#allocation15 + $0x38] ss:$12 sps:$4 sm:$0xff]  }
 0x7a5   :  { %4336 = vmatpush1.bf16.msra.mxu0 %v18793_v60  ;;  %15598 = vmatpush3.bf16.msra.mxu1 %v16299_v25 }
 0x7a6   :  { %4337 = vmatprep.subr.bf16.mxu0 %v18797_v63  ;;  %15599 = vmatprep.subr.bf16.mxu1 %v18829_v55 }
 0x7a9   :  { %4338 = vmatpush1.bf16.msra.mxu0 %v18800_v0 }
 0x7aa   :  { %4582 = vmatprep.subr.bf16.mxu0 %v18671_v4  ;;  %v16300_v4 = vld [vmem:[#allocation14 + $0xb0] ss:$12 sps:$4 sm:$0xff]  }
 0x7ab   :  { %15600 = vmatpush3.bf16.msra.mxu1 %v16300_v4  ;;  %v4700_v4 = vld [vmem:[#allocation2] sm:$0xff] }
 0x7ac   :  { %15605 = vmatprep.subr.bf16.mxu1 %v18829_v55  ;;  %4356 = vmatmul.mubr.bf16.vlgmr.msra.gmra.mrb[28].mxu0 %v4143_v26 }
 0x7ad   :  { %4583 = vmatpush1.bf16.msra.mxu0 %v18674_v5  ;;  %4614 = vmatprep.mubr.bf16.mxu0 %v17893_v2  ;;  %v16304_v5 = vld [vmem:[#allocation15 + $0x50] ss:$12 sps:$4 sm:$0xff]  }
 0x7ae   :  { %15602 = vmatmul.mubr.bf16.vlgmr.msra.gmra.mrb[60].mxu1 %v4143_v26  ;;  %4584 = vmatprep.subr.bf16.mxu0 %v18678_v8  ;;  %v16305_v8 = vld [vmem:[#allocation15 + $0x68] ss:$12 sps:$4 sm:$0xff]  }
 0x7af   :  { %15606 = vmatpush3.bf16.msra.mxu1 %v16301_v50  ;;  %15621 = vmatprep.mubr.msk.bf16.mxu1 %vm17894_vm0, %v18829_v55  ;;  %v16310_v26 = vld [vmem:[%s19681_s10 + $0x8] sm:$0xff]  }
 0x7b0   :  { %15607 = vmatprep.subr.bf16.mxu1 %v18829_v55 }
 0x7b1   :  { %4585 = vmatpush1.bf16.msra.mxu0 %v18680_v14  ;;  %v16306_v14 = vld [vmem:[#allocation15 + $0x80] ss:$12 sps:$4 sm:$0xff]  }
 0x7b2   :  { %4586 = vmatprep.subr.bf16.mxu0 %v18688_v29  ;;  %v16307_v29 = vld [vmem:[#allocation15 + $0x98] ss:$12 sps:$4 sm:$0xff]  }
 0x7b3   :  { %15608 = vmatpush3.bf16.msra.mxu1 %v16302_v51  ;;  %v16312_v51 = vld [vmem:[%s19681_s10 + $0x18] sm:$0xff]  }
 0x7b4   :  { %15609 = vmatprep.subr.bf16.mxu1 %v18829_v55 }
 0x7b5   :  { %4587 = vmatpush1.bf16.msra.mxu0 %v18690_v31  ;;  %v16308_v31 = vld [vmem:[#allocation15 + $0xb0] ss:$12 sps:$4 sm:$0xff]  }
 0x7b6   :  { %4588 = vmatprep.subr.bf16.mxu0 %v18695_v34  ;;  %v16309_v34 = vld [vmem:[%s19681_s10] sm:$0xff]  }
 0x7b7   :  { %15610 = vmatpush3.bf16.msra.mxu1 %v16303_v53  ;;  %v16313_v53 = vld [vmem:[%s19681_s10 + $0x20] sm:$0xff]  }
 0x7b8   :  { %15611 = vmatprep.subr.bf16.mxu1 %v18829_v55 }
 0x7b9   :  { %4589 = vmatpush1.bf16.msra.mxu0 %v18697_v20  ;;  %v3879_v20 = vld [vmem:[#allocation18] sm:$0x7] }
 0x7ba   :  { %4590 = vmatprep.subr.bf16.mxu0 %v18702_v24  ;;  %v3620_v24 = vld [vmem:[#allocation17] sm:$0x7]  ;;  %v3892_v39 = vrot.slane %v3879_v20, %v18377_v13 }
 0x7bb   :  { %15612 = vmatpush3.bf16.msra.mxu1 %v16304_v5  ;;  %v3633_v52 = vrot.slane %v3620_v24, %v18377_v13  ;;  %v16314_v5 = vld [vmem:[%s19681_s10 + $0x28] sm:$0xff]  }
 0x7bc   :  { %15613 = vmatprep.subr.bf16.mxu1 %v18829_v55 }
 0x7bd   :  { %4591 = vmatpush1.bf16.msra.mxu0 %v18704_v27  ;;  %v3625_v27 = vrot.slane %v3620_v24, %v18367_v44  ;;  %v3841_v9 = vadd.f32 %v18873_v54, %v3633_v52  ;;  %v4701_v54 = vld [vmem:[#allocation2 + $0x8] sm:$0xff] }
 0x7be   :  { %4592 = vmatprep.subr.bf16.mxu0 %v18709_v30  ;;  %v3884_v30 = vrot.slane %v3879_v20, %v18367_v44  ;;  %v4708_v50 = vpack.c.bf16 %v4701_v54, %v4700_v4 }
 0x7bf   :  { %15614 = vmatpush3.bf16.msra.mxu1 %v16305_v8  ;;  %v16315_v8 = vld [vmem:[%s19681_s10 + $0x30] sm:$0xff]  }
 0x7c0   :  { %15615 = vmatprep.subr.bf16.mxu1 %v18829_v55 }
 0x7c1   :  { %4593 = vmatpush1.bf16.msra.mxu0 %v18711_v33  ;;  %v3629_v33 = vrot.slane %v3620_v24, %v18370_v46 }
 0x7c2   :  { %4594 = vmatprep.subr.bf16.mxu0 %v18718_v1  ;;  %v15899_v1 = vadd.f32 %v3884_v30, %v3625_v27 }
 0x7c3   :  { %15616 = vmatpush3.bf16.msra.mxu1 %v16306_v14  ;;  %v16316_v14 = vld [vmem:[%s19681_s10 + $0x38] sm:$0xff]  }
 0x7c4   :  { %15617 = vmatprep.subr.bf16.mxu1 %v18829_v55 }
 0x7c5   :  { %4595 = vmatpush1.bf16.msra.mxu0 %v18716_v48  ;;  %v3888_v48 = vrot.slane %v3879_v20, %v18370_v46  ;;  %v4704_v20 = vld [vmem:[#allocation2 + $0x20] sm:$0xff] }
 0x7c6   :  { %4596 = vmatprep.subr.bf16.mxu0 %v18721_v36  ;;  %v4710_v24 = vpack.c.bf16 %v18843_v32, %v4704_v20  ;;  %v16321_v32 = vld [vmem:[#allocation21 + $0x20] sm:$0xff]  }
 0x7c7   :  { %15618 = vmatpush3.bf16.msra.mxu1 %v16307_v29  ;;  %v15901_v63 = vadd.f32 %v3888_v48, %v3629_v33  ;;  %v4703_v29 = vld [vmem:[#allocation2 + $0x18] sm:$0xff] }
 0x7c8   :  { %15619 = vmatprep.subr.bf16.mxu1 %v18829_v55 }
 0x7c9   :  { %4597 = vmatpush1.bf16.msra.mxu0 %v18725_v41 }
 0x7ca   :  { %15625 = vmatprep.subr.bf16.mxu0 %v16309_v34 }
 0x7cb   :  { %15620 = vmatpush3.bf16.msra.mxu1 %v16308_v31  ;;  %v4702_v31 = vld [vmem:[#allocation2 + $0x10] sm:$0xff] }
 0x85f   :  { %v4058_v36 = vpop.f32.mrb[24].mxu0  ;;  %v4099_v60 = vpop.f32.mrb[56].mxu1 }
 0x860   :  { %v15900_v0 = vadd.f32 %v15899_v1, %v4058_v36  ;;  %v4060_v45 = vpop.f32.mrb[25].mxu0  ;;  %v15583_v56 = vpop.f32.mrb[57].mxu1  ;;  %v4100_v40 = vadd.f32 %v4099_v60, %v3892_v39  ;;  %v16317_v1 = vld [vmem:[#allocation21] sm:$0xff]   ;;  %v16318_v36 = vld [vmem:[#allocation21 + $0x8] sm:$0xff]   ;;  %v16319_v60 = vld [vmem:[#allocation21 + $0x10] sm:$0xff]  }
 0x861   :  { %v4062_v41 = vpop.f32.mrb[26].mxu0  ;;  %v4102_v47 = vpop.f32.mrb[58].mxu1  ;;  %v15902_v17 = vadd.f32 %v15901_v63, %v4060_v45  ;;  %15649 = vmatprep.subr.bf16.mxu1 %v16317_v1  ;;  %v16320_v63 = vld [vmem:[#allocation21 + $0x18] sm:$0xff]   ;;  %v16322_v45 = vld [vmem:[#allocation21 + $0x28] sm:$0xff]  }
 0x862   :  { %v13963_v49 = vmul.f32 -1.442695, %v15900_v0  ;;  %v4063_v22 = vpop.f32.mrb[27].mxu0  ;;  %v15584_v59 = vpop.f32.mrb[59].mxu1  ;;  %v16324_v0 = vld [vmem:[#allocation23] sm:$0xff]   ;;  %v16326_v56 = vld [vmem:[#allocation23 + $0x8] sm:$0xff]  }
 0x863   :  { %v13964_v12 = vmul.f32 -1.442695, %v15902_v17  ;;  %v16323_v41 = vld [vmem:[#allocation21 + $0x30] sm:$0xff]   ;;  %v16328_v22 = vld [vmem:[#allocation23 + $0x18] sm:$0xff]   ;;  %v16329_v59 = vld [vmem:[#allocation23 + $0x20] sm:$0xff]  }
 0x864   :  { %16561 = vpow2.f32 %v13963_v49  ;;  %v16327_v47 = vld [vmem:[#allocation23 + $0x10] sm:$0xff]   ;;  %v16325_v49 = vld [vmem:[#allocation21 + $0x38] sm:$0xff]   ;;  %v16330_v17 = vld [vmem:[#allocation23 + $0x28] sm:$0xff]  }
 0x865   :  { %16563 = vpow2.f32 %v13964_v12  ;;  %v16331_v12 = vld [vmem:[#allocation23 + $0x30] sm:$0xff]  }
 0x86e   :  { %v16562_v15 = vpop.eup %16561 }
 0x86f   :  { %v4109_v16 = vadd.f32 1.0, %v16562_v15  ;;  %v16564_v62 = vpop.eup %16563  ;;  %v16332_v15 = vld [vmem:[#allocation23 + $0x38] sm:$0xff]  }
 0x870   :  { %v4116_v61 = vadd.f32 1.0, %v16564_v62  ;;  %v18961_v62 = vld [vmem:[#allocation4] sm:$0xff] }
 0x871   :  { %16565 = vrcp.f32 %v4109_v16  ;;  %v18959_v16 = vsub.s32 3, %v18364_v43  ;;  %v5139_v39 = vrot.slane %v18961_v62, %v18367_v44  ;;  %v5146_v52 = vrot.slane %v18961_v62, %v18370_v46 }
 0x872   :  { %16567 = vrcp.f32 %v4116_v61  ;;  %v5153_v61 = vrot.slane %v18961_v62, %v18377_v13 }
 0x873   :  { %5141 = vbcast.lane.b32.xlu1 %v5139_v39, 256  ;;  %5148 = vbcast.lane.b32.xlu0 %v5146_v52, 256 }
 0x877   :  { %5155 = vbcast.lane.b32.xlu1 %v5153_v61, 256  ;;  %v5022_v61 = vld [vmem:[%s19727_s12] sm:$0xff] }
 0x87b   :  { %v16566_v7 = vpop.eup %16565 }
 0x87c   :  { %v4119_v28 = vmul.f32 %v16566_v7, %v4100_v40  ;;  %v16568_v58 = vpop.eup %16567  ;;  %v5160_v40 = vrot.slane %v18961_v62, %v18959_v16  ;;  %v4437_v7 = vld [vmem:[#allocation18] sm:$0x7] }
 0x87d   :  { %v4122_v11 = vsub.f32 1.0, %v16568_v58  ;;  %v4124_v57 = vmul.f32 %v16568_v58, %v18847_v18  ;;  %v16311_v18 = vld [vmem:[%s19681_s10 + $0x10] sm:$0xff]   ;;  %s5018_s10 = sld [smem:[#allocation7]] }
 0x87e   :  { %v4120_v38 = vadd.f32 %v4119_v28, %v3841_v9  ;;  %5162 = vbcast.lane.b32.xlu0 %v5160_v40, 256  ;;  %v4178_v9 = vld [vmem:[#allocation17] sm:$0x7] }
 0x87f   :  { %v4183_v28 = vrot.slane %v4178_v9, %v18367_v44  ;;  %v4187_v58 = vrot.slane %v4178_v9, %v18370_v46 }
 0x880   :  { %16569 = vtanh.f32 %v4120_v38  ;;  %v4442_v38 = vrot.slane %v4437_v7, %v18367_v44 }
 0x881   :  { %v18947_v27 = vpop.f32.mrb[60].mxu1 }
 0x882   :  { %v15603_v30 = vpop.f32.mrb[61].mxu1 }
 0x883   :  { %v4401_v33 = vpop.f32.mrb[62].mxu1  ;;  %p5019_p1 = scmp.gt.s32.totalorder %s5018_s10, 0 }
 0x884   :  { %v15604_v48 = vpop.f32.mrb[63].mxu1  ;;  %v18978_v33 = vld [vmem:[#allocation20] ss:$0 sm:$0xff] }
 0x885   :  { %s5020_s0 = scalar_select %p5019_p1, 1, 0 }
 0x887   :  { %s5021_s4 = scvt.s32.f32 %s5020_s0 }
 0x889   :  { %s5025_s27 = ssub.f32 1.0, %s5021_s4  ;;  %v5023_v40 = vstv %s5021_s4 }
 0x88a   :  { %v16570_v35 = vpop.eup %16569 }
 0x88b   :  { %v4123_v37 = vmul.f32 %v16570_v35, %v4122_v11  ;;  %v4446_v11 = vrot.slane %v4437_v7, %v18370_v46  ;;  %v15903_v35 = vadd.f32 %v4442_v38, %v4183_v28  ;;  %v4687_v28 = vpop.permute.xlu0 %4686 }
 0x88d   :  { %v4125_v10 = vadd.f32 %v4124_v57, %v4123_v37 }
 0x88f   :  { %v18916_v3 = vmul.f32 %v4129_v6, %v4125_v10  ;;  %v15905_v10 = vadd.f32 %v4446_v11, %v4187_v58  ;;  %v5024_v58 = vmul.f32 %v5023_v40, %v5022_v61 }
 0x891   :  { %v18920_v21 = vadd.f32 %v4140_v19, %v18916_v3 }
 0x893   :  { %v4404_v25 = vpack.c.bf16 %v18920_v21, %v18920_v21 }
 0x895   :  { %4615 = vmatmul.mubr.bf16.vlgmr.msra.gmra.mrb[28].mxu0 %v4404_v25  ;;  %15622 = vmatmul.mubr.bf16.vlgmr.msra.gmra.mrb[64].mxu1 %v4404_v25 }
 0x896   :  { %15626 = vmatpush3.bf16.msra.mxu0 %v16309_v34  ;;  %15641 = vmatprep.mubr.bf16.mxu0 %v4708_v50  ;;  %v4709_v34 = vpack.c.bf16 %v4703_v29, %v4702_v31  ;;  %v4191_v29 = vrot.slane %v4178_v9, %v18377_v13 }
 0x897   :  { %15627 = vmatprep.subr.bf16.mxu0 %v16310_v26  ;;  %15650 = vmatpush3.bf16.msra.mxu1 %v16317_v1 }
 0x898   :  { %15651 = vmatprep.subr.bf16.mxu1 %v16318_v36 }
 0x89a   :  { %15628 = vmatpush3.bf16.msra.mxu0 %v16310_v26 }
 0x89b   :  { %15629 = vmatprep.subr.bf16.mxu0 %v16311_v18  ;;  %15652 = vmatpush3.bf16.msra.mxu1 %v16318_v36 }
 0x89c   :  { %15653 = vmatprep.subr.bf16.mxu1 %v16319_v60 }
 0x89e   :  { %15630 = vmatpush3.bf16.msra.mxu0 %v16311_v18 }
 0x89f   :  { %15631 = vmatprep.subr.bf16.mxu0 %v16312_v51  ;;  %15654 = vmatpush3.bf16.msra.mxu1 %v16319_v60 }
 0x8a0   :  { %15655 = vmatprep.subr.bf16.mxu1 %v16320_v63 }
 0x8a2   :  { %15632 = vmatpush3.bf16.msra.mxu0 %v16312_v51 }
 0x8a3   :  { %15633 = vmatprep.subr.bf16.mxu0 %v16313_v53  ;;  %15656 = vmatpush3.bf16.msra.mxu1 %v16320_v63 }
 0x8a4   :  { %15657 = vmatprep.subr.bf16.mxu1 %v16321_v32 }
 0x8a6   :  { %15634 = vmatpush3.bf16.msra.mxu0 %v16313_v53 }
 0x8a7   :  { %15635 = vmatprep.subr.bf16.mxu0 %v16314_v5  ;;  %15658 = vmatpush3.bf16.msra.mxu1 %v16321_v32 }
 0x8a8   :  { %15659 = vmatprep.subr.bf16.mxu1 %v16322_v45 }
 0x8aa   :  { %15636 = vmatpush3.bf16.msra.mxu0 %v16314_v5 }
 0x8ab   :  { %15637 = vmatprep.subr.bf16.mxu0 %v16315_v8  ;;  %15660 = vmatpush3.bf16.msra.mxu1 %v16322_v45 }
 0x8ac   :  { %15661 = vmatprep.subr.bf16.mxu1 %v16323_v41 }
 0x8ae   :  { %15638 = vmatpush3.bf16.msra.mxu0 %v16315_v8 }
 0x8af   :  { %15639 = vmatprep.subr.bf16.mxu0 %v16316_v14  ;;  %15662 = vmatpush3.bf16.msra.mxu1 %v16323_v41 }
 0x8b0   :  { %15663 = vmatprep.subr.bf16.mxu1 %v16325_v49 }
 0x8b2   :  { %15640 = vmatpush3.bf16.msra.mxu0 %v16316_v14  ;;  %v4450_v14 = vrot.slane %v4437_v7, %v18377_v13  ;;  %v5027_v7 = vstv %s5025_s27 }
 0x8b3   :  { %15673 = vmatprep.subr.bf16.mxu0 %v18829_v55  ;;  %15664 = vmatpush3.bf16.msra.mxu1 %v16325_v49  ;;  %v5028_v11 = vmul.f32 %v18829_v55, %v5027_v7 }
 0x8b5   :  { %15642 = vmatmul.mubr.bf16.vlgmr.msra.gmra.mrb[32].mxu0 %v4709_v34 }
 0x8b6   :  { %15645 = vmatprep.mubr.bf16.mxu0 %v4710_v24  ;;  %15674 = vmatpush3.bf16.msra.mxu0 %v16324_v0  ;;  %v4399_v24 = vadd.f32 %v18947_v27, %v4191_v29 }
 0x8b7   :  { %15675 = vmatprep.subr.bf16.mxu0 %v18829_v55 }
 0x8ba   :  { %15676 = vmatpush3.bf16.msra.mxu0 %v16326_v56 }
 0x8bb   :  { %15677 = vmatprep.subr.bf16.mxu0 %v18829_v55 }
 0x8be   :  { %15678 = vmatpush3.bf16.msra.mxu0 %v16327_v47 }
 0x8bf   :  { %15679 = vmatprep.subr.bf16.mxu0 %v18829_v55 }
 0x8c2   :  { %15680 = vmatpush3.bf16.msra.mxu0 %v16328_v22 }
 0x8c3   :  { %15681 = vmatprep.subr.bf16.mxu0 %v18829_v55 }
 0x8c6   :  { %15682 = vmatpush3.bf16.msra.mxu0 %v16329_v59 }
 0x8c7   :  { %15683 = vmatprep.subr.bf16.mxu0 %v18829_v55 }
 0x8ca   :  { %15684 = vmatpush3.bf16.msra.mxu0 %v16330_v17 }
 0x8cb   :  { %15685 = vmatprep.subr.bf16.mxu0 %v18829_v55 }
 0x8ce   :  { %15686 = vmatpush3.bf16.msra.mxu0 %v16331_v12 }
 0x8cf   :  { %15687 = vmatprep.subr.bf16.mxu0 %v18829_v55 }
 0x8d2   :  { %15688 = vmatpush3.bf16.msra.mxu0 %v16332_v15 }
 0x8e5   :  { %v5142_v29 = vpop.permute.xlu1 %5141 }
 0x968   :  { %v4616_v37 = vpop.f32.mrb[28].mxu0  ;;  %v4657_v57 = vpop.f32.mrb[64].mxu1 }
 0x969   :  { %v15904_v6 = vadd.f32 %v15903_v35, %v4616_v37  ;;  %v4618_v23 = vpop.f32.mrb[29].mxu0  ;;  %v15623_v19 = vpop.f32.mrb[65].mxu1  ;;  %v4658_v34 = vadd.f32 %v4657_v57, %v4450_v14  ;;  %v5029_v37 = vadd.f32 %v5028_v11, %v5024_v58 }
 0x96a   :  { %v4620_v54 = vpop.f32.mrb[30].mxu0  ;;  %v4660_v25 = vpop.f32.mrb[66].mxu1  ;;  %v15906_v18 = vadd.f32 %v15905_v10, %v4618_v23  ;;  %v19015_v10 = vsub.s32 4, %v18364_v43  ;;  %v19020_v23 = vsub.s32 6, %v18364_v43 }
 0x96b   :  { %v14014_v4 = vmul.f32 -1.442695, %v15904_v6  ;;  %v4621_v26 = vpop.f32.mrb[31].mxu0  ;;  %v15624_v50 = vpop.f32.mrb[67].mxu1  ;;  %v19011_v57 = vpack.c.bf16 %v5029_v37, %v5029_v37  ;;  %v19030_v54 = vsub.s32 7, %v18364_v43 }
 0x96c   :  { %v14015_v51 = vmul.f32 -1.442695, %v15906_v18  ;;  %v5167_v6 = vrot.slane %v18961_v62, %v19015_v10 }
 0x96d   :  { %16571 = vpow2.f32 %v14014_v4  ;;  %v5188_v25 = vrot.slane %v18961_v62, %v19030_v54  ;;  %v19037_v4 = vld [vmem:[%s19686_s15] ss:$0 sm:$0xff] }
 0x96e   :  { %16573 = vpow2.f32 %v14015_v51  ;;  %5169 = vbcast.lane.b32.xlu1 %v5167_v6, 256 }
 0x977   :  { %v16572_v53 = vpop.eup %16571 }
 0x978   :  { %v4667_v5 = vadd.f32 1.0, %v16572_v53  ;;  %v16574_v8 = vpop.eup %16573 }
 0x979   :  { %v4674_v31 = vadd.f32 1.0, %v16574_v8 }
 0x97a   :  { %16575 = vrcp.f32 %v4667_v5 }
 0x97b   :  { %16577 = vrcp.f32 %v4674_v31  ;;  %v5149_v31 = vpop.permute.xlu0 %5148 }
 0x984   :  { %v16576_v20 = vpop.eup %16575 }
 0x985   :  { %v4677_v30 = vmul.f32 %v16576_v20, %v4658_v34  ;;  %v16578_v22 = vpop.eup %16577 }
 0x986   :  { %v4680_v12 = vsub.f32 1.0, %v16578_v22  ;;  %v4682_v52 = vmul.f32 %v16578_v22, %v18920_v21  ;;  %v5163_v22 = vpop.permute.xlu0 %5162 }
 0x987   :  { %v4678_v48 = vadd.f32 %v4677_v30, %v4399_v24 }
 0x988   :  { %v15643_v1 = vpop.f32.mrb[32].mxu0 }
 0x989   :  { %16579 = vtanh.f32 %v4678_v48  ;;  %v4826_v36 = vadd.f32 %v15643_v1, %v18978_v33  ;;  %v4817_v60 = vpop.f32.mrb[33].mxu0 }
 0x98a   :  { %v4818_v63 = vadd.f32 %v18978_v33, %v4817_v60  ;;  %v15644_v32 = vpop.f32.mrb[34].mxu0 }
 0x98b   :  { %v18982_v0 = vmax.f32 %v4826_v36, 0.0  ;;  %v4829_v45 = vadd.f32 %v15644_v32, %v18978_v33  ;;  %v4820_v27 = vpop.f32.mrb[35].mxu0 }
 0x98c   :  { %v18985_v56 = vmax.f32 %v4818_v63, 0.0  ;;  %v4821_v41 = vadd.f32 %v18978_v33, %v4820_v27  ;;  %v5156_v27 = vpop.permute.xlu1 %5155 }
 0x98d   :  { %4858 = vst [vmem:[#allocation2 + $0x10] sm:$0xff] %v18982_v0  ;;  %v18989_v47 = vmax.f32 %v4829_v45, 0.0  ;;  %v14042_v45 = vld [vmem:[%s19685_s14] ss:$0 sm:$0xff] }
 0x98e   :  { %4856 = vst [vmem:[#allocation2] sm:$0xff] %v18985_v56  ;;  %v18992_v49 = vmax.f32 %v4821_v41, 0.0 }
 0x98f   :  { %4859 = vst [vmem:[#allocation2 + $0x18] sm:$0xff] %v18989_v47  ;;  %v4865_v17 = vpack.c.bf16 %v18989_v47, %v18982_v0 }
 0x990   :  { %4857 = vst [vmem:[#allocation2 + $0x8] sm:$0xff] %v18992_v49  ;;  %v4864_v59 = vpack.c.bf16 %v18992_v49, %v18985_v56 }
 0x992   :  { %15665 = vmatprep.mubr.bf16.mxu1 %v4864_v59 }
 0x993   :  { %v16580_v15 = vpop.eup %16579  ;;  %15666 = vmatmul.mubr.bf16.vlgmr.msra.gmra.mrb[68].mxu1 %v4865_v17  ;;  %v5199_v17 = vmul.f32 %v14042_v45, %v5142_v29 }
 0x994   :  { %v4681_v39 = vmul.f32 %v16580_v15, %v4680_v12  ;;  %v5200_v12 = vmul.f32 %v14042_v45, %v5149_v31  ;;  %v5201_v15 = vmul.f32 %v14042_v45, %v5156_v27 }
 0x996   :  { %v4683_v9 = vadd.f32 %v4682_v52, %v4681_v39  ;;  %v5202_v52 = vmul.f32 %v14042_v45, %v5163_v22 }
 0x998   :  { %v19004_v38 = vmul.f32 %v4687_v28, %v4683_v9 }
 0x99a   :  { %v4711_v35 = vpack.c.bf16 %v19004_v38, %v18916_v3  ;;  %v19023_v3 = vsub.s32 5, %v18364_v43 }
 0x99c   :  { %15646 = vmatmul.mubr.bf16.gmra.mrb[36].mxu0 %v4711_v35  ;;  %v5174_v19 = vrot.slane %v18961_v62, %v19023_v3 }
 0x99d   :  { %15689 = vmatprep.mubr.msk.bf16.mxu0 %vm17894_vm0, %v18829_v55  ;;  %v5181_v55 = vrot.slane %v18961_v62, %v19020_v23 }
 0x99e   :  { %5176 = vbcast.lane.b32.xlu0 %v5174_v19, 256 }
 0x99f   :  { %5183 = vbcast.lane.b32.xlu1 %v5181_v55, 256 }
 0x9a2   :  { %5190 = vbcast.lane.b32.xlu0 %v5188_v25, 256  ;;  %v14043_v25 = vld [vmem:[%s19687_s16] ss:$0 sm:$0xff] }
 0x9a4   :  { %15690 = vmatmul.mubr.bf16.vlgmr.msra.gmra.mrb[40].mxu0 %v19011_v57 }
 0x9e0   :  { %v5170_v29 = vpop.permute.xlu1 %5169 }
 0xa10   :  { %v5177_v31 = vpop.permute.xlu0 %5176 }
 0xa14   :  { %v5191_v27 = vpop.permute.xlu0 %5190 }
 0xa66   :  { %v15667_v26 = vpop.f32.mrb[68].mxu1 }
 0xa67   :  { %v4982_v50 = vadd.f32 %v15667_v26, %v19037_v4  ;;  %v4973_v18 = vpop.f32.mrb[69].mxu1 }
 0xa68   :  { %v4974_v51 = vadd.f32 %v19037_v4, %v4973_v18  ;;  %v15668_v53 = vpop.f32.mrb[70].mxu1 }
 0xa69   :  { %5006 = vst [vmem:[#allocation3 + $0x10] sm:$0xff] %v4982_v50  ;;  %v4985_v5 = vadd.f32 %v15668_v53, %v19037_v4  ;;  %v4976_v8 = vpop.f32.mrb[71].mxu1 }
 0xa6a   :  { %5004 = vst [vmem:[#allocation3] sm:$0xff] %v4974_v51  ;;  %v4977_v14 = vadd.f32 %v19037_v4, %v4976_v8 }
 0xa6b   :  { %5007 = vst [vmem:[#allocation3 + $0x18] sm:$0xff] %v4985_v5 }
 0xa6c   :  { %5005 = vst [vmem:[#allocation3 + $0x8] sm:$0xff] %v4977_v14 }
 0xa6f   :  { %v15647_v34 = vpop.f32.mrb[36].mxu0 }
 0xa70   :  { %v4842_v20 = vadd.f32 %v15647_v34, %v18978_v33  ;;  %v4833_v24 = vpop.f32.mrb[37].mxu0  ;;  %v5184_v34 = vpop.permute.xlu1 %5183 }
 0xa71   :  { %v4834_v30 = vadd.f32 %v18978_v33, %v4833_v24  ;;  %v15648_v48 = vpop.f32.mrb[38].mxu0  ;;  %v5205_v24 = vmul.f32 %v14042_v45, %v5184_v34  ;;  %v16344_v34 = vld [vmem:[#allocation24 + $0x4c] ss:$12 sps:$4 sm:$0xff]  }
 0xa72   :  { %v19045_v1 = vmax.f32 %v4842_v20, 0.0  ;;  %v4845_v36 = vadd.f32 %v15648_v48, %v18978_v33  ;;  %v4836_v60 = vpop.f32.mrb[39].mxu0 }
 0xa73   :  { %v19048_v63 = vmax.f32 %v4834_v30, 0.0  ;;  %v4837_v32 = vadd.f32 %v18978_v33, %v4836_v60 }
 0xa74   :  { %4862 = vst [vmem:[#allocation2 + $0x30] sm:$0xff] %v19045_v1  ;;  %v19055_v41 = vmax.f32 %v4845_v36, 0.0 }
 0xa75   :  { %4860 = vst [vmem:[#allocation2 + $0x20] sm:$0xff] %v19048_v63  ;;  %v19058_v59 = vmax.f32 %v4837_v32, 0.0  ;;  %v5203_v32 = vmul.f32 %v14042_v45, %v5170_v29  ;;  %v16339_v29 = vld [vmem:[#allocation24 + $0x30] ss:$12 sps:$4 sm:$0xff]  }
 0xa76   :  { %4863 = vst [vmem:[#allocation2 + $0x38] sm:$0xff] %v19055_v41  ;;  %v4867_v33 = vpack.c.bf16 %v19055_v41, %v19045_v1 }
 0xa77   :  { %4861 = vst [vmem:[#allocation2 + $0x28] sm:$0xff] %v19058_v59  ;;  %v4866_v39 = vpack.c.bf16 %v19058_v59, %v19048_v63  ;;  %v5130_v61 = vpop.f32.mrb[40].mxu0 }
 0xa78   :  { %v5216_v40 = vadd.f32 %v5130_v61, %v4977_v14  ;;  %v5215_v7 = vadd.f32 %v5130_v61, %v4974_v51  ;;  %v5217_v9 = vadd.f32 %v5130_v61, %v4982_v50  ;;  %v5218_v28 = vadd.f32 %v5130_v61, %v4985_v5  ;;  %v15691_v58 = vpop.f32.mrb[41].mxu0 }
 0xa79   :  { %15669 = vmatprep.mubr.bf16.mxu1 %v4866_v39  ;;  %v5133_v11 = vpop.f32.mrb[42].mxu0 }
 0xa7a   :  { %15670 = vmatmul.mubr.bf16.gmra.mrb[72].mxu1 %v4867_v33  ;;  %v5224_v35 = vadd.f32 %v5216_v40, %v5200_v12  ;;  %v5223_v37 = vadd.f32 %v5215_v7, %v5199_v17  ;;  %v5225_v6 = vadd.f32 %v5217_v9, %v5201_v15  ;;  %v15692_v55 = vpop.f32.mrb[43].mxu0  ;;  %v5226_v19 = vadd.f32 %v5218_v28, %v5202_v52 }
 0xa7b   :  { %v5204_v15 = vmul.f32 %v14042_v45, %v5177_v31  ;;  %v5206_v33 = vmul.f32 %v14042_v45, %v5191_v27  ;;  %v16365_v31 = vld [vmem:[#allocation24 + $0xe0] ss:$12 sps:$4 sm:$0xff]  }
 0xa7c   :  { %16581 = vtanh.f32 %v5224_v35  ;;  %v16353_v27 = vld [vmem:[#allocation24 + $0x94] ss:$12 sps:$4 sm:$0xff]  }
 0xa7d   :  { %16583 = vtanh.f32 %v5223_v37 }
 0xa7e   :  { %16585 = vtanh.f32 %v5225_v6 }
 0xa7f   :  { %16587 = vtanh.f32 %v5226_v19 }
 0xa86   :  { %v16582_v26 = vpop.eup %16581 }
 0xa87   :  { %v16584_v50 = vpop.eup %16583  ;;  %v5247_v18 = vmul.f32 %v16582_v26, %v14043_v25 }
 0xa88   :  { %v16586_v51 = vpop.eup %16585  ;;  %v5246_v53 = vmul.f32 %v16584_v50, %v14043_v25  ;;  %v16333_v50 = vld [vmem:[#allocation24] ss:$12 sps:$4 sm:$0xff]  }
 0xa89   :  { %v16588_v5 = vpop.eup %16587  ;;  %5256 = vadd.xlane.f32.xlu0 %v5247_v18  ;;  %v5248_v8 = vmul.f32 %v16586_v51, %v14043_v25  ;;  %v16335_v18 = vld [vmem:[#allocation24 + $0x4] ss:$12 sps:$4 sm:$0xff]   ;;  %v16338_v51 = vld [vmem:[#allocation24 + $0x1c] ss:$12 sps:$4 sm:$0xff]  }
 0xa8a   :  { %5254 = vadd.xlane.f32.xlu1 %v5246_v53  ;;  %v5249_v14 = vmul.f32 %v16588_v5, %v14043_v25  ;;  %5786 = vmatprep.subr.bf16.mxu1 %v16335_v18  ;;  %v16336_v53 = vld [vmem:[#allocation24 + $0x18] ss:$12 sps:$4 sm:$0xff]   ;;  %v16341_v5 = vld [vmem:[#allocation24 + $0x34] ss:$12 sps:$4 sm:$0xff]  }
 0xa8b   :  { %5787 = vmatpush1.bf16.msra.mxu1 %v16333_v50 }
 0xa8c   :  { %5788 = vmatprep.subr.bf16.mxu1 %v16338_v51 }
 0xa8d   :  { %5258 = vadd.xlane.f32.xlu0 %v5248_v8  ;;  %v16360_v8 = vld [vmem:[#allocation24 + $0xc8] ss:$12 sps:$4 sm:$0xff]  }
 0xa8e   :  { %5260 = vadd.xlane.f32.xlu1 %v5249_v14  ;;  %v16361_v14 = vld [vmem:[#allocation24 + $0x8] ss:$12 sps:$4 sm:$0xff]   ;;  %15004 = vmatprep.subr.bf16.mxu0 %v16360_v8 }
 0xa8f   :  { %5789 = vmatpush1.bf16.msra.mxu1 %v16336_v53  ;;  %15005 = vmatpush3.bf16.msra.mxu0 %v16361_v14 }
 0xa90   :  { %5790 = vmatprep.subr.bf16.mxu1 %v16341_v5  ;;  %15006 = vmatprep.subr.bf16.mxu0 %v16365_v31 }
 0xa93   :  { %5791 = vmatpush1.bf16.msra.mxu1 %v16339_v29 }
 0xa94   :  { %5792 = vmatprep.subr.bf16.mxu1 %v16344_v34  ;;  %v5288_v34 = vld [vmem:[%s19728_s26] sm:$0xff] }
 0xa95   :  { %vm5289_vm9 = vcmp.gt.f32.partialorder %v5288_v34, 0.5  ;;  %v16385_v34 = vld [vmem:[#allocation24 + $0x140] ss:$12 sps:$4 sm:$0xff]  }
 0xb4d   :  { %v15671_v20 = vpop.f32.mrb[72].mxu1 }
 0xb4e   :  { %v4998_v30 = vadd.f32 %v15671_v20, %v19037_v4  ;;  %v4989_v48 = vpop.f32.mrb[73].mxu1  ;;  %v16370_v20 = vld [vmem:[#allocation24 + $0xf8] ss:$12 sps:$4 sm:$0xff]  }
 0xb4f   :  { %v4990_v36 = vadd.f32 %v19037_v4, %v4989_v48  ;;  %v15672_v60 = vpop.f32.mrb[74].mxu1  ;;  %v16371_v48 = vld [vmem:[#allocation24 + $0x38] ss:$12 sps:$4 sm:$0xff]  }
 0xb50   :  { %5010 = vst [vmem:[#allocation3 + $0x30] sm:$0xff] %v4998_v30  ;;  %v5001_v22 = vadd.f32 %v15672_v60, %v19037_v4  ;;  %v4992_v17 = vpop.f32.mrb[75].mxu1  ;;  %v5221_v12 = vadd.f32 %v5130_v61, %v4998_v30  ;;  %v16347_v30 = vld [vmem:[#allocation24 + $0x64] ss:$12 sps:$4 sm:$0xff]   ;;  %v16350_v60 = vld [vmem:[#allocation24 + $0x7c] ss:$12 sps:$4 sm:$0xff]  }
 0xb51   :  { %5008 = vst [vmem:[#allocation3 + $0x20] sm:$0xff] %v4990_v36  ;;  %v4993_v39 = vadd.f32 %v19037_v4, %v4992_v17  ;;  %v5219_v52 = vadd.f32 %v5130_v61, %v4990_v36  ;;  %v16345_v36 = vld [vmem:[#allocation24 + $0x60] ss:$12 sps:$4 sm:$0xff]   ;;  %v16351_v17 = vld [vmem:[#allocation24 + $0x90] ss:$12 sps:$4 sm:$0xff]  }
 0xb52   :  { %5011 = vst [vmem:[#allocation3 + $0x38] sm:$0xff] %v5001_v22  ;;  %v5229_v40 = vadd.f32 %v5221_v12, %v5205_v24  ;;  %v5222_v7 = vadd.f32 %v5130_v61, %v5001_v22  ;;  %v16342_v24 = vld [vmem:[#allocation24 + $0x48] ss:$12 sps:$4 sm:$0xff]   ;;  %v5257_v22 = vpop.xlane.xlu0 %5256  ;;  %v16356_v12 = vld [vmem:[#allocation24 + $0xac] ss:$12 sps:$4 sm:$0xff]  }
 0xb53   :  { %5009 = vst [vmem:[#allocation3 + $0x28] sm:$0xff] %v4993_v39  ;;  %v5220_v9 = vadd.f32 %v5130_v61, %v4993_v39  ;;  %v5227_v28 = vadd.f32 %v5219_v52, %v5203_v32  ;;  %v14044_v61 = vld [vmem:[#allocation8] ss:$0 sm:$0xff]  ;;  %5793 = vmatpush1.bf16.msra.mxu1 %v16342_v24  ;;  %v16348_v32 = vld [vmem:[#allocation24 + $0x78] ss:$12 sps:$4 sm:$0xff]   ;;  %v5255_v52 = vpop.xlane.xlu1 %5254 }
 0xb54   :  { %16589 = vtanh.f32 %v5229_v40  ;;  %v5230_v11 = vadd.f32 %v5222_v7, %v5206_v33  ;;  %5794 = vmatprep.subr.bf16.mxu1 %v16347_v30  ;;  %v16359_v33 = vld [vmem:[#allocation24 + $0xc4] ss:$12 sps:$4 sm:$0xff]   ;;  %v16357_v40 = vld [vmem:[#allocation24 + $0xc0] ss:$12 sps:$4 sm:$0xff]   ;;  %v16364_v7 = vld [vmem:[#allocation24 + $0xdc] ss:$12 sps:$4 sm:$0xff]  }
 0xb55   :  { %v5228_v58 = vadd.f32 %v5220_v9, %v5204_v15  ;;  %16591 = vtanh.f32 %v5227_v28  ;;  %v16354_v15 = vld [vmem:[#allocation24 + $0xa8] ss:$12 sps:$4 sm:$0xff]   ;;  %v16362_v28 = vld [vmem:[#allocation24 + $0xd8] ss:$12 sps:$4 sm:$0xff]  }
 0xb56   :  { %v5259_v39 = vpop.xlane.xlu0 %5258 }
 0xb57   :  { %16593 = vtanh.f32 %v5228_v58  ;;  %5795 = vmatpush1.bf16.msra.mxu1 %v16345_v36  ;;  %v16369_v58 = vld [vmem:[#allocation24 + $0xf4] ss:$12 sps:$4 sm:$0xff]  }
 0xb58   :  { %16595 = vtanh.f32 %v5230_v11  ;;  %5796 = vmatprep.subr.bf16.mxu1 %v16350_v60  ;;  %v5261_v11 = vpop.xlane.xlu1 %5260 }
 0xb5b   :  { %5797 = vmatpush1.bf16.msra.mxu1 %v16348_v32 }
 0xb5c   :  { %5798 = vmatprep.subr.bf16.mxu1 %v16353_v27 }
 0xb5e   :  { %v16590_v35 = vpop.eup %16589 }
 0xb5f   :  { %v5252_v37 = vmul.f32 %v16590_v35, %v14043_v25  ;;  %v16592_v6 = vpop.eup %16591  ;;  %5799 = vmatpush1.bf16.msra.mxu1 %v16351_v17  ;;  %v19074_v35 = vand.u32 127, %v276_v42 }
 0xb60   :  { %v5250_v19 = vmul.f32 %v16592_v6, %v14043_v25  ;;  %5800 = vmatprep.subr.bf16.mxu1 %v16356_v12  ;;  %v16367_v6 = vld [vmem:[#allocation24 + $0xf0] ss:$12 sps:$4 sm:$0xff]  }
 0xb61   :  { %v16594_v45 = vpop.eup %16593  ;;  %5266 = vadd.xlane.f32.xlu0 %v5252_v37 }
 0xb62   :  { %v5251_v55 = vmul.f32 %v16594_v45, %v14043_v25  ;;  %v16596_v4 = vpop.eup %16595 }
 0xb63   :  { %v5253_v26 = vmul.f32 %v16596_v4, %v14043_v25  ;;  %v16366_v25 = vld [vmem:[#allocation24 + $0x20] ss:$12 sps:$4 sm:$0xff]   ;;  %5801 = vmatpush1.bf16.msra.mxu1 %v16354_v15 }
 0xb64   :  { %5264 = vadd.xlane.f32.xlu1 %v5251_v55  ;;  %15007 = vmatpush3.bf16.msra.mxu0 %v16366_v25  ;;  %v19078_v55 = vsub.s32 %v19074_v35, %v18364_v43 }
 0xb65   :  { %5262 = vadd.xlane.f32.xlu0 %v5250_v19  ;;  %15008 = vmatprep.subr.bf16.mxu0 %v16370_v20 }
 0xb66   :  { %5802 = vmatprep.subr.bf16.mxu1 %v16359_v33 }
 0xb67   :  { %5803 = vmatpush1.bf16.msra.mxu1 %v16357_v40 }
 0xb68   :  { %5268 = vadd.xlane.f32.xlu1 %v5253_v26  ;;  %15009 = vmatpush3.bf16.msra.mxu0 %v16371_v48 }
 0xb69   :  { %5804 = vmatprep.subr.bf16.mxu1 %v16364_v7 }
 0xb6b   :  { %5805 = vmatpush1.bf16.msra.mxu1 %v16362_v28 }
 0xb6c   :  { %5806 = vmatprep.subr.bf16.mxu1 %v16369_v58 }
 0xb6f   :  { %5807 = vmatpush1.bf16.msra.mxu1 %v16367_v6 }
 0xb7b   :  { %5277 = vperm.xlu0 %16035, %v14044_v61  }
 0xbee   :  { %v5267_v9 = vpop.xlane.xlu0 %5266 }
 0xbf1   :  { %v5265_v45 = vpop.xlane.xlu1 %5264 }
 0xbf2   :  { %v5263_v37 = vpop.xlane.xlu0 %5262 }
 0xbf5   :  { %v5269_v8 = vpop.xlane.xlu1 %5268 }
 0xbfa   :  { %v5278_v4 = vpop.permute.xlu0 %5277 }
 0xbfb   :  { %v5280_v19 = vadd.f32 %v5278_v4, %v5255_v52  ;;  %v5281_v26 = vadd.f32 %v5278_v4, %v5257_v22  ;;  %v5282_v61 = vadd.f32 %v5278_v4, %v5259_v39  ;;  %v5283_v50 = vadd.f32 %v5278_v4, %v5261_v11 }
 0xbfc   :  { %v5284_v18 = vadd.f32 %v5278_v4, %v5263_v37  ;;  %v5285_v42 = vadd.f32 %v5278_v4, %v5265_v45  ;;  %v5286_v43 = vadd.f32 %v5278_v4, %v5267_v9  ;;  %v5287_v14 = vadd.f32 %v5278_v4, %v5269_v8  ;;  %v16381_v8 = vld [vmem:[#allocation24 + $0x68] ss:$12 sps:$4 sm:$0xff]  }
 0xbfd   :  { %v5303_v51 = vrot.slane %v5280_v19, %v19078_v55  ;;  %v5307_v53 = vrot.slane %v5281_v26, %v19078_v55  ;;  %v5311_v5 = vrot.slane %v5282_v61, %v19078_v55  ;;  %v5315_v29 = vrot.slane %v5283_v50, %v19078_v55  ;;  %v16372_v61 = vld [vmem:[#allocation24 + $0x108] ss:$12 sps:$4 sm:$0xff]   ;;  %v16374_v50 = vld [vmem:[#allocation24 + $0x10c] ss:$12 sps:$4 sm:$0xff]  }
 0xbfe   :  { %v5319_v25 = vrot.slane %v5284_v18, %v19078_v55  ;;  %v5323_v24 = vrot.slane %v5285_v42, %v19078_v55  ;;  %v5327_v48 = vrot.slane %v5286_v43, %v19078_v55  ;;  %v5331_v60 = vrot.slane %v5287_v14, %v19078_v55  ;;  %v16375_v18 = vld [vmem:[#allocation24 + $0x110] ss:$12 sps:$4 sm:$0xff]   ;;  %5808 = vmatprep.subr.bf16.mxu1 %v16374_v50 }
 0xbff   :  { %v5333_v31 = vsel %vm5332_vm2, %v5307_v53, %v5303_v51  ;;  %v16376_v42 = vld [vmem:[#allocation24 + $0x50] ss:$12 sps:$4 sm:$0xff]   ;;  %15010 = vmatprep.subr.bf16.mxu0 %v16375_v18  ;;  %5809 = vmatpush1.bf16.msra.mxu1 %v16372_v61  ;;  %v16377_v51 = vld [vmem:[#allocation24 + $0x120] ss:$12 sps:$4 sm:$0xff]  }
 0xc00   :  { %v5335_v20 = vsel %vm5334_vm3, %v5311_v5, %v5333_v31  ;;  %15011 = vmatpush3.bf16.msra.mxu0 %v16376_v42  ;;  %v16379_v53 = vld [vmem:[#allocation24 + $0x124] ss:$12 sps:$4 sm:$0xff]   ;;  %v16380_v5 = vld [vmem:[#allocation24 + $0x128] ss:$12 sps:$4 sm:$0xff]  }
 0xc01   :  { %v5337_v30 = vsel %vm5336_vm4, %v5315_v29, %v5335_v20  ;;  %5810 = vmatprep.subr.bf16.mxu1 %v16379_v53  ;;  %15012 = vmatprep.subr.bf16.mxu0 %v16380_v5  ;;  %v16382_v29 = vld [vmem:[#allocation24 + $0x138] ss:$12 sps:$4 sm:$0xff]   ;;  %v16384_v31 = vld [vmem:[#allocation24 + $0x13c] ss:$12 sps:$4 sm:$0xff]  }
 0xc02   :  { %v5339_v36 = vsel %vm5338_vm5, %v5319_v25, %v5337_v30  ;;  %v16386_v30 = vld [vmem:[#allocation24 + $0x80] ss:$12 sps:$4 sm:$0xff]  }
 0xc03   :  { %v5341_v32 = vsel %vm5340_vm6, %v5323_v24, %v5339_v36  ;;  %5811 = vmatpush1.bf16.msra.mxu1 %v16377_v51  ;;  %v16389_v36 = vld [vmem:[#allocation24 + $0x154] ss:$12 sps:$4 sm:$0xff]  }
 0xc04   :  { %v5343_v27 = vsel %vm5342_vm7, %v5327_v48, %v5341_v32  ;;  %15013 = vmatpush3.bf16.msra.mxu0 %v16381_v8  ;;  %5812 = vmatprep.subr.bf16.mxu1 %v16384_v31  ;;  %v16387_v48 = vld [vmem:[#allocation24 + $0x150] ss:$12 sps:$4 sm:$0xff]  }
 0xc05   :  { %v5345_v22 = vsel %vm5344_vm8, %v5331_v60, %v5343_v27  ;;  %15014 = vmatprep.subr.bf16.mxu0 %v16385_v34  ;;  %v16390_v60 = vld [vmem:[#allocation24 + $0x158] ss:$12 sps:$4 sm:$0xff]  }
 0xc06   :  { %v5347_v17 = vsel %vm5289_vm9, %v5345_v22, -1e+30 }
 0xc07   :  { %v5348_v12 = vsel %vm5012_vm1, %v5347_v17, -inf  ;;  %5813 = vmatpush1.bf16.msra.mxu1 %v16382_v29 }
 0xc08   :  { %v5349_v15 = vrot.slane %v5348_v12, 4  ;;  %15015 = vmatpush3.bf16.msra.mxu0 %v16386_v30  ;;  %5814 = vmatprep.subr.bf16.mxu1 %v16389_v36  ;;  %v16408_v30 = vld [vmem:[#allocation26 + $0x38] ss:$12 sps:$4 sm:$0xff]   ;;  %v16409_v36 = vld [vmem:[#allocation26 + $0x48] ss:$12 sps:$4 sm:$0xff]  }
 0xc09   :  { %15016 = vmatprep.subr.bf16.mxu0 %v16390_v60  ;;  %v16412_v60 = vld [vmem:[#allocation26 + $0x50] ss:$12 sps:$4 sm:$0xff]  }
 0xc0a   :  { %v5350_v33 = vmax.f32 %v5348_v12, %v5349_v15  ;;  %v16394_v12 = vld [vmem:[#allocation24 + $0x16c] ss:$12 sps:$4 sm:$0xff]   ;;  %v16395_v15 = vld [vmem:[#allocation24 + $0x170] ss:$12 sps:$4 sm:$0xff]  }
 0xc0b   :  { %5815 = vmatpush1.bf16.msra.mxu1 %v16387_v48  ;;  %v16411_v48 = vld [vmem:[#allocation26 + $0x4c] ss:$12 sps:$4 sm:$0xff]  }
 0xc0c   :  { %v5351_v39 = vrot.slane %v5350_v33, 2  ;;  %5816 = vmatprep.subr.bf16.mxu1 %v16394_v12  ;;  %v16420_v12 = vld [vmem:[#allocation26 + $0x80] ss:$12 sps:$4 sm:$0xff]  }
 0xc0e   :  { %v5352_v52 = vmax.f32 %v5350_v33, %v5351_v39  ;;  %v16392_v33 = vld [vmem:[#allocation24 + $0x168] ss:$12 sps:$4 sm:$0xff]   ;;  %v16396_v39 = vld [vmem:[#allocation24 + $0xb0] ss:$12 sps:$4 sm:$0xff]  }
 0xc0f   :  { %5817 = vmatpush1.bf16.msra.mxu1 %v16392_v33 }
 0xc10   :  { %v5353_v40 = vrot.slane %v5352_v52, 1 }
 0xc12   :  { %v5354_v7 = vmax.f32 %v5352_v52, %v5353_v40  ;;  %v16645_v52 = vld [vmem:[%s19726_s28 + $0x38] sm:$0xff] }
 0xc13   :  { %v4692_v40 = vsub.f32 1.0, %v16645_v52  ;;  %v16424_v52 = vld [vmem:[#allocation26 + $0x98] ss:$12 sps:$4 sm:$0xff]  }
 0xc14   :  { %v5355_v9 = vsub.f32 %v5347_v17, %v5354_v7  ;;  %v16399_v7 = vld [vmem:[#allocation26 + $0x4] ss:$12 sps:$4 sm:$0xff]  }
 0xc15   :  { %6045 = vmatprep.subr.bf16.mxu1 %v16399_v7  ;;  %v16427_v7 = vld [vmem:[#allocation26 + $0xac] ss:$12 sps:$4 sm:$0xff]  }
 0xc16   :  { %v5356_v28 = vmul.f32 1.442695, %v5355_v9 }
 0xc18   :  { %16597 = vpow2.f32 %v5356_v28  ;;  %v19112_v28 = vld [vmem:[#allocation29 + $0x50] sm:$0xff] }
 0xc22   :  { %v16598_v58 = vpop.eup %16597 }
 0xc23   :  { %v5358_v11 = vsel %vm5012_vm1, %v16598_v58, 0.0 }
 0xc24   :  { %v5359_v37 = vrot.slane %v5358_v11, 4 }
 0xc26   :  { %v5360_v6 = vadd.f32 %v5359_v37, %v5358_v11 }
 0xc28   :  { %v5361_v45 = vrot.slane %v5360_v6, 2 }
 0xc2a   :  { %v5362_v4 = vadd.f32 %v5361_v45, %v5360_v6 }
 0xc2c   :  { %v5363_v19 = vrot.slane %v5362_v4, 1 }
 0xc2e   :  { %v5364_v26 = vadd.f32 %v5363_v19, %v5362_v4 }
 0xc30   :  { %16599 = vrcp.f32 %v5364_v26 }
 0xc3a   :  { %v16600_v43 = vpop.eup %16599 }
 0xc3b   :  { %v5366_v14 = vmul.f32 %v16600_v43, %v16598_v58 }
 0xc3d   :  { %v5367_v25 = vadd.f32 %v5366_v14, %v18961_v62  ;;  %v5386_v20 = vrot.slane %v5366_v14, %v18377_v13  ;;  %v5372_v24 = vrot.slane %v5366_v14, %v18367_v44  ;;  %v5400_v32 = vrot.slane %v5366_v14, %v19015_v10  ;;  %v16391_v62 = vld [vmem:[#allocation24 + $0x98] ss:$12 sps:$4 sm:$0xff]  }
 0xc3e   :  { %v5379_v27 = vrot.slane %v5366_v14, %v18370_v46  ;;  %v5414_v22 = vrot.slane %v5366_v14, %v19020_v23  ;;  %v5393_v17 = vrot.slane %v5366_v14, %v18959_v16  ;;  %15017 = vmatpush3.bf16.msra.mxu0 %v16391_v62  ;;  %v5407_v9 = vrot.slane %v5366_v14, %v19023_v3  ;;  %v16416_v62 = vld [vmem:[#allocation26 + $0x68] ss:$12 sps:$4 sm:$0xff]  }
 0xc3f   :  { %5368 = vst.msk [vmem:[#allocation4] sm:$0xff] %vm5012_vm1, %v5367_v25  ;;  %5388 = vbcast.lane.b32.xlu0 %v5386_v20, 256  ;;  %5374 = vbcast.lane.b32.xlu1 %v5372_v24, 256  ;;  %v5421_v58 = vrot.slane %v5366_v14, %v19030_v54  ;;  %v16400_v20 = vld [vmem:[#allocation26 + $0x8] ss:$12 sps:$4 sm:$0xff]  }
 0xc40   :  { %15018 = vmatprep.subr.bf16.mxu0 %v16395_v15  ;;  %v16403_v24 = vld [vmem:[#allocation26 + $0x1c] ss:$12 sps:$4 sm:$0xff]   ;;  %v16423_v15 = vld [vmem:[#allocation26 + $0x94] ss:$12 sps:$4 sm:$0xff]  }
 0xc42   :  { %15019 = vmatpush3.bf16.msra.mxu0 %v16396_v39  ;;  %v16421_v39 = vld [vmem:[#allocation26 + $0x90] ss:$12 sps:$4 sm:$0xff]  }
 0xc43   :  { %5402 = vbcast.lane.b32.xlu0 %v5400_v32, 256  ;;  %5381 = vbcast.lane.b32.xlu1 %v5379_v27, 256  ;;  %v16415_v32 = vld [vmem:[#allocation26 + $0x64] ss:$12 sps:$4 sm:$0xff]   ;;  %v16413_v27 = vld [vmem:[#allocation26 + $0x60] ss:$12 sps:$4 sm:$0xff]  }
 0xc44   :  { %15693 = vmatprep.subr.bf16.mxu0 %v19112_v28 }
 0xc47   :  { %5416 = vbcast.lane.b32.xlu0 %v5414_v22, 256  ;;  %5395 = vbcast.lane.b32.xlu1 %v5393_v17, 256  ;;  %v16419_v22 = vld [vmem:[#allocation26 + $0x7c] ss:$12 sps:$4 sm:$0xff]   ;;  %v16417_v17 = vld [vmem:[#allocation26 + $0x78] ss:$12 sps:$4 sm:$0xff]  }
 0xc4b   :  { %4695 = vperm.xlu0 %16035, %v4692_v40   ;;  %5409 = vbcast.lane.b32.xlu1 %v5407_v9, 256  ;;  %v16425_v9 = vld [vmem:[#allocation26 + $0xa8] ss:$12 sps:$4 sm:$0xff]  }
 0xc4f   :  { %5423 = vbcast.lane.b32.xlu1 %v5421_v58, 256  ;;  %v16428_v58 = vld [vmem:[#allocation26 + $0xb0] ss:$12 sps:$4 sm:$0xff]  }
 0xcb1   :  { %v5389_v11 = vpop.permute.xlu0 %5388  ;;  %v5375_v37 = vpop.permute.xlu1 %5374 }
 0xcb2   :  { %v5433_v45 = vmul.f32 %v5375_v37, %v18985_v56  ;;  %v5435_v26 = vmul.f32 %v5389_v11, %v18982_v0  ;;  %v16431_v37 = vld [vmem:[#allocation27 + $0x4] ss:$8 sps:$4 sm:$0xff]  }
 0xcb5   :  { %v5382_v6 = vpop.permute.xlu1 %5381  ;;  %v5403_v19 = vpop.permute.xlu0 %5402 }
 0xcb6   :  { %v5434_v4 = vmul.f32 %v5382_v6, %v18992_v49  ;;  %v5437_v51 = vmul.f32 %v5403_v19, %v19048_v63  ;;  %v16404_v63 = vld [vmem:[#allocation26 + $0x20] ss:$12 sps:$4 sm:$0xff]  }
 0xcb7   :  { %v16429_v6 = vld [vmem:[#allocation27] ss:$8 sps:$4 sm:$0xff]   ;;  %v16437_v19 = vld [vmem:[#allocation27 + $0x24] ss:$8 sps:$4 sm:$0xff]  }
 0xcb8   :  { %v5441_v61 = vadd.f32 %v5434_v4, %v5433_v45  ;;  %v16434_v45 = vld [vmem:[#allocation27 + $0x14] ss:$8 sps:$4 sm:$0xff]   ;;  %v16432_v4 = vld [vmem:[#allocation27 + $0x10] ss:$8 sps:$4 sm:$0xff]  }
 0xcb9   :  { %v5396_v50 = vpop.permute.xlu1 %5395  ;;  %v5417_v5 = vpop.permute.xlu0 %5416 }
 0xcba   :  { %v5436_v18 = vmul.f32 %v5396_v50, %v18989_v47  ;;  %v5442_v42 = vadd.f32 %v5441_v61, %v5435_v26  ;;  %v5439_v56 = vmul.f32 %v5417_v5, %v19045_v1  ;;  %v16397_v47 = vld [vmem:[#allocation26] ss:$12 sps:$4 sm:$0xff]   ;;  %v16401_v1 = vld [vmem:[#allocation26 + $0x18] ss:$12 sps:$4 sm:$0xff]   ;;  %v16452_v5 = vld [vmem:[#allocation27 + $0x74] ss:$8 sps:$4 sm:$0xff]  }
 0xcbb   :  { %v16438_v26 = vld [vmem:[#allocation27 + $0x30] ss:$8 sps:$4 sm:$0xff]   ;;  %v16443_v61 = vld [vmem:[#allocation27 + $0x44] ss:$8 sps:$4 sm:$0xff]   ;;  %v16441_v50 = vld [vmem:[#allocation27 + $0x40] ss:$8 sps:$4 sm:$0xff]  }
 0xcbc   :  { %v5443_v53 = vadd.f32 %v5442_v42, %v5436_v18  ;;  %v16446_v18 = vld [vmem:[#allocation27 + $0x54] ss:$8 sps:$4 sm:$0xff]   ;;  %v16444_v42 = vld [vmem:[#allocation27 + $0x50] ss:$8 sps:$4 sm:$0xff]  }
 0xcbd   :  { %v5410_v8 = vpop.permute.xlu1 %5409 }
 0xcbe   :  { %v5438_v43 = vmul.f32 %v5410_v8, %v19058_v59  ;;  %v5444_v14 = vadd.f32 %v5443_v53, %v5437_v51  ;;  %v16405_v59 = vld [vmem:[#allocation26 + $0x30] ss:$12 sps:$4 sm:$0xff]   ;;  %v16449_v51 = vld [vmem:[#allocation27 + $0x64] ss:$8 sps:$4 sm:$0xff]   ;;  %v16447_v53 = vld [vmem:[#allocation27 + $0x60] ss:$8 sps:$4 sm:$0xff]  }
 0xcbf   :  { %v16450_v8 = vld [vmem:[#allocation27 + $0x70] ss:$8 sps:$4 sm:$0xff]  }
 0xcc0   :  { %v5445_v29 = vadd.f32 %v5444_v14, %v5438_v43  ;;  %v16455_v43 = vld [vmem:[#allocation27 + $0x84] ss:$8 sps:$4 sm:$0xff]   ;;  %v16453_v14 = vld [vmem:[#allocation27 + $0x80] ss:$8 sps:$4 sm:$0xff]  }
 0xcc1   :  { %v5424_v49 = vpop.permute.xlu1 %5423 }
 0xcc2   :  { %v5440_v31 = vmul.f32 %v5424_v49, %v19055_v41  ;;  %v5446_v0 = vadd.f32 %v5445_v29, %v5439_v56  ;;  %v16407_v41 = vld [vmem:[#allocation26 + $0x34] ss:$12 sps:$4 sm:$0xff]   ;;  %v16456_v29 = vld [vmem:[#allocation27 + $0x90] ss:$8 sps:$4 sm:$0xff]   ;;  %v16461_v49 = vld [vmem:[#allocation27 + $0xa4] ss:$8 sps:$4 sm:$0xff]  }
 0xcc3   :  { %v16458_v56 = vld [vmem:[#allocation27 + $0x94] ss:$8 sps:$4 sm:$0xff]  }
 0xcc4   :  { %v5447_v34 = vadd.f32 %v5446_v0, %v5440_v31  ;;  %v16459_v31 = vld [vmem:[#allocation27 + $0xa0] ss:$8 sps:$4 sm:$0xff]   ;;  %v16464_v0 = vld [vmem:[#allocation27 + $0xb4] ss:$8 sps:$4 sm:$0xff]  }
 0xcc6   :  { %v19124_v25 = vpack.c.bf16 %v5447_v34, %v5447_v34  ;;  %v16462_v34 = vld [vmem:[#allocation27 + $0xb0] ss:$8 sps:$4 sm:$0xff]  }
 0xcc8   :  { %5818 = vmatprep.mubr.bf16.mxu1 %v19124_v25  ;;  %5859 = vmatprep.mubr.bf16.mxu0 %v19124_v25 }
 0xcc9   :  { %5819 = vmatmul.mubr.bf16.vlgmr.msra.gmra.mrb[76].mxu1 %v19011_v57  ;;  %5860 = vmatmul.mubr.bf16.vlgmr.msra.gmra.mrb[44].mxu0 %v19011_v57 }
 0xcca   :  { %6046 = vmatpush1.bf16.msra.mxu1 %v16397_v47  ;;  %15694 = vmatpush3.bf16.msra.mxu0 %v16400_v20  ;;  %v4696_v33 = vpop.permute.xlu0 %4695  ;;  %v16467_v47 = vld [vmem:[#allocation27 + $0xc4] ss:$8 sps:$4 sm:$0xff]   ;;  %v16470_v20 = vld [vmem:[#allocation27 + $0xd4] ss:$8 sps:$4 sm:$0xff]  }
 0xccb   :  { %6047 = vmatprep.subr.bf16.mxu1 %v16403_v24  ;;  %15695 = vmatprep.subr.bf16.mxu0 %v19112_v28  ;;  %v4698_v40 = vmul.f32 %v4696_v33, %v18920_v21  ;;  %v16468_v24 = vld [vmem:[#allocation27 + $0xd0] ss:$8 sps:$4 sm:$0xff]  }
 0xccc   :  { %6077 = vmatprep.mubr.bf16.mxu1 %v17893_v2  ;;  %15709 = vmatprep.mubr.msk.bf16.mxu0 %vm17894_vm0, %v19112_v28 }
 0xccd   :  { %v19141_v11 = vadd.f32 %v4698_v40, %v19004_v38  ;;  %v16435_v38 = vld [vmem:[#allocation27 + $0x20] ss:$8 sps:$4 sm:$0xff]  }
 0xcce   :  { %6048 = vmatpush1.bf16.msra.mxu1 %v16401_v1  ;;  %15696 = vmatpush3.bf16.msra.mxu0 %v16404_v63  ;;  %v16473_v1 = vld [vmem:[#allocation27 + $0xe4] ss:$8 sps:$4 sm:$0xff]   ;;  %v16471_v63 = vld [vmem:[#allocation27 + $0xe0] ss:$8 sps:$4 sm:$0xff]  }
 0xccf   :  { %6049 = vmatprep.subr.bf16.mxu1 %v16407_v41  ;;  %15697 = vmatprep.subr.bf16.mxu0 %v19112_v28  ;;  %v5867_v21 = vpack.c.bf16 %v19141_v11, %v19141_v11  ;;  %v16476_v41 = vld [vmem:[#allocation27 + $0xf4] ss:$8 sps:$4 sm:$0xff]  }
 0xcd2   :  { %6050 = vmatpush1.bf16.msra.mxu1 %v16405_v59  ;;  %15698 = vmatpush3.bf16.msra.mxu0 %v16408_v30  ;;  %v16474_v59 = vld [vmem:[#allocation27 + $0xf0] ss:$8 sps:$4 sm:$0xff]   ;;  %v16479_v30 = vld [vmem:[#allocation27 + $0x104] ss:$8 sps:$4 sm:$0xff]  }
 0xcd3   :  { %6051 = vmatprep.subr.bf16.mxu1 %v16411_v48  ;;  %15699 = vmatprep.subr.bf16.mxu0 %v19112_v28 }
 0xcd6   :  { %6052 = vmatpush1.bf16.msra.mxu1 %v16409_v36  ;;  %15700 = vmatpush3.bf16.msra.mxu0 %v16412_v60 }
 0xcd7   :  { %6053 = vmatprep.subr.bf16.mxu1 %v16415_v32  ;;  %15701 = vmatprep.subr.bf16.mxu0 %v19112_v28 }
 0xcda   :  { %6054 = vmatpush1.bf16.msra.mxu1 %v16413_v27  ;;  %15702 = vmatpush3.bf16.msra.mxu0 %v16416_v62  ;;  %v5513_v62 = vld [vmem:[%s19729_s1] sm:$0x7] }
 0xcdb   :  { %6055 = vmatprep.subr.bf16.mxu1 %v16419_v22  ;;  %15703 = vmatprep.subr.bf16.mxu0 %v19112_v28  ;;  %v5900_v22 = vld [vmem:[%s19691_s21] sm:$0x7] }
 0xcdc   :  { %v5909_v33 = vrot.slane %v5900_v22, %v18370_v46 }
 0xcde   :  { %6056 = vmatpush1.bf16.msra.mxu1 %v16417_v17  ;;  %15704 = vmatpush3.bf16.msra.mxu0 %v16420_v12  ;;  %v5518_v17 = vrot.slane %v5513_v62, %v18367_v44  ;;  %v5905_v12 = vrot.slane %v5900_v22, %v18367_v44 }
 0xcdf   :  { %6057 = vmatprep.subr.bf16.mxu1 %v16423_v15  ;;  %15705 = vmatprep.subr.bf16.mxu0 %v19112_v28  ;;  %v5522_v15 = vrot.slane %v5513_v62, %v18370_v46 }
 0xce2   :  { %6058 = vmatpush1.bf16.msra.mxu1 %v16421_v39  ;;  %15706 = vmatpush3.bf16.msra.mxu0 %v16424_v52  ;;  %v15907_v39 = vadd.f32 %v5905_v12, %v5518_v17 }
 0xce3   :  { %6059 = vmatprep.subr.bf16.mxu1 %v16427_v7  ;;  %15707 = vmatprep.subr.bf16.mxu0 %v19112_v28  ;;  %v16440_v28 = vld [vmem:[#allocation27 + $0x34] ss:$8 sps:$4 sm:$0xff]   ;;  %v15909_v7 = vadd.f32 %v5909_v33, %v5522_v15 }
 0xce6   :  { %6060 = vmatpush1.bf16.msra.mxu1 %v16425_v9  ;;  %15708 = vmatpush3.bf16.msra.mxu0 %v16428_v58 }
 0xce7   :  { %6448 = vmatprep.subr.bf16.mxu0 %v16431_v37 }
 0xce9   :  { %6078 = vmatmul.mubr.bf16.vlgmr.msra.gmra.mrb[76].mxu1 %v5867_v21  ;;  %15710 = vmatmul.mubr.bf16.vlgmr.msra.gmra.mrb[48].mxu0 %v5867_v21 }
 0xcea   :  { %6480 = vmatprep.mubr.bf16.mxu0 %v19124_v25  ;;  %6449 = vmatpush1.bf16.msra.mxu0 %v16429_v6  ;;  %v16465_v25 = vld [vmem:[#allocation27 + $0xc0] ss:$8 sps:$4 sm:$0xff]  }
 0xceb   :  { %6450 = vmatprep.subr.bf16.mxu0 %v16434_v45 }
 0xcee   :  { %6451 = vmatpush1.bf16.msra.mxu0 %v16432_v4 }
 0xcef   :  { %6452 = vmatprep.subr.bf16.mxu0 %v16437_v19 }
 0xcf2   :  { %6453 = vmatpush1.bf16.msra.mxu0 %v16435_v38 }
 0xcf3   :  { %6454 = vmatprep.subr.bf16.mxu0 %v16440_v28 }
 0xcf6   :  { %6455 = vmatpush1.bf16.msra.mxu0 %v16438_v26 }
 0xcf7   :  { %6456 = vmatprep.subr.bf16.mxu0 %v16443_v61 }
 0xcfa   :  { %6457 = vmatpush1.bf16.msra.mxu0 %v16441_v50 }
 0xcfb   :  { %6458 = vmatprep.subr.bf16.mxu0 %v16446_v18  ;;  %v5913_v18 = vrot.slane %v5900_v22, %v18377_v13  ;;  %v6196_v22 = vld [vmem:[%s19693_s23] sm:$0x3] }
 0xcfc   :  { %v6201_v17 = vrot.slane %v6196_v22, %v18367_v44  ;;  %v6205_v12 = vrot.slane %v6196_v22, %v18370_v46 }
 0xcfe   :  { %6459 = vmatpush1.bf16.msra.mxu0 %v16444_v42  ;;  %v5526_v42 = vrot.slane %v5513_v62, %v18377_v13  ;;  %v16498_v62 = vld [vmem:[#allocation27 + $0x170] ss:$8 sps:$4 sm:$0xff]  }
 0xcff   :  { %6460 = vmatprep.subr.bf16.mxu0 %v16449_v51 }
 0xd02   :  { %6461 = vmatpush1.bf16.msra.mxu0 %v16447_v53 }
 0xd03   :  { %6462 = vmatprep.subr.bf16.mxu0 %v16452_v5 }
 0xd06   :  { %6463 = vmatpush1.bf16.msra.mxu0 %v16450_v8 }
 0xd07   :  { %6464 = vmatprep.subr.bf16.mxu0 %v16455_v43 }
 0xd0a   :  { %6465 = vmatpush1.bf16.msra.mxu0 %v16453_v14 }
 0xd0b   :  { %6466 = vmatprep.subr.bf16.mxu0 %v16458_v56 }
 0xd0e   :  { %6467 = vmatpush1.bf16.msra.mxu0 %v16456_v29 }
 0xd0f   :  { %6468 = vmatprep.subr.bf16.mxu0 %v16461_v49 }
 0xd12   :  { %6469 = vmatpush1.bf16.msra.mxu0 %v16459_v31 }
 0xd13   :  { %6470 = vmatprep.subr.bf16.mxu0 %v16464_v0 }
 0xd16   :  { %6471 = vmatpush1.bf16.msra.mxu0 %v16462_v34 }
 0xd17   :  { %6472 = vmatprep.subr.bf16.mxu0 %v16467_v47 }
 0xd1a   :  { %6473 = vmatpush1.bf16.msra.mxu0 %v16465_v25  ;;  %v16477_v25 = vld [vmem:[#allocation27 + $0x100] ss:$8 sps:$4 sm:$0xff]  }
 0xd1b   :  { %6474 = vmatprep.subr.bf16.mxu0 %v16470_v20  ;;  %v16482_v20 = vld [vmem:[#allocation27 + $0x114] ss:$8 sps:$4 sm:$0xff]  }
 0xd1e   :  { %6475 = vmatpush1.bf16.msra.mxu0 %v16468_v24  ;;  %v16480_v24 = vld [vmem:[#allocation27 + $0x110] ss:$8 sps:$4 sm:$0xff]  }
 0xd1f   :  { %6476 = vmatprep.subr.bf16.mxu0 %v16473_v1  ;;  %v16485_v1 = vld [vmem:[#allocation27 + $0x124] ss:$8 sps:$4 sm:$0xff]  }
 0xd22   :  { %6477 = vmatpush1.bf16.msra.mxu0 %v16471_v63  ;;  %v16483_v63 = vld [vmem:[#allocation27 + $0x120] ss:$8 sps:$4 sm:$0xff]  }
 0xd23   :  { %6478 = vmatprep.subr.bf16.mxu0 %v16476_v41  ;;  %v16486_v41 = vld [vmem:[#allocation27 + $0x130] ss:$8 sps:$4 sm:$0xff]  }
 0xd26   :  { %6479 = vmatpush1.bf16.msra.mxu0 %v16474_v59  ;;  %v16491_v59 = vld [vmem:[#allocation27 + $0x144] ss:$8 sps:$4 sm:$0xff]  }
 0xd27   :  { %6489 = vmatprep.subr.bf16.mxu0 %v16479_v30  ;;  %v16489_v30 = vld [vmem:[#allocation27 + $0x140] ss:$8 sps:$4 sm:$0xff]  }
 0xd9c   :  { %v15020_v48 = vpop.f32.mrb[44].mxu0 }
 0xd9d   :  { %v15021_v36 = vpop.f32.mrb[45].mxu0 }
 0xd9e   :  { %v15022_v60 = vadd.f32 %v15021_v36, %v15020_v48  ;;  %v15023_v32 = vpop.f32.mrb[46].mxu0  ;;  %v16494_v48 = vld [vmem:[#allocation27 + $0x154] ss:$8 sps:$4 sm:$0xff]   ;;  %v16492_v36 = vld [vmem:[#allocation27 + $0x150] ss:$8 sps:$4 sm:$0xff]  }
 0xd9f   :  { %v15024_v27 = vpop.f32.mrb[47].mxu0  ;;  %v16495_v32 = vld [vmem:[#allocation27 + $0x160] ss:$8 sps:$4 sm:$0xff]  }
 0xda0   :  { %v5862_v8 = vadd.f32 %v15022_v60, %v5526_v42  ;;  %v16497_v60 = vld [vmem:[#allocation27 + $0x164] ss:$8 sps:$4 sm:$0xff]   ;;  %v16500_v27 = vld [vmem:[#allocation27 + $0x174] ss:$8 sps:$4 sm:$0xff]  }
 0xda1   :  { %v16654_v42 = vld [vmem:[#allocation12 + $0x18] sm:$0xff] (!%p14168_p2)  }
 0xdbc   :  { %v6079_v52 = vpop.f32.mrb[76].mxu1  ;;  %v6120_v40 = vpop.f32.mrb[48].mxu0 }
 0xdbd   :  { %v15908_v9 = vadd.f32 %v15907_v39, %v6079_v52  ;;  %v6081_v58 = vpop.f32.mrb[77].mxu1  ;;  %v15711_v37 = vpop.f32.mrb[49].mxu0  ;;  %v6121_v53 = vadd.f32 %v6120_v40, %v5913_v18  ;;  %v16653_v18 = vld [vmem:[#allocation12 + $0x58] sm:$0xff] (!%p14168_p2)  }
 0xdbe   :  { %v6083_v6 = vpop.f32.mrb[78].mxu1  ;;  %v6123_v21 = vpop.f32.mrb[50].mxu0  ;;  %v15910_v19 = vadd.f32 %v15909_v7, %v6081_v58 }
 0xdbf   :  { %v14117_v45 = vmul.f32 -1.442695, %v15908_v9  ;;  %v6084_v4 = vpop.f32.mrb[79].mxu1  ;;  %v15712_v38 = vpop.f32.mrb[51].mxu0  ;;  %v6537_v9 = vadd.s32 (!%p14168_p2), 128, %v19074_v35 }
 0xdc0   :  { %v14118_v28 = vmul.f32 -1.442695, %v15910_v19  ;;  %v16647_v38 = vld [vmem:[#allocation12 + $0x40] sm:$0xff] (!%p14168_p2)  }
 0xdc1   :  { %16601 = vpow2.f32 %v14117_v45  ;;  %v16648_v19 = vld [vmem:[#allocation12] sm:$0xff] (!%p14168_p2)  }
 0xdc2   :  { %16603 = vpow2.f32 %v14118_v28  ;;  %v16649_v28 = vld [vmem:[#allocation12 + $0x48] sm:$0xff] (!%p14168_p2)  }
 0xdcb   :  { %v16602_v26 = vpop.eup %16601 }
 0xdcc   :  { %v6130_v61 = vadd.f32 1.0, %v16602_v26  ;;  %v16604_v50 = vpop.eup %16603  ;;  %v16650_v26 = vld [vmem:[#allocation12 + $0x8] sm:$0xff] (!%p14168_p2)  }
 0xdcd   :  { %v6137_v51 = vadd.f32 1.0, %v16604_v50  ;;  %v16652_v50 = vld [vmem:[#allocation12 + $0x10] sm:$0xff] (!%p14168_p2)  }
 0xdce   :  { %16605 = vrcp.f32 %v6130_v61  ;;  %v16651_v61 = vld [vmem:[#allocation12 + $0x50] sm:$0xff] (!%p14168_p2)  }
 0xdcf   :  { %16607 = vrcp.f32 %v6137_v51  ;;  %v16655_v51 = vld [vmem:[#allocation12 + $0x60] sm:$0xff] (!%p14168_p2)  }
 0xdd8   :  { %v16606_v5 = vpop.eup %16605 }
 0xdd9   :  { %v6140_v43 = vmul.f32 %v16606_v5, %v6121_v53  ;;  %v16608_v56 = vpop.eup %16607  ;;  %v16656_v53 = vld [vmem:[#allocation12 + $0x20] sm:$0xff] (!%p14168_p2)   ;;  %v16657_v5 = vld [vmem:[#allocation12 + $0x68] sm:$0xff] (!%p14168_p2)  }
 0xdda   :  { %v6143_v29 = vsub.f32 1.0, %v16608_v56  ;;  %v6145_v0 = vmul.f32 %v16608_v56, %v19141_v11  ;;  %v16488_v11 = vld [vmem:[#allocation27 + $0x134] ss:$8 sps:$4 sm:$0xff]  }
 0xddb   :  { %v6141_v14 = vadd.f32 %v6140_v43, %v5862_v8  ;;  %v16658_v8 = vld [vmem:[#allocation12 + $0x28] sm:$0xff] (!%p14168_p2)   ;;  %v16659_v43 = vld [vmem:[#allocation12 + $0x70] sm:$0xff] (!%p14168_p2)  }
 0xddd   :  { %16609 = vtanh.f32 %v6141_v14 }
 0xde7   :  { %v16610_v49 = vpop.eup %16609 }
 0xde8   :  { %v6144_v31 = vmul.f32 %v16610_v49, %v6143_v29 }
 0xdea   :  { %v19160_v34 = vadd.f32 %v6145_v0, %v6144_v31  ;;  %v16660_v31 = vld [vmem:[#allocation12 + $0x30] sm:$0xff] (!%p14168_p2)   ;;  %v16661_v0 = vld [vmem:[#allocation12 + $0x78] sm:$0xff] (!%p14168_p2)  }
 0xdec   :  { %v19164_v47 = vpack.c.bf16 %v19160_v34, %v19160_v34 }
 0xdee   :  { %6481 = vmatmul.mubr.bf16.vlgmr.msra.gmra.mrb[52].mxu0 %v19164_v47 }
 0xdef   :  { %6490 = vmatpush1.bf16.msra.mxu0 %v16477_v25  ;;  %6521 = vmatprep.mubr.bf16.mxu0 %v17893_v2  ;;  %v16662_v25 = vld [vmem:[#allocation12 + $0x38] sm:$0xff] (!%p14168_p2)  }
 0xdf0   :  { %6491 = vmatprep.subr.bf16.mxu0 %v16482_v20 }
 0xdf3   :  { %6492 = vmatpush1.bf16.msra.mxu0 %v16480_v24 }
 0xdf4   :  { %6493 = vmatprep.subr.bf16.mxu0 %v16485_v1 }
 0xdf7   :  { %6494 = vmatpush1.bf16.msra.mxu0 %v16483_v63 }
 0xdf8   :  { %6495 = vmatprep.subr.bf16.mxu0 %v16488_v11 }
 0xdfb   :  { %6496 = vmatpush1.bf16.msra.mxu0 %v16486_v41  ;;  %v17895_v41 = vmov (!%p14168_p2), 1.0|1.0  }
 0xdfc   :  { %6497 = vmatprep.subr.bf16.mxu0 %v16491_v59 }
 0xdff   :  { %6498 = vmatpush1.bf16.msra.mxu0 %v16489_v30 }
 0xe00   :  { %6499 = vmatprep.subr.bf16.mxu0 %v16494_v48 }
 0xe03   :  { %6500 = vmatpush1.bf16.msra.mxu0 %v16492_v36 }
 0xe04   :  { %6501 = vmatprep.subr.bf16.mxu0 %v16497_v60 }
 0xe07   :  { %6502 = vmatpush1.bf16.msra.mxu0 %v16495_v32 }
 0xe08   :  { %6503 = vmatprep.subr.bf16.mxu0 %v16500_v27 }
 0xe0b   :  { %6504 = vmatpush1.bf16.msra.mxu0 %v16498_v62 }
 0xe0c   :  { %15035 = vmatprep.subr.bf16.mxu0 (!%p14168_p2), %v16647_v38 }
 0xe0e   :  { %6522 = vmatmul.mubr.bf16.vlgmr.msra.gmra.mrb[52].mxu0 %v19011_v57 }
 0xe0f   :  { %15036 = vmatpush3.bf16.msra.mxu0 (!%p14168_p2), %v16648_v19 }
 0xe10   :  { %15037 = vmatprep.subr.bf16.mxu0 (!%p14168_p2), %v16649_v28 }
 0xe13   :  { %15038 = vmatpush3.bf16.msra.mxu0 (!%p14168_p2), %v16650_v26 }
 0xe14   :  { %15039 = vmatprep.subr.bf16.mxu0 (!%p14168_p2), %v16651_v61 }
 0xe17   :  { %15040 = vmatpush3.bf16.msra.mxu0 (!%p14168_p2), %v16652_v50 }
 0xe18   :  { %15041 = vmatprep.subr.bf16.mxu0 (!%p14168_p2), %v16653_v18 }
 0xe1b   :  { %15042 = vmatpush3.bf16.msra.mxu0 (!%p14168_p2), %v16654_v42 }
 0xe1c   :  { %15043 = vmatprep.subr.bf16.mxu0 (!%p14168_p2), %v16655_v51 }
 0xe1f   :  { %15044 = vmatpush3.bf16.msra.mxu0 (!%p14168_p2), %v16656_v53 }
 0xe20   :  { %15045 = vmatprep.subr.bf16.mxu0 (!%p14168_p2), %v16657_v5 }
 0xe23   :  { %15046 = vmatpush3.bf16.msra.mxu0 (!%p14168_p2), %v16658_v8 }
 0xe24   :  { %15047 = vmatprep.subr.bf16.mxu0 (!%p14168_p2), %v16659_v43 }
 0xe27   :  { %15048 = vmatpush3.bf16.msra.mxu0 (!%p14168_p2), %v16660_v31 }
 0xe28   :  { %15049 = vmatprep.subr.bf16.mxu0 (!%p14168_p2), %v16661_v0 }
 0xe2b   :  { %15050 = vmatpush3.bf16.msra.mxu0 (!%p14168_p2), %v16662_v25 }
 0xedf   :  { %6536 = sbr.rel (%p14168_p2) target bundleno = 4474 (0x117a), region = 145 }
 0xee1   :  { %v6523_v15 = vpop.f32.mrb[52].mxu0 }
 0xee2   :  { %v15911_v33 = vadd.f32 %v6523_v15, %v6201_v17  ;;  %v6525_v39 = vpop.f32.mrb[53].mxu0 }
 0xee3   :  { %v15912_v52 = vadd.f32 %v6525_v39, %v6205_v12  ;;  %v6527_v40 = vpop.f32.mrb[54].mxu0 }
 0xee4   :  { %6530 = vst [vmem:[#allocation29] sm:$0xff] %v15911_v33  ;;  %v6528_v7 = vpop.f32.mrb[55].mxu0 }
 0xee5   :  { %6531 = vst [vmem:[#allocation29 + $0x8] sm:$0xff] %v15912_v52  ;;  %v6538_v57 = vmax.f32 (!%p14168_p2), %v15911_v33, %v15912_v52 }
 0xee7   :  { %6539 = vmax.xlane.f32.xlu0 %v6538_v57 }
 0xf74   :  { %v6540_v58 = vpop.xlane.xlu0 %6539 }
 0xf75   :  { %vm6541_vm10 = vcmp.eq.f32.partialorder %v15911_v33, %v6540_v58  ;;  %vm6542_vm11 = vcmp.eq.f32.partialorder %v15912_v52, %v6540_v58 }
 0xf76   :  { %v6543_v37 = vsel %vm6541_vm10, %v19074_v35, 256  ;;  %v6544_v6 = vsel %vm6542_vm11, %v6537_v9, 256 }
 0xf77   :  { %vm6545_vm12 = vcmp.lt.s32.totalorder %v6543_v37, %v6544_v6 }
 0xf78   :  { %v6546_v21 = vsel %vm6545_vm12, %v6543_v37, %v6544_v6 }
 0xf79   :  { %v6548_v45 = vshra.s32 %v6546_v21, 16  ;;  %v6547_v14 = vand.u32 65535, %v6546_v21 }
 0xf7b   :  { %v6550_v4 = vcvt.s32.f32 %v6548_v45  ;;  %v6549_v29 = vcvt.s32.f32 %v6547_v14 }
 0xf7d   :  { %6551 = vmin.xlane.f32.xlu0 %v6550_v4 }
0x100a   :  { %v6552_v56 = vpop.xlane.xlu0 %6551 }
0x100b   :  { %vm6553_vm13 = vcmp.eq.f32.partialorder %v6550_v4, %v6552_v56  ;;  %v6558_v20 = vcvt.f32.s32 %v6552_v56 }
0x100c   :  { %v6554_v49 = vsel %vm6553_vm13, %v6549_v29, inf }
0x100d   :  { %6555 = vmin.xlane.f32.xlu1 %v6554_v49  ;;  %v6559_v1 = vshll.u32 %v6558_v20, 16 }
0x109a   :  { %v6556_v24 = vpop.xlane.xlu1 %6555 }
0x109b   :  { %v6557_v63 = vcvt.f32.s32 %v6556_v24 }
0x109d   :  { %v6560_v11 = vadd.s32 %v6559_v1, %v6557_v63 }
0x109f   :  { %vm6562_vm14 = vcmp.eq.s32.totalorder %v6537_v9, %v6560_v11  ;;  %vm6561_vm15 = vcmp.eq.s32.totalorder %v19074_v35, %v6560_v11 }
0x10a0   :  { %vm14187_vm9 = vmpackc.low %vm6562_vm14, %vm6562_vm14 }
0x10a1   :  { %14188 = vmatprep.mubr.msk.bf16.mxu0 %vm14187_vm9, %v17895_v41  ;;  %vm14189_vm10 = vmpackc.low %vm6561_vm15, %vm6561_vm15 }
0x10a2   :  { %14190 = vmatmul.mubr.msk.bf16.vlgmr.msra.gmra.mrb[0].mxu0 %vm14189_vm10, %v17895_v41 }
0x1175   :  { %v15051_v59 = vpop.f32.mrb[0].mxu0 }
0x1176   :  { %v15052_v30 = vpop.f32.mrb[1].mxu0 }
0x1177   :  { %v15053_v48 = vadd.f32 %v15052_v30, %v15051_v59  ;;  %v15054_v36 = vpop.f32.mrb[2].mxu0 }
0x1178   :  { %v15055_v60 = vpop.f32.mrb[3].mxu0 }
0x1179   :  { %6737 = vst [vmem:[#allocation5] sm:$0xff] %v15053_v48 }
0x117a PF:  { %v19730_v32 = vmov 0.0   ;;  %v16665_v27 = vld [vmem:[#allocation23] sm:$0xff]   ;;  %16663 = vset.pattern.permute.xlu1 %v17893_v2  ;;  %16664 = vset.pattern.permute.xlu0 %v17893_v2  ;;  %v16666_v62 = vld [vmem:[#allocation23 + $0x8] sm:$0xff]   ;;  %v16667_v22 = vld [vmem:[#allocation23 + $0x10] sm:$0xff]   ;;  %s14191_s22 = sld [smem:[#allocation7 + $0x1]]  ;;  %s19731_s4 = sld [smem:[#allocation43_spill]] }
0x117b   :  { %15713 = vmatprep.subr.bf16.mxu1 %v19730_v32  ;;  %15729 = vmatprep.mubr.msk.bf16.mxu1 %vm17894_vm0, %v19730_v32  ;;  %v19185_v17 = vld [vmem:[#allocation4] sm:$0xff]  ;;  %v16668_v12 = vld [vmem:[#allocation23 + $0x18] sm:$0xff]   ;;  %v16671_v21 = vld [vmem:[#allocation23 + $0x30] sm:$0xff]   ;;  %s19732_s25 = sld [smem:[#allocation42_spill]]  ;;  %s19733_s7 = sld [smem:[#allocation48_spill]] }
0x117c   :  { %15714 = vmatpush3.bf16.msra.mxu1 %v16665_v27  ;;  %v6874_v15 = vrot.slane %v19185_v17, %v18377_v13  ;;  %v6860_v33 = vrot.slane %v19185_v17, %v18367_v44  ;;  %v6881_v39 = vrot.slane %v19185_v17, %v18959_v16  ;;  %v16669_v52 = vld [vmem:[#allocation23 + $0x20] sm:$0xff]   ;;  %v6867_v40 = vrot.slane %v19185_v17, %v18370_v46  ;;  %v16670_v57 = vld [vmem:[#allocation23 + $0x28] sm:$0xff]   ;;  %v16672_v26 = vld [vmem:[#allocation23 + $0x38] sm:$0xff]   ;;  %s14326_s24 = sld [smem:[#allocation7 + $0x2]] }
0x117d   :  { %15715 = vmatprep.subr.bf16.mxu1 %v19730_v32  ;;  %v6895_v7 = vrot.slane %v19185_v17, %v19023_v3  ;;  %v6888_v58 = vrot.slane %v19185_v17, %v19015_v10  ;;  %v6909_v6 = vrot.slane %v19185_v17, %v19030_v54  ;;  %v6902_v4 = vrot.slane %v19185_v17, %v19020_v23  ;;  %v14201_v5 = vld [vmem:[%s19685_s14] ss:$0 sm:$0xff]  ;;  %v6929_v43 = vld [vmem:[#allocation3 + $0x8] sm:$0xff]  ;;  %v6930_v29 = vld [vmem:[#allocation3 + $0x10] sm:$0xff] }
0x117e   :  { %6876 = vbcast.lane.b32.xlu1 %v6874_v15, 256  ;;  %6862 = vbcast.lane.b32.xlu0 %v6860_v33, 256  ;;  %v6928_v14 = vld [vmem:[#allocation3] sm:$0xff]  ;;  %v6934_v1 = vld [vmem:[#allocation3 + $0x30] sm:$0xff]  ;;  %v6931_v48 = vld [vmem:[#allocation3 + $0x18] sm:$0xff] }
0x117f   :  { %v6932_v56 = vld [vmem:[#allocation3 + $0x20] sm:$0xff] }
0x1180   :  { %15716 = vmatpush3.bf16.msra.mxu1 %v16666_v62  ;;  %p6739_p3 = scmp.gt.s32.totalorder %s14191_s22, 0  ;;  %v14192_v9 = vld [vmem:[%s19731_s4 + $0x8] sm:$0xff] }
0x1181   :  { %15717 = vmatprep.subr.bf16.mxu1 %v19730_v32  ;;  %v6747_v37 = vld [vmem:[#allocation5] sm:$0xff] }
0x1182   :  { %6883 = vbcast.lane.b32.xlu1 %v6881_v39, 256  ;;  %s6740_s29 = scalar_select %p6739_p3, 1, 0  ;;  %6869 = vbcast.lane.b32.xlu0 %v6867_v40, 256 }
0x1183   :  { %p14327_p4 = scmp.ne.s32.totalorder %s14326_s24, 0 }
0x1184   :  { %15718 = vmatpush3.bf16.msra.mxu1 %v16667_v22  ;;  %s6741_s27 = scvt.s32.f32 %s6740_s29 }
0x1185   :  { %15719 = vmatprep.subr.bf16.mxu1 %v19730_v32 }
0x1186   :  { %6897 = vbcast.lane.b32.xlu1 %v6895_v7, 256  ;;  %v6744_v45 = vstv %s6741_s27  ;;  %s6746_s18 = ssub.f32 1.0, %s6741_s27  ;;  %6890 = vbcast.lane.b32.xlu0 %v6888_v58, 256  ;;  %v6933_v7 = vld [vmem:[#allocation3 + $0x28] sm:$0xff] }
0x1187   :  { %v6745_v38 = vmul.f32 %v14192_v9, %v6744_v45 }
0x1188   :  { %15720 = vmatpush3.bf16.msra.mxu1 %v16668_v12  ;;  %v6748_v19 = vstv %s6746_s18 }
0x1189   :  { %15721 = vmatprep.subr.bf16.mxu1 %v19730_v32  ;;  %v6749_v28 = vmul.f32 %v6748_v19, %v6747_v37  ;;  %v14202_v19 = vld [vmem:[%s19687_s16] ss:$0 sm:$0xff] }
0x118a   :  { %6911 = vbcast.lane.b32.xlu1 %v6909_v6, 256  ;;  %6904 = vbcast.lane.b32.xlu0 %v6902_v4, 256 }
0x118b   :  { %v6750_v61 = vadd.f32 %v6749_v28, %v6745_v38 }
0x118c   :  { %15722 = vmatpush3.bf16.msra.mxu1 %v16669_v52 }
0x118d   :  { %15723 = vmatprep.subr.bf16.mxu1 %v19730_v32  ;;  %v19211_v50 = vpack.c.bf16 %v6750_v61, %v6750_v61 }
0x1190   :  { %15724 = vmatpush3.bf16.msra.mxu1 %v16670_v57 }
0x1191   :  { %15725 = vmatprep.subr.bf16.mxu1 %v19730_v32 }
0x1194   :  { %15726 = vmatpush3.bf16.msra.mxu1 %v16671_v21  ;;  %v6935_v21 = vld [vmem:[#allocation3 + $0x38] sm:$0xff] }
0x1195   :  { %15727 = vmatprep.subr.bf16.mxu1 %v19730_v32 }
0x1198   :  { %15728 = vmatpush3.bf16.msra.mxu1 %v16672_v26 }
0x119b   :  { %15730 = vmatmul.mubr.bf16.vlgmr.msra.gmra.mrb[0].mxu1 %v19211_v50 }
0x11f0   :  { %v6863_v18 = vpop.permute.xlu0 %6862  ;;  %v6877_v51 = vpop.permute.xlu1 %6876 }
0x11f1   :  { %v6922_v25 = vmul.f32 %v14201_v5, %v6877_v51  ;;  %v6920_v20 = vmul.f32 %v14201_v5, %v6863_v18 }
0x11f4   :  { %v6870_v42 = vpop.permute.xlu0 %6869  ;;  %v6884_v8 = vpop.permute.xlu1 %6883 }
0x11f5   :  { %v6921_v49 = vmul.f32 %v14201_v5, %v6870_v42  ;;  %v6923_v39 = vmul.f32 %v14201_v5, %v6884_v8 }
0x11f8   :  { %v6891_v53 = vpop.permute.xlu0 %6890  ;;  %v6898_v27 = vpop.permute.xlu1 %6897 }
0x11f9   :  { %v6924_v31 = vmul.f32 %v14201_v5, %v6891_v53  ;;  %v6925_v9 = vmul.f32 %v14201_v5, %v6898_v27  ;;  %v16706_v27 = vld [vmem:[#allocation24 + $0x20] ss:$12 sps:$4 sm:$0xff]  }
0x11fc   :  { %v6905_v0 = vpop.permute.xlu0 %6904  ;;  %v6912_v6 = vpop.permute.xlu1 %6911 }
0x11fd   :  { %v6926_v36 = vmul.f32 %v14201_v5, %v6905_v0  ;;  %v6927_v45 = vmul.f32 %v14201_v5, %v6912_v6  ;;  %v16704_v6 = vld [vmem:[#allocation24 + $0xdc] ss:$12 sps:$4 sm:$0xff]  }
0x126e   :  { %v6851_v24 = vpop.f32.mrb[0].mxu1 }
0x126f   :  { %v15731_v63 = vpop.f32.mrb[1].mxu1  ;;  %v6937_v11 = vadd.f32 %v6929_v43, %v6851_v24  ;;  %v6936_v41 = vadd.f32 %v6928_v14, %v6851_v24  ;;  %v6940_v59 = vadd.f32 %v6932_v56, %v6851_v24  ;;  %v6938_v30 = vadd.f32 %v6930_v29, %v6851_v24 }
0x1270   :  { %v6854_v60 = vpop.f32.mrb[2].mxu1  ;;  %v6942_v33 = vadd.f32 %v6934_v1, %v6851_v24  ;;  %v6939_v40 = vadd.f32 %v6931_v48, %v6851_v24  ;;  %v6941_v37 = vadd.f32 %v6933_v7, %v6851_v24  ;;  %v6943_v38 = vadd.f32 %v6935_v21, %v6851_v24  ;;  %v16673_v24 = vld [vmem:[#allocation24] ss:$12 sps:$4 sm:$0xff]   ;;  %v16675_v1 = vld [vmem:[#allocation24 + $0x4] ss:$12 sps:$4 sm:$0xff]  }
0x1271   :  { %v15732_v62 = vpop.f32.mrb[3].mxu1  ;;  %v6945_v22 = vadd.f32 %v6937_v11, %v6921_v49  ;;  %v6944_v12 = vadd.f32 %v6936_v41, %v6920_v20  ;;  %v6948_v15 = vadd.f32 %v6940_v59, %v6924_v31  ;;  %v6946_v52 = vadd.f32 %v6938_v30, %v6922_v25  ;;  %v14203_v20 = vld [vmem:[#allocation8] ss:$0 sm:$0xff]  ;;  %v16678_v63 = vld [vmem:[#allocation24 + $0x1c] ss:$12 sps:$4 sm:$0xff]   ;;  %7498 = vmatprep.subr.bf16.mxu1 %v16675_v1 }
0x1272   :  { %v6950_v57 = vadd.f32 %v6942_v33, %v6926_v36  ;;  %v6947_v58 = vadd.f32 %v6939_v40, %v6923_v39  ;;  %v6949_v4 = vadd.f32 %v6941_v37, %v6925_v9  ;;  %v6951_v18 = vadd.f32 %v6943_v38, %v6927_v45  ;;  %7499 = vmatpush1.bf16.msra.mxu1 %v16673_v24  ;;  %v16676_v11 = vld [vmem:[#allocation24 + $0x18] ss:$12 sps:$4 sm:$0xff]   ;;  %v16681_v41 = vld [vmem:[#allocation24 + $0x34] ss:$12 sps:$4 sm:$0xff]   ;;  %v16679_v48 = vld [vmem:[#allocation24 + $0x30] ss:$12 sps:$4 sm:$0xff]  }
0x1273   :  { %16841 = vtanh.f32 %v6945_v22  ;;  %7500 = vmatprep.subr.bf16.mxu1 %v16678_v63  ;;  %v16700_v59 = vld [vmem:[#allocation24 + $0xc8] ss:$12 sps:$4 sm:$0xff]   ;;  %v16705_v36 = vld [vmem:[#allocation24 + $0xe0] ss:$12 sps:$4 sm:$0xff]   ;;  %v16710_v62 = vld [vmem:[#allocation24 + $0xf8] ss:$12 sps:$4 sm:$0xff]  }
0x1274   :  { %16843 = vtanh.f32 %v6944_v12  ;;  %v16701_v30 = vld [vmem:[#allocation24 + $0x8] ss:$12 sps:$4 sm:$0xff]   ;;  %v16684_v60 = vld [vmem:[#allocation24 + $0x4c] ss:$12 sps:$4 sm:$0xff]   ;;  %15066 = vmatprep.subr.bf16.mxu0 %v16700_v59  ;;  %v16687_v12 = vld [vmem:[#allocation24 + $0x64] ss:$12 sps:$4 sm:$0xff]  }
0x1275   :  { %16845 = vtanh.f32 %v6948_v15  ;;  %15067 = vmatpush3.bf16.msra.mxu0 %v16701_v30  ;;  %v16682_v22 = vld [vmem:[#allocation24 + $0x48] ss:$12 sps:$4 sm:$0xff]   ;;  %v16711_v15 = vld [vmem:[#allocation24 + $0x38] ss:$12 sps:$4 sm:$0xff]   ;;  %v16685_v33 = vld [vmem:[#allocation24 + $0x60] ss:$12 sps:$4 sm:$0xff]  }
0x1276   :  { %16847 = vtanh.f32 %v6946_v52  ;;  %7501 = vmatpush1.bf16.msra.mxu1 %v16676_v11  ;;  %15068 = vmatprep.subr.bf16.mxu0 %v16705_v36  ;;  %v16690_v39 = vld [vmem:[#allocation24 + $0x7c] ss:$12 sps:$4 sm:$0xff]   ;;  %v16688_v52 = vld [vmem:[#allocation24 + $0x78] ss:$12 sps:$4 sm:$0xff]   ;;  %v16693_v40 = vld [vmem:[#allocation24 + $0x94] ss:$12 sps:$4 sm:$0xff]  }
0x1277   :  { %16849 = vtanh.f32 %v6950_v57  ;;  %7502 = vmatprep.subr.bf16.mxu1 %v16681_v41  ;;  %v16691_v7 = vld [vmem:[#allocation24 + $0x90] ss:$12 sps:$4 sm:$0xff]   ;;  %v16696_v57 = vld [vmem:[#allocation24 + $0xac] ss:$12 sps:$4 sm:$0xff]   ;;  %v16694_v9 = vld [vmem:[#allocation24 + $0xa8] ss:$12 sps:$4 sm:$0xff]  }
0x1278   :  { %16851 = vtanh.f32 %v6947_v58  ;;  %v16699_v58 = vld [vmem:[#allocation24 + $0xc4] ss:$12 sps:$4 sm:$0xff]   ;;  %v16697_v37 = vld [vmem:[#allocation24 + $0xc0] ss:$12 sps:$4 sm:$0xff]  }
0x1279   :  { %16853 = vtanh.f32 %v6949_v4  ;;  %15069 = vmatpush3.bf16.msra.mxu0 %v16706_v27  ;;  %v16702_v45 = vld [vmem:[#allocation24 + $0xd8] ss:$12 sps:$4 sm:$0xff]   ;;  %v16709_v38 = vld [vmem:[#allocation24 + $0xf4] ss:$12 sps:$4 sm:$0xff]  }
0x127a   :  { %16855 = vtanh.f32 %v6951_v18  ;;  %7503 = vmatpush1.bf16.msra.mxu1 %v16679_v48  ;;  %15070 = vmatprep.subr.bf16.mxu0 %v16710_v62  ;;  %v7009_v11 = vld [vmem:[%s19732_s25] sm:$0xff] }
0x127b   :  { %7504 = vmatprep.subr.bf16.mxu1 %v16684_v60  ;;  %vm7010_vm11 = vcmp.gt.f32.partialorder %v7009_v11, 0.5  ;;  %v16727_v11 = vld [vmem:[#allocation24 + $0x150] ss:$12 sps:$4 sm:$0xff]  }
0x127d   :  { %v16842_v28 = vpop.eup %16841  ;;  %15071 = vmatpush3.bf16.msra.mxu0 %v16711_v15 }
0x127e   :  { %v16844_v26 = vpop.eup %16843  ;;  %v6968_v61 = vmul.f32 %v16842_v28, %v14202_v19  ;;  %7505 = vmatpush1.bf16.msra.mxu1 %v16682_v22  ;;  %v16707_v28 = vld [vmem:[#allocation24 + $0xf0] ss:$12 sps:$4 sm:$0xff]  }
0x127f   :  { %v16846_v42 = vpop.eup %16845  ;;  %v6967_v51 = vmul.f32 %v16844_v26, %v14202_v19  ;;  %7506 = vmatprep.subr.bf16.mxu1 %v16687_v12 }
0x1280   :  { %v16848_v53 = vpop.eup %16847  ;;  %6977 = vadd.xlane.f32.xlu1 %v6968_v61  ;;  %v6971_v8 = vmul.f32 %v16846_v42, %v14202_v19 }
0x1281   :  { %6975 = vadd.xlane.f32.xlu0 %v6967_v51  ;;  %v16850_v5 = vpop.eup %16849  ;;  %v6969_v43 = vmul.f32 %v16848_v53, %v14202_v19 }
0x1282   :  { %v16852_v14 = vpop.eup %16851  ;;  %v6973_v56 = vmul.f32 %v16850_v5, %v14202_v19  ;;  %7507 = vmatpush1.bf16.msra.mxu1 %v16685_v33 }
0x1283   :  { %v6970_v29 = vmul.f32 %v16852_v14, %v14202_v19  ;;  %v16854_v49 = vpop.eup %16853  ;;  %7508 = vmatprep.subr.bf16.mxu1 %v16690_v39 }
0x1284   :  { %6983 = vadd.xlane.f32.xlu1 %v6971_v8  ;;  %v6972_v31 = vmul.f32 %v16854_v49, %v14202_v19  ;;  %v16856_v0 = vpop.eup %16855 }
0x1285   :  { %6979 = vadd.xlane.f32.xlu0 %v6969_v43  ;;  %v6974_v25 = vmul.f32 %v16856_v0, %v14202_v19 }
0x1286   :  { %7509 = vmatpush1.bf16.msra.mxu1 %v16688_v52 }
0x1287   :  { %7510 = vmatprep.subr.bf16.mxu1 %v16693_v40 }
0x1288   :  { %6987 = vadd.xlane.f32.xlu1 %v6973_v56 }
0x1289   :  { %6981 = vadd.xlane.f32.xlu0 %v6970_v29 }
0x128a   :  { %7511 = vmatpush1.bf16.msra.mxu1 %v16691_v7 }
0x128b   :  { %7512 = vmatprep.subr.bf16.mxu1 %v16696_v57 }
0x128d   :  { %6985 = vadd.xlane.f32.xlu0 %v6972_v31 }
0x128e   :  { %7513 = vmatpush1.bf16.msra.mxu1 %v16694_v9 }
0x128f   :  { %7514 = vmatprep.subr.bf16.mxu1 %v16699_v58 }
0x1291   :  { %6989 = vadd.xlane.f32.xlu0 %v6974_v25 }
0x1292   :  { %7515 = vmatpush1.bf16.msra.mxu1 %v16697_v37 }
0x1293   :  { %7516 = vmatprep.subr.bf16.mxu1 %v16704_v6 }
0x1296   :  { %7517 = vmatpush1.bf16.msra.mxu1 %v16702_v45 }
0x1297   :  { %7518 = vmatprep.subr.bf16.mxu1 %v16709_v38 }
0x1299   :  { %6998 = vperm.xlu1 %16663, %v14203_v20  }
0x129a   :  { %7519 = vmatpush1.bf16.msra.mxu1 %v16707_v28 }
0x130d   :  { %v6978_v21 = vpop.xlane.xlu1 %6977 }
0x130e   :  { %v6976_v4 = vpop.xlane.xlu0 %6975 }
0x1311   :  { %v6984_v19 = vpop.xlane.xlu1 %6983 }
0x1312   :  { %v6980_v26 = vpop.xlane.xlu0 %6979 }
0x1315   :  { %v6988_v61 = vpop.xlane.xlu1 %6987 }
0x1316   :  { %v6982_v18 = vpop.xlane.xlu0 %6981 }
0x1319   :  { %v6999_v42 = vpop.permute.xlu1 %6998 }
0x131a   :  { %v7001_v51 = vadd.f32 %v6999_v42, %v6976_v4  ;;  %v7002_v53 = vadd.f32 %v6999_v42, %v6978_v21  ;;  %v7003_v8 = vadd.f32 %v6999_v42, %v6980_v26  ;;  %v7004_v5 = vadd.f32 %v6999_v42, %v6982_v18  ;;  %v6986_v43 = vpop.xlane.xlu0 %6985  ;;  %v16712_v26 = vld [vmem:[#allocation24 + $0x108] ss:$12 sps:$4 sm:$0xff]   ;;  %v16715_v18 = vld [vmem:[#allocation24 + $0x110] ss:$12 sps:$4 sm:$0xff]  }
0x131b   :  { %v7005_v14 = vadd.f32 %v6999_v42, %v6984_v19  ;;  %v7006_v31 = vadd.f32 %v6999_v42, %v6986_v43  ;;  %v7007_v0 = vadd.f32 %v6999_v42, %v6988_v61  ;;  %v16714_v61 = vld [vmem:[#allocation24 + $0x10c] ss:$12 sps:$4 sm:$0xff]   ;;  %15072 = vmatprep.subr.bf16.mxu0 %v16715_v18 }
0x131c   :  { %v7022_v56 = vrot.slane %v7001_v51, %v19078_v55  ;;  %v7026_v29 = vrot.slane %v7002_v53, %v19078_v55  ;;  %v7030_v49 = vrot.slane %v7003_v8, %v19078_v55  ;;  %v7034_v25 = vrot.slane %v7004_v5, %v19078_v55  ;;  %7520 = vmatprep.subr.bf16.mxu1 %v16714_v61  ;;  %v16717_v53 = vld [vmem:[#allocation24 + $0x120] ss:$12 sps:$4 sm:$0xff]   ;;  %v16719_v8 = vld [vmem:[#allocation24 + $0x124] ss:$12 sps:$4 sm:$0xff]   ;;  %v16720_v5 = vld [vmem:[#allocation24 + $0x128] ss:$12 sps:$4 sm:$0xff]  }
0x131d   :  { %v7038_v1 = vrot.slane %v7005_v14, %v19078_v55  ;;  %v7042_v30 = vrot.slane %v7006_v31, %v19078_v55  ;;  %v7046_v36 = vrot.slane %v7007_v0, %v19078_v55  ;;  %7521 = vmatpush1.bf16.msra.mxu1 %v16712_v26  ;;  %v16721_v14 = vld [vmem:[#allocation24 + $0x68] ss:$12 sps:$4 sm:$0xff]   ;;  %v16722_v31 = vld [vmem:[#allocation24 + $0x138] ss:$12 sps:$4 sm:$0xff]  }
0x131e   :  { %v7051_v20 = vsel %vm5332_vm2, %v7026_v29, %v7022_v56  ;;  %v6990_v24 = vpop.xlane.xlu0 %6989  ;;  %7522 = vmatprep.subr.bf16.mxu1 %v16719_v8  ;;  %v16724_v0 = vld [vmem:[#allocation24 + $0x13c] ss:$12 sps:$4 sm:$0xff]  }
0x131f   :  { %v7052_v63 = vsel %vm5334_vm3, %v7030_v49, %v7051_v20  ;;  %v7008_v41 = vadd.f32 %v6999_v42, %v6990_v24  ;;  %v16716_v42 = vld [vmem:[#allocation24 + $0x50] ss:$12 sps:$4 sm:$0xff]   ;;  %v16726_v20 = vld [vmem:[#allocation24 + $0x80] ss:$12 sps:$4 sm:$0xff]  }
0x1320   :  { %v7053_v59 = vsel %vm5336_vm4, %v7034_v25, %v7052_v63  ;;  %15073 = vmatpush3.bf16.msra.mxu0 %v16716_v42  ;;  %v16725_v25 = vld [vmem:[#allocation24 + $0x140] ss:$12 sps:$4 sm:$0xff]   ;;  %v16730_v63 = vld [vmem:[#allocation24 + $0x158] ss:$12 sps:$4 sm:$0xff]  }
0x1321   :  { %v7054_v48 = vsel %vm5338_vm5, %v7038_v1, %v7053_v59  ;;  %v7050_v27 = vrot.slane %v7008_v41, %v19078_v55  ;;  %15074 = vmatprep.subr.bf16.mxu0 %v16720_v5  ;;  %7523 = vmatpush1.bf16.msra.mxu1 %v16717_v53  ;;  %v16729_v1 = vld [vmem:[#allocation24 + $0x154] ss:$12 sps:$4 sm:$0xff]   ;;  %v16731_v41 = vld [vmem:[#allocation24 + $0x98] ss:$12 sps:$4 sm:$0xff]  }
0x1322   :  { %v7055_v60 = vsel %vm5340_vm6, %v7042_v30, %v7054_v48  ;;  %7524 = vmatprep.subr.bf16.mxu1 %v16724_v0  ;;  %v16734_v48 = vld [vmem:[#allocation24 + $0x16c] ss:$12 sps:$4 sm:$0xff]   ;;  %v7144_v5 = vld [vmem:[#allocation2 + $0x38] sm:$0xff] }
0x1323   :  { %v7056_v62 = vsel %vm5342_vm7, %v7046_v36, %v7055_v60  ;;  %v16735_v36 = vld [vmem:[#allocation24 + $0x170] ss:$12 sps:$4 sm:$0xff]   ;;  %v16732_v60 = vld [vmem:[#allocation24 + $0x168] ss:$12 sps:$4 sm:$0xff]  }
0x1324   :  { %v7057_v22 = vsel %vm5344_vm8, %v7050_v27, %v7056_v62  ;;  %15075 = vmatpush3.bf16.msra.mxu0 %v16721_v14  ;;  %v16736_v27 = vld [vmem:[#allocation24 + $0xb0] ss:$12 sps:$4 sm:$0xff]  }
0x1325   :  { %v7059_v12 = vsel %vm7010_vm11, %v7057_v22, -1e+30  ;;  %15076 = vmatprep.subr.bf16.mxu0 %v16725_v25  ;;  %7525 = vmatpush1.bf16.msra.mxu1 %v16722_v31  ;;  %v16739_v62 = vld [vmem:[#allocation26 + $0x4] ss:$12 sps:$4 sm:$0xff]   ;;  %v7143_v42 = vld [vmem:[#allocation2 + $0x30] sm:$0xff] }
0x1326   :  { %v7060_v15 = vsel %vm5012_vm1, %v7059_v12, -inf  ;;  %7526 = vmatprep.subr.bf16.mxu1 %v16729_v1  ;;  %v16737_v25 = vld [vmem:[#allocation26] ss:$12 sps:$4 sm:$0xff]  }
0x1327   :  { %v7061_v33 = vrot.slane %v7060_v15, 4  ;;  %v16744_v1 = vld [vmem:[#allocation26 + $0x20] ss:$12 sps:$4 sm:$0xff]  }
0x1328   :  { %15077 = vmatpush3.bf16.msra.mxu0 %v16726_v20  ;;  %v16740_v20 = vld [vmem:[#allocation26 + $0x8] ss:$12 sps:$4 sm:$0xff]  }
0x1329   :  { %v7062_v39 = vmax.f32 %v7060_v15, %v7061_v33  ;;  %15078 = vmatprep.subr.bf16.mxu0 %v16730_v63  ;;  %7527 = vmatpush1.bf16.msra.mxu1 %v16727_v11  ;;  %v7138_v15 = vld [vmem:[#allocation2 + $0x8] sm:$0xff]  ;;  %v7137_v33 = vld [vmem:[#allocation2] sm:$0xff] }
0x132a   :  { %7528 = vmatprep.subr.bf16.mxu1 %v16734_v48  ;;  %v16747_v63 = vld [vmem:[#allocation26 + $0x34] ss:$12 sps:$4 sm:$0xff]   ;;  %v16745_v11 = vld [vmem:[#allocation26 + $0x30] ss:$12 sps:$4 sm:$0xff]  }
0x132b   :  { %v7063_v52 = vrot.slane %v7062_v39, 2  ;;  %v16752_v48 = vld [vmem:[#allocation26 + $0x50] ss:$12 sps:$4 sm:$0xff]  }
0x132c   :  { %15079 = vmatpush3.bf16.msra.mxu0 %v16731_v41  ;;  %v16748_v41 = vld [vmem:[#allocation26 + $0x38] ss:$12 sps:$4 sm:$0xff]  }
0x132d   :  { %v7064_v40 = vmax.f32 %v7062_v39, %v7063_v52  ;;  %15080 = vmatprep.subr.bf16.mxu0 %v16735_v36  ;;  %7529 = vmatpush1.bf16.msra.mxu1 %v16732_v60  ;;  %v16755_v36 = vld [vmem:[#allocation26 + $0x64] ss:$12 sps:$4 sm:$0xff]   ;;  %v16753_v60 = vld [vmem:[#allocation26 + $0x60] ss:$12 sps:$4 sm:$0xff]  }
0x132e   :  { %7756 = vmatprep.subr.bf16.mxu1 %v16739_v62  ;;  %v16759_v62 = vld [vmem:[#allocation26 + $0x7c] ss:$12 sps:$4 sm:$0xff]  }
0x132f   :  { %v7065_v7 = vrot.slane %v7064_v40, 1 }
0x1330   :  { %15081 = vmatpush3.bf16.msra.mxu0 %v16736_v27  ;;  %v16756_v27 = vld [vmem:[#allocation26 + $0x68] ss:$12 sps:$4 sm:$0xff]  }
0x1331   :  { %v7066_v57 = vmax.f32 %v7064_v40, %v7065_v7  ;;  %15733 = vmatprep.subr.bf16.mxu0 %v19730_v32 }
0x1333   :  { %v7067_v9 = vsub.f32 %v7059_v12, %v7066_v57  ;;  %v7139_v57 = vld [vmem:[#allocation2 + $0x10] sm:$0xff] }
0x1335   :  { %v7068_v58 = vmul.f32 1.442695, %v7067_v9 }
0x1337   :  { %16857 = vpow2.f32 %v7068_v58  ;;  %v7140_v58 = vld [vmem:[#allocation2 + $0x18] sm:$0xff] }
0x1341   :  { %v16858_v37 = vpop.eup %16857 }
0x1342   :  { %v7070_v6 = vsel %vm5012_vm1, %v16858_v37, 0.0 }
0x1343   :  { %v7071_v21 = vrot.slane %v7070_v6, 4 }
0x1345   :  { %v7072_v45 = vadd.f32 %v7071_v21, %v7070_v6 }
0x1347   :  { %v7073_v4 = vrot.slane %v7072_v45, 2 }
0x1349   :  { %v7074_v38 = vadd.f32 %v7073_v4, %v7072_v45  ;;  %v7141_v45 = vld [vmem:[#allocation2 + $0x20] sm:$0xff] }
0x134b   :  { %v7075_v19 = vrot.slane %v7074_v38, 1 }
0x134d   :  { %v7076_v28 = vadd.f32 %v7075_v19, %v7074_v38 }
0x134f   :  { %16859 = vrcp.f32 %v7076_v28  ;;  %v7142_v28 = vld [vmem:[#allocation2 + $0x28] sm:$0xff] }
0x1359   :  { %v16860_v51 = vpop.eup %16859 }
0x135a   :  { %v7078_v43 = vmul.f32 %v16860_v51, %v16858_v37 }
0x135c   :  { %v7079_v56 = vadd.f32 %v7078_v43, %v19185_v17  ;;  %v7091_v29 = vrot.slane %v7078_v43, %v18370_v46  ;;  %v7084_v49 = vrot.slane %v7078_v43, %v18367_v44  ;;  %v7098_v24 = vrot.slane %v7078_v43, %v18377_v13 }
0x135d   :  { %v7105_v17 = vrot.slane %v7078_v43, %v18959_v16  ;;  %v7112_v59 = vrot.slane %v7078_v43, %v19015_v10  ;;  %v7119_v30 = vrot.slane %v7078_v43, %v19023_v3  ;;  %v7126_v22 = vrot.slane %v7078_v43, %v19020_v23 }
0x135e   :  { %7080 = vst.msk [vmem:[#allocation4] sm:$0xff] %vm5012_vm1, %v7079_v56  ;;  %7093 = vbcast.lane.b32.xlu1 %v7091_v29, 256  ;;  %7086 = vbcast.lane.b32.xlu0 %v7084_v49, 256  ;;  %v7133_v12 = vrot.slane %v7078_v43, %v19030_v54 }
0x1362   :  { %7100 = vbcast.lane.b32.xlu1 %v7098_v24, 256  ;;  %7107 = vbcast.lane.b32.xlu0 %v7105_v17, 256  ;;  %v16743_v24 = vld [vmem:[#allocation26 + $0x1c] ss:$12 sps:$4 sm:$0xff]   ;;  %v16741_v17 = vld [vmem:[#allocation26 + $0x18] ss:$12 sps:$4 sm:$0xff]  }
0x1366   :  { %7114 = vbcast.lane.b32.xlu1 %v7112_v59, 256  ;;  %7121 = vbcast.lane.b32.xlu0 %v7119_v30, 256  ;;  %v16751_v59 = vld [vmem:[#allocation26 + $0x4c] ss:$12 sps:$4 sm:$0xff]   ;;  %v16749_v30 = vld [vmem:[#allocation26 + $0x48] ss:$12 sps:$4 sm:$0xff]  }
0x136a   :  { %7128 = vbcast.lane.b32.xlu1 %v7126_v22, 256  ;;  %7135 = vbcast.lane.b32.xlu0 %v7133_v12, 256  ;;  %v16757_v22 = vld [vmem:[#allocation26 + $0x78] ss:$12 sps:$4 sm:$0xff]   ;;  %v16760_v12 = vld [vmem:[#allocation26 + $0x80] ss:$12 sps:$4 sm:$0xff]  }
0x13d0   :  { %v7094_v39 = vpop.permute.xlu1 %7093  ;;  %v7087_v52 = vpop.permute.xlu0 %7086 }
0x13d1   :  { %v7146_v40 = vmul.f32 %v7138_v15, %v7094_v39  ;;  %v7145_v7 = vmul.f32 %v7137_v33, %v7087_v52  ;;  %v16763_v15 = vld [vmem:[#allocation26 + $0x94] ss:$12 sps:$4 sm:$0xff]   ;;  %v16761_v33 = vld [vmem:[#allocation26 + $0x90] ss:$12 sps:$4 sm:$0xff]   ;;  %v16764_v39 = vld [vmem:[#allocation26 + $0x98] ss:$12 sps:$4 sm:$0xff]  }
0x13d2   :  { %v16767_v52 = vld [vmem:[#allocation26 + $0xac] ss:$12 sps:$4 sm:$0xff]  }
0x13d3   :  { %v7153_v6 = vadd.f32 %v7146_v40, %v7145_v7  ;;  %v16765_v40 = vld [vmem:[#allocation26 + $0xa8] ss:$12 sps:$4 sm:$0xff]   ;;  %v16768_v7 = vld [vmem:[#allocation26 + $0xb0] ss:$12 sps:$4 sm:$0xff]  }
0x13d4   :  { %v7101_v9 = vpop.permute.xlu1 %7100  ;;  %v7108_v37 = vpop.permute.xlu0 %7107 }
0x13d5   :  { %v7147_v21 = vmul.f32 %v7139_v57, %v7101_v9  ;;  %v7148_v38 = vmul.f32 %v7140_v58, %v7108_v37  ;;  %v16771_v57 = vld [vmem:[#allocation27 + $0x4] ss:$8 sps:$4 sm:$0xff]   ;;  %v16769_v9 = vld [vmem:[#allocation27] ss:$8 sps:$4 sm:$0xff]   ;;  %v16774_v58 = vld [vmem:[#allocation27 + $0x14] ss:$8 sps:$4 sm:$0xff]  }
0x13d6   :  { %v16772_v37 = vld [vmem:[#allocation27 + $0x10] ss:$8 sps:$4 sm:$0xff]  }
0x13d7   :  { %v7154_v4 = vadd.f32 %v7153_v6, %v7147_v21  ;;  %v16775_v6 = vld [vmem:[#allocation27 + $0x20] ss:$8 sps:$4 sm:$0xff]   ;;  %v16777_v21 = vld [vmem:[#allocation27 + $0x24] ss:$8 sps:$4 sm:$0xff]  }
0x13d8   :  { %v7115_v19 = vpop.permute.xlu1 %7114  ;;  %v7122_v26 = vpop.permute.xlu0 %7121 }
0x13d9   :  { %v7155_v61 = vadd.f32 %v7154_v4, %v7148_v38  ;;  %v7149_v18 = vmul.f32 %v7141_v45, %v7115_v19  ;;  %v7150_v53 = vmul.f32 %v7142_v28, %v7122_v26  ;;  %v16780_v45 = vld [vmem:[#allocation27 + $0x34] ss:$8 sps:$4 sm:$0xff]   ;;  %v16783_v4 = vld [vmem:[#allocation27 + $0x44] ss:$8 sps:$4 sm:$0xff]   ;;  %v16781_v38 = vld [vmem:[#allocation27 + $0x40] ss:$8 sps:$4 sm:$0xff]  }
0x13da   :  { %v16786_v19 = vld [vmem:[#allocation27 + $0x54] ss:$8 sps:$4 sm:$0xff]   ;;  %v16789_v28 = vld [vmem:[#allocation27 + $0x64] ss:$8 sps:$4 sm:$0xff]   ;;  %v16787_v26 = vld [vmem:[#allocation27 + $0x60] ss:$8 sps:$4 sm:$0xff]  }
0x13db   :  { %v7156_v51 = vadd.f32 %v7155_v61, %v7149_v18  ;;  %v16792_v61 = vld [vmem:[#allocation27 + $0x74] ss:$8 sps:$4 sm:$0xff]   ;;  %v16790_v18 = vld [vmem:[#allocation27 + $0x70] ss:$8 sps:$4 sm:$0xff]  }
0x13dc   :  { %v7129_v8 = vpop.permute.xlu1 %7128  ;;  %v7136_v43 = vpop.permute.xlu0 %7135 }
0x13dd   :  { %v7157_v14 = vadd.f32 %v7156_v51, %v7150_v53  ;;  %v7151_v56 = vmul.f32 %v7143_v42, %v7129_v8  ;;  %v7152_v49 = vmul.f32 %v7144_v5, %v7136_v43  ;;  %v16795_v42 = vld [vmem:[#allocation27 + $0x84] ss:$8 sps:$4 sm:$0xff]   ;;  %v16793_v51 = vld [vmem:[#allocation27 + $0x80] ss:$8 sps:$4 sm:$0xff]   ;;  %v16798_v53 = vld [vmem:[#allocation27 + $0x94] ss:$8 sps:$4 sm:$0xff]  }
0x13de   :  { %v16796_v8 = vld [vmem:[#allocation27 + $0x90] ss:$8 sps:$4 sm:$0xff]   ;;  %v16801_v5 = vld [vmem:[#allocation27 + $0xa4] ss:$8 sps:$4 sm:$0xff]   ;;  %v16799_v43 = vld [vmem:[#allocation27 + $0xa0] ss:$8 sps:$4 sm:$0xff]  }
0x13df   :  { %v7158_v29 = vadd.f32 %v7157_v14, %v7151_v56  ;;  %v16802_v14 = vld [vmem:[#allocation27 + $0xb0] ss:$8 sps:$4 sm:$0xff]   ;;  %v16804_v56 = vld [vmem:[#allocation27 + $0xb4] ss:$8 sps:$4 sm:$0xff]  }
0x13e1   :  { %v7159_v31 = vadd.f32 %v7158_v29, %v7152_v49  ;;  %v16807_v29 = vld [vmem:[#allocation27 + $0xc4] ss:$8 sps:$4 sm:$0xff]   ;;  %v16805_v49 = vld [vmem:[#allocation27 + $0xc0] ss:$8 sps:$4 sm:$0xff]  }
0x13e3   :  { %v19251_v0 = vpack.c.bf16 %v7159_v31, %v7159_v31  ;;  %v16810_v31 = vld [vmem:[#allocation27 + $0xd4] ss:$8 sps:$4 sm:$0xff]  }
0x13e5   :  { %7530 = vmatprep.mubr.bf16.mxu1 %v19251_v0  ;;  %7571 = vmatprep.mubr.bf16.mxu0 %v19251_v0 }
0x13e6   :  { %7531 = vmatmul.mubr.bf16.vlgmr.msra.gmra.mrb[4].mxu1 %v19211_v50  ;;  %7572 = vmatmul.mubr.bf16.vlgmr.msra.gmra.mrb[0].mxu0 %v19211_v50 }
0x13e7   :  { %7757 = vmatpush1.bf16.msra.mxu1 %v16737_v25  ;;  %15734 = vmatpush3.bf16.msra.mxu0 %v16740_v20  ;;  %v16813_v25 = vld [vmem:[#allocation27 + $0xe4] ss:$8 sps:$4 sm:$0xff]   ;;  %v16811_v20 = vld [vmem:[#allocation27 + $0xe0] ss:$8 sps:$4 sm:$0xff]  }
0x13e8   :  { %7758 = vmatprep.subr.bf16.mxu1 %v16743_v24  ;;  %15735 = vmatprep.subr.bf16.mxu0 %v19730_v32  ;;  %v16816_v24 = vld [vmem:[#allocation27 + $0xf4] ss:$8 sps:$4 sm:$0xff]  }
0x13e9   :  { %7788 = vmatprep.mubr.bf16.mxu1 %v17893_v2  ;;  %15749 = vmatprep.mubr.msk.bf16.mxu0 %vm17894_vm0, %v19730_v32 }
0x13eb   :  { %7759 = vmatpush1.bf16.msra.mxu1 %v16741_v17  ;;  %15736 = vmatpush3.bf16.msra.mxu0 %v16744_v1  ;;  %v16814_v17 = vld [vmem:[#allocation27 + $0xf0] ss:$8 sps:$4 sm:$0xff]   ;;  %v16819_v1 = vld [vmem:[#allocation27 + $0x104] ss:$8 sps:$4 sm:$0xff]  }
0x13ec   :  { %7760 = vmatprep.subr.bf16.mxu1 %v16747_v63  ;;  %15737 = vmatprep.subr.bf16.mxu0 %v19730_v32 }
0x13ef   :  { %7761 = vmatpush1.bf16.msra.mxu1 %v16745_v11  ;;  %15738 = vmatpush3.bf16.msra.mxu0 %v16748_v41 }
0x13f0   :  { %7762 = vmatprep.subr.bf16.mxu1 %v16751_v59  ;;  %15739 = vmatprep.subr.bf16.mxu0 %v19730_v32 }
0x13f3   :  { %7763 = vmatpush1.bf16.msra.mxu1 %v16749_v30  ;;  %15740 = vmatpush3.bf16.msra.mxu0 %v16752_v48  ;;  %v7225_v48 = vld [vmem:[%s19733_s7] sm:$0x7] }
0x13f4   :  { %7764 = vmatprep.subr.bf16.mxu1 %v16755_v36  ;;  %15741 = vmatprep.subr.bf16.mxu0 %v19730_v32  ;;  %v7611_v36 = vld [vmem:[%s19691_s21] sm:$0x7] }
0x13f7   :  { %7765 = vmatpush1.bf16.msra.mxu1 %v16753_v60  ;;  %15742 = vmatpush3.bf16.msra.mxu0 %v16756_v27  ;;  %v7230_v60 = vrot.slane %v7225_v48, %v18367_v44  ;;  %v7616_v27 = vrot.slane %v7611_v36, %v18367_v44 }
0x13f8   :  { %7766 = vmatprep.subr.bf16.mxu1 %v16759_v62  ;;  %15743 = vmatprep.subr.bf16.mxu0 %v19730_v32  ;;  %v7234_v62 = vrot.slane %v7225_v48, %v18370_v46 }
0x13fb   :  { %7767 = vmatpush1.bf16.msra.mxu1 %v16757_v22  ;;  %15744 = vmatpush3.bf16.msra.mxu0 %v16760_v12  ;;  %v7620_v22 = vrot.slane %v7611_v36, %v18370_v46  ;;  %v15949_v12 = vadd.f32 %v7616_v27, %v7230_v60 }
0x13fc   :  { %7768 = vmatprep.subr.bf16.mxu1 %v16763_v15  ;;  %15745 = vmatprep.subr.bf16.mxu0 %v19730_v32 }
0x13ff   :  { %7769 = vmatpush1.bf16.msra.mxu1 %v16761_v33  ;;  %15746 = vmatpush3.bf16.msra.mxu0 %v16764_v39  ;;  %v15951_v33 = vadd.f32 %v7620_v22, %v7234_v62 }
0x1400   :  { %7770 = vmatprep.subr.bf16.mxu1 %v16767_v52  ;;  %15747 = vmatprep.subr.bf16.mxu0 %v19730_v32  ;;  %v16778_v32 = vld [vmem:[#allocation27 + $0x30] ss:$8 sps:$4 sm:$0xff]  }
0x1403   :  { %7771 = vmatpush1.bf16.msra.mxu1 %v16765_v40  ;;  %15748 = vmatpush3.bf16.msra.mxu0 %v16768_v7 }
0x1404   :  { %8159 = vmatprep.subr.bf16.mxu0 %v16771_v57 }
0x1406   :  { %7789 = vmatmul.mubr.bf16.vlgmr.msra.gmra.mrb[4].mxu1 %v19164_v47  ;;  %15750 = vmatmul.mubr.bf16.vlgmr.msra.gmra.mrb[4].mxu0 %v19164_v47  ;;  %v16784_v47 = vld [vmem:[#allocation27 + $0x50] ss:$8 sps:$4 sm:$0xff]  }
0x1407   :  { %8191 = vmatprep.mubr.bf16.mxu0 %v19251_v0  ;;  %8160 = vmatpush1.bf16.msra.mxu0 %v16769_v9  ;;  %v16808_v0 = vld [vmem:[#allocation27 + $0xd0] ss:$8 sps:$4 sm:$0xff]  }
0x1408   :  { %8161 = vmatprep.subr.bf16.mxu0 %v16774_v58 }
0x140b   :  { %8162 = vmatpush1.bf16.msra.mxu0 %v16772_v37 }
0x140c   :  { %8163 = vmatprep.subr.bf16.mxu0 %v16777_v21 }
0x140f   :  { %8164 = vmatpush1.bf16.msra.mxu0 %v16775_v6 }
0x1410   :  { %8165 = vmatprep.subr.bf16.mxu0 %v16780_v45 }
0x1413   :  { %8166 = vmatpush1.bf16.msra.mxu0 %v16778_v32 }
0x1414   :  { %8167 = vmatprep.subr.bf16.mxu0 %v16783_v4 }
0x1417   :  { %8168 = vmatpush1.bf16.msra.mxu0 %v16781_v38  ;;  %v7624_v38 = vrot.slane %v7611_v36, %v18377_v13  ;;  %v7907_v36 = vld [vmem:[%s19693_s23] sm:$0x3] }
0x1418   :  { %8169 = vmatprep.subr.bf16.mxu0 %v16786_v19  ;;  %v7912_v60 = vrot.slane %v7907_v36, %v18367_v44  ;;  %v7916_v27 = vrot.slane %v7907_v36, %v18370_v46 }
0x141b   :  { %8170 = vmatpush1.bf16.msra.mxu0 %v16784_v47  ;;  %v7238_v47 = vrot.slane %v7225_v48, %v18377_v13  ;;  %v16838_v48 = vld [vmem:[#allocation27 + $0x170] ss:$8 sps:$4 sm:$0xff]  }
0x141c   :  { %8171 = vmatprep.subr.bf16.mxu0 %v16789_v28 }
0x141f   :  { %8172 = vmatpush1.bf16.msra.mxu0 %v16787_v26 }
0x1420   :  { %8173 = vmatprep.subr.bf16.mxu0 %v16792_v61 }
0x1423   :  { %8174 = vmatpush1.bf16.msra.mxu0 %v16790_v18 }
0x1424   :  { %8175 = vmatprep.subr.bf16.mxu0 %v16795_v42 }
0x1427   :  { %8176 = vmatpush1.bf16.msra.mxu0 %v16793_v51 }
0x1428   :  { %8177 = vmatprep.subr.bf16.mxu0 %v16798_v53 }
0x142b   :  { %8178 = vmatpush1.bf16.msra.mxu0 %v16796_v8 }
0x142c   :  { %8179 = vmatprep.subr.bf16.mxu0 %v16801_v5 }
0x142f   :  { %8180 = vmatpush1.bf16.msra.mxu0 %v16799_v43 }
0x1430   :  { %8181 = vmatprep.subr.bf16.mxu0 %v16804_v56 }
0x1433   :  { %8182 = vmatpush1.bf16.msra.mxu0 %v16802_v14 }
0x1434   :  { %8183 = vmatprep.subr.bf16.mxu0 %v16807_v29  ;;  %v16817_v29 = vld [vmem:[#allocation27 + $0x100] ss:$8 sps:$4 sm:$0xff]  }
0x1437   :  { %8184 = vmatpush1.bf16.msra.mxu0 %v16805_v49 }
0x1438   :  { %8185 = vmatprep.subr.bf16.mxu0 %v16810_v31  ;;  %v16822_v31 = vld [vmem:[#allocation27 + $0x114] ss:$8 sps:$4 sm:$0xff]  }
0x143b   :  { %8186 = vmatpush1.bf16.msra.mxu0 %v16808_v0  ;;  %v16820_v0 = vld [vmem:[#allocation27 + $0x110] ss:$8 sps:$4 sm:$0xff]  }
0x143c   :  { %8187 = vmatprep.subr.bf16.mxu0 %v16813_v25  ;;  %v16825_v25 = vld [vmem:[#allocation27 + $0x124] ss:$8 sps:$4 sm:$0xff]  }
0x143f   :  { %8188 = vmatpush1.bf16.msra.mxu0 %v16811_v20  ;;  %v16823_v20 = vld [vmem:[#allocation27 + $0x120] ss:$8 sps:$4 sm:$0xff]  }
0x1440   :  { %8189 = vmatprep.subr.bf16.mxu0 %v16816_v24  ;;  %v16826_v24 = vld [vmem:[#allocation27 + $0x130] ss:$8 sps:$4 sm:$0xff]  }
0x1443   :  { %8190 = vmatpush1.bf16.msra.mxu0 %v16814_v17  ;;  %v16831_v17 = vld [vmem:[#allocation27 + $0x144] ss:$8 sps:$4 sm:$0xff]  }
0x1444   :  { %8200 = vmatprep.subr.bf16.mxu0 %v16819_v1  ;;  %v16829_v1 = vld [vmem:[#allocation27 + $0x140] ss:$8 sps:$4 sm:$0xff]  }
0x14b9   :  { %v15082_v63 = vpop.f32.mrb[0].mxu0 }
0x14ba   :  { %v15083_v11 = vpop.f32.mrb[1].mxu0 }
0x14bb   :  { %v15084_v41 = vadd.f32 %v15083_v11, %v15082_v63  ;;  %v15085_v59 = vpop.f32.mrb[2].mxu0  ;;  %v16834_v63 = vld [vmem:[#allocation27 + $0x154] ss:$8 sps:$4 sm:$0xff]   ;;  %v16832_v11 = vld [vmem:[#allocation27 + $0x150] ss:$8 sps:$4 sm:$0xff]  }
0x14bc   :  { %v15086_v30 = vpop.f32.mrb[3].mxu0  ;;  %v16835_v59 = vld [vmem:[#allocation27 + $0x160] ss:$8 sps:$4 sm:$0xff]  }
0x14bd   :  { %v7574_v18 = vadd.f32 %v15084_v41, %v7238_v47  ;;  %v16837_v41 = vld [vmem:[#allocation27 + $0x164] ss:$8 sps:$4 sm:$0xff]   ;;  %v16840_v30 = vld [vmem:[#allocation27 + $0x174] ss:$8 sps:$4 sm:$0xff]  }
0x14be   :  { %v16878_v47 = vld [vmem:[#allocation12 + $0x18] sm:$0xff] (!%p14327_p4)  }
0x14d9   :  { %v7790_v15 = vpop.f32.mrb[4].mxu1  ;;  %v7831_v39 = vpop.f32.mrb[4].mxu0 }
0x14da   :  { %v15950_v52 = vadd.f32 %v15949_v12, %v7790_v15  ;;  %v7792_v40 = vpop.f32.mrb[5].mxu1  ;;  %v15751_v7 = vpop.f32.mrb[5].mxu0  ;;  %v7832_v26 = vadd.f32 %v7831_v39, %v7624_v38  ;;  %v16876_v38 = vld [vmem:[#allocation12 + $0x10] sm:$0xff] (!%p14327_p4)  }
0x14db   :  { %v7794_v57 = vpop.f32.mrb[6].mxu1  ;;  %v7834_v9 = vpop.f32.mrb[6].mxu0  ;;  %v15952_v21 = vadd.f32 %v15951_v33, %v7792_v40 }
0x14dc   :  { %v14276_v58 = vmul.f32 -1.442695, %v15950_v52  ;;  %v7795_v37 = vpop.f32.mrb[7].mxu1  ;;  %v15752_v6 = vpop.f32.mrb[7].mxu0  ;;  %v8249_v52 = vadd.s32 (!%p14327_p4), 128, %v19074_v35 }
0x14dd   :  { %v14277_v45 = vmul.f32 -1.442695, %v15952_v21  ;;  %v16871_v6 = vld [vmem:[#allocation12 + $0x40] sm:$0xff] (!%p14327_p4)  }
0x14de   :  { %16861 = vpow2.f32 %v14276_v58  ;;  %v16872_v21 = vld [vmem:[#allocation12] sm:$0xff] (!%p14327_p4)  }
0x14df   :  { %16863 = vpow2.f32 %v14277_v45  ;;  %v16873_v45 = vld [vmem:[#allocation12 + $0x48] sm:$0xff] (!%p14327_p4)  }
0x14e8   :  { %v16862_v32 = vpop.eup %16861 }
0x14e9   :  { %v7841_v4 = vadd.f32 1.0, %v16862_v32  ;;  %v16864_v19 = vpop.eup %16863  ;;  %v16874_v32 = vld [vmem:[#allocation12 + $0x8] sm:$0xff] (!%p14327_p4)  }
0x14ea   :  { %v7848_v28 = vadd.f32 1.0, %v16864_v19  ;;  %v16877_v19 = vld [vmem:[#allocation12 + $0x58] sm:$0xff] (!%p14327_p4)  }
0x14eb   :  { %16865 = vrcp.f32 %v7841_v4  ;;  %v16875_v4 = vld [vmem:[#allocation12 + $0x50] sm:$0xff] (!%p14327_p4)  }
0x14ec   :  { %16867 = vrcp.f32 %v7848_v28  ;;  %v16879_v28 = vld [vmem:[#allocation12 + $0x60] sm:$0xff] (!%p14327_p4)  }
0x14f5   :  { %v16866_v61 = vpop.eup %16865 }
0x14f6   :  { %v7851_v42 = vmul.f32 %v16866_v61, %v7832_v26  ;;  %v16868_v53 = vpop.eup %16867  ;;  %v16880_v26 = vld [vmem:[#allocation12 + $0x20] sm:$0xff] (!%p14327_p4)   ;;  %v16881_v61 = vld [vmem:[#allocation12 + $0x68] sm:$0xff] (!%p14327_p4)  }
0x14f7   :  { %v7854_v8 = vsub.f32 1.0, %v16868_v53  ;;  %v7856_v14 = vmul.f32 %v16868_v53, %v19160_v34  ;;  %v16828_v34 = vld [vmem:[#allocation27 + $0x134] ss:$8 sps:$4 sm:$0xff]  }
0x14f8   :  { %v7852_v51 = vadd.f32 %v7851_v42, %v7574_v18  ;;  %v16882_v18 = vld [vmem:[#allocation12 + $0x28] sm:$0xff] (!%p14327_p4)   ;;  %v16883_v42 = vld [vmem:[#allocation12 + $0x70] sm:$0xff] (!%p14327_p4)  }
0x14fa   :  { %16869 = vtanh.f32 %v7852_v51 }
0x1504   :  { %v16870_v5 = vpop.eup %16869 }
0x1505   :  { %v7855_v43 = vmul.f32 %v16870_v5, %v7854_v8 }
0x1507   :  { %v19283_v56 = vadd.f32 %v7856_v14, %v7855_v43  ;;  %v16884_v43 = vld [vmem:[#allocation12 + $0x30] sm:$0xff] (!%p14327_p4)   ;;  %v16885_v14 = vld [vmem:[#allocation12 + $0x78] sm:$0xff] (!%p14327_p4)  }
0x1509   :  { %v19287_v49 = vpack.c.bf16 %v19283_v56, %v19283_v56 }
0x150b   :  { %8192 = vmatmul.mubr.bf16.vlgmr.msra.gmra.mrb[8].mxu0 %v19287_v49 }
0x150c   :  { %8201 = vmatpush1.bf16.msra.mxu0 %v16817_v29  ;;  %8232 = vmatprep.mubr.bf16.mxu0 %v17893_v2  ;;  %v16886_v29 = vld [vmem:[#allocation12 + $0x38] sm:$0xff] (!%p14327_p4)  }
0x150d   :  { %8202 = vmatprep.subr.bf16.mxu0 %v16822_v31 }
0x1510   :  { %8203 = vmatpush1.bf16.msra.mxu0 %v16820_v0 }
0x1511   :  { %8204 = vmatprep.subr.bf16.mxu0 %v16825_v25 }
0x1514   :  { %8205 = vmatpush1.bf16.msra.mxu0 %v16823_v20 }
0x1515   :  { %8206 = vmatprep.subr.bf16.mxu0 %v16828_v34 }
0x1518   :  { %8207 = vmatpush1.bf16.msra.mxu0 %v16826_v24  ;;  %v17896_v24 = vmov (!%p14327_p4), 1.0|1.0  }
0x1519   :  { %8208 = vmatprep.subr.bf16.mxu0 %v16831_v17 }
0x151c   :  { %8209 = vmatpush1.bf16.msra.mxu0 %v16829_v1 }
0x151d   :  { %8210 = vmatprep.subr.bf16.mxu0 %v16834_v63 }
0x1520   :  { %8211 = vmatpush1.bf16.msra.mxu0 %v16832_v11 }
0x1521   :  { %8212 = vmatprep.subr.bf16.mxu0 %v16837_v41 }
0x1524   :  { %8213 = vmatpush1.bf16.msra.mxu0 %v16835_v59 }
0x1525   :  { %8214 = vmatprep.subr.bf16.mxu0 %v16840_v30 }
0x1528   :  { %8215 = vmatpush1.bf16.msra.mxu0 %v16838_v48 }
0x1529   :  { %15097 = vmatprep.subr.bf16.mxu0 (!%p14327_p4), %v16871_v6 }
0x152b   :  { %8233 = vmatmul.mubr.bf16.vlgmr.msra.gmra.mrb[8].mxu0 %v19211_v50 }
0x152c   :  { %15098 = vmatpush3.bf16.msra.mxu0 (!%p14327_p4), %v16872_v21 }
0x152d   :  { %15099 = vmatprep.subr.bf16.mxu0 (!%p14327_p4), %v16873_v45 }
0x1530   :  { %15100 = vmatpush3.bf16.msra.mxu0 (!%p14327_p4), %v16874_v32 }
0x1531   :  { %15101 = vmatprep.subr.bf16.mxu0 (!%p14327_p4), %v16875_v4 }
0x1534   :  { %15102 = vmatpush3.bf16.msra.mxu0 (!%p14327_p4), %v16876_v38 }
0x1535   :  { %15103 = vmatprep.subr.bf16.mxu0 (!%p14327_p4), %v16877_v19 }
0x1538   :  { %15104 = vmatpush3.bf16.msra.mxu0 (!%p14327_p4), %v16878_v47 }
0x1539   :  { %15105 = vmatprep.subr.bf16.mxu0 (!%p14327_p4), %v16879_v28 }
0x153c   :  { %15106 = vmatpush3.bf16.msra.mxu0 (!%p14327_p4), %v16880_v26 }
0x153d   :  { %15107 = vmatprep.subr.bf16.mxu0 (!%p14327_p4), %v16881_v61 }
0x1540   :  { %15108 = vmatpush3.bf16.msra.mxu0 (!%p14327_p4), %v16882_v18 }
0x1541   :  { %15109 = vmatprep.subr.bf16.mxu0 (!%p14327_p4), %v16883_v42 }
0x1544   :  { %15110 = vmatpush3.bf16.msra.mxu0 (!%p14327_p4), %v16884_v43 }
0x1545   :  { %15111 = vmatprep.subr.bf16.mxu0 (!%p14327_p4), %v16885_v14 }
0x1548   :  { %15112 = vmatpush3.bf16.msra.mxu0 (!%p14327_p4), %v16886_v29 }
0x15fc   :  { %8248 = sbr.rel (%p14327_p4) target bundleno = 6295 (0x1897), region = 149 }
0x15fe   :  { %v8234_v62 = vpop.f32.mrb[8].mxu0 }
0x15ff   :  { %v15953_v22 = vadd.f32 %v8234_v62, %v7912_v60  ;;  %v8236_v12 = vpop.f32.mrb[9].mxu0 }
0x1600   :  { %v15954_v15 = vadd.f32 %v8236_v12, %v7916_v27  ;;  %v8238_v33 = vpop.f32.mrb[10].mxu0 }
0x1601   :  { %8242 = vst [vmem:[#allocation29 + $0x10] sm:$0xff] %v15953_v22  ;;  %v8239_v39 = vpop.f32.mrb[11].mxu0 }
0x1602   :  { %8243 = vst [vmem:[#allocation29 + $0x18] sm:$0xff] %v15954_v15  ;;  %v8250_v50 = vmax.f32 (!%p14327_p4), %v15953_v22, %v15954_v15 }
0x1604   :  { %8251 = vmax.xlane.f32.xlu0 %v8250_v50 }
0x1691   :  { %v8252_v40 = vpop.xlane.xlu0 %8251 }
0x1692   :  { %vm8253_vm12 = vcmp.eq.f32.partialorder %v15953_v22, %v8252_v40  ;;  %vm8254_vm13 = vcmp.eq.f32.partialorder %v15954_v15, %v8252_v40 }
0x1693   :  { %v8255_v7 = vsel %vm8253_vm12, %v19074_v35, 256  ;;  %v8256_v57 = vsel %vm8254_vm13, %v8249_v52, 256 }
0x1694   :  { %vm8257_vm14 = vcmp.lt.s32.totalorder %v8255_v7, %v8256_v57 }
0x1695   :  { %v8258_v9 = vsel %vm8257_vm14, %v8255_v7, %v8256_v57 }
0x1696   :  { %v8260_v58 = vshra.s32 %v8258_v9, 16  ;;  %v8259_v51 = vand.u32 65535, %v8258_v9 }
0x1698   :  { %v8262_v37 = vcvt.s32.f32 %v8260_v58  ;;  %v8261_v8 = vcvt.s32.f32 %v8259_v51 }
0x169a   :  { %8263 = vmin.xlane.f32.xlu0 %v8262_v37 }
0x1727   :  { %v8264_v53 = vpop.xlane.xlu0 %8263 }
0x1728   :  { %vm8265_vm15 = vcmp.eq.f32.partialorder %v8262_v37, %v8264_v53  ;;  %v8270_v31 = vcvt.f32.s32 %v8264_v53 }
0x1729   :  { %v8266_v5 = vsel %vm8265_vm15, %v8261_v8, inf }
0x172a   :  { %8267 = vmin.xlane.f32.xlu1 %v8266_v5  ;;  %v8271_v25 = vshll.u32 %v8270_v31, 16 }
0x17b7   :  { %v8268_v0 = vpop.xlane.xlu1 %8267 }
0x17b8   :  { %v8269_v20 = vcvt.f32.s32 %v8268_v0 }
0x17ba   :  { %v8272_v34 = vadd.s32 %v8271_v25, %v8269_v20 }
0x17bc   :  { %vm8274_vm9 = vcmp.eq.s32.totalorder %v8249_v52, %v8272_v34  ;;  %vm8273_vm10 = vcmp.eq.s32.totalorder %v19074_v35, %v8272_v34 }
0x17bd   :  { %vm14346_vm11 = vmpackc.low %vm8274_vm9, %vm8274_vm9 }
0x17be   :  { %14347 = vmatprep.mubr.msk.bf16.mxu0 %vm14346_vm11, %v17896_v24  ;;  %vm14348_vm12 = vmpackc.low %vm8273_vm10, %vm8273_vm10 }
0x17bf   :  { %14349 = vmatmul.mubr.msk.bf16.vlgmr.msra.gmra.mrb[0].mxu0 %vm14348_vm12, %v17896_v24 }
0x1892   :  { %v15113_v17 = vpop.f32.mrb[0].mxu0 }
0x1893   :  { %v15114_v1 = vpop.f32.mrb[1].mxu0 }
0x1894   :  { %v15115_v63 = vadd.f32 %v15114_v1, %v15113_v17  ;;  %v15116_v11 = vpop.f32.mrb[2].mxu0 }
0x1895   :  { %v15117_v41 = vpop.f32.mrb[3].mxu0 }
0x1896   :  { %8449 = vst [vmem:[#allocation5] sm:$0xff] %v15115_v63 }
0x1897 PF:  { %v19734_v59 = vmov 0.0   ;;  %v16889_v30 = vld [vmem:[#allocation23] sm:$0xff]   ;;  %16887 = vset.pattern.permute.xlu1 %v17893_v2  ;;  %16888 = vset.pattern.permute.xlu0 %v17893_v2  ;;  %v16890_v48 = vld [vmem:[#allocation23 + $0x8] sm:$0xff]   ;;  %v16891_v36 = vld [vmem:[#allocation23 + $0x10] sm:$0xff]   ;;  %s14350_s1 = sld [smem:[#allocation7 + $0x2]]  ;;  %s19735_s13 = sld [smem:[#allocation43_spill]] }
0x1898   :  { %15753 = vmatprep.subr.bf16.mxu1 %v19734_v59  ;;  %15769 = vmatprep.mubr.msk.bf16.mxu1 %vm17894_vm0, %v19734_v59  ;;  %v19307_v60 = vld [vmem:[#allocation4] sm:$0xff]  ;;  %v16892_v27 = vld [vmem:[#allocation23 + $0x18] sm:$0xff]   ;;  %v16895_v9 = vld [vmem:[#allocation23 + $0x30] sm:$0xff]   ;;  %s19736_s12 = sld [smem:[#allocation42_spill]]  ;;  %s19737_s15 = sld [smem:[#allocation48_spill]] }
0x1899   :  { %15754 = vmatpush3.bf16.msra.mxu1 %v16889_v30  ;;  %v8586_v62 = vrot.slane %v19307_v60, %v18377_v13  ;;  %v8572_v22 = vrot.slane %v19307_v60, %v18367_v44  ;;  %v8593_v12 = vrot.slane %v19307_v60, %v18959_v16  ;;  %v16893_v15 = vld [vmem:[#allocation23 + $0x20] sm:$0xff]   ;;  %v8579_v33 = vrot.slane %v19307_v60, %v18370_v46  ;;  %v16894_v50 = vld [vmem:[#allocation23 + $0x28] sm:$0xff]   ;;  %v16896_v32 = vld [vmem:[#allocation23 + $0x38] sm:$0xff]   ;;  %s14485_s20 = sld [smem:[#allocation7 + $0x3]] }
0x189a   :  { %15755 = vmatprep.subr.bf16.mxu1 %v19734_v59  ;;  %v8607_v39 = vrot.slane %v19307_v60, %v19023_v3  ;;  %v8600_v40 = vrot.slane %v19307_v60, %v19015_v10  ;;  %v8621_v57 = vrot.slane %v19307_v60, %v19030_v54  ;;  %v8614_v37 = vrot.slane %v19307_v60, %v19020_v23  ;;  %v14360_v61 = vld [vmem:[%s19685_s14] ss:$0 sm:$0xff]  ;;  %v8641_v42 = vld [vmem:[#allocation3 + $0x8] sm:$0xff]  ;;  %v8642_v8 = vld [vmem:[#allocation3 + $0x10] sm:$0xff] }
0x189b   :  { %8588 = vbcast.lane.b32.xlu1 %v8586_v62, 256  ;;  %8574 = vbcast.lane.b32.xlu0 %v8572_v22, 256  ;;  %v8640_v51 = vld [vmem:[#allocation3] sm:$0xff]  ;;  %v8646_v25 = vld [vmem:[#allocation3 + $0x30] sm:$0xff]  ;;  %v8643_v63 = vld [vmem:[#allocation3 + $0x18] sm:$0xff] }
0x189c   :  { %v8644_v53 = vld [vmem:[#allocation3 + $0x20] sm:$0xff] }
0x189d   :  { %15756 = vmatpush3.bf16.msra.mxu1 %v16890_v48  ;;  %p8451_p5 = scmp.gt.s32.totalorder %s14350_s1, 0  ;;  %v14351_v52 = vld [vmem:[%s19735_s13 + $0x10] sm:$0xff]  ;;  %v8459_v7 = vld [vmem:[#allocation5] sm:$0xff] }
0x189e   :  { %15757 = vmatprep.subr.bf16.mxu1 %v19734_v59 }
0x189f   :  { %8595 = vbcast.lane.b32.xlu1 %v8593_v12, 256  ;;  %s8452_s2 = scalar_select %p8451_p5, 1, 0  ;;  %8581 = vbcast.lane.b32.xlu0 %v8579_v33, 256 }
0x18a0   :  { %p14486_p6 = scmp.ne.s32.totalorder %s14485_s20, 0 }
0x18a1   :  { %15758 = vmatpush3.bf16.msra.mxu1 %v16891_v36  ;;  %s8453_s22 = scvt.s32.f32 %s8452_s2 }
0x18a2   :  { %15759 = vmatprep.subr.bf16.mxu1 %v19734_v59 }
0x18a3   :  { %8609 = vbcast.lane.b32.xlu1 %v8607_v39, 256  ;;  %v8456_v58 = vstv %s8453_s22  ;;  %s8458_s29 = ssub.f32 1.0, %s8453_s22  ;;  %8602 = vbcast.lane.b32.xlu0 %v8600_v40, 256  ;;  %v8645_v39 = vld [vmem:[#allocation3 + $0x28] sm:$0xff] }
0x18a4   :  { %v8457_v6 = vmul.f32 %v14351_v52, %v8456_v58 }
0x18a5   :  { %15760 = vmatpush3.bf16.msra.mxu1 %v16892_v27  ;;  %v8460_v21 = vstv %s8458_s29 }
0x18a6   :  { %15761 = vmatprep.subr.bf16.mxu1 %v19734_v59  ;;  %v8461_v45 = vmul.f32 %v8460_v21, %v8459_v7  ;;  %v14361_v21 = vld [vmem:[%s19687_s16] ss:$0 sm:$0xff] }
0x18a7   :  { %8623 = vbcast.lane.b32.xlu1 %v8621_v57, 256  ;;  %8616 = vbcast.lane.b32.xlu0 %v8614_v37, 256 }
0x18a8   :  { %v8462_v4 = vadd.f32 %v8461_v45, %v8457_v6 }
0x18a9   :  { %15762 = vmatpush3.bf16.msra.mxu1 %v16893_v15 }
0x18aa   :  { %15763 = vmatprep.subr.bf16.mxu1 %v19734_v59  ;;  %v19333_v38 = vpack.c.bf16 %v8462_v4, %v8462_v4 }
0x18ad   :  { %15764 = vmatpush3.bf16.msra.mxu1 %v16894_v50 }
0x18ae   :  { %15765 = vmatprep.subr.bf16.mxu1 %v19734_v59 }
0x18b1   :  { %15766 = vmatpush3.bf16.msra.mxu1 %v16895_v9  ;;  %v8647_v9 = vld [vmem:[#allocation3 + $0x38] sm:$0xff] }
0x18b2   :  { %15767 = vmatprep.subr.bf16.mxu1 %v19734_v59 }
0x18b5   :  { %15768 = vmatpush3.bf16.msra.mxu1 %v16896_v32 }
0x18b8   :  { %15770 = vmatmul.mubr.bf16.vlgmr.msra.gmra.mrb[0].mxu1 %v19333_v38 }
0x190d   :  { %v8575_v19 = vpop.permute.xlu0 %8574  ;;  %v8589_v28 = vpop.permute.xlu1 %8588 }
0x190e   :  { %v8634_v29 = vmul.f32 %v14360_v61, %v8589_v28  ;;  %v8632_v31 = vmul.f32 %v14360_v61, %v8575_v19 }
0x1911   :  { %v8582_v47 = vpop.permute.xlu0 %8581  ;;  %v8596_v18 = vpop.permute.xlu1 %8595 }
0x1912   :  { %v8633_v5 = vmul.f32 %v14360_v61, %v8582_v47  ;;  %v8635_v12 = vmul.f32 %v14360_v61, %v8596_v18 }
0x1915   :  { %v8603_v26 = vpop.permute.xlu0 %8602  ;;  %v8610_v30 = vpop.permute.xlu1 %8609 }
0x1916   :  { %v8636_v43 = vmul.f32 %v14360_v61, %v8603_v26  ;;  %v8637_v52 = vmul.f32 %v14360_v61, %v8610_v30  ;;  %v16930_v30 = vld [vmem:[#allocation24 + $0x20] ss:$12 sps:$4 sm:$0xff]  }
0x1919   :  { %v8617_v14 = vpop.permute.xlu0 %8616  ;;  %v8624_v57 = vpop.permute.xlu1 %8623 }
0x191a   :  { %v8638_v11 = vmul.f32 %v14360_v61, %v8617_v14  ;;  %v8639_v58 = vmul.f32 %v14360_v61, %v8624_v57  ;;  %v16928_v57 = vld [vmem:[#allocation24 + $0xdc] ss:$12 sps:$4 sm:$0xff]  }
0x198b   :  { %v8563_v0 = vpop.f32.mrb[0].mxu1 }
0x198c   :  { %v15771_v20 = vpop.f32.mrb[1].mxu1  ;;  %v8649_v34 = vadd.f32 %v8641_v42, %v8563_v0  ;;  %v8648_v24 = vadd.f32 %v8640_v51, %v8563_v0  ;;  %v8652_v17 = vadd.f32 %v8644_v53, %v8563_v0  ;;  %v8650_v1 = vadd.f32 %v8642_v8, %v8563_v0 }
0x198d   :  { %v8566_v41 = vpop.f32.mrb[2].mxu1  ;;  %v8654_v22 = vadd.f32 %v8646_v25, %v8563_v0  ;;  %v8651_v33 = vadd.f32 %v8643_v63, %v8563_v0  ;;  %v8653_v7 = vadd.f32 %v8645_v39, %v8563_v0  ;;  %v8655_v6 = vadd.f32 %v8647_v9, %v8563_v0  ;;  %v16897_v0 = vld [vmem:[#allocation24] ss:$12 sps:$4 sm:$0xff]   ;;  %v16899_v25 = vld [vmem:[#allocation24 + $0x4] ss:$12 sps:$4 sm:$0xff]  }
0x198e   :  { %v15772_v48 = vpop.f32.mrb[3].mxu1  ;;  %v8657_v36 = vadd.f32 %v8649_v34, %v8633_v5  ;;  %v8656_v27 = vadd.f32 %v8648_v24, %v8632_v31  ;;  %v8660_v62 = vadd.f32 %v8652_v17, %v8636_v43  ;;  %v8658_v15 = vadd.f32 %v8650_v1, %v8634_v29  ;;  %v14362_v31 = vld [vmem:[#allocation8] ss:$0 sm:$0xff]  ;;  %v16902_v20 = vld [vmem:[#allocation24 + $0x1c] ss:$12 sps:$4 sm:$0xff]   ;;  %9210 = vmatprep.subr.bf16.mxu1 %v16899_v25 }
0x198f   :  { %v8662_v50 = vadd.f32 %v8654_v22, %v8638_v11  ;;  %v8659_v40 = vadd.f32 %v8651_v33, %v8635_v12  ;;  %v8661_v37 = vadd.f32 %v8653_v7, %v8637_v52  ;;  %v8663_v19 = vadd.f32 %v8655_v6, %v8639_v58  ;;  %9211 = vmatpush1.bf16.msra.mxu1 %v16897_v0  ;;  %v16900_v34 = vld [vmem:[#allocation24 + $0x18] ss:$12 sps:$4 sm:$0xff]   ;;  %v16905_v24 = vld [vmem:[#allocation24 + $0x34] ss:$12 sps:$4 sm:$0xff]   ;;  %v16903_v63 = vld [vmem:[#allocation24 + $0x30] ss:$12 sps:$4 sm:$0xff]  }
0x1990   :  { %17065 = vtanh.f32 %v8657_v36  ;;  %9212 = vmatprep.subr.bf16.mxu1 %v16902_v20  ;;  %v16924_v17 = vld [vmem:[#allocation24 + $0xc8] ss:$12 sps:$4 sm:$0xff]   ;;  %v16929_v11 = vld [vmem:[#allocation24 + $0xe0] ss:$12 sps:$4 sm:$0xff]   ;;  %v16934_v48 = vld [vmem:[#allocation24 + $0xf8] ss:$12 sps:$4 sm:$0xff]  }
0x1991   :  { %17067 = vtanh.f32 %v8656_v27  ;;  %v16925_v1 = vld [vmem:[#allocation24 + $0x8] ss:$12 sps:$4 sm:$0xff]   ;;  %v16908_v41 = vld [vmem:[#allocation24 + $0x4c] ss:$12 sps:$4 sm:$0xff]   ;;  %15128 = vmatprep.subr.bf16.mxu0 %v16924_v17  ;;  %v16911_v27 = vld [vmem:[#allocation24 + $0x64] ss:$12 sps:$4 sm:$0xff]  }
0x1992   :  { %17069 = vtanh.f32 %v8660_v62  ;;  %15129 = vmatpush3.bf16.msra.mxu0 %v16925_v1  ;;  %v16906_v36 = vld [vmem:[#allocation24 + $0x48] ss:$12 sps:$4 sm:$0xff]   ;;  %v16935_v62 = vld [vmem:[#allocation24 + $0x38] ss:$12 sps:$4 sm:$0xff]   ;;  %v16909_v22 = vld [vmem:[#allocation24 + $0x60] ss:$12 sps:$4 sm:$0xff]  }
0x1993   :  { %17071 = vtanh.f32 %v8658_v15  ;;  %9213 = vmatpush1.bf16.msra.mxu1 %v16900_v34  ;;  %15130 = vmatprep.subr.bf16.mxu0 %v16929_v11  ;;  %v16914_v12 = vld [vmem:[#allocation24 + $0x7c] ss:$12 sps:$4 sm:$0xff]   ;;  %v16912_v15 = vld [vmem:[#allocation24 + $0x78] ss:$12 sps:$4 sm:$0xff]   ;;  %v16917_v33 = vld [vmem:[#allocation24 + $0x94] ss:$12 sps:$4 sm:$0xff]  }
0x1994   :  { %17073 = vtanh.f32 %v8662_v50  ;;  %9214 = vmatprep.subr.bf16.mxu1 %v16905_v24  ;;  %v16915_v39 = vld [vmem:[#allocation24 + $0x90] ss:$12 sps:$4 sm:$0xff]   ;;  %v16920_v50 = vld [vmem:[#allocation24 + $0xac] ss:$12 sps:$4 sm:$0xff]   ;;  %v16918_v52 = vld [vmem:[#allocation24 + $0xa8] ss:$12 sps:$4 sm:$0xff]  }
0x1995   :  { %17075 = vtanh.f32 %v8659_v40  ;;  %v16923_v40 = vld [vmem:[#allocation24 + $0xc4] ss:$12 sps:$4 sm:$0xff]   ;;  %v16921_v7 = vld [vmem:[#allocation24 + $0xc0] ss:$12 sps:$4 sm:$0xff]  }
0x1996   :  { %17077 = vtanh.f32 %v8661_v37  ;;  %15131 = vmatpush3.bf16.msra.mxu0 %v16930_v30  ;;  %v16926_v58 = vld [vmem:[#allocation24 + $0xd8] ss:$12 sps:$4 sm:$0xff]   ;;  %v16933_v6 = vld [vmem:[#allocation24 + $0xf4] ss:$12 sps:$4 sm:$0xff]  }
0x1997   :  { %17079 = vtanh.f32 %v8663_v19  ;;  %9215 = vmatpush1.bf16.msra.mxu1 %v16903_v63  ;;  %15132 = vmatprep.subr.bf16.mxu0 %v16934_v48  ;;  %v8721_v34 = vld [vmem:[%s19736_s12] sm:$0xff] }
0x1998   :  { %9216 = vmatprep.subr.bf16.mxu1 %v16908_v41  ;;  %vm8722_vm13 = vcmp.gt.f32.partialorder %v8721_v34, 0.5  ;;  %v16951_v34 = vld [vmem:[#allocation24 + $0x150] ss:$12 sps:$4 sm:$0xff]  }
0x199a   :  { %v17066_v45 = vpop.eup %17065  ;;  %15133 = vmatpush3.bf16.msra.mxu0 %v16935_v62 }
0x199b   :  { %v17068_v32 = vpop.eup %17067  ;;  %v8680_v4 = vmul.f32 %v17066_v45, %v14361_v21  ;;  %9217 = vmatpush1.bf16.msra.mxu1 %v16906_v36  ;;  %v16931_v45 = vld [vmem:[#allocation24 + $0xf0] ss:$12 sps:$4 sm:$0xff]  }
0x199c   :  { %v17070_v47 = vpop.eup %17069  ;;  %v8679_v28 = vmul.f32 %v17068_v32, %v14361_v21  ;;  %9218 = vmatprep.subr.bf16.mxu1 %v16911_v27 }
0x199d   :  { %v17072_v26 = vpop.eup %17071  ;;  %8689 = vadd.xlane.f32.xlu1 %v8680_v4  ;;  %v8683_v18 = vmul.f32 %v17070_v47, %v14361_v21 }
0x199e   :  { %8687 = vadd.xlane.f32.xlu0 %v8679_v28  ;;  %v17074_v61 = vpop.eup %17073  ;;  %v8681_v42 = vmul.f32 %v17072_v26, %v14361_v21 }
0x199f   :  { %v17076_v51 = vpop.eup %17075  ;;  %v8685_v53 = vmul.f32 %v17074_v61, %v14361_v21  ;;  %9219 = vmatpush1.bf16.msra.mxu1 %v16909_v22 }
0x19a0   :  { %v8682_v8 = vmul.f32 %v17076_v51, %v14361_v21  ;;  %v17078_v5 = vpop.eup %17077  ;;  %9220 = vmatprep.subr.bf16.mxu1 %v16914_v12 }
0x19a1   :  { %8695 = vadd.xlane.f32.xlu1 %v8683_v18  ;;  %v8684_v43 = vmul.f32 %v17078_v5, %v14361_v21  ;;  %v17080_v14 = vpop.eup %17079 }
0x19a2   :  { %8691 = vadd.xlane.f32.xlu0 %v8681_v42  ;;  %v8686_v29 = vmul.f32 %v17080_v14, %v14361_v21 }
0x19a3   :  { %9221 = vmatpush1.bf16.msra.mxu1 %v16912_v15 }
0x19a4   :  { %9222 = vmatprep.subr.bf16.mxu1 %v16917_v33 }
0x19a5   :  { %8699 = vadd.xlane.f32.xlu1 %v8685_v53 }
0x19a6   :  { %8693 = vadd.xlane.f32.xlu0 %v8682_v8 }
0x19a7   :  { %9223 = vmatpush1.bf16.msra.mxu1 %v16915_v39 }
0x19a8   :  { %9224 = vmatprep.subr.bf16.mxu1 %v16920_v50 }
0x19aa   :  { %8697 = vadd.xlane.f32.xlu0 %v8684_v43 }
0x19ab   :  { %9225 = vmatpush1.bf16.msra.mxu1 %v16918_v52 }
0x19ac   :  { %9226 = vmatprep.subr.bf16.mxu1 %v16923_v40 }
0x19ae   :  { %8701 = vadd.xlane.f32.xlu0 %v8686_v29 }
0x19af   :  { %9227 = vmatpush1.bf16.msra.mxu1 %v16921_v7 }
0x19b0   :  { %9228 = vmatprep.subr.bf16.mxu1 %v16928_v57 }
0x19b3   :  { %9229 = vmatpush1.bf16.msra.mxu1 %v16926_v58 }
0x19b4   :  { %9230 = vmatprep.subr.bf16.mxu1 %v16933_v6 }
0x19b6   :  { %8710 = vperm.xlu1 %16887, %v14362_v31  }
0x19b7   :  { %9231 = vmatpush1.bf16.msra.mxu1 %v16931_v45 }
0x1a2a   :  { %v8690_v9 = vpop.xlane.xlu1 %8689 }
0x1a2b   :  { %v8688_v37 = vpop.xlane.xlu0 %8687 }
0x1a2e   :  { %v8696_v21 = vpop.xlane.xlu1 %8695 }
0x1a2f   :  { %v8692_v32 = vpop.xlane.xlu0 %8691 }
0x1a32   :  { %v8700_v4 = vpop.xlane.xlu1 %8699 }
0x1a33   :  { %v8694_v19 = vpop.xlane.xlu0 %8693 }
0x1a36   :  { %v8711_v47 = vpop.permute.xlu1 %8710 }
0x1a37   :  { %v8713_v28 = vadd.f32 %v8711_v47, %v8688_v37  ;;  %v8714_v26 = vadd.f32 %v8711_v47, %v8690_v9  ;;  %v8715_v18 = vadd.f32 %v8711_v47, %v8692_v32  ;;  %v8716_v61 = vadd.f32 %v8711_v47, %v8694_v19  ;;  %v8698_v42 = vpop.xlane.xlu0 %8697  ;;  %v16936_v32 = vld [vmem:[#allocation24 + $0x108] ss:$12 sps:$4 sm:$0xff]   ;;  %v16939_v19 = vld [vmem:[#allocation24 + $0x110] ss:$12 sps:$4 sm:$0xff]  }
0x1a38   :  { %v8717_v51 = vadd.f32 %v8711_v47, %v8696_v21  ;;  %v8718_v43 = vadd.f32 %v8711_v47, %v8698_v42  ;;  %v8719_v14 = vadd.f32 %v8711_v47, %v8700_v4  ;;  %v16938_v4 = vld [vmem:[#allocation24 + $0x10c] ss:$12 sps:$4 sm:$0xff]   ;;  %15134 = vmatprep.subr.bf16.mxu0 %v16939_v19 }
0x1a39   :  { %v8734_v53 = vrot.slane %v8713_v28, %v19078_v55  ;;  %v8738_v8 = vrot.slane %v8714_v26, %v19078_v55  ;;  %v8742_v5 = vrot.slane %v8715_v18, %v19078_v55  ;;  %v8746_v29 = vrot.slane %v8716_v61, %v19078_v55  ;;  %9232 = vmatprep.subr.bf16.mxu1 %v16938_v4  ;;  %v16941_v26 = vld [vmem:[#allocation24 + $0x120] ss:$12 sps:$4 sm:$0xff]   ;;  %v16943_v18 = vld [vmem:[#allocation24 + $0x124] ss:$12 sps:$4 sm:$0xff]   ;;  %v16944_v61 = vld [vmem:[#allocation24 + $0x128] ss:$12 sps:$4 sm:$0xff]  }
0x1a3a   :  { %v8750_v25 = vrot.slane %v8717_v51, %v19078_v55  ;;  %v8754_v1 = vrot.slane %v8718_v43, %v19078_v55  ;;  %v8758_v11 = vrot.slane %v8719_v14, %v19078_v55  ;;  %9233 = vmatpush1.bf16.msra.mxu1 %v16936_v32  ;;  %v16945_v51 = vld [vmem:[#allocation24 + $0x68] ss:$12 sps:$4 sm:$0xff]   ;;  %v16946_v43 = vld [vmem:[#allocation24 + $0x138] ss:$12 sps:$4 sm:$0xff]  }
0x1a3b   :  { %v8763_v31 = vsel %vm5332_vm2, %v8738_v8, %v8734_v53  ;;  %v8702_v0 = vpop.xlane.xlu0 %8701  ;;  %9234 = vmatprep.subr.bf16.mxu1 %v16943_v18  ;;  %v16948_v14 = vld [vmem:[#allocation24 + $0x13c] ss:$12 sps:$4 sm:$0xff]  }
0x1a3c   :  { %v8764_v20 = vsel %vm5334_vm3, %v8742_v5, %v8763_v31  ;;  %v8720_v24 = vadd.f32 %v8711_v47, %v8702_v0  ;;  %v16940_v47 = vld [vmem:[#allocation24 + $0x50] ss:$12 sps:$4 sm:$0xff]   ;;  %v16950_v31 = vld [vmem:[#allocation24 + $0x80] ss:$12 sps:$4 sm:$0xff]  }
0x1a3d   :  { %v8765_v17 = vsel %vm5336_vm4, %v8746_v29, %v8764_v20  ;;  %15135 = vmatpush3.bf16.msra.mxu0 %v16940_v47  ;;  %v16949_v29 = vld [vmem:[#allocation24 + $0x140] ss:$12 sps:$4 sm:$0xff]   ;;  %v16954_v20 = vld [vmem:[#allocation24 + $0x158] ss:$12 sps:$4 sm:$0xff]  }
0x1a3e   :  { %v8766_v63 = vsel %vm5338_vm5, %v8750_v25, %v8765_v17  ;;  %v8762_v30 = vrot.slane %v8720_v24, %v19078_v55  ;;  %15136 = vmatprep.subr.bf16.mxu0 %v16944_v61  ;;  %9235 = vmatpush1.bf16.msra.mxu1 %v16941_v26  ;;  %v16953_v25 = vld [vmem:[#allocation24 + $0x154] ss:$12 sps:$4 sm:$0xff]   ;;  %v16955_v24 = vld [vmem:[#allocation24 + $0x98] ss:$12 sps:$4 sm:$0xff]  }
0x1a3f   :  { %v8767_v41 = vsel %vm5340_vm6, %v8754_v1, %v8766_v63  ;;  %9236 = vmatprep.subr.bf16.mxu1 %v16948_v14  ;;  %v16958_v63 = vld [vmem:[#allocation24 + $0x16c] ss:$12 sps:$4 sm:$0xff]   ;;  %v8856_v61 = vld [vmem:[#allocation2 + $0x38] sm:$0xff] }
0x1a40   :  { %v8768_v48 = vsel %vm5342_vm7, %v8758_v11, %v8767_v41  ;;  %v16959_v11 = vld [vmem:[#allocation24 + $0x170] ss:$12 sps:$4 sm:$0xff]   ;;  %v16956_v41 = vld [vmem:[#allocation24 + $0x168] ss:$12 sps:$4 sm:$0xff]  }
0x1a41   :  { %v8769_v36 = vsel %vm5344_vm8, %v8762_v30, %v8768_v48  ;;  %15137 = vmatpush3.bf16.msra.mxu0 %v16945_v51  ;;  %v16960_v30 = vld [vmem:[#allocation24 + $0xb0] ss:$12 sps:$4 sm:$0xff]  }
0x1a42   :  { %v8771_v27 = vsel %vm8722_vm13, %v8769_v36, -1e+30  ;;  %15138 = vmatprep.subr.bf16.mxu0 %v16949_v29  ;;  %9237 = vmatpush1.bf16.msra.mxu1 %v16946_v43  ;;  %v16963_v48 = vld [vmem:[#allocation26 + $0x4] ss:$12 sps:$4 sm:$0xff]   ;;  %v8855_v47 = vld [vmem:[#allocation2 + $0x30] sm:$0xff] }
0x1a43   :  { %v8772_v62 = vsel %vm5012_vm1, %v8771_v27, -inf  ;;  %9238 = vmatprep.subr.bf16.mxu1 %v16953_v25  ;;  %v16961_v29 = vld [vmem:[#allocation26] ss:$12 sps:$4 sm:$0xff]  }
0x1a44   :  { %v8773_v22 = vrot.slane %v8772_v62, 4  ;;  %v16968_v25 = vld [vmem:[#allocation26 + $0x20] ss:$12 sps:$4 sm:$0xff]  }
0x1a45   :  { %15139 = vmatpush3.bf16.msra.mxu0 %v16950_v31  ;;  %v16964_v31 = vld [vmem:[#allocation26 + $0x8] ss:$12 sps:$4 sm:$0xff]  }
0x1a46   :  { %v8774_v12 = vmax.f32 %v8772_v62, %v8773_v22  ;;  %15140 = vmatprep.subr.bf16.mxu0 %v16954_v20  ;;  %9239 = vmatpush1.bf16.msra.mxu1 %v16951_v34  ;;  %v8850_v62 = vld [vmem:[#allocation2 + $0x8] sm:$0xff]  ;;  %v8849_v22 = vld [vmem:[#allocation2] sm:$0xff] }
0x1a47   :  { %9240 = vmatprep.subr.bf16.mxu1 %v16958_v63  ;;  %v16971_v20 = vld [vmem:[#allocation26 + $0x34] ss:$12 sps:$4 sm:$0xff]   ;;  %v16969_v34 = vld [vmem:[#allocation26 + $0x30] ss:$12 sps:$4 sm:$0xff]  }
0x1a48   :  { %v8775_v15 = vrot.slane %v8774_v12, 2  ;;  %v16976_v63 = vld [vmem:[#allocation26 + $0x50] ss:$12 sps:$4 sm:$0xff]  }
0x1a49   :  { %15141 = vmatpush3.bf16.msra.mxu0 %v16955_v24  ;;  %v16972_v24 = vld [vmem:[#allocation26 + $0x38] ss:$12 sps:$4 sm:$0xff]  }
0x1a4a   :  { %v8776_v33 = vmax.f32 %v8774_v12, %v8775_v15  ;;  %15142 = vmatprep.subr.bf16.mxu0 %v16959_v11  ;;  %9241 = vmatpush1.bf16.msra.mxu1 %v16956_v41  ;;  %v16979_v11 = vld [vmem:[#allocation26 + $0x64] ss:$12 sps:$4 sm:$0xff]   ;;  %v16977_v41 = vld [vmem:[#allocation26 + $0x60] ss:$12 sps:$4 sm:$0xff]  }
0x1a4b   :  { %9468 = vmatprep.subr.bf16.mxu1 %v16963_v48  ;;  %v16983_v48 = vld [vmem:[#allocation26 + $0x7c] ss:$12 sps:$4 sm:$0xff]  }
0x1a4c   :  { %v8777_v39 = vrot.slane %v8776_v33, 1 }
0x1a4d   :  { %15143 = vmatpush3.bf16.msra.mxu0 %v16960_v30  ;;  %v16980_v30 = vld [vmem:[#allocation26 + $0x68] ss:$12 sps:$4 sm:$0xff]  }
0x1a4e   :  { %v8778_v50 = vmax.f32 %v8776_v33, %v8777_v39  ;;  %15773 = vmatprep.subr.bf16.mxu0 %v19734_v59 }
0x1a50   :  { %v8779_v52 = vsub.f32 %v8771_v27, %v8778_v50  ;;  %v8851_v50 = vld [vmem:[#allocation2 + $0x10] sm:$0xff] }
0x1a52   :  { %v8780_v40 = vmul.f32 1.442695, %v8779_v52 }
0x1a54   :  { %17081 = vpow2.f32 %v8780_v40  ;;  %v8852_v40 = vld [vmem:[#allocation2 + $0x18] sm:$0xff] }
0x1a5e   :  { %v17082_v7 = vpop.eup %17081 }
0x1a5f   :  { %v8782_v57 = vsel %vm5012_vm1, %v17082_v7, 0.0 }
0x1a60   :  { %v8783_v9 = vrot.slane %v8782_v57, 4 }
0x1a62   :  { %v8784_v58 = vadd.f32 %v8783_v9, %v8782_v57 }
0x1a64   :  { %v8785_v37 = vrot.slane %v8784_v58, 2 }
0x1a66   :  { %v8786_v6 = vadd.f32 %v8785_v37, %v8784_v58  ;;  %v8853_v58 = vld [vmem:[#allocation2 + $0x20] sm:$0xff] }
0x1a68   :  { %v8787_v21 = vrot.slane %v8786_v6, 1 }
0x1a6a   :  { %v8788_v45 = vadd.f32 %v8787_v21, %v8786_v6 }
0x1a6c   :  { %17083 = vrcp.f32 %v8788_v45  ;;  %v8854_v45 = vld [vmem:[#allocation2 + $0x28] sm:$0xff] }
0x1a76   :  { %v17084_v28 = vpop.eup %17083 }
0x1a77   :  { %v8790_v42 = vmul.f32 %v17084_v28, %v17082_v7 }
0x1a79   :  { %v8791_v53 = vadd.f32 %v8790_v42, %v19307_v60  ;;  %v8803_v8 = vrot.slane %v8790_v42, %v18370_v46  ;;  %v8796_v5 = vrot.slane %v8790_v42, %v18367_v44  ;;  %v8810_v0 = vrot.slane %v8790_v42, %v18377_v13 }
0x1a7a   :  { %v8817_v60 = vrot.slane %v8790_v42, %v18959_v16  ;;  %v8824_v17 = vrot.slane %v8790_v42, %v19015_v10  ;;  %v8831_v1 = vrot.slane %v8790_v42, %v19023_v3  ;;  %v8838_v36 = vrot.slane %v8790_v42, %v19020_v23 }
0x1a7b   :  { %8792 = vst.msk [vmem:[#allocation4] sm:$0xff] %vm5012_vm1, %v8791_v53  ;;  %8805 = vbcast.lane.b32.xlu1 %v8803_v8, 256  ;;  %8798 = vbcast.lane.b32.xlu0 %v8796_v5, 256  ;;  %v8845_v27 = vrot.slane %v8790_v42, %v19030_v54 }
0x1a7f   :  { %8812 = vbcast.lane.b32.xlu1 %v8810_v0, 256  ;;  %8819 = vbcast.lane.b32.xlu0 %v8817_v60, 256  ;;  %v16967_v0 = vld [vmem:[#allocation26 + $0x1c] ss:$12 sps:$4 sm:$0xff]   ;;  %v16965_v60 = vld [vmem:[#allocation26 + $0x18] ss:$12 sps:$4 sm:$0xff]  }
0x1a83   :  { %8826 = vbcast.lane.b32.xlu1 %v8824_v17, 256  ;;  %8833 = vbcast.lane.b32.xlu0 %v8831_v1, 256  ;;  %v16975_v17 = vld [vmem:[#allocation26 + $0x4c] ss:$12 sps:$4 sm:$0xff]   ;;  %v16973_v1 = vld [vmem:[#allocation26 + $0x48] ss:$12 sps:$4 sm:$0xff]  }
0x1a87   :  { %8840 = vbcast.lane.b32.xlu1 %v8838_v36, 256  ;;  %8847 = vbcast.lane.b32.xlu0 %v8845_v27, 256  ;;  %v16981_v36 = vld [vmem:[#allocation26 + $0x78] ss:$12 sps:$4 sm:$0xff]   ;;  %v16984_v27 = vld [vmem:[#allocation26 + $0x80] ss:$12 sps:$4 sm:$0xff]  }
0x1aed   :  { %v8806_v12 = vpop.permute.xlu1 %8805  ;;  %v8799_v15 = vpop.permute.xlu0 %8798 }
0x1aee   :  { %v8858_v33 = vmul.f32 %v8850_v62, %v8806_v12  ;;  %v8857_v39 = vmul.f32 %v8849_v22, %v8799_v15  ;;  %v16987_v62 = vld [vmem:[#allocation26 + $0x94] ss:$12 sps:$4 sm:$0xff]   ;;  %v16985_v22 = vld [vmem:[#allocation26 + $0x90] ss:$12 sps:$4 sm:$0xff]   ;;  %v16988_v12 = vld [vmem:[#allocation26 + $0x98] ss:$12 sps:$4 sm:$0xff]  }
0x1aef   :  { %v16991_v15 = vld [vmem:[#allocation26 + $0xac] ss:$12 sps:$4 sm:$0xff]  }
0x1af0   :  { %v8865_v57 = vadd.f32 %v8858_v33, %v8857_v39  ;;  %v16989_v33 = vld [vmem:[#allocation26 + $0xa8] ss:$12 sps:$4 sm:$0xff]   ;;  %v16992_v39 = vld [vmem:[#allocation26 + $0xb0] ss:$12 sps:$4 sm:$0xff]  }
0x1af1   :  { %v8813_v52 = vpop.permute.xlu1 %8812  ;;  %v8820_v7 = vpop.permute.xlu0 %8819 }
0x1af2   :  { %v8859_v9 = vmul.f32 %v8851_v50, %v8813_v52  ;;  %v8860_v6 = vmul.f32 %v8852_v40, %v8820_v7  ;;  %v16995_v50 = vld [vmem:[#allocation27 + $0x4] ss:$8 sps:$4 sm:$0xff]   ;;  %v16993_v52 = vld [vmem:[#allocation27] ss:$8 sps:$4 sm:$0xff]   ;;  %v16998_v40 = vld [vmem:[#allocation27 + $0x14] ss:$8 sps:$4 sm:$0xff]  }
0x1af3   :  { %v16996_v7 = vld [vmem:[#allocation27 + $0x10] ss:$8 sps:$4 sm:$0xff]  }
0x1af4   :  { %v8866_v37 = vadd.f32 %v8865_v57, %v8859_v9  ;;  %v16999_v57 = vld [vmem:[#allocation27 + $0x20] ss:$8 sps:$4 sm:$0xff]   ;;  %v17001_v9 = vld [vmem:[#allocation27 + $0x24] ss:$8 sps:$4 sm:$0xff]  }
0x1af5   :  { %v8827_v21 = vpop.permute.xlu1 %8826  ;;  %v8834_v32 = vpop.permute.xlu0 %8833 }
0x1af6   :  { %v8867_v4 = vadd.f32 %v8866_v37, %v8860_v6  ;;  %v8861_v19 = vmul.f32 %v8853_v58, %v8827_v21  ;;  %v8862_v26 = vmul.f32 %v8854_v45, %v8834_v32  ;;  %v17004_v58 = vld [vmem:[#allocation27 + $0x34] ss:$8 sps:$4 sm:$0xff]   ;;  %v17007_v37 = vld [vmem:[#allocation27 + $0x44] ss:$8 sps:$4 sm:$0xff]   ;;  %v17005_v6 = vld [vmem:[#allocation27 + $0x40] ss:$8 sps:$4 sm:$0xff]  }
0x1af7   :  { %v17010_v21 = vld [vmem:[#allocation27 + $0x54] ss:$8 sps:$4 sm:$0xff]   ;;  %v17013_v45 = vld [vmem:[#allocation27 + $0x64] ss:$8 sps:$4 sm:$0xff]   ;;  %v17011_v32 = vld [vmem:[#allocation27 + $0x60] ss:$8 sps:$4 sm:$0xff]  }
0x1af8   :  { %v8868_v28 = vadd.f32 %v8867_v4, %v8861_v19  ;;  %v17016_v4 = vld [vmem:[#allocation27 + $0x74] ss:$8 sps:$4 sm:$0xff]   ;;  %v17014_v19 = vld [vmem:[#allocation27 + $0x70] ss:$8 sps:$4 sm:$0xff]  }
0x1af9   :  { %v8841_v18 = vpop.permute.xlu1 %8840  ;;  %v8848_v42 = vpop.permute.xlu0 %8847 }
0x1afa   :  { %v8869_v51 = vadd.f32 %v8868_v28, %v8862_v26  ;;  %v8863_v53 = vmul.f32 %v8855_v47, %v8841_v18  ;;  %v8864_v5 = vmul.f32 %v8856_v61, %v8848_v42  ;;  %v17019_v47 = vld [vmem:[#allocation27 + $0x84] ss:$8 sps:$4 sm:$0xff]   ;;  %v17017_v28 = vld [vmem:[#allocation27 + $0x80] ss:$8 sps:$4 sm:$0xff]   ;;  %v17022_v26 = vld [vmem:[#allocation27 + $0x94] ss:$8 sps:$4 sm:$0xff]  }
0x1afb   :  { %v17020_v18 = vld [vmem:[#allocation27 + $0x90] ss:$8 sps:$4 sm:$0xff]   ;;  %v17025_v61 = vld [vmem:[#allocation27 + $0xa4] ss:$8 sps:$4 sm:$0xff]   ;;  %v17023_v42 = vld [vmem:[#allocation27 + $0xa0] ss:$8 sps:$4 sm:$0xff]  }
0x1afc   :  { %v8870_v8 = vadd.f32 %v8869_v51, %v8863_v53  ;;  %v17026_v51 = vld [vmem:[#allocation27 + $0xb0] ss:$8 sps:$4 sm:$0xff]   ;;  %v17028_v53 = vld [vmem:[#allocation27 + $0xb4] ss:$8 sps:$4 sm:$0xff]  }
0x1afe   :  { %v8871_v43 = vadd.f32 %v8870_v8, %v8864_v5  ;;  %v17031_v8 = vld [vmem:[#allocation27 + $0xc4] ss:$8 sps:$4 sm:$0xff]   ;;  %v17029_v5 = vld [vmem:[#allocation27 + $0xc0] ss:$8 sps:$4 sm:$0xff]  }
0x1b00   :  { %v19373_v14 = vpack.c.bf16 %v8871_v43, %v8871_v43  ;;  %v17034_v43 = vld [vmem:[#allocation27 + $0xd4] ss:$8 sps:$4 sm:$0xff]  }
0x1b02   :  { %9242 = vmatprep.mubr.bf16.mxu1 %v19373_v14  ;;  %9283 = vmatprep.mubr.bf16.mxu0 %v19373_v14 }
0x1b03   :  { %9243 = vmatmul.mubr.bf16.vlgmr.msra.gmra.mrb[4].mxu1 %v19333_v38  ;;  %9284 = vmatmul.mubr.bf16.vlgmr.msra.gmra.mrb[0].mxu0 %v19333_v38 }
0x1b04   :  { %9469 = vmatpush1.bf16.msra.mxu1 %v16961_v29  ;;  %15774 = vmatpush3.bf16.msra.mxu0 %v16964_v31  ;;  %v17037_v29 = vld [vmem:[#allocation27 + $0xe4] ss:$8 sps:$4 sm:$0xff]   ;;  %v17035_v31 = vld [vmem:[#allocation27 + $0xe0] ss:$8 sps:$4 sm:$0xff]  }
0x1b05   :  { %9470 = vmatprep.subr.bf16.mxu1 %v16967_v0  ;;  %15775 = vmatprep.subr.bf16.mxu0 %v19734_v59  ;;  %v17040_v0 = vld [vmem:[#allocation27 + $0xf4] ss:$8 sps:$4 sm:$0xff]  }
0x1b06   :  { %9500 = vmatprep.mubr.bf16.mxu1 %v17893_v2  ;;  %15789 = vmatprep.mubr.msk.bf16.mxu0 %vm17894_vm0, %v19734_v59 }
0x1b08   :  { %9471 = vmatpush1.bf16.msra.mxu1 %v16965_v60  ;;  %15776 = vmatpush3.bf16.msra.mxu0 %v16968_v25  ;;  %v17038_v60 = vld [vmem:[#allocation27 + $0xf0] ss:$8 sps:$4 sm:$0xff]   ;;  %v17043_v25 = vld [vmem:[#allocation27 + $0x104] ss:$8 sps:$4 sm:$0xff]  }
0x1b09   :  { %9472 = vmatprep.subr.bf16.mxu1 %v16971_v20  ;;  %15777 = vmatprep.subr.bf16.mxu0 %v19734_v59 }
0x1b0c   :  { %9473 = vmatpush1.bf16.msra.mxu1 %v16969_v34  ;;  %15778 = vmatpush3.bf16.msra.mxu0 %v16972_v24 }
0x1b0d   :  { %9474 = vmatprep.subr.bf16.mxu1 %v16975_v17  ;;  %15779 = vmatprep.subr.bf16.mxu0 %v19734_v59 }
0x1b10   :  { %9475 = vmatpush1.bf16.msra.mxu1 %v16973_v1  ;;  %15780 = vmatpush3.bf16.msra.mxu0 %v16976_v63  ;;  %v8937_v63 = vld [vmem:[%s19737_s15] sm:$0x7] }
0x1b11   :  { %9476 = vmatprep.subr.bf16.mxu1 %v16979_v11  ;;  %15781 = vmatprep.subr.bf16.mxu0 %v19734_v59  ;;  %v9323_v11 = vld [vmem:[%s19691_s21] sm:$0x7] }
0x1b14   :  { %9477 = vmatpush1.bf16.msra.mxu1 %v16977_v41  ;;  %15782 = vmatpush3.bf16.msra.mxu0 %v16980_v30  ;;  %v8942_v41 = vrot.slane %v8937_v63, %v18367_v44  ;;  %v9328_v30 = vrot.slane %v9323_v11, %v18367_v44 }
0x1b15   :  { %9478 = vmatprep.subr.bf16.mxu1 %v16983_v48  ;;  %15783 = vmatprep.subr.bf16.mxu0 %v19734_v59  ;;  %v8946_v48 = vrot.slane %v8937_v63, %v18370_v46 }
0x1b18   :  { %9479 = vmatpush1.bf16.msra.mxu1 %v16981_v36  ;;  %15784 = vmatpush3.bf16.msra.mxu0 %v16984_v27  ;;  %v9332_v36 = vrot.slane %v9323_v11, %v18370_v46  ;;  %v15963_v27 = vadd.f32 %v9328_v30, %v8942_v41 }
0x1b19   :  { %9480 = vmatprep.subr.bf16.mxu1 %v16987_v62  ;;  %15785 = vmatprep.subr.bf16.mxu0 %v19734_v59 }
0x1b1c   :  { %9481 = vmatpush1.bf16.msra.mxu1 %v16985_v22  ;;  %15786 = vmatpush3.bf16.msra.mxu0 %v16988_v12  ;;  %v15965_v22 = vadd.f32 %v9332_v36, %v8946_v48 }
0x1b1d   :  { %9482 = vmatprep.subr.bf16.mxu1 %v16991_v15  ;;  %15787 = vmatprep.subr.bf16.mxu0 %v19734_v59  ;;  %v17002_v59 = vld [vmem:[#allocation27 + $0x30] ss:$8 sps:$4 sm:$0xff]  }
0x1b20   :  { %9483 = vmatpush1.bf16.msra.mxu1 %v16989_v33  ;;  %15788 = vmatpush3.bf16.msra.mxu0 %v16992_v39 }
0x1b21   :  { %9871 = vmatprep.subr.bf16.mxu0 %v16995_v50 }
0x1b23   :  { %9501 = vmatmul.mubr.bf16.vlgmr.msra.gmra.mrb[4].mxu1 %v19287_v49  ;;  %15790 = vmatmul.mubr.bf16.vlgmr.msra.gmra.mrb[4].mxu0 %v19287_v49  ;;  %v17008_v49 = vld [vmem:[#allocation27 + $0x50] ss:$8 sps:$4 sm:$0xff]  }
0x1b24   :  { %9903 = vmatprep.mubr.bf16.mxu0 %v19373_v14  ;;  %9872 = vmatpush1.bf16.msra.mxu0 %v16993_v52  ;;  %v17032_v14 = vld [vmem:[#allocation27 + $0xd0] ss:$8 sps:$4 sm:$0xff]  }
0x1b25   :  { %9873 = vmatprep.subr.bf16.mxu0 %v16998_v40 }
0x1b28   :  { %9874 = vmatpush1.bf16.msra.mxu0 %v16996_v7 }
0x1b29   :  { %9875 = vmatprep.subr.bf16.mxu0 %v17001_v9 }
0x1b2c   :  { %9876 = vmatpush1.bf16.msra.mxu0 %v16999_v57 }
0x1b2d   :  { %9877 = vmatprep.subr.bf16.mxu0 %v17004_v58 }
0x1b30   :  { %9878 = vmatpush1.bf16.msra.mxu0 %v17002_v59 }
0x1b31   :  { %9879 = vmatprep.subr.bf16.mxu0 %v17007_v37 }
0x1b34   :  { %9880 = vmatpush1.bf16.msra.mxu0 %v17005_v6  ;;  %v9336_v6 = vrot.slane %v9323_v11, %v18377_v13  ;;  %v9619_v11 = vld [vmem:[%s19693_s23] sm:$0x3] }
0x1b35   :  { %9881 = vmatprep.subr.bf16.mxu0 %v17010_v21  ;;  %v9624_v41 = vrot.slane %v9619_v11, %v18367_v44  ;;  %v9628_v30 = vrot.slane %v9619_v11, %v18370_v46 }
0x1b38   :  { %9882 = vmatpush1.bf16.msra.mxu0 %v17008_v49  ;;  %v8950_v49 = vrot.slane %v8937_v63, %v18377_v13  ;;  %v17062_v63 = vld [vmem:[#allocation27 + $0x170] ss:$8 sps:$4 sm:$0xff]  }
0x1b39   :  { %9883 = vmatprep.subr.bf16.mxu0 %v17013_v45 }
0x1b3c   :  { %9884 = vmatpush1.bf16.msra.mxu0 %v17011_v32 }
0x1b3d   :  { %9885 = vmatprep.subr.bf16.mxu0 %v17016_v4 }
0x1b40   :  { %9886 = vmatpush1.bf16.msra.mxu0 %v17014_v19 }
0x1b41   :  { %9887 = vmatprep.subr.bf16.mxu0 %v17019_v47 }
0x1b44   :  { %9888 = vmatpush1.bf16.msra.mxu0 %v17017_v28 }
0x1b45   :  { %9889 = vmatprep.subr.bf16.mxu0 %v17022_v26 }
0x1b48   :  { %9890 = vmatpush1.bf16.msra.mxu0 %v17020_v18 }
0x1b49   :  { %9891 = vmatprep.subr.bf16.mxu0 %v17025_v61 }
0x1b4c   :  { %9892 = vmatpush1.bf16.msra.mxu0 %v17023_v42 }
0x1b4d   :  { %9893 = vmatprep.subr.bf16.mxu0 %v17028_v53 }
0x1b50   :  { %9894 = vmatpush1.bf16.msra.mxu0 %v17026_v51 }
0x1b51   :  { %9895 = vmatprep.subr.bf16.mxu0 %v17031_v8  ;;  %v17041_v8 = vld [vmem:[#allocation27 + $0x100] ss:$8 sps:$4 sm:$0xff]  }
0x1b54   :  { %9896 = vmatpush1.bf16.msra.mxu0 %v17029_v5 }
0x1b55   :  { %9897 = vmatprep.subr.bf16.mxu0 %v17034_v43  ;;  %v17046_v43 = vld [vmem:[#allocation27 + $0x114] ss:$8 sps:$4 sm:$0xff]  }
0x1b58   :  { %9898 = vmatpush1.bf16.msra.mxu0 %v17032_v14  ;;  %v17044_v14 = vld [vmem:[#allocation27 + $0x110] ss:$8 sps:$4 sm:$0xff]  }
0x1b59   :  { %9899 = vmatprep.subr.bf16.mxu0 %v17037_v29  ;;  %v17049_v29 = vld [vmem:[#allocation27 + $0x124] ss:$8 sps:$4 sm:$0xff]  }
0x1b5c   :  { %9900 = vmatpush1.bf16.msra.mxu0 %v17035_v31  ;;  %v17047_v31 = vld [vmem:[#allocation27 + $0x120] ss:$8 sps:$4 sm:$0xff]  }
0x1b5d   :  { %9901 = vmatprep.subr.bf16.mxu0 %v17040_v0  ;;  %v17050_v0 = vld [vmem:[#allocation27 + $0x130] ss:$8 sps:$4 sm:$0xff]  }
0x1b60   :  { %9902 = vmatpush1.bf16.msra.mxu0 %v17038_v60  ;;  %v17055_v60 = vld [vmem:[#allocation27 + $0x144] ss:$8 sps:$4 sm:$0xff]  }
0x1b61   :  { %9912 = vmatprep.subr.bf16.mxu0 %v17043_v25  ;;  %v17053_v25 = vld [vmem:[#allocation27 + $0x140] ss:$8 sps:$4 sm:$0xff]  }
0x1bd6   :  { %v15144_v20 = vpop.f32.mrb[0].mxu0 }
0x1bd7   :  { %v15145_v34 = vpop.f32.mrb[1].mxu0 }
0x1bd8   :  { %v15146_v24 = vadd.f32 %v15145_v34, %v15144_v20  ;;  %v15147_v17 = vpop.f32.mrb[2].mxu0  ;;  %v17058_v20 = vld [vmem:[#allocation27 + $0x154] ss:$8 sps:$4 sm:$0xff]   ;;  %v17056_v34 = vld [vmem:[#allocation27 + $0x150] ss:$8 sps:$4 sm:$0xff]  }
0x1bd9   :  { %v15148_v1 = vpop.f32.mrb[3].mxu0  ;;  %v17059_v17 = vld [vmem:[#allocation27 + $0x160] ss:$8 sps:$4 sm:$0xff]  }
0x1bda   :  { %v9286_v19 = vadd.f32 %v15146_v24, %v8950_v49  ;;  %v17061_v24 = vld [vmem:[#allocation27 + $0x164] ss:$8 sps:$4 sm:$0xff]   ;;  %v17064_v1 = vld [vmem:[#allocation27 + $0x174] ss:$8 sps:$4 sm:$0xff]  }
0x1bdb   :  { %v17102_v49 = vld [vmem:[#allocation12 + $0x18] sm:$0xff] (!%p14486_p6)  }
0x1bf6   :  { %v9502_v62 = vpop.f32.mrb[4].mxu1  ;;  %v9543_v12 = vpop.f32.mrb[4].mxu0 }
0x1bf7   :  { %v15964_v15 = vadd.f32 %v15963_v27, %v9502_v62  ;;  %v9504_v33 = vpop.f32.mrb[5].mxu1  ;;  %v15791_v39 = vpop.f32.mrb[5].mxu0  ;;  %v9544_v32 = vadd.f32 %v9543_v12, %v9336_v6  ;;  %v17100_v6 = vld [vmem:[#allocation12 + $0x10] sm:$0xff] (!%p14486_p6)  }
0x1bf8   :  { %v9506_v50 = vpop.f32.mrb[6].mxu1  ;;  %v9546_v52 = vpop.f32.mrb[6].mxu0  ;;  %v15966_v9 = vadd.f32 %v15965_v22, %v9504_v33 }
0x1bf9   :  { %v14435_v40 = vmul.f32 -1.442695, %v15964_v15  ;;  %v9507_v7 = vpop.f32.mrb[7].mxu1  ;;  %v15792_v57 = vpop.f32.mrb[7].mxu0  ;;  %v9961_v15 = vadd.s32 (!%p14486_p6), 128, %v19074_v35 }
0x1bfa   :  { %v14436_v58 = vmul.f32 -1.442695, %v15966_v9  ;;  %v17095_v57 = vld [vmem:[#allocation12 + $0x40] sm:$0xff] (!%p14486_p6)  }
0x1bfb   :  { %17085 = vpow2.f32 %v14435_v40  ;;  %v17096_v9 = vld [vmem:[#allocation12] sm:$0xff] (!%p14486_p6)  }
0x1bfc   :  { %17087 = vpow2.f32 %v14436_v58  ;;  %v17097_v58 = vld [vmem:[#allocation12 + $0x48] sm:$0xff] (!%p14486_p6)  }
0x1c05   :  { %v17086_v59 = vpop.eup %17085 }
0x1c06   :  { %v9553_v37 = vadd.f32 1.0, %v17086_v59  ;;  %v17088_v21 = vpop.eup %17087  ;;  %v17098_v59 = vld [vmem:[#allocation12 + $0x8] sm:$0xff] (!%p14486_p6)  }
0x1c07   :  { %v9560_v45 = vadd.f32 1.0, %v17088_v21  ;;  %v17101_v21 = vld [vmem:[#allocation12 + $0x58] sm:$0xff] (!%p14486_p6)  }
0x1c08   :  { %17089 = vrcp.f32 %v9553_v37  ;;  %v17099_v37 = vld [vmem:[#allocation12 + $0x50] sm:$0xff] (!%p14486_p6)  }
0x1c09   :  { %17091 = vrcp.f32 %v9560_v45  ;;  %v17103_v45 = vld [vmem:[#allocation12 + $0x60] sm:$0xff] (!%p14486_p6)  }
0x1c12   :  { %v17090_v4 = vpop.eup %17089 }
0x1c13   :  { %v9563_v47 = vmul.f32 %v17090_v4, %v9544_v32  ;;  %v17092_v26 = vpop.eup %17091  ;;  %v17104_v32 = vld [vmem:[#allocation12 + $0x20] sm:$0xff] (!%p14486_p6)   ;;  %v17105_v4 = vld [vmem:[#allocation12 + $0x68] sm:$0xff] (!%p14486_p6)  }
0x1c14   :  { %v9566_v18 = vsub.f32 1.0, %v17092_v26  ;;  %v9568_v51 = vmul.f32 %v17092_v26, %v19283_v56  ;;  %v17052_v56 = vld [vmem:[#allocation27 + $0x134] ss:$8 sps:$4 sm:$0xff]  }
0x1c15   :  { %v9564_v28 = vadd.f32 %v9563_v47, %v9286_v19  ;;  %v17106_v19 = vld [vmem:[#allocation12 + $0x28] sm:$0xff] (!%p14486_p6)   ;;  %v17107_v47 = vld [vmem:[#allocation12 + $0x70] sm:$0xff] (!%p14486_p6)  }
0x1c17   :  { %17093 = vtanh.f32 %v9564_v28 }
0x1c21   :  { %v17094_v61 = vpop.eup %17093 }
0x1c22   :  { %v9567_v42 = vmul.f32 %v17094_v61, %v9566_v18 }
0x1c24   :  { %v19405_v53 = vadd.f32 %v9568_v51, %v9567_v42  ;;  %v17108_v42 = vld [vmem:[#allocation12 + $0x30] sm:$0xff] (!%p14486_p6)   ;;  %v17109_v51 = vld [vmem:[#allocation12 + $0x78] sm:$0xff] (!%p14486_p6)  }
0x1c26   :  { %v19409_v5 = vpack.c.bf16 %v19405_v53, %v19405_v53 }
0x1c28   :  { %9904 = vmatmul.mubr.bf16.vlgmr.msra.gmra.mrb[8].mxu0 %v19409_v5 }
0x1c29   :  { %9913 = vmatpush1.bf16.msra.mxu0 %v17041_v8  ;;  %9944 = vmatprep.mubr.bf16.mxu0 %v17893_v2  ;;  %v17110_v8 = vld [vmem:[#allocation12 + $0x38] sm:$0xff] (!%p14486_p6)  }
0x1c2a   :  { %9914 = vmatprep.subr.bf16.mxu0 %v17046_v43 }
0x1c2d   :  { %9915 = vmatpush1.bf16.msra.mxu0 %v17044_v14 }
0x1c2e   :  { %9916 = vmatprep.subr.bf16.mxu0 %v17049_v29 }
0x1c31   :  { %9917 = vmatpush1.bf16.msra.mxu0 %v17047_v31 }
0x1c32   :  { %9918 = vmatprep.subr.bf16.mxu0 %v17052_v56 }
0x1c35   :  { %9919 = vmatpush1.bf16.msra.mxu0 %v17050_v0  ;;  %v17897_v0 = vmov (!%p14486_p6), 1.0|1.0  }
0x1c36   :  { %9920 = vmatprep.subr.bf16.mxu0 %v17055_v60 }
0x1c39   :  { %9921 = vmatpush1.bf16.msra.mxu0 %v17053_v25 }
0x1c3a   :  { %9922 = vmatprep.subr.bf16.mxu0 %v17058_v20 }
0x1c3d   :  { %9923 = vmatpush1.bf16.msra.mxu0 %v17056_v34 }
0x1c3e   :  { %9924 = vmatprep.subr.bf16.mxu0 %v17061_v24 }
0x1c41   :  { %9925 = vmatpush1.bf16.msra.mxu0 %v17059_v17 }
0x1c42   :  { %9926 = vmatprep.subr.bf16.mxu0 %v17064_v1 }
0x1c45   :  { %9927 = vmatpush1.bf16.msra.mxu0 %v17062_v63 }
0x1c46   :  { %15159 = vmatprep.subr.bf16.mxu0 (!%p14486_p6), %v17095_v57 }
0x1c48   :  { %9945 = vmatmul.mubr.bf16.vlgmr.msra.gmra.mrb[8].mxu0 %v19333_v38 }
0x1c49   :  { %15160 = vmatpush3.bf16.msra.mxu0 (!%p14486_p6), %v17096_v9 }
0x1c4a   :  { %15161 = vmatprep.subr.bf16.mxu0 (!%p14486_p6), %v17097_v58 }
0x1c4d   :  { %15162 = vmatpush3.bf16.msra.mxu0 (!%p14486_p6), %v17098_v59 }
0x1c4e   :  { %15163 = vmatprep.subr.bf16.mxu0 (!%p14486_p6), %v17099_v37 }
0x1c51   :  { %15164 = vmatpush3.bf16.msra.mxu0 (!%p14486_p6), %v17100_v6 }
0x1c52   :  { %15165 = vmatprep.subr.bf16.mxu0 (!%p14486_p6), %v17101_v21 }
0x1c55   :  { %15166 = vmatpush3.bf16.msra.mxu0 (!%p14486_p6), %v17102_v49 }
0x1c56   :  { %15167 = vmatprep.subr.bf16.mxu0 (!%p14486_p6), %v17103_v45 }
0x1c59   :  { %15168 = vmatpush3.bf16.msra.mxu0 (!%p14486_p6), %v17104_v32 }
0x1c5a   :  { %15169 = vmatprep.subr.bf16.mxu0 (!%p14486_p6), %v17105_v4 }
0x1c5d   :  { %15170 = vmatpush3.bf16.msra.mxu0 (!%p14486_p6), %v17106_v19 }
0x1c5e   :  { %15171 = vmatprep.subr.bf16.mxu0 (!%p14486_p6), %v17107_v47 }
0x1c61   :  { %15172 = vmatpush3.bf16.msra.mxu0 (!%p14486_p6), %v17108_v42 }
0x1c62   :  { %15173 = vmatprep.subr.bf16.mxu0 (!%p14486_p6), %v17109_v51 }
0x1c65   :  { %15174 = vmatpush3.bf16.msra.mxu0 (!%p14486_p6), %v17110_v8 }
0x1d19   :  { %9960 = sbr.rel (%p14486_p6) target bundleno = 8116 (0x1fb4), region = 153 }
0x1d1b   :  { %v9946_v48 = vpop.f32.mrb[8].mxu0 }
0x1d1c   :  { %v15967_v36 = vadd.f32 %v9946_v48, %v9624_v41  ;;  %v9948_v27 = vpop.f32.mrb[9].mxu0 }
0x1d1d   :  { %v15968_v62 = vadd.f32 %v9948_v27, %v9628_v30  ;;  %v9950_v22 = vpop.f32.mrb[10].mxu0 }
0x1d1e   :  { %9954 = vst [vmem:[#allocation29 + $0x20] sm:$0xff] %v15967_v36  ;;  %v9951_v12 = vpop.f32.mrb[11].mxu0 }
0x1d1f   :  { %9955 = vst [vmem:[#allocation29 + $0x28] sm:$0xff] %v15968_v62  ;;  %v9962_v38 = vmax.f32 (!%p14486_p6), %v15967_v36, %v15968_v62 }
0x1d21   :  { %9963 = vmax.xlane.f32.xlu0 %v9962_v38 }
0x1dae   :  { %v9964_v33 = vpop.xlane.xlu0 %9963 }
0x1daf   :  { %vm9965_vm14 = vcmp.eq.f32.partialorder %v15967_v36, %v9964_v33  ;;  %vm9966_vm15 = vcmp.eq.f32.partialorder %v15968_v62, %v9964_v33 }
0x1db0   :  { %v9967_v39 = vsel %vm9965_vm14, %v19074_v35, 256  ;;  %v9968_v50 = vsel %vm9966_vm15, %v9961_v15, 256 }
0x1db1   :  { %vm9969_vm9 = vcmp.lt.s32.totalorder %v9967_v39, %v9968_v50 }
0x1db2   :  { %v9970_v52 = vsel %vm9969_vm9, %v9967_v39, %v9968_v50 }
0x1db3   :  { %v9972_v40 = vshra.s32 %v9970_v52, 16  ;;  %v9971_v28 = vand.u32 65535, %v9970_v52 }
0x1db5   :  { %v9974_v7 = vcvt.s32.f32 %v9972_v40  ;;  %v9973_v18 = vcvt.s32.f32 %v9971_v28 }
0x1db7   :  { %9975 = vmin.xlane.f32.xlu0 %v9974_v7 }
0x1e44   :  { %v9976_v26 = vpop.xlane.xlu0 %9975 }
0x1e45   :  { %vm9977_vm10 = vcmp.eq.f32.partialorder %v9974_v7, %v9976_v26  ;;  %v9982_v43 = vcvt.f32.s32 %v9976_v26 }
0x1e46   :  { %v9978_v61 = vsel %vm9977_vm10, %v9973_v18, inf }
0x1e47   :  { %9979 = vmin.xlane.f32.xlu1 %v9978_v61  ;;  %v9983_v29 = vshll.u32 %v9982_v43, 16 }
0x1ed4   :  { %v9980_v14 = vpop.xlane.xlu1 %9979 }
0x1ed5   :  { %v9981_v31 = vcvt.f32.s32 %v9980_v14 }
0x1ed7   :  { %v9984_v56 = vadd.s32 %v9983_v29, %v9981_v31 }
0x1ed9   :  { %vm9986_vm11 = vcmp.eq.s32.totalorder %v9961_v15, %v9984_v56  ;;  %vm9985_vm12 = vcmp.eq.s32.totalorder %v19074_v35, %v9984_v56 }
0x1eda   :  { %vm14505_vm13 = vmpackc.low %vm9986_vm11, %vm9986_vm11 }
0x1edb   :  { %14506 = vmatprep.mubr.msk.bf16.mxu0 %vm14505_vm13, %v17897_v0  ;;  %vm14507_vm14 = vmpackc.low %vm9985_vm12, %vm9985_vm12 }
0x1edc   :  { %14508 = vmatmul.mubr.msk.bf16.vlgmr.msra.gmra.mrb[0].mxu0 %vm14507_vm14, %v17897_v0 }
0x1faf   :  { %v15175_v60 = vpop.f32.mrb[0].mxu0 }
0x1fb0   :  { %v15176_v25 = vpop.f32.mrb[1].mxu0 }
0x1fb1   :  { %v15177_v20 = vadd.f32 %v15176_v25, %v15175_v60  ;;  %v15178_v34 = vpop.f32.mrb[2].mxu0 }
0x1fb2   :  { %v15179_v24 = vpop.f32.mrb[3].mxu0 }
0x1fb3   :  { %10161 = vst [vmem:[#allocation5] sm:$0xff] %v15177_v20 }
0x1fb4 PF:  { %v19738_v17 = vmov 0.0   ;;  %v17113_v1 = vld [vmem:[#allocation23] sm:$0xff]   ;;  %17111 = vset.pattern.permute.xlu1 %v17893_v2  ;;  %17112 = vset.pattern.permute.xlu0 %v17893_v2  ;;  %v17114_v63 = vld [vmem:[#allocation23 + $0x8] sm:$0xff]   ;;  %v17115_v11 = vld [vmem:[#allocation23 + $0x10] sm:$0xff]   ;;  %s14509_s26 = sld [smem:[#allocation7 + $0x3]]  ;;  %s19739_s3 = sld [smem:[#allocation43_spill]] }
0x1fb5   :  { %15793 = vmatprep.subr.bf16.mxu1 %v19738_v17  ;;  %15809 = vmatprep.mubr.msk.bf16.mxu1 %vm17894_vm0, %v19738_v17  ;;  %v19429_v41 = vld [vmem:[#allocation4] sm:$0xff]  ;;  %v17116_v30 = vld [vmem:[#allocation23 + $0x18] sm:$0xff]   ;;  %v17119_v52 = vld [vmem:[#allocation23 + $0x30] sm:$0xff]   ;;  %s19740_s0 = sld [smem:[#allocation42_spill]]  ;;  %s19741_s18 = sld [smem:[#allocation48_spill]] }
0x1fb6   :  { %15794 = vmatpush3.bf16.msra.mxu1 %v17113_v1  ;;  %v10298_v48 = vrot.slane %v19429_v41, %v18377_v13  ;;  %v10284_v36 = vrot.slane %v19429_v41, %v18367_v44  ;;  %v10305_v27 = vrot.slane %v19429_v41, %v18959_v16  ;;  %v17117_v62 = vld [vmem:[#allocation23 + $0x20] sm:$0xff]   ;;  %v10291_v22 = vrot.slane %v19429_v41, %v18370_v46  ;;  %v17118_v38 = vld [vmem:[#allocation23 + $0x28] sm:$0xff]   ;;  %v17120_v59 = vld [vmem:[#allocation23 + $0x38] sm:$0xff]   ;;  %s14644_s9 = sld [smem:[#allocation7 + $0x4]] }
0x1fb7   :  { %15795 = vmatprep.subr.bf16.mxu1 %v19738_v17  ;;  %v10319_v12 = vrot.slane %v19429_v41, %v19023_v3  ;;  %v10312_v33 = vrot.slane %v19429_v41, %v19015_v10  ;;  %v10333_v50 = vrot.slane %v19429_v41, %v19030_v54  ;;  %v10326_v7 = vrot.slane %v19429_v41, %v19020_v23  ;;  %v14519_v4 = vld [vmem:[%s19685_s14] ss:$0 sm:$0xff]  ;;  %v10353_v47 = vld [vmem:[#allocation3 + $0x8] sm:$0xff]  ;;  %v10354_v18 = vld [vmem:[#allocation3 + $0x10] sm:$0xff] }
0x1fb8   :  { %10300 = vbcast.lane.b32.xlu1 %v10298_v48, 256  ;;  %10286 = vbcast.lane.b32.xlu0 %v10284_v36, 256  ;;  %v10352_v28 = vld [vmem:[#allocation3] sm:$0xff]  ;;  %v10358_v29 = vld [vmem:[#allocation3 + $0x30] sm:$0xff]  ;;  %v10355_v20 = vld [vmem:[#allocation3 + $0x18] sm:$0xff] }
0x1fb9   :  { %v10356_v26 = vld [vmem:[#allocation3 + $0x20] sm:$0xff] }
0x1fba   :  { %15796 = vmatpush3.bf16.msra.mxu1 %v17114_v63  ;;  %p10163_p7 = scmp.gt.s32.totalorder %s14509_s26, 0  ;;  %v14510_v15 = vld [vmem:[%s19739_s3 + $0x18] sm:$0xff]  ;;  %v10171_v39 = vld [vmem:[#allocation5] sm:$0xff] }
0x1fbb   :  { %15797 = vmatprep.subr.bf16.mxu1 %v19738_v17 }
0x1fbc   :  { %10307 = vbcast.lane.b32.xlu1 %v10305_v27, 256  ;;  %s10164_s17 = scalar_select %p10163_p7, 1, 0  ;;  %10293 = vbcast.lane.b32.xlu0 %v10291_v22, 256 }
0x1fbd   :  { %p14645_p8 = scmp.ne.s32.totalorder %s14644_s9, 0 }
0x1fbe   :  { %15798 = vmatpush3.bf16.msra.mxu1 %v17115_v11  ;;  %s10165_s1 = scvt.s32.f32 %s10164_s17 }
0x1fbf   :  { %15799 = vmatprep.subr.bf16.mxu1 %v19738_v17 }
0x1fc0   :  { %10321 = vbcast.lane.b32.xlu1 %v10319_v12, 256  ;;  %v10168_v40 = vstv %s10165_s1  ;;  %s10170_s2 = ssub.f32 1.0, %s10165_s1  ;;  %10314 = vbcast.lane.b32.xlu0 %v10312_v33, 256  ;;  %v10357_v12 = vld [vmem:[#allocation3 + $0x28] sm:$0xff] }
0x1fc1   :  { %v10169_v57 = vmul.f32 %v14510_v15, %v10168_v40 }
0x1fc2   :  { %15800 = vmatpush3.bf16.msra.mxu1 %v17116_v30  ;;  %v10172_v9 = vstv %s10170_s2 }
0x1fc3   :  { %15801 = vmatprep.subr.bf16.mxu1 %v19738_v17  ;;  %v10173_v58 = vmul.f32 %v10172_v9, %v10171_v39  ;;  %v14520_v9 = vld [vmem:[%s19687_s16] ss:$0 sm:$0xff] }
0x1fc4   :  { %10335 = vbcast.lane.b32.xlu1 %v10333_v50, 256  ;;  %10328 = vbcast.lane.b32.xlu0 %v10326_v7, 256 }
0x1fc5   :  { %v10174_v37 = vadd.f32 %v10173_v58, %v10169_v57 }
0x1fc6   :  { %15802 = vmatpush3.bf16.msra.mxu1 %v17117_v62 }
0x1fc7   :  { %15803 = vmatprep.subr.bf16.mxu1 %v19738_v17  ;;  %v19455_v6 = vpack.c.bf16 %v10174_v37, %v10174_v37 }
0x1fca   :  { %15804 = vmatpush3.bf16.msra.mxu1 %v17118_v38 }
0x1fcb   :  { %15805 = vmatprep.subr.bf16.mxu1 %v19738_v17 }
0x1fce   :  { %15806 = vmatpush3.bf16.msra.mxu1 %v17119_v52  ;;  %v10359_v52 = vld [vmem:[#allocation3 + $0x38] sm:$0xff] }
0x1fcf   :  { %15807 = vmatprep.subr.bf16.mxu1 %v19738_v17 }
0x1fd2   :  { %15808 = vmatpush3.bf16.msra.mxu1 %v17120_v59 }
0x1fd5   :  { %15810 = vmatmul.mubr.bf16.vlgmr.msra.gmra.mrb[0].mxu1 %v19455_v6 }
0x202a   :  { %v10287_v21 = vpop.permute.xlu0 %10286  ;;  %v10301_v45 = vpop.permute.xlu1 %10300 }
0x202b   :  { %v10346_v8 = vmul.f32 %v14519_v4, %v10301_v45  ;;  %v10344_v43 = vmul.f32 %v14519_v4, %v10287_v21 }
0x202e   :  { %v10294_v49 = vpop.permute.xlu0 %10293  ;;  %v10308_v19 = vpop.permute.xlu1 %10307 }
0x202f   :  { %v10345_v61 = vmul.f32 %v14519_v4, %v10294_v49  ;;  %v10347_v27 = vmul.f32 %v14519_v4, %v10308_v19 }
0x2032   :  { %v10315_v32 = vpop.permute.xlu0 %10314  ;;  %v10322_v1 = vpop.permute.xlu1 %10321 }
0x2033   :  { %v10348_v42 = vmul.f32 %v14519_v4, %v10315_v32  ;;  %v10349_v15 = vmul.f32 %v14519_v4, %v10322_v1  ;;  %v17154_v1 = vld [vmem:[#allocation24 + $0x20] ss:$12 sps:$4 sm:$0xff]  }
0x2036   :  { %v10329_v51 = vpop.permute.xlu0 %10328  ;;  %v10336_v50 = vpop.permute.xlu1 %10335 }
0x2037   :  { %v10350_v34 = vmul.f32 %v14519_v4, %v10329_v51  ;;  %v10351_v40 = vmul.f32 %v14519_v4, %v10336_v50  ;;  %v17152_v50 = vld [vmem:[#allocation24 + $0xdc] ss:$12 sps:$4 sm:$0xff]  }
0x20a8   :  { %v10275_v14 = vpop.f32.mrb[0].mxu1 }
0x20a9   :  { %v15811_v31 = vpop.f32.mrb[1].mxu1  ;;  %v10361_v56 = vadd.f32 %v10353_v47, %v10275_v14  ;;  %v10360_v0 = vadd.f32 %v10352_v28, %v10275_v14  ;;  %v10364_v60 = vadd.f32 %v10356_v26, %v10275_v14  ;;  %v10362_v25 = vadd.f32 %v10354_v18, %v10275_v14 }
0x20aa   :  { %v10278_v24 = vpop.f32.mrb[2].mxu1  ;;  %v10366_v36 = vadd.f32 %v10358_v29, %v10275_v14  ;;  %v10363_v22 = vadd.f32 %v10355_v20, %v10275_v14  ;;  %v10365_v39 = vadd.f32 %v10357_v12, %v10275_v14  ;;  %v10367_v57 = vadd.f32 %v10359_v52, %v10275_v14  ;;  %v17121_v14 = vld [vmem:[#allocation24] ss:$12 sps:$4 sm:$0xff]   ;;  %v17123_v29 = vld [vmem:[#allocation24 + $0x4] ss:$12 sps:$4 sm:$0xff]  }
0x20ab   :  { %v15812_v63 = vpop.f32.mrb[3].mxu1  ;;  %v10369_v11 = vadd.f32 %v10361_v56, %v10345_v61  ;;  %v10368_v30 = vadd.f32 %v10360_v0, %v10344_v43  ;;  %v10372_v48 = vadd.f32 %v10364_v60, %v10348_v42  ;;  %v10370_v62 = vadd.f32 %v10362_v25, %v10346_v8  ;;  %v14521_v43 = vld [vmem:[#allocation8] ss:$0 sm:$0xff]  ;;  %v17126_v31 = vld [vmem:[#allocation24 + $0x1c] ss:$12 sps:$4 sm:$0xff]   ;;  %10922 = vmatprep.subr.bf16.mxu1 %v17123_v29 }
0x20ac   :  { %v10374_v38 = vadd.f32 %v10366_v36, %v10350_v34  ;;  %v10371_v33 = vadd.f32 %v10363_v22, %v10347_v27  ;;  %v10373_v7 = vadd.f32 %v10365_v39, %v10349_v15  ;;  %v10375_v21 = vadd.f32 %v10367_v57, %v10351_v40  ;;  %10923 = vmatpush1.bf16.msra.mxu1 %v17121_v14  ;;  %v17124_v56 = vld [vmem:[#allocation24 + $0x18] ss:$12 sps:$4 sm:$0xff]   ;;  %v17129_v0 = vld [vmem:[#allocation24 + $0x34] ss:$12 sps:$4 sm:$0xff]   ;;  %v17127_v20 = vld [vmem:[#allocation24 + $0x30] ss:$12 sps:$4 sm:$0xff]  }
0x20ad   :  { %17289 = vtanh.f32 %v10369_v11  ;;  %10924 = vmatprep.subr.bf16.mxu1 %v17126_v31  ;;  %v17148_v60 = vld [vmem:[#allocation24 + $0xc8] ss:$12 sps:$4 sm:$0xff]   ;;  %v17153_v34 = vld [vmem:[#allocation24 + $0xe0] ss:$12 sps:$4 sm:$0xff]   ;;  %v17158_v63 = vld [vmem:[#allocation24 + $0xf8] ss:$12 sps:$4 sm:$0xff]  }
0x20ae   :  { %17291 = vtanh.f32 %v10368_v30  ;;  %v17149_v25 = vld [vmem:[#allocation24 + $0x8] ss:$12 sps:$4 sm:$0xff]   ;;  %v17132_v24 = vld [vmem:[#allocation24 + $0x4c] ss:$12 sps:$4 sm:$0xff]   ;;  %15190 = vmatprep.subr.bf16.mxu0 %v17148_v60  ;;  %v17135_v30 = vld [vmem:[#allocation24 + $0x64] ss:$12 sps:$4 sm:$0xff]  }
0x20af   :  { %17293 = vtanh.f32 %v10372_v48  ;;  %15191 = vmatpush3.bf16.msra.mxu0 %v17149_v25  ;;  %v17130_v11 = vld [vmem:[#allocation24 + $0x48] ss:$12 sps:$4 sm:$0xff]   ;;  %v17159_v48 = vld [vmem:[#allocation24 + $0x38] ss:$12 sps:$4 sm:$0xff]   ;;  %v17133_v36 = vld [vmem:[#allocation24 + $0x60] ss:$12 sps:$4 sm:$0xff]  }
0x20b0   :  { %17295 = vtanh.f32 %v10370_v62  ;;  %10925 = vmatpush1.bf16.msra.mxu1 %v17124_v56  ;;  %15192 = vmatprep.subr.bf16.mxu0 %v17153_v34  ;;  %v17138_v27 = vld [vmem:[#allocation24 + $0x7c] ss:$12 sps:$4 sm:$0xff]   ;;  %v17136_v62 = vld [vmem:[#allocation24 + $0x78] ss:$12 sps:$4 sm:$0xff]   ;;  %v17141_v22 = vld [vmem:[#allocation24 + $0x94] ss:$12 sps:$4 sm:$0xff]  }
0x20b1   :  { %17297 = vtanh.f32 %v10374_v38  ;;  %10926 = vmatprep.subr.bf16.mxu1 %v17129_v0  ;;  %v17139_v12 = vld [vmem:[#allocation24 + $0x90] ss:$12 sps:$4 sm:$0xff]   ;;  %v17144_v38 = vld [vmem:[#allocation24 + $0xac] ss:$12 sps:$4 sm:$0xff]   ;;  %v17142_v15 = vld [vmem:[#allocation24 + $0xa8] ss:$12 sps:$4 sm:$0xff]  }
0x20b2   :  { %17299 = vtanh.f32 %v10371_v33  ;;  %v17147_v33 = vld [vmem:[#allocation24 + $0xc4] ss:$12 sps:$4 sm:$0xff]   ;;  %v17145_v39 = vld [vmem:[#allocation24 + $0xc0] ss:$12 sps:$4 sm:$0xff]  }
0x20b3   :  { %17301 = vtanh.f32 %v10373_v7  ;;  %15193 = vmatpush3.bf16.msra.mxu0 %v17154_v1  ;;  %v17150_v40 = vld [vmem:[#allocation24 + $0xd8] ss:$12 sps:$4 sm:$0xff]   ;;  %v17157_v57 = vld [vmem:[#allocation24 + $0xf4] ss:$12 sps:$4 sm:$0xff]  }
0x20b4   :  { %17303 = vtanh.f32 %v10375_v21  ;;  %10927 = vmatpush1.bf16.msra.mxu1 %v17127_v20  ;;  %15194 = vmatprep.subr.bf16.mxu0 %v17158_v63  ;;  %v10433_v56 = vld [vmem:[%s19740_s0] sm:$0xff] }
0x20b5   :  { %10928 = vmatprep.subr.bf16.mxu1 %v17132_v24  ;;  %vm10434_vm15 = vcmp.gt.f32.partialorder %v10433_v56, 0.5  ;;  %v17175_v56 = vld [vmem:[#allocation24 + $0x150] ss:$12 sps:$4 sm:$0xff]  }
0x20b7   :  { %v17290_v58 = vpop.eup %17289  ;;  %15195 = vmatpush3.bf16.msra.mxu0 %v17159_v48 }
0x20b8   :  { %v17292_v59 = vpop.eup %17291  ;;  %v10392_v37 = vmul.f32 %v17290_v58, %v14520_v9  ;;  %10929 = vmatpush1.bf16.msra.mxu1 %v17130_v11  ;;  %v17155_v58 = vld [vmem:[#allocation24 + $0xf0] ss:$12 sps:$4 sm:$0xff]  }
0x20b9   :  { %v17294_v49 = vpop.eup %17293  ;;  %v10391_v45 = vmul.f32 %v17292_v59, %v14520_v9  ;;  %10930 = vmatprep.subr.bf16.mxu1 %v17135_v30 }
0x20ba   :  { %v17296_v32 = vpop.eup %17295  ;;  %10401 = vadd.xlane.f32.xlu1 %v10392_v37  ;;  %v10395_v19 = vmul.f32 %v17294_v49, %v14520_v9 }
0x20bb   :  { %10399 = vadd.xlane.f32.xlu0 %v10391_v45  ;;  %v17298_v4 = vpop.eup %17297  ;;  %v10393_v47 = vmul.f32 %v17296_v32, %v14520_v9 }
0x20bc   :  { %v17300_v28 = vpop.eup %17299  ;;  %v10397_v26 = vmul.f32 %v17298_v4, %v14520_v9  ;;  %10931 = vmatpush1.bf16.msra.mxu1 %v17133_v36 }
0x20bd   :  { %v10394_v18 = vmul.f32 %v17300_v28, %v14520_v9  ;;  %v17302_v61 = vpop.eup %17301  ;;  %10932 = vmatprep.subr.bf16.mxu1 %v17138_v27 }
0x20be   :  { %10407 = vadd.xlane.f32.xlu1 %v10395_v19  ;;  %v10396_v42 = vmul.f32 %v17302_v61, %v14520_v9  ;;  %v17304_v51 = vpop.eup %17303 }
0x20bf   :  { %10403 = vadd.xlane.f32.xlu0 %v10393_v47  ;;  %v10398_v8 = vmul.f32 %v17304_v51, %v14520_v9 }
0x20c0   :  { %10933 = vmatpush1.bf16.msra.mxu1 %v17136_v62 }
0x20c1   :  { %10934 = vmatprep.subr.bf16.mxu1 %v17141_v22 }
0x20c2   :  { %10411 = vadd.xlane.f32.xlu1 %v10397_v26 }
0x20c3   :  { %10405 = vadd.xlane.f32.xlu0 %v10394_v18 }
0x20c4   :  { %10935 = vmatpush1.bf16.msra.mxu1 %v17139_v12 }
0x20c5   :  { %10936 = vmatprep.subr.bf16.mxu1 %v17144_v38 }
0x20c7   :  { %10409 = vadd.xlane.f32.xlu0 %v10396_v42 }
0x20c8   :  { %10937 = vmatpush1.bf16.msra.mxu1 %v17142_v15 }
0x20c9   :  { %10938 = vmatprep.subr.bf16.mxu1 %v17147_v33 }
0x20cb   :  { %10413 = vadd.xlane.f32.xlu0 %v10398_v8 }
0x20cc   :  { %10939 = vmatpush1.bf16.msra.mxu1 %v17145_v39 }
0x20cd   :  { %10940 = vmatprep.subr.bf16.mxu1 %v17152_v50 }
0x20d0   :  { %10941 = vmatpush1.bf16.msra.mxu1 %v17150_v40 }
0x20d1   :  { %10942 = vmatprep.subr.bf16.mxu1 %v17157_v57 }
0x20d3   :  { %10422 = vperm.xlu1 %17111, %v14521_v43  }
0x20d4   :  { %10943 = vmatpush1.bf16.msra.mxu1 %v17155_v58 }
0x2147   :  { %v10402_v52 = vpop.xlane.xlu1 %10401 }
0x2148   :  { %v10400_v7 = vpop.xlane.xlu0 %10399 }
0x214b   :  { %v10408_v9 = vpop.xlane.xlu1 %10407 }
0x214c   :  { %v10404_v59 = vpop.xlane.xlu0 %10403 }
0x214f   :  { %v10412_v37 = vpop.xlane.xlu1 %10411 }
0x2150   :  { %v10406_v21 = vpop.xlane.xlu0 %10405 }
0x2153   :  { %v10423_v49 = vpop.permute.xlu1 %10422 }
0x2154   :  { %v10425_v45 = vadd.f32 %v10423_v49, %v10400_v7  ;;  %v10426_v32 = vadd.f32 %v10423_v49, %v10402_v52  ;;  %v10427_v19 = vadd.f32 %v10423_v49, %v10404_v59  ;;  %v10428_v4 = vadd.f32 %v10423_v49, %v10406_v21  ;;  %v10410_v47 = vpop.xlane.xlu0 %10409  ;;  %v17160_v59 = vld [vmem:[#allocation24 + $0x108] ss:$12 sps:$4 sm:$0xff]   ;;  %v17163_v21 = vld [vmem:[#allocation24 + $0x110] ss:$12 sps:$4 sm:$0xff]  }
0x2155   :  { %v10429_v28 = vadd.f32 %v10423_v49, %v10408_v9  ;;  %v10430_v42 = vadd.f32 %v10423_v49, %v10410_v47  ;;  %v10431_v51 = vadd.f32 %v10423_v49, %v10412_v37  ;;  %v17162_v37 = vld [vmem:[#allocation24 + $0x10c] ss:$12 sps:$4 sm:$0xff]   ;;  %15196 = vmatprep.subr.bf16.mxu0 %v17163_v21 }
0x2156   :  { %v10446_v26 = vrot.slane %v10425_v45, %v19078_v55  ;;  %v10450_v18 = vrot.slane %v10426_v32, %v19078_v55  ;;  %v10454_v61 = vrot.slane %v10427_v19, %v19078_v55  ;;  %v10458_v8 = vrot.slane %v10428_v4, %v19078_v55  ;;  %10944 = vmatprep.subr.bf16.mxu1 %v17162_v37  ;;  %v17165_v32 = vld [vmem:[#allocation24 + $0x120] ss:$12 sps:$4 sm:$0xff]   ;;  %v17167_v19 = vld [vmem:[#allocation24 + $0x124] ss:$12 sps:$4 sm:$0xff]   ;;  %v17168_v4 = vld [vmem:[#allocation24 + $0x128] ss:$12 sps:$4 sm:$0xff]  }
0x2157   :  { %v10462_v29 = vrot.slane %v10429_v28, %v19078_v55  ;;  %v10466_v25 = vrot.slane %v10430_v42, %v19078_v55  ;;  %v10470_v34 = vrot.slane %v10431_v51, %v19078_v55  ;;  %10945 = vmatpush1.bf16.msra.mxu1 %v17160_v59  ;;  %v17169_v28 = vld [vmem:[#allocation24 + $0x68] ss:$12 sps:$4 sm:$0xff]   ;;  %v17170_v42 = vld [vmem:[#allocation24 + $0x138] ss:$12 sps:$4 sm:$0xff]  }
0x2158   :  { %v10475_v43 = vsel %vm5332_vm2, %v10450_v18, %v10446_v26  ;;  %v10414_v14 = vpop.xlane.xlu0 %10413  ;;  %10946 = vmatprep.subr.bf16.mxu1 %v17167_v19  ;;  %v17172_v51 = vld [vmem:[#allocation24 + $0x13c] ss:$12 sps:$4 sm:$0xff]  }
0x2159   :  { %v10476_v31 = vsel %vm5334_vm3, %v10454_v61, %v10475_v43  ;;  %v10432_v0 = vadd.f32 %v10423_v49, %v10414_v14  ;;  %v17164_v49 = vld [vmem:[#allocation24 + $0x50] ss:$12 sps:$4 sm:$0xff]   ;;  %v17174_v43 = vld [vmem:[#allocation24 + $0x80] ss:$12 sps:$4 sm:$0xff]  }
0x215a   :  { %v10477_v60 = vsel %vm5336_vm4, %v10458_v8, %v10476_v31  ;;  %15197 = vmatpush3.bf16.msra.mxu0 %v17164_v49  ;;  %v17173_v8 = vld [vmem:[#allocation24 + $0x140] ss:$12 sps:$4 sm:$0xff]   ;;  %v17178_v31 = vld [vmem:[#allocation24 + $0x158] ss:$12 sps:$4 sm:$0xff]  }
0x215b   :  { %v10478_v20 = vsel %vm5338_vm5, %v10462_v29, %v10477_v60  ;;  %v10474_v1 = vrot.slane %v10432_v0, %v19078_v55  ;;  %15198 = vmatprep.subr.bf16.mxu0 %v17168_v4  ;;  %10947 = vmatpush1.bf16.msra.mxu1 %v17165_v32  ;;  %v17177_v29 = vld [vmem:[#allocation24 + $0x154] ss:$12 sps:$4 sm:$0xff]   ;;  %v17179_v0 = vld [vmem:[#allocation24 + $0x98] ss:$12 sps:$4 sm:$0xff]  }
0x215c   :  { %v10479_v24 = vsel %vm5340_vm6, %v10466_v25, %v10478_v20  ;;  %10948 = vmatprep.subr.bf16.mxu1 %v17172_v51  ;;  %v17182_v20 = vld [vmem:[#allocation24 + $0x16c] ss:$12 sps:$4 sm:$0xff]   ;;  %v10568_v4 = vld [vmem:[#allocation2 + $0x38] sm:$0xff] }
0x215d   :  { %v10480_v63 = vsel %vm5342_vm7, %v10470_v34, %v10479_v24  ;;  %v17183_v34 = vld [vmem:[#allocation24 + $0x170] ss:$12 sps:$4 sm:$0xff]   ;;  %v17180_v24 = vld [vmem:[#allocation24 + $0x168] ss:$12 sps:$4 sm:$0xff]  }
0x215e   :  { %v10481_v11 = vsel %vm5344_vm8, %v10474_v1, %v10480_v63  ;;  %15199 = vmatpush3.bf16.msra.mxu0 %v17169_v28  ;;  %v17184_v1 = vld [vmem:[#allocation24 + $0xb0] ss:$12 sps:$4 sm:$0xff]  }
0x215f   :  { %v10483_v30 = vsel %vm10434_vm15, %v10481_v11, -1e+30  ;;  %15200 = vmatprep.subr.bf16.mxu0 %v17173_v8  ;;  %10949 = vmatpush1.bf16.msra.mxu1 %v17170_v42  ;;  %v17187_v63 = vld [vmem:[#allocation26 + $0x4] ss:$12 sps:$4 sm:$0xff]   ;;  %v10567_v49 = vld [vmem:[#allocation2 + $0x30] sm:$0xff] }
0x2160   :  { %v10484_v48 = vsel %vm5012_vm1, %v10483_v30, -inf  ;;  %10950 = vmatprep.subr.bf16.mxu1 %v17177_v29  ;;  %v17185_v8 = vld [vmem:[#allocation26] ss:$12 sps:$4 sm:$0xff]  }
0x2161   :  { %v10485_v36 = vrot.slane %v10484_v48, 4  ;;  %v17192_v29 = vld [vmem:[#allocation26 + $0x20] ss:$12 sps:$4 sm:$0xff]  }
0x2162   :  { %15201 = vmatpush3.bf16.msra.mxu0 %v17174_v43  ;;  %v17188_v43 = vld [vmem:[#allocation26 + $0x8] ss:$12 sps:$4 sm:$0xff]  }
0x2163   :  { %v10486_v27 = vmax.f32 %v10484_v48, %v10485_v36  ;;  %15202 = vmatprep.subr.bf16.mxu0 %v17178_v31  ;;  %10951 = vmatpush1.bf16.msra.mxu1 %v17175_v56  ;;  %v10562_v48 = vld [vmem:[#allocation2 + $0x8] sm:$0xff]  ;;  %v10561_v36 = vld [vmem:[#allocation2] sm:$0xff] }
0x2164   :  { %10952 = vmatprep.subr.bf16.mxu1 %v17182_v20  ;;  %v17195_v31 = vld [vmem:[#allocation26 + $0x34] ss:$12 sps:$4 sm:$0xff]   ;;  %v17193_v56 = vld [vmem:[#allocation26 + $0x30] ss:$12 sps:$4 sm:$0xff]  }
0x2165   :  { %v10487_v62 = vrot.slane %v10486_v27, 2  ;;  %v17200_v20 = vld [vmem:[#allocation26 + $0x50] ss:$12 sps:$4 sm:$0xff]  }
0x2166   :  { %15203 = vmatpush3.bf16.msra.mxu0 %v17179_v0  ;;  %v17196_v0 = vld [vmem:[#allocation26 + $0x38] ss:$12 sps:$4 sm:$0xff]  }
0x2167   :  { %v10488_v22 = vmax.f32 %v10486_v27, %v10487_v62  ;;  %15204 = vmatprep.subr.bf16.mxu0 %v17183_v34  ;;  %10953 = vmatpush1.bf16.msra.mxu1 %v17180_v24  ;;  %v17203_v34 = vld [vmem:[#allocation26 + $0x64] ss:$12 sps:$4 sm:$0xff]   ;;  %v17201_v24 = vld [vmem:[#allocation26 + $0x60] ss:$12 sps:$4 sm:$0xff]  }
0x2168   :  { %11180 = vmatprep.subr.bf16.mxu1 %v17187_v63  ;;  %v17207_v63 = vld [vmem:[#allocation26 + $0x7c] ss:$12 sps:$4 sm:$0xff]  }
0x2169   :  { %v10489_v12 = vrot.slane %v10488_v22, 1 }
0x216a   :  { %15205 = vmatpush3.bf16.msra.mxu0 %v17184_v1  ;;  %v17204_v1 = vld [vmem:[#allocation26 + $0x68] ss:$12 sps:$4 sm:$0xff]  }
0x216b   :  { %v10490_v38 = vmax.f32 %v10488_v22, %v10489_v12  ;;  %15813 = vmatprep.subr.bf16.mxu0 %v19738_v17 }
0x216d   :  { %v10491_v15 = vsub.f32 %v10483_v30, %v10490_v38  ;;  %v10563_v38 = vld [vmem:[#allocation2 + $0x10] sm:$0xff] }
0x216f   :  { %v10492_v33 = vmul.f32 1.442695, %v10491_v15 }
0x2171   :  { %17305 = vpow2.f32 %v10492_v33  ;;  %v10564_v33 = vld [vmem:[#allocation2 + $0x18] sm:$0xff] }
0x217b   :  { %v17306_v39 = vpop.eup %17305 }
0x217c   :  { %v10494_v50 = vsel %vm5012_vm1, %v17306_v39, 0.0 }
0x217d   :  { %v10495_v52 = vrot.slane %v10494_v50, 4 }
0x217f   :  { %v10496_v40 = vadd.f32 %v10495_v52, %v10494_v50 }
0x2181   :  { %v10497_v7 = vrot.slane %v10496_v40, 2 }
0x2183   :  { %v10498_v57 = vadd.f32 %v10497_v7, %v10496_v40  ;;  %v10565_v40 = vld [vmem:[#allocation2 + $0x20] sm:$0xff] }
0x2185   :  { %v10499_v9 = vrot.slane %v10498_v57, 1 }
0x2187   :  { %v10500_v58 = vadd.f32 %v10499_v9, %v10498_v57 }
0x2189   :  { %17307 = vrcp.f32 %v10500_v58  ;;  %v10566_v58 = vld [vmem:[#allocation2 + $0x28] sm:$0xff] }
0x2193   :  { %v17308_v45 = vpop.eup %17307 }
0x2194   :  { %v10502_v47 = vmul.f32 %v17308_v45, %v17306_v39 }
0x2196   :  { %v10503_v26 = vadd.f32 %v10502_v47, %v19429_v41  ;;  %v10515_v18 = vrot.slane %v10502_v47, %v18370_v46  ;;  %v10508_v61 = vrot.slane %v10502_v47, %v18367_v44  ;;  %v10522_v14 = vrot.slane %v10502_v47, %v18377_v13 }
0x2197   :  { %v10529_v41 = vrot.slane %v10502_v47, %v18959_v16  ;;  %v10536_v60 = vrot.slane %v10502_v47, %v19015_v10  ;;  %v10543_v25 = vrot.slane %v10502_v47, %v19023_v3  ;;  %v10550_v11 = vrot.slane %v10502_v47, %v19020_v23 }
0x2198   :  { %10504 = vst.msk [vmem:[#allocation4] sm:$0xff] %vm5012_vm1, %v10503_v26  ;;  %10517 = vbcast.lane.b32.xlu1 %v10515_v18, 256  ;;  %10510 = vbcast.lane.b32.xlu0 %v10508_v61, 256  ;;  %v10557_v30 = vrot.slane %v10502_v47, %v19030_v54 }
0x219c   :  { %10524 = vbcast.lane.b32.xlu1 %v10522_v14, 256  ;;  %10531 = vbcast.lane.b32.xlu0 %v10529_v41, 256  ;;  %v17191_v14 = vld [vmem:[#allocation26 + $0x1c] ss:$12 sps:$4 sm:$0xff]   ;;  %v17189_v41 = vld [vmem:[#allocation26 + $0x18] ss:$12 sps:$4 sm:$0xff]  }
0x21a0   :  { %10538 = vbcast.lane.b32.xlu1 %v10536_v60, 256  ;;  %10545 = vbcast.lane.b32.xlu0 %v10543_v25, 256  ;;  %v17199_v60 = vld [vmem:[#allocation26 + $0x4c] ss:$12 sps:$4 sm:$0xff]   ;;  %v17197_v25 = vld [vmem:[#allocation26 + $0x48] ss:$12 sps:$4 sm:$0xff]  }
0x21a4   :  { %10552 = vbcast.lane.b32.xlu1 %v10550_v11, 256  ;;  %10559 = vbcast.lane.b32.xlu0 %v10557_v30, 256  ;;  %v17205_v11 = vld [vmem:[#allocation26 + $0x78] ss:$12 sps:$4 sm:$0xff]   ;;  %v17208_v30 = vld [vmem:[#allocation26 + $0x80] ss:$12 sps:$4 sm:$0xff]  }
0x220a   :  { %v10518_v27 = vpop.permute.xlu1 %10517  ;;  %v10511_v62 = vpop.permute.xlu0 %10510 }
0x220b   :  { %v10570_v22 = vmul.f32 %v10562_v48, %v10518_v27  ;;  %v10569_v12 = vmul.f32 %v10561_v36, %v10511_v62  ;;  %v17211_v48 = vld [vmem:[#allocation26 + $0x94] ss:$12 sps:$4 sm:$0xff]   ;;  %v17209_v36 = vld [vmem:[#allocation26 + $0x90] ss:$12 sps:$4 sm:$0xff]   ;;  %v17212_v27 = vld [vmem:[#allocation26 + $0x98] ss:$12 sps:$4 sm:$0xff]  }
0x220c   :  { %v17215_v62 = vld [vmem:[#allocation26 + $0xac] ss:$12 sps:$4 sm:$0xff]  }
0x220d   :  { %v10577_v50 = vadd.f32 %v10570_v22, %v10569_v12  ;;  %v17213_v22 = vld [vmem:[#allocation26 + $0xa8] ss:$12 sps:$4 sm:$0xff]   ;;  %v17216_v12 = vld [vmem:[#allocation26 + $0xb0] ss:$12 sps:$4 sm:$0xff]  }
0x220e   :  { %v10525_v15 = vpop.permute.xlu1 %10524  ;;  %v10532_v39 = vpop.permute.xlu0 %10531 }
0x220f   :  { %v10571_v52 = vmul.f32 %v10563_v38, %v10525_v15  ;;  %v10572_v57 = vmul.f32 %v10564_v33, %v10532_v39  ;;  %v17219_v38 = vld [vmem:[#allocation27 + $0x4] ss:$8 sps:$4 sm:$0xff]   ;;  %v17217_v15 = vld [vmem:[#allocation27] ss:$8 sps:$4 sm:$0xff]   ;;  %v17222_v33 = vld [vmem:[#allocation27 + $0x14] ss:$8 sps:$4 sm:$0xff]  }
0x2210   :  { %v17220_v39 = vld [vmem:[#allocation27 + $0x10] ss:$8 sps:$4 sm:$0xff]  }
0x2211   :  { %v10578_v7 = vadd.f32 %v10577_v50, %v10571_v52  ;;  %v17223_v50 = vld [vmem:[#allocation27 + $0x20] ss:$8 sps:$4 sm:$0xff]   ;;  %v17225_v52 = vld [vmem:[#allocation27 + $0x24] ss:$8 sps:$4 sm:$0xff]  }
0x2212   :  { %v10539_v9 = vpop.permute.xlu1 %10538  ;;  %v10546_v59 = vpop.permute.xlu0 %10545 }
0x2213   :  { %v10579_v37 = vadd.f32 %v10578_v7, %v10572_v57  ;;  %v10573_v21 = vmul.f32 %v10565_v40, %v10539_v9  ;;  %v10574_v32 = vmul.f32 %v10566_v58, %v10546_v59  ;;  %v17228_v40 = vld [vmem:[#allocation27 + $0x34] ss:$8 sps:$4 sm:$0xff]   ;;  %v17231_v7 = vld [vmem:[#allocation27 + $0x44] ss:$8 sps:$4 sm:$0xff]   ;;  %v17229_v57 = vld [vmem:[#allocation27 + $0x40] ss:$8 sps:$4 sm:$0xff]  }
0x2214   :  { %v17234_v9 = vld [vmem:[#allocation27 + $0x54] ss:$8 sps:$4 sm:$0xff]   ;;  %v17237_v58 = vld [vmem:[#allocation27 + $0x64] ss:$8 sps:$4 sm:$0xff]   ;;  %v17235_v59 = vld [vmem:[#allocation27 + $0x60] ss:$8 sps:$4 sm:$0xff]  }
0x2215   :  { %v10580_v45 = vadd.f32 %v10579_v37, %v10573_v21  ;;  %v17240_v37 = vld [vmem:[#allocation27 + $0x74] ss:$8 sps:$4 sm:$0xff]   ;;  %v17238_v21 = vld [vmem:[#allocation27 + $0x70] ss:$8 sps:$4 sm:$0xff]  }
0x2216   :  { %v10553_v19 = vpop.permute.xlu1 %10552  ;;  %v10560_v47 = vpop.permute.xlu0 %10559 }
0x2217   :  { %v10581_v28 = vadd.f32 %v10580_v45, %v10574_v32  ;;  %v10575_v26 = vmul.f32 %v10567_v49, %v10553_v19  ;;  %v10576_v61 = vmul.f32 %v10568_v4, %v10560_v47  ;;  %v17243_v49 = vld [vmem:[#allocation27 + $0x84] ss:$8 sps:$4 sm:$0xff]   ;;  %v17241_v45 = vld [vmem:[#allocation27 + $0x80] ss:$8 sps:$4 sm:$0xff]   ;;  %v17246_v32 = vld [vmem:[#allocation27 + $0x94] ss:$8 sps:$4 sm:$0xff]  }
0x2218   :  { %v17244_v19 = vld [vmem:[#allocation27 + $0x90] ss:$8 sps:$4 sm:$0xff]   ;;  %v17249_v4 = vld [vmem:[#allocation27 + $0xa4] ss:$8 sps:$4 sm:$0xff]   ;;  %v17247_v47 = vld [vmem:[#allocation27 + $0xa0] ss:$8 sps:$4 sm:$0xff]  }
0x2219   :  { %v10582_v18 = vadd.f32 %v10581_v28, %v10575_v26  ;;  %v17250_v28 = vld [vmem:[#allocation27 + $0xb0] ss:$8 sps:$4 sm:$0xff]   ;;  %v17252_v26 = vld [vmem:[#allocation27 + $0xb4] ss:$8 sps:$4 sm:$0xff]  }
0x221b   :  { %v10583_v42 = vadd.f32 %v10582_v18, %v10576_v61  ;;  %v17255_v18 = vld [vmem:[#allocation27 + $0xc4] ss:$8 sps:$4 sm:$0xff]   ;;  %v17253_v61 = vld [vmem:[#allocation27 + $0xc0] ss:$8 sps:$4 sm:$0xff]  }
0x221d   :  { %v19495_v51 = vpack.c.bf16 %v10583_v42, %v10583_v42  ;;  %v17258_v42 = vld [vmem:[#allocation27 + $0xd4] ss:$8 sps:$4 sm:$0xff]  }
0x221f   :  { %10954 = vmatprep.mubr.bf16.mxu1 %v19495_v51  ;;  %10995 = vmatprep.mubr.bf16.mxu0 %v19495_v51 }
0x2220   :  { %10955 = vmatmul.mubr.bf16.vlgmr.msra.gmra.mrb[4].mxu1 %v19455_v6  ;;  %10996 = vmatmul.mubr.bf16.vlgmr.msra.gmra.mrb[0].mxu0 %v19455_v6 }
0x2221   :  { %11181 = vmatpush1.bf16.msra.mxu1 %v17185_v8  ;;  %15814 = vmatpush3.bf16.msra.mxu0 %v17188_v43  ;;  %v17261_v8 = vld [vmem:[#allocation27 + $0xe4] ss:$8 sps:$4 sm:$0xff]   ;;  %v17259_v43 = vld [vmem:[#allocation27 + $0xe0] ss:$8 sps:$4 sm:$0xff]  }
0x2222   :  { %11182 = vmatprep.subr.bf16.mxu1 %v17191_v14  ;;  %15815 = vmatprep.subr.bf16.mxu0 %v19738_v17  ;;  %v17264_v14 = vld [vmem:[#allocation27 + $0xf4] ss:$8 sps:$4 sm:$0xff]  }
0x2223   :  { %11212 = vmatprep.mubr.bf16.mxu1 %v17893_v2  ;;  %15829 = vmatprep.mubr.msk.bf16.mxu0 %vm17894_vm0, %v19738_v17 }
0x2225   :  { %11183 = vmatpush1.bf16.msra.mxu1 %v17189_v41  ;;  %15816 = vmatpush3.bf16.msra.mxu0 %v17192_v29  ;;  %v17262_v41 = vld [vmem:[#allocation27 + $0xf0] ss:$8 sps:$4 sm:$0xff]   ;;  %v17267_v29 = vld [vmem:[#allocation27 + $0x104] ss:$8 sps:$4 sm:$0xff]  }
0x2226   :  { %11184 = vmatprep.subr.bf16.mxu1 %v17195_v31  ;;  %15817 = vmatprep.subr.bf16.mxu0 %v19738_v17 }
0x2229   :  { %11185 = vmatpush1.bf16.msra.mxu1 %v17193_v56  ;;  %15818 = vmatpush3.bf16.msra.mxu0 %v17196_v0 }
0x222a   :  { %11186 = vmatprep.subr.bf16.mxu1 %v17199_v60  ;;  %15819 = vmatprep.subr.bf16.mxu0 %v19738_v17 }
0x222d   :  { %11187 = vmatpush1.bf16.msra.mxu1 %v17197_v25  ;;  %15820 = vmatpush3.bf16.msra.mxu0 %v17200_v20  ;;  %v10649_v20 = vld [vmem:[%s19741_s18] sm:$0x7] }
0x222e   :  { %11188 = vmatprep.subr.bf16.mxu1 %v17203_v34  ;;  %15821 = vmatprep.subr.bf16.mxu0 %v19738_v17  ;;  %v11035_v34 = vld [vmem:[%s19691_s21] sm:$0x7] }
0x2231   :  { %11189 = vmatpush1.bf16.msra.mxu1 %v17201_v24  ;;  %15822 = vmatpush3.bf16.msra.mxu0 %v17204_v1  ;;  %v10654_v24 = vrot.slane %v10649_v20, %v18367_v44  ;;  %v11040_v1 = vrot.slane %v11035_v34, %v18367_v44 }
0x2232   :  { %11190 = vmatprep.subr.bf16.mxu1 %v17207_v63  ;;  %15823 = vmatprep.subr.bf16.mxu0 %v19738_v17  ;;  %v10658_v63 = vrot.slane %v10649_v20, %v18370_v46 }
0x2235   :  { %11191 = vmatpush1.bf16.msra.mxu1 %v17205_v11  ;;  %15824 = vmatpush3.bf16.msra.mxu0 %v17208_v30  ;;  %v11044_v11 = vrot.slane %v11035_v34, %v18370_v46  ;;  %v15977_v30 = vadd.f32 %v11040_v1, %v10654_v24 }
0x2236   :  { %11192 = vmatprep.subr.bf16.mxu1 %v17211_v48  ;;  %15825 = vmatprep.subr.bf16.mxu0 %v19738_v17 }
0x2239   :  { %11193 = vmatpush1.bf16.msra.mxu1 %v17209_v36  ;;  %15826 = vmatpush3.bf16.msra.mxu0 %v17212_v27  ;;  %v15979_v36 = vadd.f32 %v11044_v11, %v10658_v63 }
0x223a   :  { %11194 = vmatprep.subr.bf16.mxu1 %v17215_v62  ;;  %15827 = vmatprep.subr.bf16.mxu0 %v19738_v17  ;;  %v17226_v17 = vld [vmem:[#allocation27 + $0x30] ss:$8 sps:$4 sm:$0xff]  }
0x223d   :  { %11195 = vmatpush1.bf16.msra.mxu1 %v17213_v22  ;;  %15828 = vmatpush3.bf16.msra.mxu0 %v17216_v12 }
0x223e   :  { %11583 = vmatprep.subr.bf16.mxu0 %v17219_v38 }
0x2240   :  { %11213 = vmatmul.mubr.bf16.vlgmr.msra.gmra.mrb[4].mxu1 %v19409_v5  ;;  %15830 = vmatmul.mubr.bf16.vlgmr.msra.gmra.mrb[4].mxu0 %v19409_v5  ;;  %v17232_v5 = vld [vmem:[#allocation27 + $0x50] ss:$8 sps:$4 sm:$0xff]  }
0x2241   :  { %11615 = vmatprep.mubr.bf16.mxu0 %v19495_v51  ;;  %11584 = vmatpush1.bf16.msra.mxu0 %v17217_v15  ;;  %v17256_v51 = vld [vmem:[#allocation27 + $0xd0] ss:$8 sps:$4 sm:$0xff]  }
0x2242   :  { %11585 = vmatprep.subr.bf16.mxu0 %v17222_v33 }
0x2245   :  { %11586 = vmatpush1.bf16.msra.mxu0 %v17220_v39 }
0x2246   :  { %11587 = vmatprep.subr.bf16.mxu0 %v17225_v52 }
0x2249   :  { %11588 = vmatpush1.bf16.msra.mxu0 %v17223_v50 }
0x224a   :  { %11589 = vmatprep.subr.bf16.mxu0 %v17228_v40 }
0x224d   :  { %11590 = vmatpush1.bf16.msra.mxu0 %v17226_v17 }
0x224e   :  { %11591 = vmatprep.subr.bf16.mxu0 %v17231_v7 }
0x2251   :  { %11592 = vmatpush1.bf16.msra.mxu0 %v17229_v57  ;;  %v11048_v57 = vrot.slane %v11035_v34, %v18377_v13  ;;  %v11331_v34 = vld [vmem:[%s19693_s23] sm:$0x3] }
0x2252   :  { %11593 = vmatprep.subr.bf16.mxu0 %v17234_v9  ;;  %v11336_v24 = vrot.slane %v11331_v34, %v18367_v44  ;;  %v11340_v1 = vrot.slane %v11331_v34, %v18370_v46 }
0x2255   :  { %11594 = vmatpush1.bf16.msra.mxu0 %v17232_v5  ;;  %v10662_v5 = vrot.slane %v10649_v20, %v18377_v13  ;;  %v17286_v20 = vld [vmem:[#allocation27 + $0x170] ss:$8 sps:$4 sm:$0xff]  }
0x2256   :  { %11595 = vmatprep.subr.bf16.mxu0 %v17237_v58 }
0x2259   :  { %11596 = vmatpush1.bf16.msra.mxu0 %v17235_v59 }
0x225a   :  { %11597 = vmatprep.subr.bf16.mxu0 %v17240_v37 }
0x225d   :  { %11598 = vmatpush1.bf16.msra.mxu0 %v17238_v21 }
0x225e   :  { %11599 = vmatprep.subr.bf16.mxu0 %v17243_v49 }
0x2261   :  { %11600 = vmatpush1.bf16.msra.mxu0 %v17241_v45 }
0x2262   :  { %11601 = vmatprep.subr.bf16.mxu0 %v17246_v32 }
0x2265   :  { %11602 = vmatpush1.bf16.msra.mxu0 %v17244_v19 }
0x2266   :  { %11603 = vmatprep.subr.bf16.mxu0 %v17249_v4 }
0x2269   :  { %11604 = vmatpush1.bf16.msra.mxu0 %v17247_v47 }
0x226a   :  { %11605 = vmatprep.subr.bf16.mxu0 %v17252_v26 }
0x226d   :  { %11606 = vmatpush1.bf16.msra.mxu0 %v17250_v28 }
0x226e   :  { %11607 = vmatprep.subr.bf16.mxu0 %v17255_v18  ;;  %v17265_v18 = vld [vmem:[#allocation27 + $0x100] ss:$8 sps:$4 sm:$0xff]  }
0x2271   :  { %11608 = vmatpush1.bf16.msra.mxu0 %v17253_v61 }
0x2272   :  { %11609 = vmatprep.subr.bf16.mxu0 %v17258_v42  ;;  %v17270_v42 = vld [vmem:[#allocation27 + $0x114] ss:$8 sps:$4 sm:$0xff]  }
0x2275   :  { %11610 = vmatpush1.bf16.msra.mxu0 %v17256_v51  ;;  %v17268_v51 = vld [vmem:[#allocation27 + $0x110] ss:$8 sps:$4 sm:$0xff]  }
0x2276   :  { %11611 = vmatprep.subr.bf16.mxu0 %v17261_v8  ;;  %v17273_v8 = vld [vmem:[#allocation27 + $0x124] ss:$8 sps:$4 sm:$0xff]  }
0x2279   :  { %11612 = vmatpush1.bf16.msra.mxu0 %v17259_v43  ;;  %v17271_v43 = vld [vmem:[#allocation27 + $0x120] ss:$8 sps:$4 sm:$0xff]  }
0x227a   :  { %11613 = vmatprep.subr.bf16.mxu0 %v17264_v14  ;;  %v17274_v14 = vld [vmem:[#allocation27 + $0x130] ss:$8 sps:$4 sm:$0xff]  }
0x227d   :  { %11614 = vmatpush1.bf16.msra.mxu0 %v17262_v41  ;;  %v17279_v41 = vld [vmem:[#allocation27 + $0x144] ss:$8 sps:$4 sm:$0xff]  }
0x227e   :  { %11624 = vmatprep.subr.bf16.mxu0 %v17267_v29  ;;  %v17277_v29 = vld [vmem:[#allocation27 + $0x140] ss:$8 sps:$4 sm:$0xff]  }
0x22f3   :  { %v15206_v31 = vpop.f32.mrb[0].mxu0 }
0x22f4   :  { %v15207_v56 = vpop.f32.mrb[1].mxu0 }
0x22f5   :  { %v15208_v0 = vadd.f32 %v15207_v56, %v15206_v31  ;;  %v15209_v60 = vpop.f32.mrb[2].mxu0  ;;  %v17282_v31 = vld [vmem:[#allocation27 + $0x154] ss:$8 sps:$4 sm:$0xff]   ;;  %v17280_v56 = vld [vmem:[#allocation27 + $0x150] ss:$8 sps:$4 sm:$0xff]  }
0x22f6   :  { %v15210_v25 = vpop.f32.mrb[3].mxu0  ;;  %v17283_v60 = vld [vmem:[#allocation27 + $0x160] ss:$8 sps:$4 sm:$0xff]  }
0x22f7   :  { %v10998_v21 = vadd.f32 %v15208_v0, %v10662_v5  ;;  %v17285_v0 = vld [vmem:[#allocation27 + $0x164] ss:$8 sps:$4 sm:$0xff]   ;;  %v17288_v25 = vld [vmem:[#allocation27 + $0x174] ss:$8 sps:$4 sm:$0xff]  }
0x22f8   :  { %v17326_v5 = vld [vmem:[#allocation12 + $0x18] sm:$0xff] (!%p14645_p8)  }
0x2313   :  { %v11214_v48 = vpop.f32.mrb[4].mxu1  ;;  %v11255_v27 = vpop.f32.mrb[4].mxu0 }
0x2314   :  { %v15978_v62 = vadd.f32 %v15977_v30, %v11214_v48  ;;  %v11216_v22 = vpop.f32.mrb[5].mxu1  ;;  %v15831_v12 = vpop.f32.mrb[5].mxu0  ;;  %v11256_v59 = vadd.f32 %v11255_v27, %v11048_v57  ;;  %v17324_v57 = vld [vmem:[#allocation12 + $0x10] sm:$0xff] (!%p14645_p8)  }
0x2315   :  { %v11218_v38 = vpop.f32.mrb[6].mxu1  ;;  %v11258_v15 = vpop.f32.mrb[6].mxu0  ;;  %v15980_v52 = vadd.f32 %v15979_v36, %v11216_v22 }
0x2316   :  { %v14594_v33 = vmul.f32 -1.442695, %v15978_v62  ;;  %v11219_v39 = vpop.f32.mrb[7].mxu1  ;;  %v15832_v50 = vpop.f32.mrb[7].mxu0  ;;  %v11673_v62 = vadd.s32 (!%p14645_p8), 128, %v19074_v35 }
0x2317   :  { %v14595_v40 = vmul.f32 -1.442695, %v15980_v52  ;;  %v17319_v50 = vld [vmem:[#allocation12 + $0x40] sm:$0xff] (!%p14645_p8)  }
0x2318   :  { %17309 = vpow2.f32 %v14594_v33  ;;  %v17320_v52 = vld [vmem:[#allocation12] sm:$0xff] (!%p14645_p8)  }
0x2319   :  { %17311 = vpow2.f32 %v14595_v40  ;;  %v17321_v40 = vld [vmem:[#allocation12 + $0x48] sm:$0xff] (!%p14645_p8)  }
0x2322   :  { %v17310_v17 = vpop.eup %17309 }
0x2323   :  { %v11265_v7 = vadd.f32 1.0, %v17310_v17  ;;  %v17312_v9 = vpop.eup %17311  ;;  %v17322_v17 = vld [vmem:[#allocation12 + $0x8] sm:$0xff] (!%p14645_p8)  }
0x2324   :  { %v11272_v58 = vadd.f32 1.0, %v17312_v9  ;;  %v17325_v9 = vld [vmem:[#allocation12 + $0x58] sm:$0xff] (!%p14645_p8)  }
0x2325   :  { %17313 = vrcp.f32 %v11265_v7  ;;  %v17323_v7 = vld [vmem:[#allocation12 + $0x50] sm:$0xff] (!%p14645_p8)  }
0x2326   :  { %17315 = vrcp.f32 %v11272_v58  ;;  %v17327_v58 = vld [vmem:[#allocation12 + $0x60] sm:$0xff] (!%p14645_p8)  }
0x232f   :  { %v17314_v37 = vpop.eup %17313 }
0x2330   :  { %v11275_v49 = vmul.f32 %v17314_v37, %v11256_v59  ;;  %v17316_v32 = vpop.eup %17315  ;;  %v17328_v59 = vld [vmem:[#allocation12 + $0x20] sm:$0xff] (!%p14645_p8)   ;;  %v17329_v37 = vld [vmem:[#allocation12 + $0x68] sm:$0xff] (!%p14645_p8)  }
0x2331   :  { %v11278_v19 = vsub.f32 1.0, %v17316_v32  ;;  %v11280_v28 = vmul.f32 %v17316_v32, %v19405_v53  ;;  %v17276_v53 = vld [vmem:[#allocation27 + $0x134] ss:$8 sps:$4 sm:$0xff]  }
0x2332   :  { %v11276_v45 = vadd.f32 %v11275_v49, %v10998_v21  ;;  %v17330_v21 = vld [vmem:[#allocation12 + $0x28] sm:$0xff] (!%p14645_p8)   ;;  %v17331_v49 = vld [vmem:[#allocation12 + $0x70] sm:$0xff] (!%p14645_p8)  }
0x2334   :  { %17317 = vtanh.f32 %v11276_v45 }
0x233e   :  { %v17318_v4 = vpop.eup %17317 }
0x233f   :  { %v11279_v47 = vmul.f32 %v17318_v4, %v11278_v19 }
0x2341   :  { %v19527_v26 = vadd.f32 %v11280_v28, %v11279_v47  ;;  %v17332_v47 = vld [vmem:[#allocation12 + $0x30] sm:$0xff] (!%p14645_p8)   ;;  %v17333_v28 = vld [vmem:[#allocation12 + $0x78] sm:$0xff] (!%p14645_p8)  }
0x2343   :  { %v19531_v61 = vpack.c.bf16 %v19527_v26, %v19527_v26 }
0x2345   :  { %11616 = vmatmul.mubr.bf16.vlgmr.msra.gmra.mrb[8].mxu0 %v19531_v61 }
0x2346   :  { %11625 = vmatpush1.bf16.msra.mxu0 %v17265_v18  ;;  %11656 = vmatprep.mubr.bf16.mxu0 %v17893_v2  ;;  %v17334_v18 = vld [vmem:[#allocation12 + $0x38] sm:$0xff] (!%p14645_p8)  }
0x2347   :  { %11626 = vmatprep.subr.bf16.mxu0 %v17270_v42 }
0x234a   :  { %11627 = vmatpush1.bf16.msra.mxu0 %v17268_v51 }
0x234b   :  { %11628 = vmatprep.subr.bf16.mxu0 %v17273_v8 }
0x234e   :  { %11629 = vmatpush1.bf16.msra.mxu0 %v17271_v43 }
0x234f   :  { %11630 = vmatprep.subr.bf16.mxu0 %v17276_v53 }
0x2352   :  { %11631 = vmatpush1.bf16.msra.mxu0 %v17274_v14  ;;  %v17898_v14 = vmov (!%p14645_p8), 1.0|1.0  }
0x2353   :  { %11632 = vmatprep.subr.bf16.mxu0 %v17279_v41 }
0x2356   :  { %11633 = vmatpush1.bf16.msra.mxu0 %v17277_v29 }
0x2357   :  { %11634 = vmatprep.subr.bf16.mxu0 %v17282_v31 }
0x235a   :  { %11635 = vmatpush1.bf16.msra.mxu0 %v17280_v56 }
0x235b   :  { %11636 = vmatprep.subr.bf16.mxu0 %v17285_v0 }
0x235e   :  { %11637 = vmatpush1.bf16.msra.mxu0 %v17283_v60 }
0x235f   :  { %11638 = vmatprep.subr.bf16.mxu0 %v17288_v25 }
0x2362   :  { %11639 = vmatpush1.bf16.msra.mxu0 %v17286_v20 }
0x2363   :  { %15221 = vmatprep.subr.bf16.mxu0 (!%p14645_p8), %v17319_v50 }
0x2365   :  { %11657 = vmatmul.mubr.bf16.vlgmr.msra.gmra.mrb[8].mxu0 %v19455_v6 }
0x2366   :  { %15222 = vmatpush3.bf16.msra.mxu0 (!%p14645_p8), %v17320_v52 }
0x2367   :  { %15223 = vmatprep.subr.bf16.mxu0 (!%p14645_p8), %v17321_v40 }
0x236a   :  { %15224 = vmatpush3.bf16.msra.mxu0 (!%p14645_p8), %v17322_v17 }
0x236b   :  { %15225 = vmatprep.subr.bf16.mxu0 (!%p14645_p8), %v17323_v7 }
0x236e   :  { %15226 = vmatpush3.bf16.msra.mxu0 (!%p14645_p8), %v17324_v57 }
0x236f   :  { %15227 = vmatprep.subr.bf16.mxu0 (!%p14645_p8), %v17325_v9 }
0x2372   :  { %15228 = vmatpush3.bf16.msra.mxu0 (!%p14645_p8), %v17326_v5 }
0x2373   :  { %15229 = vmatprep.subr.bf16.mxu0 (!%p14645_p8), %v17327_v58 }
0x2376   :  { %15230 = vmatpush3.bf16.msra.mxu0 (!%p14645_p8), %v17328_v59 }
0x2377   :  { %15231 = vmatprep.subr.bf16.mxu0 (!%p14645_p8), %v17329_v37 }
0x237a   :  { %15232 = vmatpush3.bf16.msra.mxu0 (!%p14645_p8), %v17330_v21 }
0x237b   :  { %15233 = vmatprep.subr.bf16.mxu0 (!%p14645_p8), %v17331_v49 }
0x237e   :  { %15234 = vmatpush3.bf16.msra.mxu0 (!%p14645_p8), %v17332_v47 }
0x237f   :  { %15235 = vmatprep.subr.bf16.mxu0 (!%p14645_p8), %v17333_v28 }
0x2382   :  { %15236 = vmatpush3.bf16.msra.mxu0 (!%p14645_p8), %v17334_v18 }
0x2436   :  { %11672 = sbr.rel (%p14645_p8) target bundleno = 9937 (0x26d1), region = 157 }
0x2438   :  { %v11658_v63 = vpop.f32.mrb[8].mxu0 }
0x2439   :  { %v15981_v11 = vadd.f32 %v11658_v63, %v11336_v24  ;;  %v11660_v30 = vpop.f32.mrb[9].mxu0 }
0x243a   :  { %v15982_v48 = vadd.f32 %v11660_v30, %v11340_v1  ;;  %v11662_v36 = vpop.f32.mrb[10].mxu0 }
0x243b   :  { %11666 = vst [vmem:[#allocation29 + $0x30] sm:$0xff] %v15981_v11  ;;  %v11663_v27 = vpop.f32.mrb[11].mxu0 }
0x243c   :  { %11667 = vst [vmem:[#allocation29 + $0x38] sm:$0xff] %v15982_v48  ;;  %v11674_v6 = vmax.f32 (!%p14645_p8), %v15981_v11, %v15982_v48 }
0x243e   :  { %11675 = vmax.xlane.f32.xlu0 %v11674_v6 }
0x24cb   :  { %v11676_v22 = vpop.xlane.xlu0 %11675 }
0x24cc   :  { %vm11677_vm9 = vcmp.eq.f32.partialorder %v15981_v11, %v11676_v22  ;;  %vm11678_vm10 = vcmp.eq.f32.partialorder %v15982_v48, %v11676_v22 }
0x24cd   :  { %v11679_v12 = vsel %vm11677_vm9, %v19074_v35, 256  ;;  %v11680_v38 = vsel %vm11678_vm10, %v11673_v62, 256 }
0x24ce   :  { %vm11681_vm11 = vcmp.lt.s32.totalorder %v11679_v12, %v11680_v38 }
0x24cf   :  { %v11682_v15 = vsel %vm11681_vm11, %v11679_v12, %v11680_v38 }
0x24d0   :  { %v11684_v33 = vshra.s32 %v11682_v15, 16  ;;  %v11683_v45 = vand.u32 65535, %v11682_v15 }
0x24d2   :  { %v11686_v39 = vcvt.s32.f32 %v11684_v33  ;;  %v11685_v19 = vcvt.s32.f32 %v11683_v45 }
0x24d4   :  { %11687 = vmin.xlane.f32.xlu0 %v11686_v39 }
0x2561   :  { %v11688_v32 = vpop.xlane.xlu0 %11687 }
0x2562   :  { %vm11689_vm12 = vcmp.eq.f32.partialorder %v11686_v39, %v11688_v32  ;;  %v11694_v42 = vcvt.f32.s32 %v11688_v32 }
0x2563   :  { %v11690_v4 = vsel %vm11689_vm12, %v11685_v19, inf }
0x2564   :  { %11691 = vmin.xlane.f32.xlu1 %v11690_v4  ;;  %v11695_v8 = vshll.u32 %v11694_v42, 16 }
0x25f1   :  { %v11692_v51 = vpop.xlane.xlu1 %11691 }
0x25f2   :  { %v11693_v43 = vcvt.f32.s32 %v11692_v51 }
0x25f4   :  { %v11696_v53 = vadd.s32 %v11695_v8, %v11693_v43 }
0x25f6   :  { %vm11698_vm13 = vcmp.eq.s32.totalorder %v11673_v62, %v11696_v53  ;;  %vm11697_vm14 = vcmp.eq.s32.totalorder %v19074_v35, %v11696_v53 }
0x25f7   :  { %vm14664_vm15 = vmpackc.low %vm11698_vm13, %vm11698_vm13 }
0x25f8   :  { %14665 = vmatprep.mubr.msk.bf16.mxu0 %vm14664_vm15, %v17898_v14  ;;  %vm14666_vm9 = vmpackc.low %vm11697_vm14, %vm11697_vm14 }
0x25f9   :  { %14667 = vmatmul.mubr.msk.bf16.vlgmr.msra.gmra.mrb[0].mxu0 %vm14666_vm9, %v17898_v14 }
0x26cc   :  { %v15237_v41 = vpop.f32.mrb[0].mxu0 }
0x26cd   :  { %v15238_v29 = vpop.f32.mrb[1].mxu0 }
0x26ce   :  { %v15239_v31 = vadd.f32 %v15238_v29, %v15237_v41  ;;  %v15240_v56 = vpop.f32.mrb[2].mxu0 }
0x26cf   :  { %v15241_v0 = vpop.f32.mrb[3].mxu0 }
0x26d0   :  { %11873 = vst [vmem:[#allocation5] sm:$0xff] %v15239_v31 }
0x26d1 PF:  { %v19742_v60 = vmov 0.0   ;;  %v17337_v25 = vld [vmem:[#allocation23] sm:$0xff]   ;;  %17335 = vset.pattern.permute.xlu1 %v17893_v2  ;;  %17336 = vset.pattern.permute.xlu0 %v17893_v2  ;;  %v17338_v20 = vld [vmem:[#allocation23 + $0x8] sm:$0xff]   ;;  %v17339_v34 = vld [vmem:[#allocation23 + $0x10] sm:$0xff]   ;;  %s14668_s19 = sld [smem:[#allocation7 + $0x4]]  ;;  %s19744_s2 = sld [smem:[#allocation42_spill]] }
0x26d2   :  { %15833 = vmatprep.subr.bf16.mxu1 %v19742_v60  ;;  %15849 = vmatprep.mubr.msk.bf16.mxu1 %vm17894_vm0, %v19742_v60  ;;  %v19551_v24 = vld [vmem:[#allocation4] sm:$0xff]  ;;  %v17340_v1 = vld [vmem:[#allocation23 + $0x18] sm:$0xff]   ;;  %s19743_s7 = sld [smem:[#allocation43_spill]]  ;;  %v17343_v15 = vld [vmem:[#allocation23 + $0x30] sm:$0xff]   ;;  %s19745_s13 = sld [smem:[#allocation48_spill]] }
0x26d3   :  { %15834 = vmatpush3.bf16.msra.mxu1 %v17337_v25  ;;  %v12010_v63 = vrot.slane %v19551_v24, %v18377_v13  ;;  %v11996_v11 = vrot.slane %v19551_v24, %v18367_v44  ;;  %v12017_v30 = vrot.slane %v19551_v24, %v18959_v16  ;;  %v17341_v48 = vld [vmem:[#allocation23 + $0x20] sm:$0xff]   ;;  %v12003_v36 = vrot.slane %v19551_v24, %v18370_v46  ;;  %v17342_v6 = vld [vmem:[#allocation23 + $0x28] sm:$0xff]   ;;  %v17344_v17 = vld [vmem:[#allocation23 + $0x38] sm:$0xff]  }
0x26d4   :  { %15835 = vmatprep.subr.bf16.mxu1 %v19742_v60  ;;  %v12031_v27 = vrot.slane %v19551_v24, %v19023_v3  ;;  %v12024_v22 = vrot.slane %v19551_v24, %v19015_v10  ;;  %v12045_v38 = vrot.slane %v19551_v24, %v19030_v54  ;;  %v12038_v39 = vrot.slane %v19551_v24, %v19020_v23  ;;  %v14678_v37 = vld [vmem:[%s19685_s14] ss:$0 sm:$0xff]  ;;  %v12065_v49 = vld [vmem:[#allocation3 + $0x8] sm:$0xff]  ;;  %v12066_v19 = vld [vmem:[#allocation3 + $0x10] sm:$0xff] }
0x26d5   :  { %12012 = vbcast.lane.b32.xlu1 %v12010_v63, 256  ;;  %11998 = vbcast.lane.b32.xlu0 %v11996_v11, 256  ;;  %v12064_v45 = vld [vmem:[#allocation3] sm:$0xff]  ;;  %v12070_v8 = vld [vmem:[#allocation3 + $0x30] sm:$0xff]  ;;  %v12067_v31 = vld [vmem:[#allocation3 + $0x18] sm:$0xff] }
0x26d6   :  { %v12068_v32 = vld [vmem:[#allocation3 + $0x20] sm:$0xff] }
0x26d7   :  { %15836 = vmatpush3.bf16.msra.mxu1 %v17338_v20  ;;  %p11875_p9 = scmp.gt.s32.totalorder %s14668_s19, 0  ;;  %v11883_v12 = vld [vmem:[#allocation5] sm:$0xff] }
0x26d8   :  { %15837 = vmatprep.subr.bf16.mxu1 %v19742_v60  ;;  %v14669_v62 = vld [vmem:[%s19743_s7 + $0x20] sm:$0xff] }
0x26d9   :  { %12019 = vbcast.lane.b32.xlu1 %v12017_v30, 256  ;;  %s11876_s25 = scalar_select %p11875_p9, 1, 0  ;;  %12005 = vbcast.lane.b32.xlu0 %v12003_v36, 256 }
0x26db   :  { %15838 = vmatpush3.bf16.msra.mxu1 %v17339_v34  ;;  %s11877_s26 = scvt.s32.f32 %s11876_s25 }
0x26dc   :  { %15839 = vmatprep.subr.bf16.mxu1 %v19742_v60 }
0x26dd   :  { %12033 = vbcast.lane.b32.xlu1 %v12031_v27, 256  ;;  %v11880_v33 = vstv %s11877_s26  ;;  %s11882_s17 = ssub.f32 1.0, %s11877_s26  ;;  %12026 = vbcast.lane.b32.xlu0 %v12024_v22, 256  ;;  %v12069_v27 = vld [vmem:[#allocation3 + $0x28] sm:$0xff] }
0x26de   :  { %v11881_v50 = vmul.f32 %v14669_v62, %v11880_v33 }
0x26df   :  { %15840 = vmatpush3.bf16.msra.mxu1 %v17340_v1  ;;  %v11884_v52 = vstv %s11882_s17 }
0x26e0   :  { %15841 = vmatprep.subr.bf16.mxu1 %v19742_v60  ;;  %v11885_v40 = vmul.f32 %v11884_v52, %v11883_v12  ;;  %v14679_v52 = vld [vmem:[%s19687_s16] ss:$0 sm:$0xff] }
0x26e1   :  { %12047 = vbcast.lane.b32.xlu1 %v12045_v38, 256  ;;  %12040 = vbcast.lane.b32.xlu0 %v12038_v39, 256 }
0x26e2   :  { %v11886_v7 = vadd.f32 %v11885_v40, %v11881_v50 }
0x26e3   :  { %15842 = vmatpush3.bf16.msra.mxu1 %v17341_v48 }
0x26e4   :  { %15843 = vmatprep.subr.bf16.mxu1 %v19742_v60  ;;  %v19577_v57 = vpack.c.bf16 %v11886_v7, %v11886_v7 }
0x26e7   :  { %15844 = vmatpush3.bf16.msra.mxu1 %v17342_v6 }
0x26e8   :  { %15845 = vmatprep.subr.bf16.mxu1 %v19742_v60 }
0x26eb   :  { %15846 = vmatpush3.bf16.msra.mxu1 %v17343_v15  ;;  %v12071_v15 = vld [vmem:[#allocation3 + $0x38] sm:$0xff] }
0x26ec   :  { %15847 = vmatprep.subr.bf16.mxu1 %v19742_v60 }
0x26ef   :  { %15848 = vmatpush3.bf16.msra.mxu1 %v17344_v17 }
0x26f2   :  { %15850 = vmatmul.mubr.bf16.vlgmr.msra.gmra.mrb[0].mxu1 %v19577_v57 }
0x2747   :  { %v11999_v9 = vpop.permute.xlu0 %11998  ;;  %v12013_v58 = vpop.permute.xlu1 %12012 }
0x2748   :  { %v12058_v18 = vmul.f32 %v14678_v37, %v12013_v58  ;;  %v12056_v42 = vmul.f32 %v14678_v37, %v11999_v9 }
0x274b   :  { %v12006_v5 = vpop.permute.xlu0 %12005  ;;  %v12020_v21 = vpop.permute.xlu1 %12019 }
0x274c   :  { %v12057_v4 = vmul.f32 %v14678_v37, %v12006_v5  ;;  %v12059_v30 = vmul.f32 %v14678_v37, %v12020_v21 }
0x274f   :  { %v12027_v59 = vpop.permute.xlu0 %12026  ;;  %v12034_v25 = vpop.permute.xlu1 %12033 }
0x2750   :  { %v12060_v47 = vmul.f32 %v14678_v37, %v12027_v59  ;;  %v12061_v62 = vmul.f32 %v14678_v37, %v12034_v25  ;;  %v17378_v25 = vld [vmem:[#allocation24 + $0x20] ss:$12 sps:$4 sm:$0xff]  }
0x2753   :  { %v12041_v28 = vpop.permute.xlu0 %12040  ;;  %v12048_v38 = vpop.permute.xlu1 %12047 }
0x2754   :  { %v12062_v56 = vmul.f32 %v14678_v37, %v12041_v28  ;;  %v12063_v33 = vmul.f32 %v14678_v37, %v12048_v38  ;;  %v17376_v38 = vld [vmem:[#allocation24 + $0xdc] ss:$12 sps:$4 sm:$0xff]  }
0x27c5   :  { %v11987_v51 = vpop.f32.mrb[0].mxu1 }
0x27c6   :  { %v15851_v43 = vpop.f32.mrb[1].mxu1  ;;  %v12073_v53 = vadd.f32 %v12065_v49, %v11987_v51  ;;  %v12072_v14 = vadd.f32 %v12064_v45, %v11987_v51  ;;  %v12076_v41 = vadd.f32 %v12068_v32, %v11987_v51  ;;  %v12074_v29 = vadd.f32 %v12066_v19, %v11987_v51 }
0x27c7   :  { %v11990_v0 = vpop.f32.mrb[2].mxu1  ;;  %v12078_v11 = vadd.f32 %v12070_v8, %v11987_v51  ;;  %v12075_v36 = vadd.f32 %v12067_v31, %v11987_v51  ;;  %v12077_v12 = vadd.f32 %v12069_v27, %v11987_v51  ;;  %v12079_v50 = vadd.f32 %v12071_v15, %v11987_v51  ;;  %v17345_v51 = vld [vmem:[#allocation24] ss:$12 sps:$4 sm:$0xff]   ;;  %v17347_v8 = vld [vmem:[#allocation24 + $0x4] ss:$12 sps:$4 sm:$0xff]  }
0x27c8   :  { %v15852_v20 = vpop.f32.mrb[3].mxu1  ;;  %v12081_v34 = vadd.f32 %v12073_v53, %v12057_v4  ;;  %v12080_v1 = vadd.f32 %v12072_v14, %v12056_v42  ;;  %v12084_v63 = vadd.f32 %v12076_v41, %v12060_v47  ;;  %v12082_v48 = vadd.f32 %v12074_v29, %v12058_v18  ;;  %v14680_v42 = vld [vmem:[#allocation8] ss:$0 sm:$0xff]  ;;  %v17350_v43 = vld [vmem:[#allocation24 + $0x1c] ss:$12 sps:$4 sm:$0xff]   ;;  %12634 = vmatprep.subr.bf16.mxu1 %v17347_v8 }
0x27c9   :  { %v12086_v6 = vadd.f32 %v12078_v11, %v12062_v56  ;;  %v12083_v22 = vadd.f32 %v12075_v36, %v12059_v30  ;;  %v12085_v39 = vadd.f32 %v12077_v12, %v12061_v62  ;;  %v12087_v9 = vadd.f32 %v12079_v50, %v12063_v33  ;;  %12635 = vmatpush1.bf16.msra.mxu1 %v17345_v51  ;;  %v17348_v53 = vld [vmem:[#allocation24 + $0x18] ss:$12 sps:$4 sm:$0xff]   ;;  %v17353_v14 = vld [vmem:[#allocation24 + $0x34] ss:$12 sps:$4 sm:$0xff]   ;;  %v17351_v31 = vld [vmem:[#allocation24 + $0x30] ss:$12 sps:$4 sm:$0xff]  }
0x27ca   :  { %17513 = vtanh.f32 %v12081_v34  ;;  %12636 = vmatprep.subr.bf16.mxu1 %v17350_v43  ;;  %v17372_v41 = vld [vmem:[#allocation24 + $0xc8] ss:$12 sps:$4 sm:$0xff]   ;;  %v17377_v56 = vld [vmem:[#allocation24 + $0xe0] ss:$12 sps:$4 sm:$0xff]   ;;  %v17382_v20 = vld [vmem:[#allocation24 + $0xf8] ss:$12 sps:$4 sm:$0xff]  }
0x27cb   :  { %17515 = vtanh.f32 %v12080_v1  ;;  %v17373_v29 = vld [vmem:[#allocation24 + $0x8] ss:$12 sps:$4 sm:$0xff]   ;;  %v17356_v0 = vld [vmem:[#allocation24 + $0x4c] ss:$12 sps:$4 sm:$0xff]   ;;  %15252 = vmatprep.subr.bf16.mxu0 %v17372_v41  ;;  %v17359_v1 = vld [vmem:[#allocation24 + $0x64] ss:$12 sps:$4 sm:$0xff]  }
0x27cc   :  { %17517 = vtanh.f32 %v12084_v63  ;;  %15253 = vmatpush3.bf16.msra.mxu0 %v17373_v29  ;;  %v17354_v34 = vld [vmem:[#allocation24 + $0x48] ss:$12 sps:$4 sm:$0xff]   ;;  %v17383_v63 = vld [vmem:[#allocation24 + $0x38] ss:$12 sps:$4 sm:$0xff]   ;;  %v17357_v11 = vld [vmem:[#allocation24 + $0x60] ss:$12 sps:$4 sm:$0xff]  }
0x27cd   :  { %17519 = vtanh.f32 %v12082_v48  ;;  %12637 = vmatpush1.bf16.msra.mxu1 %v17348_v53  ;;  %15254 = vmatprep.subr.bf16.mxu0 %v17377_v56  ;;  %v17362_v30 = vld [vmem:[#allocation24 + $0x7c] ss:$12 sps:$4 sm:$0xff]   ;;  %v17360_v48 = vld [vmem:[#allocation24 + $0x78] ss:$12 sps:$4 sm:$0xff]   ;;  %v17365_v36 = vld [vmem:[#allocation24 + $0x94] ss:$12 sps:$4 sm:$0xff]  }
0x27ce   :  { %17521 = vtanh.f32 %v12086_v6  ;;  %12638 = vmatprep.subr.bf16.mxu1 %v17353_v14  ;;  %v17363_v27 = vld [vmem:[#allocation24 + $0x90] ss:$12 sps:$4 sm:$0xff]   ;;  %v17368_v6 = vld [vmem:[#allocation24 + $0xac] ss:$12 sps:$4 sm:$0xff]   ;;  %v17366_v62 = vld [vmem:[#allocation24 + $0xa8] ss:$12 sps:$4 sm:$0xff]  }
0x27cf   :  { %17523 = vtanh.f32 %v12083_v22  ;;  %v17371_v22 = vld [vmem:[#allocation24 + $0xc4] ss:$12 sps:$4 sm:$0xff]   ;;  %v17369_v12 = vld [vmem:[#allocation24 + $0xc0] ss:$12 sps:$4 sm:$0xff]  }
0x27d0   :  { %17525 = vtanh.f32 %v12085_v39  ;;  %15255 = vmatpush3.bf16.msra.mxu0 %v17378_v25  ;;  %v17374_v33 = vld [vmem:[#allocation24 + $0xd8] ss:$12 sps:$4 sm:$0xff]   ;;  %v17381_v50 = vld [vmem:[#allocation24 + $0xf4] ss:$12 sps:$4 sm:$0xff]  }
0x27d1   :  { %17527 = vtanh.f32 %v12087_v9  ;;  %12639 = vmatpush1.bf16.msra.mxu1 %v17351_v31  ;;  %15256 = vmatprep.subr.bf16.mxu0 %v17382_v20  ;;  %v12145_v53 = vld [vmem:[%s19744_s2] sm:$0xff] }
0x27d2   :  { %12640 = vmatprep.subr.bf16.mxu1 %v17356_v0 }
0x27d4   :  { %v17514_v40 = vpop.eup %17513  ;;  %15257 = vmatpush3.bf16.msra.mxu0 %v17383_v63 }
0x27d5   :  { %v17516_v17 = vpop.eup %17515  ;;  %v12104_v7 = vmul.f32 %v17514_v40, %v14679_v52  ;;  %12641 = vmatpush1.bf16.msra.mxu1 %v17354_v34  ;;  %v17379_v40 = vld [vmem:[#allocation24 + $0xf0] ss:$12 sps:$4 sm:$0xff]  }
0x27d6   :  { %v17518_v5 = vpop.eup %17517  ;;  %v12103_v58 = vmul.f32 %v17516_v17, %v14679_v52  ;;  %12642 = vmatprep.subr.bf16.mxu1 %v17359_v1 }
0x27d7   :  { %v17520_v59 = vpop.eup %17519  ;;  %12113 = vadd.xlane.f32.xlu1 %v12104_v7  ;;  %v12107_v21 = vmul.f32 %v17518_v5, %v14679_v52 }
0x27d8   :  { %12111 = vadd.xlane.f32.xlu0 %v12103_v58  ;;  %v17522_v37 = vpop.eup %17521  ;;  %v12105_v49 = vmul.f32 %v17520_v59, %v14679_v52 }
0x27d9   :  { %v17524_v45 = vpop.eup %17523  ;;  %v12109_v32 = vmul.f32 %v17522_v37, %v14679_v52  ;;  %12643 = vmatpush1.bf16.msra.mxu1 %v17357_v11 }
0x27da   :  { %v12106_v19 = vmul.f32 %v17524_v45, %v14679_v52  ;;  %v17526_v4 = vpop.eup %17525  ;;  %12644 = vmatprep.subr.bf16.mxu1 %v17362_v30 }
0x27db   :  { %12119 = vadd.xlane.f32.xlu1 %v12107_v21  ;;  %v12108_v47 = vmul.f32 %v17526_v4, %v14679_v52  ;;  %v17528_v28 = vpop.eup %17527 }
0x27dc   :  { %12115 = vadd.xlane.f32.xlu0 %v12105_v49  ;;  %v12110_v18 = vmul.f32 %v17528_v28, %v14679_v52 }
0x27dd   :  { %12645 = vmatpush1.bf16.msra.mxu1 %v17360_v48 }
0x27de   :  { %12646 = vmatprep.subr.bf16.mxu1 %v17365_v36 }
0x27df   :  { %12123 = vadd.xlane.f32.xlu1 %v12109_v32 }
0x27e0   :  { %12117 = vadd.xlane.f32.xlu0 %v12106_v19 }
0x27e1   :  { %12647 = vmatpush1.bf16.msra.mxu1 %v17363_v27 }
0x27e2   :  { %12648 = vmatprep.subr.bf16.mxu1 %v17368_v6 }
0x27e4   :  { %12121 = vadd.xlane.f32.xlu0 %v12108_v47 }
0x27e5   :  { %12649 = vmatpush1.bf16.msra.mxu1 %v17366_v62 }
0x27e6   :  { %12650 = vmatprep.subr.bf16.mxu1 %v17371_v22 }
0x27e8   :  { %12125 = vadd.xlane.f32.xlu0 %v12110_v18 }
0x27e9   :  { %12651 = vmatpush1.bf16.msra.mxu1 %v17369_v12 }
0x27ea   :  { %12652 = vmatprep.subr.bf16.mxu1 %v17376_v38 }
0x27ed   :  { %12653 = vmatpush1.bf16.msra.mxu1 %v17374_v33 }
0x27ee   :  { %12654 = vmatprep.subr.bf16.mxu1 %v17381_v50 }
0x27f0   :  { %12134 = vperm.xlu1 %17335, %v14680_v42  }
0x27f1   :  { %12655 = vmatpush1.bf16.msra.mxu1 %v17379_v40  ;;  %v17384_v40 = vld [vmem:[#allocation24 + $0x108] ss:$12 sps:$4 sm:$0xff]  }
0x2864   :  { %v12114_v15 = vpop.xlane.xlu1 %12113 }
0x2865   :  { %v12112_v39 = vpop.xlane.xlu0 %12111 }
0x2868   :  { %v12120_v52 = vpop.xlane.xlu1 %12119 }
0x2869   :  { %v12116_v17 = vpop.xlane.xlu0 %12115 }
0x286c   :  { %v12124_v7 = vpop.xlane.xlu1 %12123 }
0x286d   :  { %v12118_v9 = vpop.xlane.xlu0 %12117 }
0x2870   :  { %v12135_v5 = vpop.permute.xlu1 %12134 }
0x2871   :  { %v12137_v58 = vadd.f32 %v12135_v5, %v12112_v39  ;;  %v12138_v59 = vadd.f32 %v12135_v5, %v12114_v15  ;;  %v12139_v21 = vadd.f32 %v12135_v5, %v12116_v17  ;;  %v12140_v37 = vadd.f32 %v12135_v5, %v12118_v9  ;;  %v12122_v49 = vpop.xlane.xlu0 %12121  ;;  %v17386_v17 = vld [vmem:[#allocation24 + $0x10c] ss:$12 sps:$4 sm:$0xff]   ;;  %v17388_v9 = vld [vmem:[#allocation24 + $0x50] ss:$12 sps:$4 sm:$0xff]  }
0x2872   :  { %v12141_v45 = vadd.f32 %v12135_v5, %v12120_v52  ;;  %v12142_v47 = vadd.f32 %v12135_v5, %v12122_v49  ;;  %v12143_v28 = vadd.f32 %v12135_v5, %v12124_v7  ;;  %v17387_v7 = vld [vmem:[#allocation24 + $0x110] ss:$12 sps:$4 sm:$0xff]   ;;  %12656 = vmatprep.subr.bf16.mxu1 %v17386_v17  ;;  %v17393_v49 = vld [vmem:[#allocation24 + $0x68] ss:$12 sps:$4 sm:$0xff]  }
0x2873   :  { %v12158_v32 = vrot.slane %v12137_v58, %v19078_v55  ;;  %v12162_v19 = vrot.slane %v12138_v59, %v19078_v55  ;;  %v12166_v4 = vrot.slane %v12139_v21, %v19078_v55  ;;  %v12170_v18 = vrot.slane %v12140_v37, %v19078_v55  ;;  %15258 = vmatprep.subr.bf16.mxu0 %v17387_v7  ;;  %v17389_v58 = vld [vmem:[#allocation24 + $0x120] ss:$12 sps:$4 sm:$0xff]   ;;  %v17391_v59 = vld [vmem:[#allocation24 + $0x124] ss:$12 sps:$4 sm:$0xff]   ;;  %v17392_v21 = vld [vmem:[#allocation24 + $0x128] ss:$12 sps:$4 sm:$0xff]  }
0x2874   :  { %v12174_v8 = vrot.slane %v12141_v45, %v19078_v55  ;;  %v12178_v29 = vrot.slane %v12142_v47, %v19078_v55  ;;  %v12182_v56 = vrot.slane %v12143_v28, %v19078_v55  ;;  %12657 = vmatpush1.bf16.msra.mxu1 %v17384_v40  ;;  %15259 = vmatpush3.bf16.msra.mxu0 %v17388_v9  ;;  %v17396_v47 = vld [vmem:[#allocation24 + $0x13c] ss:$12 sps:$4 sm:$0xff]   ;;  %v17397_v28 = vld [vmem:[#allocation24 + $0x140] ss:$12 sps:$4 sm:$0xff]  }
0x2875   :  { %v12187_v42 = vsel %vm5332_vm2, %v12162_v19, %v12158_v32  ;;  %v12126_v51 = vpop.xlane.xlu0 %12125  ;;  %vm12146_vm2 = vcmp.gt.f32.partialorder %v12145_v53, 0.5  ;;  %12658 = vmatprep.subr.bf16.mxu1 %v17391_v59  ;;  %15260 = vmatprep.subr.bf16.mxu0 %v17392_v21  ;;  %v17403_v53 = vld [vmem:[#allocation24 + $0x98] ss:$12 sps:$4 sm:$0xff]  }
0x2876   :  { %v12188_v43 = vsel %vm5334_vm3, %v12166_v4, %v12187_v42  ;;  %v12144_v14 = vadd.f32 %v12135_v5, %v12126_v51  ;;  %v17394_v4 = vld [vmem:[#allocation24 + $0x138] ss:$12 sps:$4 sm:$0xff]   ;;  %v17401_v51 = vld [vmem:[#allocation24 + $0x154] ss:$12 sps:$4 sm:$0xff]  }
0x2877   :  { %v12189_v41 = vsel %vm5336_vm4, %v12170_v18, %v12188_v43  ;;  %v17398_v18 = vld [vmem:[#allocation24 + $0x80] ss:$12 sps:$4 sm:$0xff]   ;;  %v17399_v43 = vld [vmem:[#allocation24 + $0x150] ss:$12 sps:$4 sm:$0xff]  }
0x2878   :  { %v12190_v31 = vsel %vm5338_vm5, %v12174_v8, %v12189_v41  ;;  %v12186_v25 = vrot.slane %v12144_v14, %v19078_v55  ;;  %12659 = vmatpush1.bf16.msra.mxu1 %v17389_v58  ;;  %15261 = vmatpush3.bf16.msra.mxu0 %v17393_v49  ;;  %v17402_v8 = vld [vmem:[#allocation24 + $0x158] ss:$12 sps:$4 sm:$0xff]   ;;  %v17409_v49 = vld [vmem:[#allocation26] ss:$12 sps:$4 sm:$0xff]  }
0x2879   :  { %v12191_v0 = vsel %vm5340_vm6, %v12178_v29, %v12190_v31  ;;  %12660 = vmatprep.subr.bf16.mxu1 %v17396_v47  ;;  %15262 = vmatprep.subr.bf16.mxu0 %v17397_v28  ;;  %v17406_v29 = vld [vmem:[#allocation24 + $0x16c] ss:$12 sps:$4 sm:$0xff]   ;;  %v17407_v31 = vld [vmem:[#allocation24 + $0x170] ss:$12 sps:$4 sm:$0xff]   ;;  %v17419_v47 = vld [vmem:[#allocation26 + $0x34] ss:$12 sps:$4 sm:$0xff]  }
0x287a   :  { %v12192_v20 = vsel %vm5342_vm7, %v12182_v56, %v12191_v0  ;;  %v17404_v56 = vld [vmem:[#allocation24 + $0x168] ss:$12 sps:$4 sm:$0xff]   ;;  %v17411_v0 = vld [vmem:[#allocation26 + $0x4] ss:$12 sps:$4 sm:$0xff]  }
0x287b   :  { %v12193_v34 = vsel %vm5344_vm8, %v12186_v25, %v12192_v20  ;;  %v12280_v17 = vld [vmem:[#allocation2 + $0x38] sm:$0xff] }
0x287c   :  { %v12195_v1 = vsel %vm12146_vm2, %v12193_v34, -1e+30  ;;  %12661 = vmatpush1.bf16.msra.mxu1 %v17394_v4  ;;  %15263 = vmatpush3.bf16.msra.mxu0 %v17398_v18  ;;  %v17416_v4 = vld [vmem:[#allocation26 + $0x20] ss:$12 sps:$4 sm:$0xff]   ;;  %v17417_v28 = vld [vmem:[#allocation26 + $0x30] ss:$12 sps:$4 sm:$0xff]  }
0x287d   :  { %v12196_v63 = vsel %vm5012_vm1, %v12195_v1, -inf  ;;  %12662 = vmatprep.subr.bf16.mxu1 %v17401_v51  ;;  %15264 = vmatprep.subr.bf16.mxu0 %v17402_v8  ;;  %v17420_v18 = vld [vmem:[#allocation26 + $0x38] ss:$12 sps:$4 sm:$0xff]   ;;  %v17424_v51 = vld [vmem:[#allocation26 + $0x50] ss:$12 sps:$4 sm:$0xff]  }
0x287e   :  { %v12197_v11 = vrot.slane %v12196_v63, 4  ;;  %v17427_v8 = vld [vmem:[#allocation26 + $0x64] ss:$12 sps:$4 sm:$0xff]  }
0x2880   :  { %v12198_v30 = vmax.f32 %v12196_v63, %v12197_v11  ;;  %12663 = vmatpush1.bf16.msra.mxu1 %v17399_v43  ;;  %15265 = vmatpush3.bf16.msra.mxu0 %v17403_v53  ;;  %v17425_v43 = vld [vmem:[#allocation26 + $0x60] ss:$12 sps:$4 sm:$0xff]   ;;  %v17428_v53 = vld [vmem:[#allocation26 + $0x68] ss:$12 sps:$4 sm:$0xff]  }
0x2881   :  { %12664 = vmatprep.subr.bf16.mxu1 %v17406_v29  ;;  %15266 = vmatprep.subr.bf16.mxu0 %v17407_v31  ;;  %v17432_v29 = vld [vmem:[#allocation26 + $0x80] ss:$12 sps:$4 sm:$0xff]  }
0x2882   :  { %v12199_v48 = vrot.slane %v12198_v30, 2  ;;  %v17435_v31 = vld [vmem:[#allocation26 + $0x94] ss:$12 sps:$4 sm:$0xff]  }
0x2884   :  { %v12200_v36 = vmax.f32 %v12198_v30, %v12199_v48  ;;  %12665 = vmatpush1.bf16.msra.mxu1 %v17404_v56  ;;  %v12275_v30 = vld [vmem:[#allocation2 + $0x10] sm:$0xff] }
0x2885   :  { %12892 = vmatprep.subr.bf16.mxu1 %v17411_v0  ;;  %v17433_v56 = vld [vmem:[#allocation26 + $0x90] ss:$12 sps:$4 sm:$0xff]   ;;  %v17439_v0 = vld [vmem:[#allocation26 + $0xac] ss:$12 sps:$4 sm:$0xff]  }
0x2886   :  { %v12201_v27 = vrot.slane %v12200_v36, 1 }
0x2888   :  { %v12202_v6 = vmax.f32 %v12200_v36, %v12201_v27  ;;  %v12276_v36 = vld [vmem:[#allocation2 + $0x18] sm:$0xff] }
0x288a   :  { %v12203_v62 = vsub.f32 %v12195_v1, %v12202_v6 }
0x288c   :  { %v12204_v22 = vmul.f32 1.442695, %v12203_v62 }
0x288e   :  { %17529 = vpow2.f32 %v12204_v22 }
0x2898   :  { %v17530_v12 = vpop.eup %17529 }
0x2899   :  { %v12206_v38 = vsel %vm5012_vm1, %v17530_v12, 0.0 }
0x289a   :  { %v12207_v55 = vrot.slane %v12206_v38, 4 }
0x289c   :  { %v12208_v15 = vadd.f32 %v12207_v55, %v12206_v38  ;;  %v12278_v38 = vld [vmem:[#allocation2 + $0x28] sm:$0xff] }
0x289e   :  { %v12209_v33 = vrot.slane %v12208_v15, 2 }
0x28a0   :  { %v12210_v39 = vadd.f32 %v12209_v33, %v12208_v15 }
0x28a2   :  { %v12211_v50 = vrot.slane %v12210_v39, 1 }
0x28a4   :  { %v12212_v52 = vadd.f32 %v12211_v50, %v12210_v39  ;;  %v12279_v39 = vld [vmem:[#allocation2 + $0x30] sm:$0xff] }
0x28a6   :  { %17531 = vrcp.f32 %v12212_v52 }
0x28b0   :  { %v17532_v5 = vpop.eup %17531 }
0x28b1   :  { %v12214_v37 = vmul.f32 %v17532_v5, %v17530_v12 }
0x28b3   :  { %v12215_v45 = vadd.f32 %v12214_v37, %v19551_v24  ;;  %v12227_v32 = vrot.slane %v12214_v37, %v18370_v46  ;;  %v12220_v19 = vrot.slane %v12214_v37, %v18367_v44  ;;  %v12234_v42 = vrot.slane %v12214_v37, %v18377_v13 }
0x28b4   :  { %v12241_v24 = vrot.slane %v12214_v37, %v18959_v16  ;;  %v12248_v14 = vrot.slane %v12214_v37, %v19015_v10  ;;  %v12255_v41 = vrot.slane %v12214_v37, %v19023_v3  ;;  %v17408_v16 = vld [vmem:[#allocation24 + $0xb0] ss:$12 sps:$4 sm:$0xff]   ;;  %v12262_v25 = vrot.slane %v12214_v37, %v19020_v23  ;;  %v12273_v3 = vld [vmem:[#allocation2] sm:$0xff] }
0x28b5   :  { %12216 = vst.msk [vmem:[#allocation4] sm:$0xff] %vm5012_vm1, %v12215_v45  ;;  %12229 = vbcast.lane.b32.xlu1 %v12227_v32, 256  ;;  %12222 = vbcast.lane.b32.xlu0 %v12220_v19, 256  ;;  %v12269_v20 = vrot.slane %v12214_v37, %v19030_v54  ;;  %v12274_v10 = vld [vmem:[#allocation2 + $0x8] sm:$0xff]  ;;  %v12277_v54 = vld [vmem:[#allocation2 + $0x20] sm:$0xff] }
0x28b6   :  { %15267 = vmatpush3.bf16.msra.mxu0 %v17408_v16  ;;  %v17412_v45 = vld [vmem:[#allocation26 + $0x8] ss:$12 sps:$4 sm:$0xff]   ;;  %v17413_v19 = vld [vmem:[#allocation26 + $0x18] ss:$12 sps:$4 sm:$0xff]  }
0x28b7   :  { %15853 = vmatprep.subr.bf16.mxu0 %v19742_v60  ;;  %v17415_v32 = vld [vmem:[#allocation26 + $0x1c] ss:$12 sps:$4 sm:$0xff]   ;;  %v17436_v16 = vld [vmem:[#allocation26 + $0x98] ss:$12 sps:$4 sm:$0xff]  }
0x28b9   :  { %12236 = vbcast.lane.b32.xlu1 %v12234_v42, 256  ;;  %12243 = vbcast.lane.b32.xlu0 %v12241_v24, 256  ;;  %v17423_v42 = vld [vmem:[#allocation26 + $0x4c] ss:$12 sps:$4 sm:$0xff]   ;;  %v17421_v24 = vld [vmem:[#allocation26 + $0x48] ss:$12 sps:$4 sm:$0xff]  }
0x28bd   :  { %12250 = vbcast.lane.b32.xlu1 %v12248_v14, 256  ;;  %12257 = vbcast.lane.b32.xlu0 %v12255_v41, 256  ;;  %v17431_v14 = vld [vmem:[#allocation26 + $0x7c] ss:$12 sps:$4 sm:$0xff]   ;;  %v17429_v41 = vld [vmem:[#allocation26 + $0x78] ss:$12 sps:$4 sm:$0xff]  }
0x28c1   :  { %12264 = vbcast.lane.b32.xlu1 %v12262_v25, 256  ;;  %12271 = vbcast.lane.b32.xlu0 %v12269_v20, 256  ;;  %v17437_v25 = vld [vmem:[#allocation26 + $0xa8] ss:$12 sps:$4 sm:$0xff]   ;;  %v17440_v20 = vld [vmem:[#allocation26 + $0xb0] ss:$12 sps:$4 sm:$0xff]  }
0x2927   :  { %v12230_v34 = vpop.permute.xlu1 %12229  ;;  %v12223_v1 = vpop.permute.xlu0 %12222 }
0x2928   :  { %v12282_v63 = vmul.f32 %v12274_v10, %v12230_v34  ;;  %v12281_v11 = vmul.f32 %v12273_v3, %v12223_v1  ;;  %v17443_v10 = vld [vmem:[#allocation27 + $0x4] ss:$8 sps:$4 sm:$0xff]   ;;  %v17441_v3 = vld [vmem:[#allocation27] ss:$8 sps:$4 sm:$0xff]   ;;  %v17446_v34 = vld [vmem:[#allocation27 + $0x14] ss:$8 sps:$4 sm:$0xff]  }
0x2929   :  { %v17444_v1 = vld [vmem:[#allocation27 + $0x10] ss:$8 sps:$4 sm:$0xff]  }
0x292a   :  { %v12289_v23 = vadd.f32 %v12282_v63, %v12281_v11  ;;  %v17447_v63 = vld [vmem:[#allocation27 + $0x20] ss:$8 sps:$4 sm:$0xff]   ;;  %v17449_v11 = vld [vmem:[#allocation27 + $0x24] ss:$8 sps:$4 sm:$0xff]  }
0x292b   :  { %v12237_v48 = vpop.permute.xlu1 %12236  ;;  %v12244_v27 = vpop.permute.xlu0 %12243 }
0x292c   :  { %v12283_v6 = vmul.f32 %v12275_v30, %v12237_v48  ;;  %v12284_v22 = vmul.f32 %v12276_v36, %v12244_v27  ;;  %v17452_v30 = vld [vmem:[#allocation27 + $0x34] ss:$8 sps:$4 sm:$0xff]   ;;  %v17455_v48 = vld [vmem:[#allocation27 + $0x44] ss:$8 sps:$4 sm:$0xff]   ;;  %v17453_v36 = vld [vmem:[#allocation27 + $0x40] ss:$8 sps:$4 sm:$0xff]  }
0x292d   :  { %v17458_v27 = vld [vmem:[#allocation27 + $0x54] ss:$8 sps:$4 sm:$0xff]  }
0x292e   :  { %v12290_v62 = vadd.f32 %v12289_v23, %v12283_v6  ;;  %v17461_v23 = vld [vmem:[#allocation27 + $0x64] ss:$8 sps:$4 sm:$0xff]   ;;  %v17459_v6 = vld [vmem:[#allocation27 + $0x60] ss:$8 sps:$4 sm:$0xff]  }
0x292f   :  { %v12251_v12 = vpop.permute.xlu1 %12250  ;;  %v12258_v55 = vpop.permute.xlu0 %12257 }
0x2930   :  { %v12291_v15 = vadd.f32 %v12290_v62, %v12284_v22  ;;  %v12285_v33 = vmul.f32 %v12277_v54, %v12251_v12  ;;  %v12286_v52 = vmul.f32 %v12278_v38, %v12258_v55  ;;  %v17464_v54 = vld [vmem:[#allocation27 + $0x74] ss:$8 sps:$4 sm:$0xff]   ;;  %v17462_v62 = vld [vmem:[#allocation27 + $0x70] ss:$8 sps:$4 sm:$0xff]   ;;  %v17467_v22 = vld [vmem:[#allocation27 + $0x84] ss:$8 sps:$4 sm:$0xff]  }
0x2931   :  { %v17465_v12 = vld [vmem:[#allocation27 + $0x80] ss:$8 sps:$4 sm:$0xff]   ;;  %v17470_v38 = vld [vmem:[#allocation27 + $0x94] ss:$8 sps:$4 sm:$0xff]   ;;  %v17468_v55 = vld [vmem:[#allocation27 + $0x90] ss:$8 sps:$4 sm:$0xff]  }
0x2932   :  { %v12292_v50 = vadd.f32 %v12291_v15, %v12285_v33  ;;  %v17473_v15 = vld [vmem:[#allocation27 + $0xa4] ss:$8 sps:$4 sm:$0xff]   ;;  %v17471_v33 = vld [vmem:[#allocation27 + $0xa0] ss:$8 sps:$4 sm:$0xff]  }
0x2933   :  { %v12265_v40 = vpop.permute.xlu1 %12264  ;;  %v12272_v7 = vpop.permute.xlu0 %12271 }
0x2934   :  { %v12293_v9 = vadd.f32 %v12292_v50, %v12286_v52  ;;  %v12287_v5 = vmul.f32 %v12279_v39, %v12265_v40  ;;  %v12288_v59 = vmul.f32 %v12280_v17, %v12272_v7  ;;  %v17474_v39 = vld [vmem:[#allocation27 + $0xb0] ss:$8 sps:$4 sm:$0xff]   ;;  %v17476_v50 = vld [vmem:[#allocation27 + $0xb4] ss:$8 sps:$4 sm:$0xff]   ;;  %v17479_v52 = vld [vmem:[#allocation27 + $0xc4] ss:$8 sps:$4 sm:$0xff]  }
0x2935   :  { %v17477_v40 = vld [vmem:[#allocation27 + $0xc0] ss:$8 sps:$4 sm:$0xff]   ;;  %v17482_v17 = vld [vmem:[#allocation27 + $0xd4] ss:$8 sps:$4 sm:$0xff]   ;;  %v17480_v7 = vld [vmem:[#allocation27 + $0xd0] ss:$8 sps:$4 sm:$0xff]  }
0x2936   :  { %v12294_v58 = vadd.f32 %v12293_v9, %v12287_v5  ;;  %v17485_v9 = vld [vmem:[#allocation27 + $0xe4] ss:$8 sps:$4 sm:$0xff]   ;;  %v17483_v5 = vld [vmem:[#allocation27 + $0xe0] ss:$8 sps:$4 sm:$0xff]  }
0x2938   :  { %v12295_v21 = vadd.f32 %v12294_v58, %v12288_v59  ;;  %v17488_v58 = vld [vmem:[#allocation27 + $0xf4] ss:$8 sps:$4 sm:$0xff]   ;;  %v17486_v59 = vld [vmem:[#allocation27 + $0xf0] ss:$8 sps:$4 sm:$0xff]  }
0x293a   :  { %v19617_v37 = vpack.c.bf16 %v12295_v21, %v12295_v21  ;;  %v17491_v21 = vld [vmem:[#allocation27 + $0x104] ss:$8 sps:$4 sm:$0xff]  }
0x293c   :  { %12666 = vmatprep.mubr.bf16.mxu1 %v19617_v37  ;;  %12707 = vmatprep.mubr.bf16.mxu0 %v19617_v37 }
0x293d   :  { %12667 = vmatmul.mubr.bf16.vlgmr.msra.gmra.mrb[4].mxu1 %v19577_v57  ;;  %12708 = vmatmul.mubr.bf16.vlgmr.msra.gmra.mrb[0].mxu0 %v19577_v57 }
0x293e   :  { %12893 = vmatpush1.bf16.msra.mxu1 %v17409_v49  ;;  %15854 = vmatpush3.bf16.msra.mxu0 %v17412_v45 }
0x293f   :  { %12894 = vmatprep.subr.bf16.mxu1 %v17415_v32  ;;  %15855 = vmatprep.subr.bf16.mxu0 %v19742_v60 }
0x2940   :  { %12924 = vmatprep.mubr.bf16.mxu1 %v17893_v2  ;;  %15869 = vmatprep.mubr.msk.bf16.mxu0 %vm17894_vm0, %v19742_v60 }
0x2942   :  { %12895 = vmatpush1.bf16.msra.mxu1 %v17413_v19  ;;  %15856 = vmatpush3.bf16.msra.mxu0 %v17416_v4  ;;  %v12361_v4 = vld [vmem:[%s19745_s13] sm:$0x7] }
0x2943   :  { %12896 = vmatprep.subr.bf16.mxu1 %v17419_v47  ;;  %15857 = vmatprep.subr.bf16.mxu0 %v19742_v60  ;;  %v12747_v47 = vld [vmem:[%s19691_s21] sm:$0x7]  ;;  %s14803_s21 = sld [smem:[#allocation7 + $0x5]] }
0x2946   :  { %12897 = vmatpush1.bf16.msra.mxu1 %v17417_v28  ;;  %15858 = vmatpush3.bf16.msra.mxu0 %v17420_v18  ;;  %v12366_v28 = vrot.slane %v12361_v4, %v18367_v44  ;;  %v12752_v18 = vrot.slane %v12747_v47, %v18367_v44 }
0x2947   :  { %12898 = vmatprep.subr.bf16.mxu1 %v17423_v42  ;;  %15859 = vmatprep.subr.bf16.mxu0 %v19742_v60  ;;  %v12370_v42 = vrot.slane %v12361_v4, %v18370_v46 }
0x2949   :  { %p14804_p10 = scmp.ne.s32.totalorder %s14803_s21, 0 }
0x294a   :  { %12899 = vmatpush1.bf16.msra.mxu1 %v17421_v24  ;;  %15860 = vmatpush3.bf16.msra.mxu0 %v17424_v51  ;;  %v12756_v24 = vrot.slane %v12747_v47, %v18370_v46  ;;  %v15991_v51 = vadd.f32 %v12752_v18, %v12366_v28  ;;  %v13385_v28 = vadd.s32 (!%p14804_p10), 128, %v19074_v35 }
0x294b   :  { %12900 = vmatprep.subr.bf16.mxu1 %v17427_v8  ;;  %15861 = vmatprep.subr.bf16.mxu0 %v19742_v60 }
0x294e   :  { %12901 = vmatpush1.bf16.msra.mxu1 %v17425_v43  ;;  %15862 = vmatpush3.bf16.msra.mxu0 %v17428_v53  ;;  %v15993_v43 = vadd.f32 %v12756_v24, %v12370_v42 }
0x294f   :  { %12902 = vmatprep.subr.bf16.mxu1 %v17431_v14  ;;  %15863 = vmatprep.subr.bf16.mxu0 %v19742_v60 }
0x2952   :  { %12903 = vmatpush1.bf16.msra.mxu1 %v17429_v41  ;;  %15864 = vmatpush3.bf16.msra.mxu0 %v17432_v29 }
0x2953   :  { %12904 = vmatprep.subr.bf16.mxu1 %v17435_v31  ;;  %15865 = vmatprep.subr.bf16.mxu0 %v19742_v60 }
0x2956   :  { %12905 = vmatpush1.bf16.msra.mxu1 %v17433_v56  ;;  %15866 = vmatpush3.bf16.msra.mxu0 %v17436_v16 }
0x2957   :  { %12906 = vmatprep.subr.bf16.mxu1 %v17439_v0  ;;  %15867 = vmatprep.subr.bf16.mxu0 %v19742_v60  ;;  %v17450_v60 = vld [vmem:[#allocation27 + $0x30] ss:$8 sps:$4 sm:$0xff]  }
0x295a   :  { %12907 = vmatpush1.bf16.msra.mxu1 %v17437_v25  ;;  %15868 = vmatpush3.bf16.msra.mxu0 %v17440_v20 }
0x295b   :  { %13295 = vmatprep.subr.bf16.mxu0 %v17443_v10 }
0x295d   :  { %12925 = vmatmul.mubr.bf16.vlgmr.msra.gmra.mrb[4].mxu1 %v19531_v61  ;;  %15870 = vmatmul.mubr.bf16.vlgmr.msra.gmra.mrb[4].mxu0 %v19531_v61  ;;  %v17456_v61 = vld [vmem:[#allocation27 + $0x50] ss:$8 sps:$4 sm:$0xff]  }
0x295e   :  { %13327 = vmatprep.mubr.bf16.mxu0 %v19617_v37  ;;  %13296 = vmatpush1.bf16.msra.mxu0 %v17441_v3 }
0x295f   :  { %13297 = vmatprep.subr.bf16.mxu0 %v17446_v34 }
0x2962   :  { %13298 = vmatpush1.bf16.msra.mxu0 %v17444_v1  ;;  %v12760_v1 = vrot.slane %v12747_v47, %v18377_v13 }
0x2963   :  { %13299 = vmatprep.subr.bf16.mxu0 %v17449_v11  ;;  %v12374_v11 = vrot.slane %v12361_v4, %v18377_v13  ;;  %v17492_v13 = vld [vmem:[#allocation27 + $0x110] ss:$8 sps:$4 sm:$0xff]  }
0x2966   :  { %13300 = vmatpush1.bf16.msra.mxu0 %v17447_v63 }
0x2967   :  { %13301 = vmatprep.subr.bf16.mxu0 %v17452_v30 }
0x296a   :  { %13302 = vmatpush1.bf16.msra.mxu0 %v17450_v60 }
0x296b   :  { %13303 = vmatprep.subr.bf16.mxu0 %v17455_v48 }
0x296e   :  { %13304 = vmatpush1.bf16.msra.mxu0 %v17453_v36 }
0x296f   :  { %13305 = vmatprep.subr.bf16.mxu0 %v17458_v27 }
0x2972   :  { %13306 = vmatpush1.bf16.msra.mxu0 %v17456_v61 }
0x2973   :  { %13307 = vmatprep.subr.bf16.mxu0 %v17461_v23 }
0x2976   :  { %13308 = vmatpush1.bf16.msra.mxu0 %v17459_v6 }
0x2977   :  { %13309 = vmatprep.subr.bf16.mxu0 %v17464_v54 }
0x297a   :  { %13310 = vmatpush1.bf16.msra.mxu0 %v17462_v62 }
0x297b   :  { %13311 = vmatprep.subr.bf16.mxu0 %v17467_v22 }
0x297e   :  { %13312 = vmatpush1.bf16.msra.mxu0 %v17465_v12 }
0x297f   :  { %13313 = vmatprep.subr.bf16.mxu0 %v17470_v38  ;;  %v17489_v38 = vld [vmem:[#allocation27 + $0x100] ss:$8 sps:$4 sm:$0xff]  }
0x2982   :  { %13314 = vmatpush1.bf16.msra.mxu0 %v17468_v55 }
0x2983   :  { %13315 = vmatprep.subr.bf16.mxu0 %v17473_v15  ;;  %v17494_v15 = vld [vmem:[#allocation27 + $0x114] ss:$8 sps:$4 sm:$0xff]  }
0x2986   :  { %13316 = vmatpush1.bf16.msra.mxu0 %v17471_v33  ;;  %v17497_v33 = vld [vmem:[#allocation27 + $0x124] ss:$8 sps:$4 sm:$0xff]  }
0x2987   :  { %13317 = vmatprep.subr.bf16.mxu0 %v17476_v50  ;;  %v17500_v50 = vld [vmem:[#allocation27 + $0x134] ss:$8 sps:$4 sm:$0xff]  }
0x298a   :  { %13318 = vmatpush1.bf16.msra.mxu0 %v17474_v39  ;;  %v17495_v39 = vld [vmem:[#allocation27 + $0x120] ss:$8 sps:$4 sm:$0xff]  }
0x298b   :  { %13319 = vmatprep.subr.bf16.mxu0 %v17479_v52  ;;  %v17498_v52 = vld [vmem:[#allocation27 + $0x130] ss:$8 sps:$4 sm:$0xff]  }
0x298e   :  { %13320 = vmatpush1.bf16.msra.mxu0 %v17477_v40  ;;  %v17503_v40 = vld [vmem:[#allocation27 + $0x144] ss:$8 sps:$4 sm:$0xff]  }
0x298f   :  { %13321 = vmatprep.subr.bf16.mxu0 %v17482_v17  ;;  %v17506_v17 = vld [vmem:[#allocation27 + $0x154] ss:$8 sps:$4 sm:$0xff]  }
0x2992   :  { %13322 = vmatpush1.bf16.msra.mxu0 %v17480_v7  ;;  %v17504_v7 = vld [vmem:[#allocation27 + $0x150] ss:$8 sps:$4 sm:$0xff]  }
0x2993   :  { %13323 = vmatprep.subr.bf16.mxu0 %v17485_v9  ;;  %v17509_v9 = vld [vmem:[#allocation27 + $0x164] ss:$8 sps:$4 sm:$0xff]  }
0x2996   :  { %13324 = vmatpush1.bf16.msra.mxu0 %v17483_v5  ;;  %v17512_v5 = vld [vmem:[#allocation27 + $0x174] ss:$8 sps:$4 sm:$0xff]  }
0x2997   :  { %13325 = vmatprep.subr.bf16.mxu0 %v17488_v58  ;;  %v17510_v58 = vld [vmem:[#allocation27 + $0x170] ss:$8 sps:$4 sm:$0xff]  }
0x299a   :  { %13326 = vmatpush1.bf16.msra.mxu0 %v17486_v59  ;;  %v13043_v59 = vld [vmem:[%s19693_s23] sm:$0x3] }
0x299b   :  { %13336 = vmatprep.subr.bf16.mxu0 %v17491_v21  ;;  %v13048_v21 = vrot.slane %v13043_v59, %v18367_v44 }
0x2a10   :  { %v15268_v37 = vpop.f32.mrb[0].mxu0 }
0x2a11   :  { %v15269_v49 = vpop.f32.mrb[1].mxu0 }
0x2a12   :  { %v15270_v45 = vadd.f32 %v15269_v49, %v15268_v37  ;;  %v15271_v32 = vpop.f32.mrb[2].mxu0  ;;  %v13052_v37 = vrot.slane %v13043_v59, %v18370_v46 }
0x2a13   :  { %v15272_v19 = vpop.f32.mrb[3].mxu0 }
0x2a14   :  { %v12710_v36 = vadd.f32 %v15270_v45, %v12374_v11  ;;  %v17556_v11 = vld [vmem:[#allocation12 + $0x30] sm:$0xff] (!%p14804_p10)  }
0x2a30   :  { %v12926_v8 = vpop.f32.mrb[4].mxu1  ;;  %v12967_v53 = vpop.f32.mrb[4].mxu0 }
0x2a31   :  { %v15992_v14 = vadd.f32 %v15991_v51, %v12926_v8  ;;  %v12928_v41 = vpop.f32.mrb[5].mxu1  ;;  %v15871_v29 = vpop.f32.mrb[5].mxu0  ;;  %v12968_v60 = vadd.f32 %v12967_v53, %v12760_v1  ;;  %v17543_v8 = vld [vmem:[#allocation12 + $0x40] sm:$0xff] (!%p14804_p10)   ;;  %v17545_v53 = vld [vmem:[#allocation12 + $0x48] sm:$0xff] (!%p14804_p10)  }
0x2a32   :  { %v12930_v31 = vpop.f32.mrb[6].mxu1  ;;  %v12970_v56 = vpop.f32.mrb[6].mxu0  ;;  %v15994_v20 = vadd.f32 %v15993_v43, %v12928_v41  ;;  %v17544_v43 = vld [vmem:[#allocation12] sm:$0xff] (!%p14804_p10)   ;;  %v17547_v41 = vld [vmem:[#allocation12 + $0x50] sm:$0xff] (!%p14804_p10)  }
0x2a33   :  { %v14753_v16 = vmul.f32 -1.442695, %v15992_v14  ;;  %v12931_v0 = vpop.f32.mrb[7].mxu1  ;;  %v15872_v25 = vpop.f32.mrb[7].mxu0  ;;  %v17546_v14 = vld [vmem:[#allocation12 + $0x8] sm:$0xff] (!%p14804_p10)   ;;  %v17548_v29 = vld [vmem:[#allocation12 + $0x10] sm:$0xff] (!%p14804_p10)  }
0x2a34   :  { %v14754_v10 = vmul.f32 -1.442695, %v15994_v20  ;;  %v17549_v31 = vld [vmem:[#allocation12 + $0x58] sm:$0xff] (!%p14804_p10)   ;;  %v17552_v0 = vld [vmem:[#allocation12 + $0x20] sm:$0xff] (!%p14804_p10)   ;;  %v17553_v25 = vld [vmem:[#allocation12 + $0x68] sm:$0xff] (!%p14804_p10)  }
0x2a35   :  { %17533 = vpow2.f32 %v14753_v16  ;;  %v17550_v56 = vld [vmem:[#allocation12 + $0x18] sm:$0xff] (!%p14804_p10)   ;;  %v17551_v16 = vld [vmem:[#allocation12 + $0x60] sm:$0xff] (!%p14804_p10)   ;;  %v17554_v20 = vld [vmem:[#allocation12 + $0x28] sm:$0xff] (!%p14804_p10)  }
0x2a36   :  { %17535 = vpow2.f32 %v14754_v10  ;;  %v17555_v10 = vld [vmem:[#allocation12 + $0x70] sm:$0xff] (!%p14804_p10)  }
0x2a3f   :  { %v17534_v3 = vpop.eup %17533 }
0x2a40   :  { %v12977_v34 = vadd.f32 1.0, %v17534_v3  ;;  %v17536_v63 = vpop.eup %17535 }
0x2a41   :  { %v12984_v30 = vadd.f32 1.0, %v17536_v63 }
0x2a42   :  { %17537 = vrcp.f32 %v12977_v34 }
0x2a43   :  { %17539 = vrcp.f32 %v12984_v30  ;;  %v17557_v30 = vld [vmem:[#allocation12 + $0x78] sm:$0xff] (!%p14804_p10)  }
0x2a4c   :  { %v17538_v48 = vpop.eup %17537 }
0x2a4d   :  { %v12987_v27 = vmul.f32 %v17538_v48, %v12968_v60  ;;  %v17540_v23 = vpop.eup %17539  ;;  %v17558_v60 = vld [vmem:[#allocation12 + $0x38] sm:$0xff] (!%p14804_p10)  }
0x2a4e   :  { %v12990_v6 = vsub.f32 1.0, %v17540_v23  ;;  %v12992_v22 = vmul.f32 %v17540_v23, %v19527_v26  ;;  %v17501_v26 = vld [vmem:[#allocation27 + $0x140] ss:$8 sps:$4 sm:$0xff]  }
0x2a4f   :  { %v12988_v61 = vadd.f32 %v12987_v27, %v12710_v36 }
0x2a51   :  { %17541 = vtanh.f32 %v12988_v61 }
0x2a5b   :  { %v17542_v54 = vpop.eup %17541 }
0x2a5c   :  { %v12991_v62 = vmul.f32 %v17542_v54, %v12990_v6  ;;  %v17899_v6 = vmov (!%p14804_p10), 1.0|1.0  }
0x2a5e   :  { %v12993_v12 = vadd.f32 %v12992_v22, %v12991_v62 }
0x2a60   :  { %v12994_v55 = vpack.c.bf16 %v12993_v12, %v12993_v12 }
0x2a62   :  { %13328 = vmatmul.mubr.bf16.vlgmr.msra.gmra.mrb[8].mxu0 %v12994_v55 }
0x2a63   :  { %13337 = vmatpush1.bf16.msra.mxu0 %v17489_v38  ;;  %13368 = vmatprep.mubr.bf16.mxu0 %v17893_v2  ;;  %v17507_v2 = vld [vmem:[#allocation27 + $0x160] ss:$8 sps:$4 sm:$0xff]  }
0x2a64   :  { %13338 = vmatprep.subr.bf16.mxu0 %v17494_v15 }
0x2a67   :  { %13339 = vmatpush1.bf16.msra.mxu0 %v17492_v13 }
0x2a68   :  { %13340 = vmatprep.subr.bf16.mxu0 %v17497_v33 }
0x2a6b   :  { %13341 = vmatpush1.bf16.msra.mxu0 %v17495_v39 }
0x2a6c   :  { %13342 = vmatprep.subr.bf16.mxu0 %v17500_v50 }
0x2a6f   :  { %13343 = vmatpush1.bf16.msra.mxu0 %v17498_v52 }
0x2a70   :  { %13344 = vmatprep.subr.bf16.mxu0 %v17503_v40 }
0x2a73   :  { %13345 = vmatpush1.bf16.msra.mxu0 %v17501_v26 }
0x2a74   :  { %13346 = vmatprep.subr.bf16.mxu0 %v17506_v17 }
0x2a77   :  { %13347 = vmatpush1.bf16.msra.mxu0 %v17504_v7 }
0x2a78   :  { %13348 = vmatprep.subr.bf16.mxu0 %v17509_v9 }
0x2a7b   :  { %13349 = vmatpush1.bf16.msra.mxu0 %v17507_v2 }
0x2a7c   :  { %13350 = vmatprep.subr.bf16.mxu0 %v17512_v5 }
0x2a7f   :  { %13351 = vmatpush1.bf16.msra.mxu0 %v17510_v58 }
0x2a80   :  { %15283 = vmatprep.subr.bf16.mxu0 (!%p14804_p10), %v17543_v8 }
0x2a82   :  { %13369 = vmatmul.mubr.bf16.vlgmr.msra.gmra.mrb[8].mxu0 %v19577_v57 }
0x2a83   :  { %15284 = vmatpush3.bf16.msra.mxu0 (!%p14804_p10), %v17544_v43 }
0x2a84   :  { %15285 = vmatprep.subr.bf16.mxu0 (!%p14804_p10), %v17545_v53 }
0x2a87   :  { %15286 = vmatpush3.bf16.msra.mxu0 (!%p14804_p10), %v17546_v14 }
0x2a88   :  { %15287 = vmatprep.subr.bf16.mxu0 (!%p14804_p10), %v17547_v41 }
0x2a8b   :  { %15288 = vmatpush3.bf16.msra.mxu0 (!%p14804_p10), %v17548_v29 }
0x2a8c   :  { %15289 = vmatprep.subr.bf16.mxu0 (!%p14804_p10), %v17549_v31 }
0x2a8f   :  { %15290 = vmatpush3.bf16.msra.mxu0 (!%p14804_p10), %v17550_v56 }
0x2a90   :  { %15291 = vmatprep.subr.bf16.mxu0 (!%p14804_p10), %v17551_v16 }
0x2a93   :  { %15292 = vmatpush3.bf16.msra.mxu0 (!%p14804_p10), %v17552_v0 }
0x2a94   :  { %15293 = vmatprep.subr.bf16.mxu0 (!%p14804_p10), %v17553_v25 }
0x2a97   :  { %15294 = vmatpush3.bf16.msra.mxu0 (!%p14804_p10), %v17554_v20 }
0x2a98   :  { %15295 = vmatprep.subr.bf16.mxu0 (!%p14804_p10), %v17555_v10 }
0x2a9b   :  { %15296 = vmatpush3.bf16.msra.mxu0 (!%p14804_p10), %v17556_v11 }
0x2a9c   :  { %15297 = vmatprep.subr.bf16.mxu0 (!%p14804_p10), %v17557_v30 }
0x2a9f   :  { %15298 = vmatpush3.bf16.msra.mxu0 (!%p14804_p10), %v17558_v60 }
0x2b53   :  { %13384 = sbr.rel (%p14804_p10) target bundleno = 11758 (0x2dee), region = 161 }
0x2b55   :  { %v13370_v49 = vpop.f32.mrb[8].mxu0 }
0x2b56   :  { %v15995_v45 = vadd.f32 %v13370_v49, %v13048_v21  ;;  %v13372_v32 = vpop.f32.mrb[9].mxu0 }
0x2b57   :  { %v15996_v19 = vadd.f32 %v13372_v32, %v13052_v37  ;;  %v13374_v4 = vpop.f32.mrb[10].mxu0 }
0x2b58   :  { %13378 = vst [vmem:[#allocation29 + $0x40] sm:$0xff] %v15995_v45  ;;  %v13375_v47 = vpop.f32.mrb[11].mxu0 }
0x2b59   :  { %13379 = vst [vmem:[#allocation29 + $0x48] sm:$0xff] %v15996_v19  ;;  %v13386_v57 = vmax.f32 (!%p14804_p10), %v15995_v45, %v15996_v19 }
0x2b5b   :  { %13387 = vmax.xlane.f32.xlu0 %v13386_v57 }
0x2be8   :  { %v13388_v18 = vpop.xlane.xlu0 %13387 }
0x2be9   :  { %vm13389_vm0 = vcmp.eq.f32.partialorder %v15995_v45, %v13388_v18  ;;  %vm13390_vm1 = vcmp.eq.f32.partialorder %v15996_v19, %v13388_v18 }
0x2bea   :  { %v13391_v44 = vsel %vm13389_vm0, %v19074_v35, 256  ;;  %v13392_v46 = vsel %vm13390_vm1, %v13385_v28, 256 }
0x2beb   :  { %vm13393_vm3 = vcmp.lt.s32.totalorder %v13391_v44, %v13392_v46 }
0x2bec   :  { %v13394_v42 = vsel %vm13393_vm3, %v13391_v44, %v13392_v46 }
0x2bed   :  { %v13396_v24 = vshra.s32 %v13394_v42, 16  ;;  %v13395_v3 = vand.u32 65535, %v13394_v42 }
0x2bef   :  { %v13398_v51 = vcvt.s32.f32 %v13396_v24  ;;  %v13397_v1 = vcvt.s32.f32 %v13395_v3 }
0x2bf1   :  { %13399 = vmin.xlane.f32.xlu0 %v13398_v51 }
0x2c7e   :  { %v13400_v34 = vpop.xlane.xlu0 %13399 }
0x2c7f   :  { %vm13401_vm4 = vcmp.eq.f32.partialorder %v13398_v51, %v13400_v34  ;;  %v13406_v48 = vcvt.f32.s32 %v13400_v34 }
0x2c80   :  { %v13402_v63 = vsel %vm13401_vm4, %v13397_v1, inf }
0x2c81   :  { %13403 = vmin.xlane.f32.xlu1 %v13402_v63  ;;  %v13407_v27 = vshll.u32 %v13406_v48, 16 }
0x2d0e   :  { %v13404_v36 = vpop.xlane.xlu1 %13403 }
0x2d0f   :  { %v13405_v61 = vcvt.f32.s32 %v13404_v36 }
0x2d11   :  { %v13408_v23 = vadd.s32 %v13407_v27, %v13405_v61 }
0x2d13   :  { %vm13410_vm5 = vcmp.eq.s32.totalorder %v13385_v28, %v13408_v23  ;;  %vm13409_vm6 = vcmp.eq.s32.totalorder %v19074_v35, %v13408_v23 }
0x2d14   :  { %vm14823_vm7 = vmpackc.low %vm13410_vm5, %vm13410_vm5 }
0x2d15   :  { %14824 = vmatprep.mubr.msk.bf16.mxu0 %vm14823_vm7, %v17899_v6  ;;  %vm14825_vm8 = vmpackc.low %vm13409_vm6, %vm13409_vm6 }
0x2d16   :  { %14826 = vmatmul.mubr.msk.bf16.vlgmr.msra.gmra.mrb[0].mxu0 %vm14825_vm8, %v17899_v6 }
0x2de9   :  { %v15299_v54 = vpop.f32.mrb[0].mxu0 }
0x2dea   :  { %v15300_v62 = vpop.f32.mrb[1].mxu0 }
0x2deb   :  { %v15301_v22 = vadd.f32 %v15300_v62, %v15299_v54  ;;  %v15302_v12 = vpop.f32.mrb[2].mxu0 }
0x2dec   :  { %v15303_v38 = vpop.f32.mrb[3].mxu0 }
0x2ded   :  { %13585 = vst [vmem:[#allocation5] sm:$0xff] %v15301_v22 }
0x2dee PF:  { %s17900_s23 = smov [#allocation29]  }
0x2def   :  { %s13591_s4 = sshll.u32 %s17900_s23, 4  ;;  %s13592_s4 = int_to_ptr.vmem [resolvable:$true] %s13591_s4 }
0x2df0   :  { %s17833_s27 = scalar_lea.vmem %s13592_s4, 1536  ;;  %p17838_p12 = scmp.lt.s32.totalorder %s13592_s4, %s13592_s4 }
0x2df1   :  { %p17834_p11 = scmp.ne.s32.totalorder %s13592_s4, %s17833_s27  ;;  %p17839_p13 = scmp.lt.s32.totalorder %s17833_s27, %s17833_s27 }
0x2df3   :  { %p17840_p0 = por %p17839_p13, %p17838_p12 }
0x2df5   :  { %p17841_p1 = pnand %p17840_p0, %p17834_p11 }
0x2df7   :  { %17844 = shalt.err (!%p17841_p1)
}
0x2df8   :  { %s19746_s12 = sld [smem:[#allocation49_spill]] }
0x2dfe   :  { %s17845_s9 = scalar_lea.hbm %s19746_s12, 1536 }
0x2dff   :  { %p17846_p2 = scmp.ne.s32.totalorder %s19746_s12, %s17845_s9  ;;  %p17849_p3 = scmp.lt.u32.totalorder %s17845_s9, %s19746_s12 }
0x2e01   :  { %p17851_p4 = pnand %p17849_p3, %p17846_p2 }
0x2e03   :  { %17854 = shalt.err (!%p17851_p4)
}
0x2e04   :  { %s17901_s20 = smov 256   ;;  %s17902_s5 = smov 16  }
0x2e05   :  { %13597 = dma.vmem_to_hbm [thread:$0]  %s13592_s4, 1536, %s19746_s12, [#allocation11], %s17901_s20, %s17901_s20, %s17902_s5  }
0x2e06   :  { %17871 = dma.done.wait [#allocation11], 1536  }
0x2e07   :  { %17872 = vsyncadd [#allocation11], 4294965760 }
0x2e08   :  { %13601 = vsyncpa [#allocation10], 1 }
0x2e09   :  { %13602 = vsyncpa [#allocation13], 1 }
0x2e0a   :  { %13603 = vsyncpa [#allocation16], 1 }
0x2e0b   :  { %13604 = vsyncpa [#allocation19], 1 }
0x2e0c   :  { %13605 = vsyncpa [#allocation22], 1 }
0x2e0d   :  { %13606 = vsyncpa [#allocation25], 1 }
0x2e0e   :  { %13607 = vsyncpa [#allocation28], 1 }
0x2e0f   :  { %13608 = vsyncpa [#allocation11], 1 }

</bundles_post_ra>
